<compile_context>
chip_gen: v5e
topology: v5e:2x2
jax: 0.10.0
libtpu: 0.0.40
codegen_flags: <defaults>
</compile_context>

<pallas_src>
import functools

import jax
import jax.numpy as jnp
import numpy as np
from jax.experimental import pallas as pl
from jax.experimental.pallas import tpu as pltpu


# ----------------------------------------------------------------------------
# helpers
# ----------------------------------------------------------------------------

def _round_up(x, m):
    return (x + m - 1) // m * m


def _conv_w_to_mat(w):
    """(OC, C, kh, kw) torch conv weight -> (Kp, Np) bf16 matmul weight.

    K ordered (dy, dx, c) to match the im2col concat below; K padded to a
    multiple of 128 (MXU contraction alignment), OC padded to 128 lanes.
    Done ONCE in prepare_params, never inside the jitted forward.
    """
    OC, C, kh, kw = w.shape
    K = kh * kw * C
    m = jnp.transpose(w, (2, 3, 1, 0)).reshape(K, OC)
    Kp = _round_up(K, 128)
    Np = _round_up(OC, 128)
    m = jnp.pad(m, ((0, Kp - K), (0, Np - OC)))
    return m.astype(jnp.bfloat16)


def _convT_w_to_mat(w):
    """PyTorch ConvTranspose2d weight (Cin, Cout, k, k) -> matmul weight of the
    equivalent stride-1 conv on the interior-dilated input (flip + swap)."""
    w_eq = jnp.transpose(jnp.flip(w, (2, 3)), (1, 0, 2, 3))   # (Cout, Cin, k, k)
    return _conv_w_to_mat(w_eq)


def _im2col(x, kh, kw, stride):
    """NHWC -> (N*OH*OW, Kp) im2col matrix, lane-dense (taps concatenated on
    the channel/lane axis).  The K alignment pad is folded into the same
    single concat pass (no separate jnp.pad copy)."""
    NB, Hp, Wp, C = x.shape
    OH = (Hp - kh) // stride + 1
    OW = (Wp - kw) // stride + 1
    taps = []
    for dy in range(kh):
        for dx in range(kw):
            taps.append(x[:, dy:dy + stride * (OH - 1) + 1:stride,
                             dx:dx + stride * (OW - 1) + 1:stride, :])
    K = kh * kw * C
    Kp = _round_up(K, 128)
    if Kp != K:
        taps.append(jnp.zeros((NB, OH, OW, Kp - K), x.dtype))
    a = jnp.concatenate(taps, axis=-1)                         # (NB, OH, OW, Kp)
    return a.reshape(NB * OH * OW, Kp), OH, OW


# ----------------------------------------------------------------------------
# Fused Pallas kernel: act(InstanceNorm(A @ B + bias)) [+ skip]
#   grid = (batch,)  -> one image per block, so the row-reduction inside the
#   block IS the per-(n, c) InstanceNorm statistic; channels on the lane axis.
# ----------------------------------------------------------------------------

def _conv_fused_kernel(a_ref, b_ref, bias_ref, *rest,
                       norm, act, slope, eps, add_skip):
    if add_skip:
        skip_ref, o_ref = rest
    else:
        (o_ref,) = rest

    y = jnp.dot(a_ref[...], b_ref[...], preferred_element_type=jnp.float32)
    y = y + bias_ref[...]                                      # (hw, Np) + (1, Np)

    if norm:                                                   # InstanceNorm2d
        mean = jnp.mean(y, axis=0, keepdims=True)
        var = jnp.mean((y - mean) ** 2, axis=0, keepdims=True) # biased (PyTorch)
        y = (y - mean) * jax.lax.rsqrt(var + eps)

    if act == "relu":
        y = jnp.maximum(y, 0.0)
    elif act == "leaky":
        y = jnp.where(y >= 0.0, y, y * slope)
    elif act == "sigmoid":
        y = jax.nn.sigmoid(y)

    if add_skip:                                               # residual (post-IN)
        y = y + skip_ref[...].astype(jnp.float32)

    o_ref[...] = y.astype(o_ref.dtype)


def conv2d_fused(x, w_mat, bias_mat, *, oc, kh, kw, stride=1, padding=0,
                 pad_mode="zero", norm=False, act="none", skip=None,
                 slope=0.2, eps=1e-5, out_dtype=jnp.bfloat16):
    """x: (NB, H, W, C) NHWC.  Returns (NB, OH, OW, oc) in out_dtype."""
    NB = x.shape[0]
    xb = x.astype(jnp.bfloat16)
    if padding:
        mode = "reflect" if pad_mode == "reflect" else "constant"
        xb = jnp.pad(xb, ((0, 0), (padding, padding), (padding, padding), (0, 0)),
                     mode=mode)

    a, OH, OW = _im2col(xb, kh, kw, stride)
    Kp = a.shape[1]
    Np = w_mat.shape[1]
    assert w_mat.shape[0] == Kp, (w_mat.shape, Kp)
    hw = OH * OW
    M = NB * hw
    assert hw % 8 == 0, "per-image spatial size must be a multiple of 8"

    if bias_mat is None:
        bias_mat = jnp.zeros((1, Np), jnp.float32)

    inputs = [a, w_mat, bias_mat]
    in_specs = [
        pl.BlockSpec((hw, Kp), lambda b: (b, 0)),     # one image's patch rows
        pl.BlockSpec((Kp, Np), lambda b: (0, 0)),     # full weight, resident
        pl.BlockSpec((1, Np), lambda b: (0, 0)),
    ]
    add_skip = skip is not None
    if add_skip:
        skip_mat = skip.reshape(M, oc).astype(jnp.bfloat16)
        skip_mat = jnp.pad(skip_mat, ((0, 0), (0, Np - oc)))
        inputs.append(skip_mat)
        in_specs.append(pl.BlockSpec((hw, Np), lambda b: (b, 0)))

    kernel = functools.partial(_conv_fused_kernel, norm=norm, act=act,
                               slope=slope, eps=eps, add_skip=add_skip)
    out = pl.pallas_call(
        kernel,
        out_shape=jax.ShapeDtypeStruct((M, Np), out_dtype),
        grid=(NB,),
        in_specs=in_specs,
        out_specs=pl.BlockSpec((hw, Np), lambda b: (b, 0)),
        compiler_params=pltpu.CompilerParams(
            dimension_semantics=("parallel",)),       # batch splits across TCs (v7x)
    )(*inputs)
    return out[:, :oc].reshape(NB, OH, OW, oc)


def conv_transpose2d_fused(x, w_mat, *, oc):
    """PyTorch ConvTranspose2d(k=4, s=2, p=1, bias=False) + InstanceNorm + ReLU.

    Interior-dilate the input by 2 and edge-pad by k-1-p = 2 (one lax.pad),
    then it is a plain stride-1 4x4 conv -> reuse the fused conv/IN/ReLU kernel.
    """
    pad_cfg = ((0, 0, 0), (2, 2, 1), (2, 2, 1), (0, 0, 0))
    xd = jax.lax.pad(x.astype(jnp.bfloat16), jnp.array(0, jnp.bfloat16), pad_cfg)
    return conv2d_fused(xd, w_mat, None, oc=oc, kh=4, kw=4, stride=1, padding=0,
                        norm=True, act="relu")


# ----------------------------------------------------------------------------
# CBAM attention block (standard definition; reduction=16, bias-free MLP)
# ----------------------------------------------------------------------------

def cbam_block(x, p):
    """x: (NB, H, W, C) bf16.  Tiny channel MLP / spatial conv stay in XLA:
    at (2N x C x C/16) they are sub-MXU-size and a Pallas call is pure overhead."""
    NB, H, W, C = x.shape
    xf = x.astype(jnp.float32)

    # channel attention: shared MLP over avg & max pooled vectors
    pooled = jnp.concatenate([jnp.mean(xf, axis=(1, 2)),
                              jnp.max(xf, axis=(1, 2))], axis=0)       # (2N, C)
    h = jax.nn.relu(pooled @ p["fc1"])
    o = h @ p["fc2"]
    ca = jax.nn.sigmoid(o[:NB] + o[NB:])                               # (N, C)
    xf = xf * ca[:, None, None, :]

    # spatial attention: 7x7 conv over [mean_c, max_c] as one fused contraction
    s = jnp.concatenate([jnp.mean(xf, axis=-1, keepdims=True),
                         jnp.max(xf, axis=-1, keepdims=True)], axis=-1)  # (N,H,W,2)
    sp = jnp.pad(s, ((0, 0), (3, 3), (3, 3), (0, 0)))
    wins = jnp.concatenate(
        [sp[:, di:di + H, dj:dj + W, :] for di in range(7) for dj in range(7)],
        axis=-1)                                                       # (N,H,W,98)
    sa = jax.nn.sigmoid(jnp.einsum("nhwk,k->nhw", wins, p["sp_w"]))
    return (xf * sa[..., None]).astype(jnp.bfloat16)


# ----------------------------------------------------------------------------
# ERDNet forward (activations NHWC / lane-dense; NCHW only at the boundary)
# ----------------------------------------------------------------------------

def erdnet_forward(x_nchw, mp, *, n_blocks, n_down, ngf, output_nc):
    out = jnp.transpose(x_nchw, (0, 2, 3, 1)).astype(jnp.bfloat16)

    # WRPM: ReflectionPad(3) -> Conv7x7 (no bias) -> InstanceNorm -> ReLU
    out = conv2d_fused(out, mp["wrpm_w"], None, oc=ngf, kh=7, kw=7,
                       padding=3, pad_mode="reflect", norm=True, act="relu")

    # ADM: [Conv4x4 s2 p1 (no bias) -> IN -> LeakyReLU(0.2) -> CBAM]
    for i in range(n_down):
        p = mp["adm"][i]
        oc = ngf * (2 ** (i + 1))
        out = conv2d_fused(out, p["conv_w"], None, oc=oc, kh=4, kw=4,
                           stride=2, padding=1, norm=True, act="leaky")
        out = cbam_block(out, p["cbam"])

    # HFRLM: ResnetBlocks — skip add fused into the second conv's epilogue
    dim = ngf * (2 ** n_down)
    for i in range(n_blocks):
        p = mp["res"][i]
        y = conv2d_fused(out, p["w1"], None, oc=dim, kh=3, kw=3,
                         padding=1, pad_mode="reflect", norm=True, act="relu")
        out = conv2d_fused(y, p["w2"], None, oc=dim, kh=3, kw=3,
                           padding=1, pad_mode="reflect", norm=True, act="none",
                           skip=out)

    # UM: [ConvTranspose4x4 s2 p1 (no bias) -> IN -> ReLU]
    for i in range(n_down):
        p = mp["um"][i]
        oc = ngf * (2 ** (n_down - i - 1))
        out = conv_transpose2d_fused(out, p["w"], oc=oc)

    # FMSM: ReflectionPad(3) -> Conv7x7 (with bias) -> Sigmoid (fused)
    out = conv2d_fused(out, mp["fmsm_w"], mp["fmsm_b"], oc=output_nc, kh=7, kw=7,
                       padding=3, pad_mode="reflect", norm=False, act="sigmoid",
                       out_dtype=jnp.float32)
    return jnp.transpose(out, (0, 3, 1, 2))                     # back to NCHW


# ----------------------------------------------------------------------------
# Parameters: torch-layout init + one-time matmul-form preparation
# ----------------------------------------------------------------------------

def init_params(key, input_nc, output_nc, n_blocks, n_down, ngf):
    keys = iter(jax.random.split(key, 128))

    def w(shape):
        fan_in = float(np.prod(shape[1:])) if len(shape) > 1 else float(shape[0])
        return (jax.random.normal(next(keys), shape, jnp.float32)
                / np.sqrt(max(fan_in, 1.0)))

    params = {"wrpm_w": w((ngf, input_nc, 7, 7))}

    params["adm"] = []
    for i in range(n_down):
        cin = ngf * (2 ** i)
        cout = cin * 2
        hidden = max(cout // 16, 1)
        params["adm"].append({
            "conv_w": w((cout, cin, 4, 4)),
            "cbam": {"fc1": w((cout, hidden)),
                     "fc2": w((hidden, cout)),
                     "sp_w": w((1, 2, 7, 7))},
        })

    dim = ngf * (2 ** n_down)
    params["res"] = [{"w1": w((dim, dim, 3, 3)), "w2": w((dim, dim, 3, 3))}
                     for _ in range(n_blocks)]

    params["um"] = []
    for i in range(n_down):
        cin = ngf * (2 ** (n_down - i))
        cout = cin // 2
        params["um"].append({"w": w((cin, cout, 4, 4))})   # ConvTranspose2d layout

    params["fmsm_w"] = w((output_nc, ngf, 7, 7))
    params["fmsm_b"] = jnp.zeros((output_nc,), jnp.float32)
    return params


def prepare_params(params):
    """One-time re-layout of every weight to padded bf16 matmul form."""
    mp = {"wrpm_w": _conv_w_to_mat(params["wrpm_w"])}
    mp["adm"] = []
    for p in params["adm"]:
        mp["adm"].append({
            "conv_w": _conv_w_to_mat(p["conv_w"]),
            "cbam": {
                "fc1": p["cbam"]["fc1"].astype(jnp.float32),
                "fc2": p["cbam"]["fc2"].astype(jnp.float32),
                "sp_w": jnp.transpose(p["cbam"]["sp_w"], (2, 3, 1, 0))
                           .reshape(-1).astype(jnp.float32),
            },
        })
    mp["res"] = [{"w1": _conv_w_to_mat(p["w1"]), "w2": _conv_w_to_mat(p["w2"])}
                 for p in params["res"]]
    mp["um"] = [{"w": _convT_w_to_mat(p["w"])} for p in params["um"]]
    mp["fmsm_w"] = _conv_w_to_mat(params["fmsm_w"])
    nb = params["fmsm_b"].shape[0]
    mp["fmsm_b"] = jnp.pad(params["fmsm_b"].astype(jnp.float32),
                           (0, _round_up(nb, 128) - nb)).reshape(1, -1)
    return mp


# ----------------------------------------------------------------------------
# Main
# ----------------------------------------------------------------------------

if __name__ == "__main__":
    INPUT_NC, OUTPUT_NC = 3, 3
    N_BLOCKS, N_DOWN, NGF = 2, 2, 16
    B, H, W = 2, 16, 16

    key = jax.random.PRNGKey(0)
    kx, kp = jax.random.split(key)
    x = jax.random.normal(kx, (B, INPUT_NC, H, W), jnp.float32)
    params = init_params(kp, INPUT_NC, OUTPUT_NC, N_BLOCKS, N_DOWN, NGF)
    mparams = prepare_params(params)        # one-time weight re-layout (not jitted)

    fwd = jax.jit(functools.partial(erdnet_forward, n_blocks=N_BLOCKS,
                                    n_down=N_DOWN, ngf=NGF, output_nc=OUTPUT_NC))
    out = jax.block_until_ready(fwd(x, mparams))

    assert out.shape == (B, OUTPUT_NC, H, W), out.shape
    assert bool(jnp.all(jnp.isfinite(out)))
    assert bool(jnp.all((out >= 0.0) & (out <= 1.0)))   # sigmoid output range
    print("KERNEL_OK")
</pallas_src>

<mosaic_0001>
module attributes {stable_mosaic.version = 11 : i64} {
  func.func @_conv_fused_kernel(%arg0: i32, %arg1: memref<256x256xbf16, #tpu.memory_space<vmem>>, %arg2: memref<256x128xbf16, #tpu.memory_space<vmem>>, %arg3: memref<1x128xf32, #tpu.memory_space<vmem>>, %arg4: memref<256x128xbf16, #tpu.memory_space<vmem>>) attributes {dimension_semantics = [#tpu.dimension_semantics<parallel>], iteration_bounds = array<i64: 2>, scalar_prefetch = 0 : i64, scratch_operands = 0 : i64, tpu.core_type = #tpu.core_type<tc>, window_params = [{transform_indices = @transform_0, window_bounds = array<i64: 256, 256>}, {pipeline_mode = #tpu.pipeline_mode<synchronous>, transform_indices = @transform_1, window_bounds = array<i64: 256, 128>}, {pipeline_mode = #tpu.pipeline_mode<synchronous>, transform_indices = @transform_2, window_bounds = array<i64: 1, 128>}, {transform_indices = @transform_3, window_bounds = array<i64: 256, 128>}]} {
    %c0 = arith.constant 0 : index
    %c0_0 = arith.constant 0 : index
    %0 = vector.load %arg1[%c0, %c0_0] : memref<256x256xbf16, #tpu.memory_space<vmem>>, vector<256x256xbf16>
    %c0_1 = arith.constant 0 : index
    %c0_2 = arith.constant 0 : index
    %1 = vector.load %arg2[%c0_1, %c0_2] : memref<256x128xbf16, #tpu.memory_space<vmem>>, vector<256x128xbf16>
    %cst = arith.constant dense<0.000000e+00> : vector<256x128xf32>
    %2 = tpu.matmul %0, %1, %cst {dimension_numbers = #tpu.dot_dimension_numbers<[1], [0], [0], [1], [0, 0, 1, 1], [], []>} : vector<256x256xbf16>, vector<256x128xbf16>, vector<256x128xf32> -> vector<256x128xf32>
    %c0_3 = arith.constant 0 : index
    %c0_4 = arith.constant 0 : index
    %3 = vector.load %arg3[%c0_3, %c0_4] : memref<1x128xf32, #tpu.memory_space<vmem>>, vector<1x128xf32>
    %4 = vector.broadcast %3 : vector<1x128xf32> to vector<256x128xf32>
    %5 = arith.addf %2, %4 : vector<256x128xf32>
    %cst_5 = arith.constant dense<0.000000e+00> : vector<128xf32>
    %6 = vector.multi_reduction <add>, %5, %cst_5 [0] : vector<256x128xf32> to vector<128xf32>
    %7 = vector.shape_cast %6 : vector<128xf32> to vector<1x128xf32>
    %cst_6 = arith.constant 2.560000e+02 : f32
    %8 = vector.broadcast %cst_6 : f32 to vector<1x128xf32>
    %9 = arith.divf %7, %8 : vector<1x128xf32>
    %10 = vector.broadcast %9 : vector<1x128xf32> to vector<256x128xf32>
    %11 = arith.subf %5, %10 : vector<256x128xf32>
    %12 = arith.mulf %11, %11 : vector<256x128xf32>
    %cst_7 = arith.constant dense<0.000000e+00> : vector<128xf32>
    %13 = vector.multi_reduction <add>, %12, %cst_7 [0] : vector<256x128xf32> to vector<128xf32>
    %14 = vector.shape_cast %13 : vector<128xf32> to vector<1x128xf32>
    %cst_8 = arith.constant 2.560000e+02 : f32
    %15 = vector.broadcast %cst_8 : f32 to vector<1x128xf32>
    %16 = arith.divf %14, %15 : vector<1x128xf32>
    %17 = vector.broadcast %9 : vector<1x128xf32> to vector<256x128xf32>
    %18 = arith.subf %5, %17 : vector<256x128xf32>
    %cst_9 = arith.constant 9.99999974E-6 : f32
    %19 = vector.broadcast %cst_9 : f32 to vector<1x128xf32>
    %20 = arith.addf %16, %19 : vector<1x128xf32>
    %21 = math.rsqrt %20 : vector<1x128xf32>
    %22 = vector.broadcast %21 : vector<1x128xf32> to vector<256x128xf32>
    %23 = arith.mulf %18, %22 : vector<256x128xf32>
    %cst_10 = arith.constant 0.000000e+00 : f32
    %24 = vector.broadcast %cst_10 : f32 to vector<256x128xf32>
    %25 = arith.maximumf %23, %24 : vector<256x128xf32>
    %26 = arith.truncf %25 : vector<256x128xf32> to vector<256x128xbf16>
    %c0_11 = arith.constant 0 : index
    %c0_12 = arith.constant 0 : index
    %27 = vector.load %arg4[%c0_11, %c0_12] : memref<256x128xbf16, #tpu.memory_space<vmem>>, vector<256x128xbf16>
    tpu.vector_store %arg4[%c0_11, %c0_12], %26 {strides = array<i32>} : memref<256x128xbf16, #tpu.memory_space<vmem>>, vector<256x128xbf16>,
    return
  }
  func.func @transform_0(%arg0: i32) -> (i32, i32) {
    %c0_i32 = arith.constant 0 : i32
    %c0_i32_0 = arith.constant 0 : i32
    return %arg0, %c0_i32 : i32, i32
  }
  func.func @transform_1(%arg0: i32) -> (i32, i32) {
    %c0_i32 = arith.constant 0 : i32
    %c0_i32_0 = arith.constant 0 : i32
    %c0_i32_1 = arith.constant 0 : i32
    return %c0_i32, %c0_i32_0 : i32, i32
  }
  func.func @transform_2(%arg0: i32) -> (i32, i32) {
    %c0_i32 = arith.constant 0 : i32
    %c0_i32_0 = arith.constant 0 : i32
    %c0_i32_1 = arith.constant 0 : i32
    return %c0_i32, %c0_i32_0 : i32, i32
  }
  func.func @transform_3(%arg0: i32) -> (i32, i32) {
    %c0_i32 = arith.constant 0 : i32
    %c0_i32_0 = arith.constant 0 : i32
    return %arg0, %c0_i32 : i32, i32
  }
}

module attributes {stable_mosaic.version = 11 : i64} {
  func.func @_conv_fused_kernel(%arg0: i32, %arg1: memref<64x256xbf16, #tpu.memory_space<vmem>>, %arg2: memref<256x128xbf16, #tpu.memory_space<vmem>>, %arg3: memref<1x128xf32, #tpu.memory_space<vmem>>, %arg4: memref<64x128xbf16, #tpu.memory_space<vmem>>) attributes {dimension_semantics = [#tpu.dimension_semantics<parallel>], iteration_bounds = array<i64: 2>, scalar_prefetch = 0 : i64, scratch_operands = 0 : i64, tpu.core_type = #tpu.core_type<tc>, window_params = [{transform_indices = @transform_0, window_bounds = array<i64: 64, 256>}, {pipeline_mode = #tpu.pipeline_mode<synchronous>, transform_indices = @transform_1, window_bounds = array<i64: 256, 128>}, {pipeline_mode = #tpu.pipeline_mode<synchronous>, transform_indices = @transform_2, window_bounds = array<i64: 1, 128>}, {transform_indices = @transform_3, window_bounds = array<i64: 64, 128>}]} {
    %c0 = arith.constant 0 : index
    %c0_0 = arith.constant 0 : index
    %0 = vector.load %arg1[%c0, %c0_0] : memref<64x256xbf16, #tpu.memory_space<vmem>>, vector<64x256xbf16>
    %c0_1 = arith.constant 0 : index
    %c0_2 = arith.constant 0 : index
    %1 = vector.load %arg2[%c0_1, %c0_2] : memref<256x128xbf16, #tpu.memory_space<vmem>>, vector<256x128xbf16>
    %cst = arith.constant dense<0.000000e+00> : vector<64x128xf32>
    %2 = tpu.matmul %0, %1, %cst {dimension_numbers = #tpu.dot_dimension_numbers<[1], [0], [0], [1], [0, 0, 1, 1], [], []>} : vector<64x256xbf16>, vector<256x128xbf16>, vector<64x128xf32> -> vector<64x128xf32>
    %c0_3 = arith.constant 0 : index
    %c0_4 = arith.constant 0 : index
    %3 = vector.load %arg3[%c0_3, %c0_4] : memref<1x128xf32, #tpu.memory_space<vmem>>, vector<1x128xf32>
    %4 = vector.broadcast %3 : vector<1x128xf32> to vector<64x128xf32>
    %5 = arith.addf %2, %4 : vector<64x128xf32>
    %cst_5 = arith.constant dense<0.000000e+00> : vector<128xf32>
    %6 = vector.multi_reduction <add>, %5, %cst_5 [0] : vector<64x128xf32> to vector<128xf32>
    %7 = vector.shape_cast %6 : vector<128xf32> to vector<1x128xf32>
    %cst_6 = arith.constant 6.400000e+01 : f32
    %8 = vector.broadcast %cst_6 : f32 to vector<1x128xf32>
    %9 = arith.divf %7, %8 : vector<1x128xf32>
    %10 = vector.broadcast %9 : vector<1x128xf32> to vector<64x128xf32>
    %11 = arith.subf %5, %10 : vector<64x128xf32>
    %12 = arith.mulf %11, %11 : vector<64x128xf32>
    %cst_7 = arith.constant dense<0.000000e+00> : vector<128xf32>
    %13 = vector.multi_reduction <add>, %12, %cst_7 [0] : vector<64x128xf32> to vector<128xf32>
    %14 = vector.shape_cast %13 : vector<128xf32> to vector<1x128xf32>
    %cst_8 = arith.constant 6.400000e+01 : f32
    %15 = vector.broadcast %cst_8 : f32 to vector<1x128xf32>
    %16 = arith.divf %14, %15 : vector<1x128xf32>
    %17 = vector.broadcast %9 : vector<1x128xf32> to vector<64x128xf32>
    %18 = arith.subf %5, %17 : vector<64x128xf32>
    %cst_9 = arith.constant 9.99999974E-6 : f32
    %19 = vector.broadcast %cst_9 : f32 to vector<1x128xf32>
    %20 = arith.addf %16, %19 : vector<1x128xf32>
    %21 = math.rsqrt %20 : vector<1x128xf32>
    %22 = vector.broadcast %21 : vector<1x128xf32> to vector<64x128xf32>
    %23 = arith.mulf %18, %22 : vector<64x128xf32>
    %cst_10 = arith.constant 0.000000e+00 : f32
    %24 = vector.broadcast %cst_10 : f32 to vector<64x128xf32>
    %25 = arith.cmpf oge, %23, %24 : vector<64x128xf32>
    %cst_11 = arith.constant 2.000000e-01 : f32
    %26 = vector.broadcast %cst_11 : f32 to vector<64x128xf32>
    %27 = arith.mulf %23, %26 : vector<64x128xf32>
    %28 = arith.select %25, %23, %27 : vector<64x128xi1>, vector<64x128xf32>
    %29 = arith.truncf %28 : vector<64x128xf32> to vector<64x128xbf16>
    %c0_12 = arith.constant 0 : index
    %c0_13 = arith.constant 0 : index
    %30 = vector.load %arg4[%c0_12, %c0_13] : memref<64x128xbf16, #tpu.memory_space<vmem>>, vector<64x128xbf16>
    tpu.vector_store %arg4[%c0_12, %c0_13], %29 {strides = array<i32>} : memref<64x128xbf16, #tpu.memory_space<vmem>>, vector<64x128xbf16>,
    return
  }
  func.func @transform_0(%arg0: i32) -> (i32, i32) {
    %c0_i32 = arith.constant 0 : i32
    %c0_i32_0 = arith.constant 0 : i32
    return %arg0, %c0_i32 : i32, i32
  }
  func.func @transform_1(%arg0: i32) -> (i32, i32) {
    %c0_i32 = arith.constant 0 : i32
    %c0_i32_0 = arith.constant 0 : i32
    %c0_i32_1 = arith.constant 0 : i32
    return %c0_i32, %c0_i32_0 : i32, i32
  }
  func.func @transform_2(%arg0: i32) -> (i32, i32) {
    %c0_i32 = arith.constant 0 : i32
    %c0_i32_0 = arith.constant 0 : i32
    %c0_i32_1 = arith.constant 0 : i32
    return %c0_i32, %c0_i32_0 : i32, i32
  }
  func.func @transform_3(%arg0: i32) -> (i32, i32) {
    %c0_i32 = arith.constant 0 : i32
    %c0_i32_0 = arith.constant 0 : i32
    return %arg0, %c0_i32 : i32, i32
  }
}

module attributes {stable_mosaic.version = 11 : i64} {
  func.func @_conv_fused_kernel(%arg0: i32, %arg1: memref<16x512xbf16, #tpu.memory_space<vmem>>, %arg2: memref<512x128xbf16, #tpu.memory_space<vmem>>, %arg3: memref<1x128xf32, #tpu.memory_space<vmem>>, %arg4: memref<16x128xbf16, #tpu.memory_space<vmem>>) attributes {dimension_semantics = [#tpu.dimension_semantics<parallel>], iteration_bounds = array<i64: 2>, scalar_prefetch = 0 : i64, scratch_operands = 0 : i64, tpu.core_type = #tpu.core_type<tc>, window_params = [{transform_indices = @transform_0, window_bounds = array<i64: 16, 512>}, {pipeline_mode = #tpu.pipeline_mode<synchronous>, transform_indices = @transform_1, window_bounds = array<i64: 512, 128>}, {pipeline_mode = #tpu.pipeline_mode<synchronous>, transform_indices = @transform_2, window_bounds = array<i64: 1, 128>}, {transform_indices = @transform_3, window_bounds = array<i64: 16, 128>}]} {
    %c0 = arith.constant 0 : index
    %c0_0 = arith.constant 0 : index
    %0 = vector.load %arg1[%c0, %c0_0] : memref<16x512xbf16, #tpu.memory_space<vmem>>, vector<16x512xbf16>
    %c0_1 = arith.constant 0 : index
    %c0_2 = arith.constant 0 : index
    %1 = vector.load %arg2[%c0_1, %c0_2] : memref<512x128xbf16, #tpu.memory_space<vmem>>, vector<512x128xbf16>
    %cst = arith.constant dense<0.000000e+00> : vector<16x128xf32>
    %2 = tpu.matmul %0, %1, %cst {dimension_numbers = #tpu.dot_dimension_numbers<[1], [0], [0], [1], [0, 0, 1, 1], [], []>} : vector<16x512xbf16>, vector<512x128xbf16>, vector<16x128xf32> -> vector<16x128xf32>
    %c0_3 = arith.constant 0 : index
    %c0_4 = arith.constant 0 : index
    %3 = vector.load %arg3[%c0_3, %c0_4] : memref<1x128xf32, #tpu.memory_space<vmem>>, vector<1x128xf32>
    %4 = vector.broadcast %3 : vector<1x128xf32> to vector<16x128xf32>
    %5 = arith.addf %2, %4 : vector<16x128xf32>
    %cst_5 = arith.constant dense<0.000000e+00> : vector<128xf32>
    %6 = vector.multi_reduction <add>, %5, %cst_5 [0] : vector<16x128xf32> to vector<128xf32>
    %7 = vector.shape_cast %6 : vector<128xf32> to vector<1x128xf32>
    %cst_6 = arith.constant 1.600000e+01 : f32
    %8 = vector.broadcast %cst_6 : f32 to vector<1x128xf32>
    %9 = arith.divf %7, %8 : vector<1x128xf32>
    %10 = vector.broadcast %9 : vector<1x128xf32> to vector<16x128xf32>
    %11 = arith.subf %5, %10 : vector<16x128xf32>
    %12 = arith.mulf %11, %11 : vector<16x128xf32>
    %cst_7 = arith.constant dense<0.000000e+00> : vector<128xf32>
    %13 = vector.multi_reduction <add>, %12, %cst_7 [0] : vector<16x128xf32> to vector<128xf32>
    %14 = vector.shape_cast %13 : vector<128xf32> to vector<1x128xf32>
    %cst_8 = arith.constant 1.600000e+01 : f32
    %15 = vector.broadcast %cst_8 : f32 to vector<1x128xf32>
    %16 = arith.divf %14, %15 : vector<1x128xf32>
    %17 = vector.broadcast %9 : vector<1x128xf32> to vector<16x128xf32>
    %18 = arith.subf %5, %17 : vector<16x128xf32>
    %cst_9 = arith.constant 9.99999974E-6 : f32
    %19 = vector.broadcast %cst_9 : f32 to vector<1x128xf32>
    %20 = arith.addf %16, %19 : vector<1x128xf32>
    %21 = math.rsqrt %20 : vector<1x128xf32>
    %22 = vector.broadcast %21 : vector<1x128xf32> to vector<16x128xf32>
    %23 = arith.mulf %18, %22 : vector<16x128xf32>
    %cst_10 = arith.constant 0.000000e+00 : f32
    %24 = vector.broadcast %cst_10 : f32 to vector<16x128xf32>
    %25 = arith.cmpf oge, %23, %24 : vector<16x128xf32>
    %cst_11 = arith.constant 2.000000e-01 : f32
    %26 = vector.broadcast %cst_11 : f32 to vector<16x128xf32>
    %27 = arith.mulf %23, %26 : vector<16x128xf32>
    %28 = arith.select %25, %23, %27 : vector<16x128xi1>, vector<16x128xf32>
    %29 = arith.truncf %28 : vector<16x128xf32> to vector<16x128xbf16>
    %c0_12 = arith.constant 0 : index
    %c0_13 = arith.constant 0 : index
    %30 = vector.load %arg4[%c0_12, %c0_13] : memref<16x128xbf16, #tpu.memory_space<vmem>>, vector<16x128xbf16>
    tpu.vector_store %arg4[%c0_12, %c0_13], %29 {strides = array<i32>} : memref<16x128xbf16, #tpu.memory_space<vmem>>, vector<16x128xbf16>,
    return
  }
  func.func @transform_0(%arg0: i32) -> (i32, i32) {
    %c0_i32 = arith.constant 0 : i32
    %c0_i32_0 = arith.constant 0 : i32
    return %arg0, %c0_i32 : i32, i32
  }
  func.func @transform_1(%arg0: i32) -> (i32, i32) {
    %c0_i32 = arith.constant 0 : i32
    %c0_i32_0 = arith.constant 0 : i32
    %c0_i32_1 = arith.constant 0 : i32
    return %c0_i32, %c0_i32_0 : i32, i32
  }
  func.func @transform_2(%arg0: i32) -> (i32, i32) {
    %c0_i32 = arith.constant 0 : i32
    %c0_i32_0 = arith.constant 0 : i32
    %c0_i32_1 = arith.constant 0 : i32
    return %c0_i32, %c0_i32_0 : i32, i32
  }
  func.func @transform_3(%arg0: i32) -> (i32, i32) {
    %c0_i32 = arith.constant 0 : i32
    %c0_i32_0 = arith.constant 0 : i32
    return %arg0, %c0_i32 : i32, i32
  }
}

module attributes {stable_mosaic.version = 11 : i64} {
  func.func @_conv_fused_kernel(%arg0: i32, %arg1: memref<16x640xbf16, #tpu.memory_space<vmem>>, %arg2: memref<640x128xbf16, #tpu.memory_space<vmem>>, %arg3: memref<1x128xf32, #tpu.memory_space<vmem>>, %arg4: memref<16x128xbf16, #tpu.memory_space<vmem>>) attributes {dimension_semantics = [#tpu.dimension_semantics<parallel>], iteration_bounds = array<i64: 2>, scalar_prefetch = 0 : i64, scratch_operands = 0 : i64, tpu.core_type = #tpu.core_type<tc>, window_params = [{transform_indices = @transform_0, window_bounds = array<i64: 16, 640>}, {pipeline_mode = #tpu.pipeline_mode<synchronous>, transform_indices = @transform_1, window_bounds = array<i64: 640, 128>}, {pipeline_mode = #tpu.pipeline_mode<synchronous>, transform_indices = @transform_2, window_bounds = array<i64: 1, 128>}, {transform_indices = @transform_3, window_bounds = array<i64: 16, 128>}]} {
    %c0 = arith.constant 0 : index
    %c0_0 = arith.constant 0 : index
    %0 = vector.load %arg1[%c0, %c0_0] : memref<16x640xbf16, #tpu.memory_space<vmem>>, vector<16x640xbf16>
    %c0_1 = arith.constant 0 : index
    %c0_2 = arith.constant 0 : index
    %1 = vector.load %arg2[%c0_1, %c0_2] : memref<640x128xbf16, #tpu.memory_space<vmem>>, vector<640x128xbf16>
    %cst = arith.constant dense<0.000000e+00> : vector<16x128xf32>
    %2 = tpu.matmul %0, %1, %cst {dimension_numbers = #tpu.dot_dimension_numbers<[1], [0], [0], [1], [0, 0, 1, 1], [], []>} : vector<16x640xbf16>, vector<640x128xbf16>, vector<16x128xf32> -> vector<16x128xf32>
    %c0_3 = arith.constant 0 : index
    %c0_4 = arith.constant 0 : index
    %3 = vector.load %arg3[%c0_3, %c0_4] : memref<1x128xf32, #tpu.memory_space<vmem>>, vector<1x128xf32>
    %4 = vector.broadcast %3 : vector<1x128xf32> to vector<16x128xf32>
    %5 = arith.addf %2, %4 : vector<16x128xf32>
    %cst_5 = arith.constant dense<0.000000e+00> : vector<128xf32>
    %6 = vector.multi_reduction <add>, %5, %cst_5 [0] : vector<16x128xf32> to vector<128xf32>
    %7 = vector.shape_cast %6 : vector<128xf32> to vector<1x128xf32>
    %cst_6 = arith.constant 1.600000e+01 : f32
    %8 = vector.broadcast %cst_6 : f32 to vector<1x128xf32>
    %9 = arith.divf %7, %8 : vector<1x128xf32>
    %10 = vector.broadcast %9 : vector<1x128xf32> to vector<16x128xf32>
    %11 = arith.subf %5, %10 : vector<16x128xf32>
    %12 = arith.mulf %11, %11 : vector<16x128xf32>
    %cst_7 = arith.constant dense<0.000000e+00> : vector<128xf32>
    %13 = vector.multi_reduction <add>, %12, %cst_7 [0] : vector<16x128xf32> to vector<128xf32>
    %14 = vector.shape_cast %13 : vector<128xf32> to vector<1x128xf32>
    %cst_8 = arith.constant 1.600000e+01 : f32
    %15 = vector.broadcast %cst_8 : f32 to vector<1x128xf32>
    %16 = arith.divf %14, %15 : vector<1x128xf32>
    %17 = vector.broadcast %9 : vector<1x128xf32> to vector<16x128xf32>
    %18 = arith.subf %5, %17 : vector<16x128xf32>
    %cst_9 = arith.constant 9.99999974E-6 : f32
    %19 = vector.broadcast %cst_9 : f32 to vector<1x128xf32>
    %20 = arith.addf %16, %19 : vector<1x128xf32>
    %21 = math.rsqrt %20 : vector<1x128xf32>
    %22 = vector.broadcast %21 : vector<1x128xf32> to vector<16x128xf32>
    %23 = arith.mulf %18, %22 : vector<16x128xf32>
    %cst_10 = arith.constant 0.000000e+00 : f32
    %24 = vector.broadcast %cst_10 : f32 to vector<16x128xf32>
    %25 = arith.maximumf %23, %24 : vector<16x128xf32>
    %26 = arith.truncf %25 : vector<16x128xf32> to vector<16x128xbf16>
    %c0_11 = arith.constant 0 : index
    %c0_12 = arith.constant 0 : index
    %27 = vector.load %arg4[%c0_11, %c0_12] : memref<16x128xbf16, #tpu.memory_space<vmem>>, vector<16x128xbf16>
    tpu.vector_store %arg4[%c0_11, %c0_12], %26 {strides = array<i32>} : memref<16x128xbf16, #tpu.memory_space<vmem>>, vector<16x128xbf16>,
    return
  }
  func.func @transform_0(%arg0: i32) -> (i32, i32) {
    %c0_i32 = arith.constant 0 : i32
    %c0_i32_0 = arith.constant 0 : i32
    return %arg0, %c0_i32 : i32, i32
  }
  func.func @transform_1(%arg0: i32) -> (i32, i32) {
    %c0_i32 = arith.constant 0 : i32
    %c0_i32_0 = arith.constant 0 : i32
    %c0_i32_1 = arith.constant 0 : i32
    return %c0_i32, %c0_i32_0 : i32, i32
  }
  func.func @transform_2(%arg0: i32) -> (i32, i32) {
    %c0_i32 = arith.constant 0 : i32
    %c0_i32_0 = arith.constant 0 : i32
    %c0_i32_1 = arith.constant 0 : i32
    return %c0_i32, %c0_i32_0 : i32, i32
  }
  func.func @transform_3(%arg0: i32) -> (i32, i32) {
    %c0_i32 = arith.constant 0 : i32
    %c0_i32_0 = arith.constant 0 : i32
    return %arg0, %c0_i32 : i32, i32
  }
}

module attributes {stable_mosaic.version = 11 : i64} {
  func.func @_conv_fused_kernel(%arg0: i32, %arg1: memref<16x640xbf16, #tpu.memory_space<vmem>>, %arg2: memref<640x128xbf16, #tpu.memory_space<vmem>>, %arg3: memref<1x128xf32, #tpu.memory_space<vmem>>, %arg4: memref<16x128xbf16, #tpu.memory_space<vmem>>, %arg5: memref<16x128xbf16, #tpu.memory_space<vmem>>) attributes {dimension_semantics = [#tpu.dimension_semantics<parallel>], iteration_bounds = array<i64: 2>, scalar_prefetch = 0 : i64, scratch_operands = 0 : i64, tpu.core_type = #tpu.core_type<tc>, window_params = [{transform_indices = @transform_0, window_bounds = array<i64: 16, 640>}, {pipeline_mode = #tpu.pipeline_mode<synchronous>, transform_indices = @transform_1, window_bounds = array<i64: 640, 128>}, {pipeline_mode = #tpu.pipeline_mode<synchronous>, transform_indices = @transform_2, window_bounds = array<i64: 1, 128>}, {transform_indices = @transform_3, window_bounds = array<i64: 16, 128>}, {transform_indices = @transform_4, window_bounds = array<i64: 16, 128>}]} {
    %c0 = arith.constant 0 : index
    %c0_0 = arith.constant 0 : index
    %0 = vector.load %arg1[%c0, %c0_0] : memref<16x640xbf16, #tpu.memory_space<vmem>>, vector<16x640xbf16>
    %c0_1 = arith.constant 0 : index
    %c0_2 = arith.constant 0 : index
    %1 = vector.load %arg2[%c0_1, %c0_2] : memref<640x128xbf16, #tpu.memory_space<vmem>>, vector<640x128xbf16>
    %cst = arith.constant dense<0.000000e+00> : vector<16x128xf32>
    %2 = tpu.matmul %0, %1, %cst {dimension_numbers = #tpu.dot_dimension_numbers<[1], [0], [0], [1], [0, 0, 1, 1], [], []>} : vector<16x640xbf16>, vector<640x128xbf16>, vector<16x128xf32> -> vector<16x128xf32>
    %c0_3 = arith.constant 0 : index
    %c0_4 = arith.constant 0 : index
    %3 = vector.load %arg3[%c0_3, %c0_4] : memref<1x128xf32, #tpu.memory_space<vmem>>, vector<1x128xf32>
    %4 = vector.broadcast %3 : vector<1x128xf32> to vector<16x128xf32>
    %5 = arith.addf %2, %4 : vector<16x128xf32>
    %cst_5 = arith.constant dense<0.000000e+00> : vector<128xf32>
    %6 = vector.multi_reduction <add>, %5, %cst_5 [0] : vector<16x128xf32> to vector<128xf32>
    %7 = vector.shape_cast %6 : vector<128xf32> to vector<1x128xf32>
    %cst_6 = arith.constant 1.600000e+01 : f32
    %8 = vector.broadcast %cst_6 : f32 to vector<1x128xf32>
    %9 = arith.divf %7, %8 : vector<1x128xf32>
    %10 = vector.broadcast %9 : vector<1x128xf32> to vector<16x128xf32>
    %11 = arith.subf %5, %10 : vector<16x128xf32>
    %12 = arith.mulf %11, %11 : vector<16x128xf32>
    %cst_7 = arith.constant dense<0.000000e+00> : vector<128xf32>
    %13 = vector.multi_reduction <add>, %12, %cst_7 [0] : vector<16x128xf32> to vector<128xf32>
    %14 = vector.shape_cast %13 : vector<128xf32> to vector<1x128xf32>
    %cst_8 = arith.constant 1.600000e+01 : f32
    %15 = vector.broadcast %cst_8 : f32 to vector<1x128xf32>
    %16 = arith.divf %14, %15 : vector<1x128xf32>
    %17 = vector.broadcast %9 : vector<1x128xf32> to vector<16x128xf32>
    %18 = arith.subf %5, %17 : vector<16x128xf32>
    %cst_9 = arith.constant 9.99999974E-6 : f32
    %19 = vector.broadcast %cst_9 : f32 to vector<1x128xf32>
    %20 = arith.addf %16, %19 : vector<1x128xf32>
    %21 = math.rsqrt %20 : vector<1x128xf32>
    %22 = vector.broadcast %21 : vector<1x128xf32> to vector<16x128xf32>
    %23 = arith.mulf %18, %22 : vector<16x128xf32>
    %c0_10 = arith.constant 0 : index
    %c0_11 = arith.constant 0 : index
    %24 = vector.load %arg4[%c0_10, %c0_11] : memref<16x128xbf16, #tpu.memory_space<vmem>>, vector<16x128xbf16>
    %25 = arith.extf %24 : vector<16x128xbf16> to vector<16x128xf32>
    %26 = arith.addf %23, %25 : vector<16x128xf32>
    %27 = arith.truncf %26 : vector<16x128xf32> to vector<16x128xbf16>
    %c0_12 = arith.constant 0 : index
    %c0_13 = arith.constant 0 : index
    %28 = vector.load %arg5[%c0_12, %c0_13] : memref<16x128xbf16, #tpu.memory_space<vmem>>, vector<16x128xbf16>
    tpu.vector_store %arg5[%c0_12, %c0_13], %27 {strides = array<i32>} : memref<16x128xbf16, #tpu.memory_space<vmem>>, vector<16x128xbf16>,
    return
  }
  func.func @transform_0(%arg0: i32) -> (i32, i32) {
    %c0_i32 = arith.constant 0 : i32
    %c0_i32_0 = arith.constant 0 : i32
    return %arg0, %c0_i32 : i32, i32
  }
  func.func @transform_1(%arg0: i32) -> (i32, i32) {
    %c0_i32 = arith.constant 0 : i32
    %c0_i32_0 = arith.constant 0 : i32
    %c0_i32_1 = arith.constant 0 : i32
    return %c0_i32, %c0_i32_0 : i32, i32
  }
  func.func @transform_2(%arg0: i32) -> (i32, i32) {
    %c0_i32 = arith.constant 0 : i32
    %c0_i32_0 = arith.constant 0 : i32
    %c0_i32_1 = arith.constant 0 : i32
    return %c0_i32, %c0_i32_0 : i32, i32
  }
  func.func @transform_3(%arg0: i32) -> (i32, i32) {
    %c0_i32 = arith.constant 0 : i32
    %c0_i32_0 = arith.constant 0 : i32
    return %arg0, %c0_i32 : i32, i32
  }
  func.func @transform_4(%arg0: i32) -> (i32, i32) {
    %c0_i32 = arith.constant 0 : i32
    %c0_i32_0 = arith.constant 0 : i32
    return %arg0, %c0_i32 : i32, i32
  }
}

module attributes {stable_mosaic.version = 11 : i64} {
  func.func @_conv_fused_kernel(%arg0: i32, %arg1: memref<64x1024xbf16, #tpu.memory_space<vmem>>, %arg2: memref<1024x128xbf16, #tpu.memory_space<vmem>>, %arg3: memref<1x128xf32, #tpu.memory_space<vmem>>, %arg4: memref<64x128xbf16, #tpu.memory_space<vmem>>) attributes {dimension_semantics = [#tpu.dimension_semantics<parallel>], iteration_bounds = array<i64: 2>, scalar_prefetch = 0 : i64, scratch_operands = 0 : i64, tpu.core_type = #tpu.core_type<tc>, window_params = [{transform_indices = @transform_0, window_bounds = array<i64: 64, 1024>}, {pipeline_mode = #tpu.pipeline_mode<synchronous>, transform_indices = @transform_1, window_bounds = array<i64: 1024, 128>}, {pipeline_mode = #tpu.pipeline_mode<synchronous>, transform_indices = @transform_2, window_bounds = array<i64: 1, 128>}, {transform_indices = @transform_3, window_bounds = array<i64: 64, 128>}]} {
    %c0 = arith.constant 0 : index
    %c0_0 = arith.constant 0 : index
    %0 = vector.load %arg1[%c0, %c0_0] : memref<64x1024xbf16, #tpu.memory_space<vmem>>, vector<64x1024xbf16>
    %c0_1 = arith.constant 0 : index
    %c0_2 = arith.constant 0 : index
    %1 = vector.load %arg2[%c0_1, %c0_2] : memref<1024x128xbf16, #tpu.memory_space<vmem>>, vector<1024x128xbf16>
    %cst = arith.constant dense<0.000000e+00> : vector<64x128xf32>
    %2 = tpu.matmul %0, %1, %cst {dimension_numbers = #tpu.dot_dimension_numbers<[1], [0], [0], [1], [0, 0, 1, 1], [], []>} : vector<64x1024xbf16>, vector<1024x128xbf16>, vector<64x128xf32> -> vector<64x128xf32>
    %c0_3 = arith.constant 0 : index
    %c0_4 = arith.constant 0 : index
    %3 = vector.load %arg3[%c0_3, %c0_4] : memref<1x128xf32, #tpu.memory_space<vmem>>, vector<1x128xf32>
    %4 = vector.broadcast %3 : vector<1x128xf32> to vector<64x128xf32>
    %5 = arith.addf %2, %4 : vector<64x128xf32>
    %cst_5 = arith.constant dense<0.000000e+00> : vector<128xf32>
    %6 = vector.multi_reduction <add>, %5, %cst_5 [0] : vector<64x128xf32> to vector<128xf32>
    %7 = vector.shape_cast %6 : vector<128xf32> to vector<1x128xf32>
    %cst_6 = arith.constant 6.400000e+01 : f32
    %8 = vector.broadcast %cst_6 : f32 to vector<1x128xf32>
    %9 = arith.divf %7, %8 : vector<1x128xf32>
    %10 = vector.broadcast %9 : vector<1x128xf32> to vector<64x128xf32>
    %11 = arith.subf %5, %10 : vector<64x128xf32>
    %12 = arith.mulf %11, %11 : vector<64x128xf32>
    %cst_7 = arith.constant dense<0.000000e+00> : vector<128xf32>
    %13 = vector.multi_reduction <add>, %12, %cst_7 [0] : vector<64x128xf32> to vector<128xf32>
    %14 = vector.shape_cast %13 : vector<128xf32> to vector<1x128xf32>
    %cst_8 = arith.constant 6.400000e+01 : f32
    %15 = vector.broadcast %cst_8 : f32 to vector<1x128xf32>
    %16 = arith.divf %14, %15 : vector<1x128xf32>
    %17 = vector.broadcast %9 : vector<1x128xf32> to vector<64x128xf32>
    %18 = arith.subf %5, %17 : vector<64x128xf32>
    %cst_9 = arith.constant 9.99999974E-6 : f32
    %19 = vector.broadcast %cst_9 : f32 to vector<1x128xf32>
    %20 = arith.addf %16, %19 : vector<1x128xf32>
    %21 = math.rsqrt %20 : vector<1x128xf32>
    %22 = vector.broadcast %21 : vector<1x128xf32> to vector<64x128xf32>
    %23 = arith.mulf %18, %22 : vector<64x128xf32>
    %cst_10 = arith.constant 0.000000e+00 : f32
    %24 = vector.broadcast %cst_10 : f32 to vector<64x128xf32>
    %25 = arith.maximumf %23, %24 : vector<64x128xf32>
    %26 = arith.truncf %25 : vector<64x128xf32> to vector<64x128xbf16>
    %c0_11 = arith.constant 0 : index
    %c0_12 = arith.constant 0 : index
    %27 = vector.load %arg4[%c0_11, %c0_12] : memref<64x128xbf16, #tpu.memory_space<vmem>>, vector<64x128xbf16>
    tpu.vector_store %arg4[%c0_11, %c0_12], %26 {strides = array<i32>} : memref<64x128xbf16, #tpu.memory_space<vmem>>, vector<64x128xbf16>,
    return
  }
  func.func @transform_0(%arg0: i32) -> (i32, i32) {
    %c0_i32 = arith.constant 0 : i32
    %c0_i32_0 = arith.constant 0 : i32
    return %arg0, %c0_i32 : i32, i32
  }
  func.func @transform_1(%arg0: i32) -> (i32, i32) {
    %c0_i32 = arith.constant 0 : i32
    %c0_i32_0 = arith.constant 0 : i32
    %c0_i32_1 = arith.constant 0 : i32
    return %c0_i32, %c0_i32_0 : i32, i32
  }
  func.func @transform_2(%arg0: i32) -> (i32, i32) {
    %c0_i32 = arith.constant 0 : i32
    %c0_i32_0 = arith.constant 0 : i32
    %c0_i32_1 = arith.constant 0 : i32
    return %c0_i32, %c0_i32_0 : i32, i32
  }
  func.func @transform_3(%arg0: i32) -> (i32, i32) {
    %c0_i32 = arith.constant 0 : i32
    %c0_i32_0 = arith.constant 0 : i32
    return %arg0, %c0_i32 : i32, i32
  }
}

module attributes {stable_mosaic.version = 11 : i64} {
  func.func @_conv_fused_kernel(%arg0: i32, %arg1: memref<256x512xbf16, #tpu.memory_space<vmem>>, %arg2: memref<512x128xbf16, #tpu.memory_space<vmem>>, %arg3: memref<1x128xf32, #tpu.memory_space<vmem>>, %arg4: memref<256x128xbf16, #tpu.memory_space<vmem>>) attributes {dimension_semantics = [#tpu.dimension_semantics<parallel>], iteration_bounds = array<i64: 2>, scalar_prefetch = 0 : i64, scratch_operands = 0 : i64, tpu.core_type = #tpu.core_type<tc>, window_params = [{transform_indices = @transform_0, window_bounds = array<i64: 256, 512>}, {pipeline_mode = #tpu.pipeline_mode<synchronous>, transform_indices = @transform_1, window_bounds = array<i64: 512, 128>}, {pipeline_mode = #tpu.pipeline_mode<synchronous>, transform_indices = @transform_2, window_bounds = array<i64: 1, 128>}, {transform_indices = @transform_3, window_bounds = array<i64: 256, 128>}]} {
    %c0 = arith.constant 0 : index
    %c0_0 = arith.constant 0 : index
    %0 = vector.load %arg1[%c0, %c0_0] : memref<256x512xbf16, #tpu.memory_space<vmem>>, vector<256x512xbf16>
    %c0_1 = arith.constant 0 : index
    %c0_2 = arith.constant 0 : index
    %1 = vector.load %arg2[%c0_1, %c0_2] : memref<512x128xbf16, #tpu.memory_space<vmem>>, vector<512x128xbf16>
    %cst = arith.constant dense<0.000000e+00> : vector<256x128xf32>
    %2 = tpu.matmul %0, %1, %cst {dimension_numbers = #tpu.dot_dimension_numbers<[1], [0], [0], [1], [0, 0, 1, 1], [], []>} : vector<256x512xbf16>, vector<512x128xbf16>, vector<256x128xf32> -> vector<256x128xf32>
    %c0_3 = arith.constant 0 : index
    %c0_4 = arith.constant 0 : index
    %3 = vector.load %arg3[%c0_3, %c0_4] : memref<1x128xf32, #tpu.memory_space<vmem>>, vector<1x128xf32>
    %4 = vector.broadcast %3 : vector<1x128xf32> to vector<256x128xf32>
    %5 = arith.addf %2, %4 : vector<256x128xf32>
    %cst_5 = arith.constant dense<0.000000e+00> : vector<128xf32>
    %6 = vector.multi_reduction <add>, %5, %cst_5 [0] : vector<256x128xf32> to vector<128xf32>
    %7 = vector.shape_cast %6 : vector<128xf32> to vector<1x128xf32>
    %cst_6 = arith.constant 2.560000e+02 : f32
    %8 = vector.broadcast %cst_6 : f32 to vector<1x128xf32>
    %9 = arith.divf %7, %8 : vector<1x128xf32>
    %10 = vector.broadcast %9 : vector<1x128xf32> to vector<256x128xf32>
    %11 = arith.subf %5, %10 : vector<256x128xf32>
    %12 = arith.mulf %11, %11 : vector<256x128xf32>
    %cst_7 = arith.constant dense<0.000000e+00> : vector<128xf32>
    %13 = vector.multi_reduction <add>, %12, %cst_7 [0] : vector<256x128xf32> to vector<128xf32>
    %14 = vector.shape_cast %13 : vector<128xf32> to vector<1x128xf32>
    %cst_8 = arith.constant 2.560000e+02 : f32
    %15 = vector.broadcast %cst_8 : f32 to vector<1x128xf32>
    %16 = arith.divf %14, %15 : vector<1x128xf32>
    %17 = vector.broadcast %9 : vector<1x128xf32> to vector<256x128xf32>
    %18 = arith.subf %5, %17 : vector<256x128xf32>
    %cst_9 = arith.constant 9.99999974E-6 : f32
    %19 = vector.broadcast %cst_9 : f32 to vector<1x128xf32>
    %20 = arith.addf %16, %19 : vector<1x128xf32>
    %21 = math.rsqrt %20 : vector<1x128xf32>
    %22 = vector.broadcast %21 : vector<1x128xf32> to vector<256x128xf32>
    %23 = arith.mulf %18, %22 : vector<256x128xf32>
    %cst_10 = arith.constant 0.000000e+00 : f32
    %24 = vector.broadcast %cst_10 : f32 to vector<256x128xf32>
    %25 = arith.maximumf %23, %24 : vector<256x128xf32>
    %26 = arith.truncf %25 : vector<256x128xf32> to vector<256x128xbf16>
    %c0_11 = arith.constant 0 : index
    %c0_12 = arith.constant 0 : index
    %27 = vector.load %arg4[%c0_11, %c0_12] : memref<256x128xbf16, #tpu.memory_space<vmem>>, vector<256x128xbf16>
    tpu.vector_store %arg4[%c0_11, %c0_12], %26 {strides = array<i32>} : memref<256x128xbf16, #tpu.memory_space<vmem>>, vector<256x128xbf16>,
    return
  }
  func.func @transform_0(%arg0: i32) -> (i32, i32) {
    %c0_i32 = arith.constant 0 : i32
    %c0_i32_0 = arith.constant 0 : i32
    return %arg0, %c0_i32 : i32, i32
  }
  func.func @transform_1(%arg0: i32) -> (i32, i32) {
    %c0_i32 = arith.constant 0 : i32
    %c0_i32_0 = arith.constant 0 : i32
    %c0_i32_1 = arith.constant 0 : i32
    return %c0_i32, %c0_i32_0 : i32, i32
  }
  func.func @transform_2(%arg0: i32) -> (i32, i32) {
    %c0_i32 = arith.constant 0 : i32
    %c0_i32_0 = arith.constant 0 : i32
    %c0_i32_1 = arith.constant 0 : i32
    return %c0_i32, %c0_i32_0 : i32, i32
  }
  func.func @transform_3(%arg0: i32) -> (i32, i32) {
    %c0_i32 = arith.constant 0 : i32
    %c0_i32_0 = arith.constant 0 : i32
    return %arg0, %c0_i32 : i32, i32
  }
}

module attributes {stable_mosaic.version = 11 : i64} {
  func.func @_conv_fused_kernel(%arg0: i32, %arg1: memref<256x896xbf16, #tpu.memory_space<vmem>>, %arg2: memref<896x128xbf16, #tpu.memory_space<vmem>>, %arg3: memref<1x128xf32, #tpu.memory_space<vmem>>, %arg4: memref<256x128xf32, #tpu.memory_space<vmem>>) attributes {dimension_semantics = [#tpu.dimension_semantics<parallel>], iteration_bounds = array<i64: 2>, scalar_prefetch = 0 : i64, scratch_operands = 0 : i64, tpu.core_type = #tpu.core_type<tc>, window_params = [{transform_indices = @transform_0, window_bounds = array<i64: 256, 896>}, {pipeline_mode = #tpu.pipeline_mode<synchronous>, transform_indices = @transform_1, window_bounds = array<i64: 896, 128>}, {pipeline_mode = #tpu.pipeline_mode<synchronous>, transform_indices = @transform_2, window_bounds = array<i64: 1, 128>}, {transform_indices = @transform_3, window_bounds = array<i64: 256, 128>}]} {
    %c0 = arith.constant 0 : index
    %c0_0 = arith.constant 0 : index
    %0 = vector.load %arg1[%c0, %c0_0] : memref<256x896xbf16, #tpu.memory_space<vmem>>, vector<256x896xbf16>
    %c0_1 = arith.constant 0 : index
    %c0_2 = arith.constant 0 : index
    %1 = vector.load %arg2[%c0_1, %c0_2] : memref<896x128xbf16, #tpu.memory_space<vmem>>, vector<896x128xbf16>
    %cst = arith.constant dense<0.000000e+00> : vector<256x128xf32>
    %2 = tpu.matmul %0, %1, %cst {dimension_numbers = #tpu.dot_dimension_numbers<[1], [0], [0], [1], [0, 0, 1, 1], [], []>} : vector<256x896xbf16>, vector<896x128xbf16>, vector<256x128xf32> -> vector<256x128xf32>
    %c0_3 = arith.constant 0 : index
    %c0_4 = arith.constant 0 : index
    %3 = vector.load %arg3[%c0_3, %c0_4] : memref<1x128xf32, #tpu.memory_space<vmem>>, vector<1x128xf32>
    %4 = vector.broadcast %3 : vector<1x128xf32> to vector<256x128xf32>
    %5 = arith.addf %2, %4 : vector<256x128xf32>
    %6 = arith.negf %5 : vector<256x128xf32>
    %7 = math.exp %6 : vector<256x128xf32>
    %cst_5 = arith.constant 1.000000e+00 : f32
    %8 = vector.broadcast %cst_5 : f32 to vector<256x128xf32>
    %9 = arith.addf %8, %7 : vector<256x128xf32>
    %10 = arith.divf %8, %9 : vector<256x128xf32>
    %c0_6 = arith.constant 0 : index
    %c0_7 = arith.constant 0 : index
    %11 = vector.load %arg4[%c0_6, %c0_7] : memref<256x128xf32, #tpu.memory_space<vmem>>, vector<256x128xf32>
    tpu.vector_store %arg4[%c0_6, %c0_7], %10 {strides = array<i32>} : memref<256x128xf32, #tpu.memory_space<vmem>>, vector<256x128xf32>,
    return
  }
  func.func @transform_0(%arg0: i32) -> (i32, i32) {
    %c0_i32 = arith.constant 0 : i32
    %c0_i32_0 = arith.constant 0 : i32
    return %arg0, %c0_i32 : i32, i32
  }
  func.func @transform_1(%arg0: i32) -> (i32, i32) {
    %c0_i32 = arith.constant 0 : i32
    %c0_i32_0 = arith.constant 0 : i32
    %c0_i32_1 = arith.constant 0 : i32
    return %c0_i32, %c0_i32_0 : i32, i32
  }
  func.func @transform_2(%arg0: i32) -> (i32, i32) {
    %c0_i32 = arith.constant 0 : i32
    %c0_i32_0 = arith.constant 0 : i32
    %c0_i32_1 = arith.constant 0 : i32
    return %c0_i32, %c0_i32_0 : i32, i32
  }
  func.func @transform_3(%arg0: i32) -> (i32, i32) {
    %c0_i32 = arith.constant 0 : i32
    %c0_i32_0 = arith.constant 0 : i32
    return %arg0, %c0_i32 : i32, i32
  }
}

</mosaic_0001>

<bundles_post_ra>
// kernel: mul.18
= control target key start
LH: loop header
LB: loop body
LE: loop exit
PB: predicated region body
PF: predicated region fallthrough
CT: control target
= control target key end

     0   :  { %s118_s0 = inlined_call_operand.vmem [shape: f32[2,32], index: 0, kind: input, shape index: {}]   ;;  %s119_s1 = inlined_call_operand.vmem [shape: f32[2,8,8,32], index: 1, kind: output, shape index: {}]  }
   0x1   :  { %v4_v0 = vld [vmem:[%s118_s0] ss:$0 sm:$0xff]  ;;  %v38_v1 = vld [vmem:[%s118_s0 + $0x1] ss:$0 sm:$0xff] }
   0x2   :  { %5 = vst [vmem:[%s119_s1] sm:$0xff] %v4_v0 }
   0x3   :  { %39 = vst [vmem:[%s119_s1 + $0x40] sm:$0xff] %v38_v1 }
   0x4   :  { %40 = vst [vmem:[%s119_s1 + $0x8] sm:$0xff] %v4_v0 }
   0x5   :  { %41 = vst [vmem:[%s119_s1 + $0x48] sm:$0xff] %v38_v1 }
   0x6   :  { %42 = vst [vmem:[%s119_s1 + $0x10] sm:$0xff] %v4_v0 }
   0x7   :  { %43 = vst [vmem:[%s119_s1 + $0x50] sm:$0xff] %v38_v1 }
   0x8   :  { %44 = vst [vmem:[%s119_s1 + $0x18] sm:$0xff] %v4_v0 }
   0x9   :  { %45 = vst [vmem:[%s119_s1 + $0x58] sm:$0xff] %v38_v1 }
   0xa   :  { %46 = vst [vmem:[%s119_s1 + $0x20] sm:$0xff] %v4_v0 }
   0xb   :  { %47 = vst [vmem:[%s119_s1 + $0x60] sm:$0xff] %v38_v1 }
   0xc   :  { %48 = vst [vmem:[%s119_s1 + $0x28] sm:$0xff] %v4_v0 }
   0xd   :  { %49 = vst [vmem:[%s119_s1 + $0x68] sm:$0xff] %v38_v1 }
   0xe   :  { %50 = vst [vmem:[%s119_s1 + $0x30] sm:$0xff] %v4_v0 }
   0xf   :  { %51 = vst [vmem:[%s119_s1 + $0x70] sm:$0xff] %v38_v1 }
  0x10   :  { %52 = vst [vmem:[%s119_s1 + $0x38] sm:$0xff] %v4_v0 }
  0x11   :  { %53 = vst [vmem:[%s119_s1 + $0x78] sm:$0xff] %v38_v1 }

// kernel: erdnet_forward.10
= control target key start
LH: loop header
LB: loop body
LE: loop exit
PB: predicated region body
PF: predicated region fallthrough
CT: control target
= control target key end

     0   :  { %s1428_s12 = smov 0   ;;  %s1908_s0 = inlined_call_operand.vmem [shape: bf16[512,256], index: 0, kind: input, shape index: {}]   ;;  %s1909_s1 = inlined_call_operand.vmem [shape: bf16[256,128], index: 1, kind: input, shape index: {}]   ;;  %s1910_s2 = inlined_call_operand.vmem [shape: f32[1,128], index: 2, kind: input, shape index: {}]   ;;  %s1911_s3 = inlined_call_operand.vmem [shape: bf16[512,128], index: 3, kind: output, shape index: {}]  }
   0x1 LB: > { %s1021_s13 = sadd.s32 4294967295, %s1405_s12   ;;  %p1025_p0 = scmp.ge.s32.totalorder %s1405_s12, 1  ;;  %s1405_s12 = sphi %s1428_s12, %s13_s12  }
   0x2   : > { %p139_p1 = scmp.lt.s32.totalorder %s1405_s12, 3 }
   0x4   : > { %p140_p2 = pnand %p1025_p0, %p139_p1 }
   0x5   : > { %s1026_s26 = sshll.u32 (!%p140_p2), %s1021_s13, 5 }
   0x6   : > { %143 = sbr.rel (%p140_p2) target bundleno = 476 (0x1dc), region = 32  ;;  %p165_p3 = scmp.lt.s32.totalorder (!%p140_p2), %s1026_s26, 63 }
   0xb   : > { %v1265_v0 = vld [vmem:[%s1909_s1 + $0x38] sm:$0xff]  ;;  %v1264_v2 = vld [vmem:[%s1909_s1 + $0x30] sm:$0xff]  ;;  %v1263_v4 = vld [vmem:[%s1909_s1 + $0x28] sm:$0xff]  ;;  %s1913_s26 = smov (!%p165_p3, %s1026_s26), 63 }
   0xc   : > { %v1273_v1 = vld [vmem:[%s1909_s1 + $0x78] sm:$0xff]  ;;  %501 = vmatpush.bf16.msra.mxu0 %v1265_v0  ;;  %v1272_v3 = vld [vmem:[%s1909_s1 + $0x70] sm:$0xff]  ;;  %1369 = vmatpush.bf16.msra.mxu2 %v1265_v0  ;;  %v1271_v5 = vld [vmem:[%s1909_s1 + $0x68] sm:$0xff]  ;;  %s1225_s13 = sshll.u32 %s1913_s26, 3  ;;  %s1030_s28 = sshll.u32 %s1913_s26, 2 }
   0xd   : > { %590 = vmatpush.bf16.msra.mxu1 %v1273_v1  ;;  %1377 = vmatpush.bf16.msra.mxu3 %v1273_v1  ;;  %v1262_v6 = vld [vmem:[%s1909_s1 + $0x20] sm:$0xff]  ;;  %v1261_v8 = vld [vmem:[%s1909_s1 + $0x18] sm:$0xff]  ;;  %v1260_v10 = vld [vmem:[%s1909_s1 + $0x10] sm:$0xff]  ;;  %s1484_s20 = scalar_lea.vmem %s1908_s0, %s1225_s13  ;;  %s1887_s4 = scalar_lea.vmem %s1911_s3, %s1030_s28 }
   0xe   : > { %v1270_v7 = vld [vmem:[%s1909_s1 + $0x60] sm:$0xff]  ;;  %v1269_v9 = vld [vmem:[%s1909_s1 + $0x58] sm:$0xff]  ;;  %v1268_v11 = vld [vmem:[%s1909_s1 + $0x50] sm:$0xff] }
   0xf   : > { %v1259_v12 = vld [vmem:[%s1909_s1 + $0x8] sm:$0xff]  ;;  %v1258_v14 = vld [vmem:[%s1909_s1] sm:$0xff]  ;;  %v1041_v28 = vld [vmem:[%s1484_s20 + $0x10] sm:$0xf] }
  0x10   : > { %502 = vmatpush.bf16.msra.mxu0 %v1264_v2  ;;  %1370 = vmatpush.bf16.msra.mxu2 %v1264_v2  ;;  %v1267_v13 = vld [vmem:[%s1909_s1 + $0x48] sm:$0xff]  ;;  %v1266_v15 = vld [vmem:[%s1909_s1 + $0x40] sm:$0xff]  ;;  %v1229_v29 = vld [vmem:[%s1484_s20 + $0x14] sm:$0xf0] }
  0x11   : > { %591 = vmatpush.bf16.msra.mxu1 %v1272_v3  ;;  %1378 = vmatpush.bf16.msra.mxu3 %v1272_v3  ;;  %v1033_v16 = vld [vmem:[%s1484_s20] sm:$0xf]  ;;  %v1227_v17 = vld [vmem:[%s1484_s20 + $0x4] sm:$0xf0]  ;;  %v1226_v18 = vld [vmem:[%s1484_s20 + $0x4] sm:$0xf]  ;;  %v1042_v36 = vor.u32 %v1229_v29, %v1041_v28 }
  0x12   : > { %v1035_v19 = vld [vmem:[%s1484_s20 + $0x8] sm:$0xf0]  ;;  %v1097_v20 = vld [vmem:[%s1484_s20 + $0x80] sm:$0xf]  ;;  %v1243_v21 = vld [vmem:[%s1484_s20 + $0x84] sm:$0xf0]  ;;  %v1034_v24 = vor.u32 %v1227_v17, %v1033_v16 }
  0x13   : > { %v1242_v22 = vld [vmem:[%s1484_s20 + $0x84] sm:$0xf]  ;;  %v1099_v23 = vld [vmem:[%s1484_s20 + $0x88] sm:$0xf0]  ;;  %v1038_v25 = vor.u32 %v1226_v18, %v1035_v19  ;;  %v1098_v26 = vor.u32 %v1243_v21, %v1097_v20  ;;  %v1228_v30 = vld [vmem:[%s1484_s20 + $0x14] sm:$0xf] }
  0x14   : > { %503 = vmatpush.bf16.msra.mxu0 %v1263_v4  ;;  %1371 = vmatpush.bf16.msra.mxu2 %v1263_v4  ;;  %v1102_v27 = vor.u32 %v1242_v22, %v1099_v23  ;;  %v1043_v31 = vld [vmem:[%s1484_s20 + $0x18] sm:$0xf0]  ;;  %v1105_v32 = vld [vmem:[%s1484_s20 + $0x90] sm:$0xf]  ;;  %v1245_v33 = vld [vmem:[%s1484_s20 + $0x94] sm:$0xf0] }
  0x15   : > { %592 = vmatpush.bf16.msra.mxu1 %v1271_v5  ;;  %1379 = vmatpush.bf16.msra.mxu3 %v1271_v5  ;;  %v1244_v34 = vld [vmem:[%s1484_s20 + $0x94] sm:$0xf]  ;;  %v1107_v35 = vld [vmem:[%s1484_s20 + $0x98] sm:$0xf0]  ;;  %v1046_v37 = vor.u32 %v1228_v30, %v1043_v31  ;;  %v1106_v38 = vor.u32 %v1245_v33, %v1105_v32  ;;  %v1049_v40 = vld [vmem:[%s1484_s20 + $0x20] sm:$0xf] }
  0x16   : > { %v1110_v39 = vor.u32 %v1244_v34, %v1107_v35  ;;  %v1231_v41 = vld [vmem:[%s1484_s20 + $0x24] sm:$0xf0]  ;;  %v1230_v42 = vld [vmem:[%s1484_s20 + $0x24] sm:$0xf]  ;;  %v1051_v43 = vld [vmem:[%s1484_s20 + $0x28] sm:$0xf0] }
  0x17   : > { %v1113_v44 = vld [vmem:[%s1484_s20 + $0xa0] sm:$0xf]  ;;  %v1247_v45 = vld [vmem:[%s1484_s20 + $0xa4] sm:$0xf0]  ;;  %v1246_v46 = vld [vmem:[%s1484_s20 + $0xa4] sm:$0xf]  ;;  %v1050_v48 = vor.u32 %v1231_v41, %v1049_v40  ;;  %v1054_v49 = vor.u32 %v1230_v42, %v1051_v43 }
  0x18   : > { %504 = vmatpush.bf16.msra.mxu0 %v1262_v6  ;;  %1372 = vmatpush.bf16.msra.mxu2 %v1262_v6  ;;  %v1115_v47 = vld [vmem:[%s1484_s20 + $0xa8] sm:$0xf0]  ;;  %v1114_v50 = vor.u32 %v1247_v45, %v1113_v44  ;;  %v1057_v52 = vld [vmem:[%s1484_s20 + $0x30] sm:$0xf]  ;;  %v1233_v53 = vld [vmem:[%s1484_s20 + $0x34] sm:$0xf0] }
  0x19   : > { %593 = vmatpush.bf16.msra.mxu1 %v1270_v7  ;;  %1380 = vmatpush.bf16.msra.mxu3 %v1270_v7  ;;  %v1118_v51 = vor.u32 %v1246_v46, %v1115_v47  ;;  %v1232_v54 = vld [vmem:[%s1484_s20 + $0x34] sm:$0xf]  ;;  %v1059_v55 = vld [vmem:[%s1484_s20 + $0x38] sm:$0xf0]  ;;  %v1121_v56 = vld [vmem:[%s1484_s20 + $0xb0] sm:$0xf]  ;;  %v1058_v60 = vor.u32 %v1233_v53, %v1057_v52 }
  0x1a   : > { %v1249_v57 = vld [vmem:[%s1484_s20 + $0xb4] sm:$0xf0]  ;;  %v1248_v58 = vld [vmem:[%s1484_s20 + $0xb4] sm:$0xf]  ;;  %v1123_v59 = vld [vmem:[%s1484_s20 + $0xb8] sm:$0xf0]  ;;  %v1062_v61 = vor.u32 %v1232_v54, %v1059_v55 }
  0x1b   : > { %v1122_v62 = vor.u32 %v1249_v57, %v1121_v56  ;;  %v1126_v63 = vor.u32 %v1248_v58, %v1123_v59  ;;  %v1065_v0 = vld [vmem:[%s1484_s20 + $0x40] sm:$0xf]  ;;  %v1235_v1 = vld [vmem:[%s1484_s20 + $0x44] sm:$0xf0]  ;;  %v1234_v2 = vld [vmem:[%s1484_s20 + $0x44] sm:$0xf] }
  0x1c   : > { %505 = vmatpush.bf16.msra.mxu0 %v1261_v8  ;;  %1373 = vmatpush.bf16.msra.mxu2 %v1261_v8  ;;  %v1067_v3 = vld [vmem:[%s1484_s20 + $0x48] sm:$0xf0]  ;;  %v1129_v4 = vld [vmem:[%s1484_s20 + $0xc0] sm:$0xf]  ;;  %v1251_v5 = vld [vmem:[%s1484_s20 + $0xc4] sm:$0xf0]  ;;  %v1066_v8 = vor.u32 %v1235_v1, %v1065_v0 }
  0x1d   : > { %594 = vmatpush.bf16.msra.mxu1 %v1269_v9  ;;  %1381 = vmatpush.bf16.msra.mxu3 %v1269_v9  ;;  %v1250_v6 = vld [vmem:[%s1484_s20 + $0xc4] sm:$0xf]  ;;  %v1131_v7 = vld [vmem:[%s1484_s20 + $0xc8] sm:$0xf0]  ;;  %v1070_v9 = vor.u32 %v1234_v2, %v1067_v3  ;;  %v1137_v16 = vld [vmem:[%s1484_s20 + $0xd0] sm:$0xf] }
  0x1e   : > { %v1253_v17 = vld [vmem:[%s1484_s20 + $0xd4] sm:$0xf0]  ;;  %v1252_v18 = vld [vmem:[%s1484_s20 + $0xd4] sm:$0xf]  ;;  %v1139_v19 = vld [vmem:[%s1484_s20 + $0xd8] sm:$0xf0] }
  0x1f   : > { %v1138_v22 = vor.u32 %v1253_v17, %v1137_v16  ;;  %v1142_v23 = vor.u32 %v1252_v18, %v1139_v19  ;;  %v1145_v28 = vld [vmem:[%s1484_s20 + $0xe0] sm:$0xf]  ;;  %v1255_v29 = vld [vmem:[%s1484_s20 + $0xe4] sm:$0xf0]  ;;  %v1254_v30 = vld [vmem:[%s1484_s20 + $0xe4] sm:$0xf] }
  0x20   : > { %506 = vmatpush.bf16.msra.mxu0 %v1260_v10  ;;  %1374 = vmatpush.bf16.msra.mxu2 %v1260_v10  ;;  %v1130_v10 = vor.u32 %v1251_v5, %v1129_v4  ;;  %v1147_v31 = vld [vmem:[%s1484_s20 + $0xe8] sm:$0xf0]  ;;  %v1146_v34 = vor.u32 %v1255_v29, %v1145_v28  ;;  %v1153_v40 = vld [vmem:[%s1484_s20 + $0xf0] sm:$0xf]  ;;  %v1257_v41 = vld [vmem:[%s1484_s20 + $0xf4] sm:$0xf0] }
  0x21   : > { %595 = vmatpush.bf16.msra.mxu1 %v1268_v11  ;;  %1382 = vmatpush.bf16.msra.mxu3 %v1268_v11  ;;  %v1134_v11 = vor.u32 %v1250_v6, %v1131_v7  ;;  %v1150_v35 = vor.u32 %v1254_v30, %v1147_v31  ;;  %v1256_v42 = vld [vmem:[%s1484_s20 + $0xf4] sm:$0xf]  ;;  %v1155_v43 = vld [vmem:[%s1484_s20 + $0xf8] sm:$0xf0]  ;;  %v1154_v46 = vor.u32 %v1257_v41, %v1153_v40 }
  0x22   : > { %v1158_v47 = vor.u32 %v1256_v42, %v1155_v43 }
  0x24   : > { %507 = vmatpush.bf16.msra.mxu0 %v1259_v12  ;;  %1375 = vmatpush.bf16.msra.mxu2 %v1259_v12  ;;  %v1073_v12 = vld [vmem:[%s1484_s20 + $0x50] sm:$0xf] }
  0x25   : > { %596 = vmatpush.bf16.msra.mxu1 %v1267_v13  ;;  %1383 = vmatpush.bf16.msra.mxu3 %v1267_v13  ;;  %v1237_v13 = vld [vmem:[%s1484_s20 + $0x54] sm:$0xf0] }
  0x26   : > { %v1074_v20 = vor.u32 %v1237_v13, %v1073_v12 }
  0x28   : > { %508 = vmatpush.bf16.msra.mxu0 %v1258_v14  ;;  %1376 = vmatpush.bf16.msra.mxu2 %v1258_v14  ;;  %v1236_v14 = vld [vmem:[%s1484_s20 + $0x54] sm:$0xf] }
  0x29   : > { %597 = vmatpush.bf16.msra.mxu1 %v1266_v15  ;;  %1384 = vmatpush.bf16.msra.mxu3 %v1266_v15  ;;  %v1075_v15 = vld [vmem:[%s1484_s20 + $0x58] sm:$0xf0] }
  0x2a   : > { %v1078_v21 = vor.u32 %v1236_v14, %v1075_v15 }
  0x2b   : > { %509 = vmatmul.bf16.vlgmr.msra.gmra.mxu0 %v1034_v24  ;;  %549 = vmatmul.bf16.vlgmr.msra.gmra.mxu2 %v1098_v26  ;;  %v1081_v24 = vld [vmem:[%s1484_s20 + $0x60] sm:$0xf]  ;;  %v1238_v26 = vld [vmem:[%s1484_s20 + $0x64] sm:$0xf] }
  0x2c   : > { %598 = vmatmul.bf16.vlgmr.msra.gmra.mxu1 %v1038_v25  ;;  %638 = vmatmul.bf16.vlgmr.msra.gmra.mxu3 %v1102_v27  ;;  %v1239_v25 = vld [vmem:[%s1484_s20 + $0x64] sm:$0xf0]  ;;  %v1083_v27 = vld [vmem:[%s1484_s20 + $0x68] sm:$0xf0] }
  0x2d   : > { %v1082_v32 = vor.u32 %v1239_v25, %v1081_v24  ;;  %v1086_v33 = vor.u32 %v1238_v26, %v1083_v27 }
  0x3b   : > { %514 = vmatmul.bf16.gmra.mxu0 %v1042_v36  ;;  %554 = vmatmul.bf16.gmra.mxu2 %v1106_v38  ;;  %v1089_v36 = vld [vmem:[%s1484_s20 + $0x70] sm:$0xf]  ;;  %v1240_v38 = vld [vmem:[%s1484_s20 + $0x74] sm:$0xf] }
  0x3c   : > { %603 = vmatmul.bf16.gmra.mxu1 %v1046_v37  ;;  %643 = vmatmul.bf16.gmra.mxu3 %v1110_v39  ;;  %v1241_v37 = vld [vmem:[%s1484_s20 + $0x74] sm:$0xf0]  ;;  %v1091_v39 = vld [vmem:[%s1484_s20 + $0x78] sm:$0xf0] }
  0x3d   : > { %v1090_v44 = vor.u32 %v1241_v37, %v1089_v36  ;;  %v1094_v45 = vor.u32 %v1240_v38, %v1091_v39 }
  0x4b   : > { %519 = vmatmul.bf16.gmra.mxu0 %v1050_v48  ;;  %559 = vmatmul.bf16.gmra.mxu2 %v1114_v50  ;;  %v1559_v48 = vld [vmem:[%s1910_s2] ss:$0 sm:$0xff] }
  0x4c   : > { %608 = vmatmul.bf16.gmra.mxu1 %v1054_v49  ;;  %648 = vmatmul.bf16.gmra.mxu3 %v1118_v51 }
  0x5b   : > { %524 = vmatmul.bf16.gmra.mxu0 %v1058_v60  ;;  %564 = vmatmul.bf16.gmra.mxu2 %v1122_v62 }
  0x5c   : > { %613 = vmatmul.bf16.gmra.mxu1 %v1062_v61  ;;  %653 = vmatmul.bf16.gmra.mxu3 %v1126_v63 }
  0x6b   : > { %529 = vmatmul.bf16.gmra.mxu0 %v1066_v8  ;;  %569 = vmatmul.bf16.gmra.mxu2 %v1130_v10 }
  0x6c   : > { %618 = vmatmul.bf16.gmra.mxu1 %v1070_v9  ;;  %658 = vmatmul.bf16.gmra.mxu3 %v1134_v11 }
  0x7b   : > { %534 = vmatmul.bf16.gmra.mxu0 %v1074_v20  ;;  %574 = vmatmul.bf16.gmra.mxu2 %v1138_v22 }
  0x7c   : > { %623 = vmatmul.bf16.gmra.mxu1 %v1078_v21  ;;  %663 = vmatmul.bf16.gmra.mxu3 %v1142_v23 }
  0x8b   : > { %539 = vmatmul.bf16.gmra.mxu0 %v1082_v32  ;;  %579 = vmatmul.bf16.gmra.mxu2 %v1146_v34 }
  0x8c   : > { %628 = vmatmul.bf16.gmra.mxu1 %v1086_v33  ;;  %668 = vmatmul.bf16.gmra.mxu3 %v1150_v35 }
  0x9b   : > { %544 = vmatmul.bf16.gmra.mxu0 %v1090_v44  ;;  %584 = vmatmul.bf16.gmra.mxu2 %v1154_v46 }
  0x9c   : > { %633 = vmatmul.bf16.gmra.mxu1 %v1094_v45  ;;  %673 = vmatmul.bf16.gmra.mxu3 %v1158_v47 }
  0xa8   : > { %v510_v49 = vpop.f32.mrf.mxu0 }
  0xa9   : > { %v599_v50 = vpop.f32.mrf.mxu1  ;;  %v511_v51 = vadd.f32 %v1559_v48, %v510_v49 }
  0xab   : > { %v1562_v52 = vadd.f32 %v599_v50, %v511_v51 }
  0xae   : > { %v550_v53 = vpop.f32.mrf.mxu2 }
  0xaf   : > { %v639_v54 = vpop.f32.mrf.mxu3  ;;  %v551_v57 = vadd.f32 %v1559_v48, %v550_v53 }
  0xb0   : > { %v512_v55 = vpop.f32.mrf.mxu0 }
  0xb1   : > { %v601_v56 = vpop.f32.mrf.mxu1  ;;  %v513_v58 = vadd.f32 %v1559_v48, %v512_v55  ;;  %v1566_v59 = vadd.f32 %v639_v54, %v551_v57 }
  0xb3   : > { %v1568_v60 = vadd.f32 %v601_v56, %v513_v58 }
  0xb5   : > { %v679_v53 = vadd.f32 %v1568_v60, %v1562_v52 }
  0xb6   : > { %v552_v61 = vpop.f32.mrf.mxu2 }
  0xb7   : > { %v641_v62 = vpop.f32.mrf.mxu3  ;;  %v553_v1 = vadd.f32 %v1559_v48, %v552_v61 }
  0xb8   : > { %v515_v63 = vpop.f32.mrf.mxu0 }
  0xb9   : > { %v604_v0 = vpop.f32.mrf.mxu1  ;;  %v516_v2 = vadd.f32 %v1559_v48, %v515_v63  ;;  %v1572_v3 = vadd.f32 %v641_v62, %v553_v1 }
  0xbb   : > { %v1574_v4 = vadd.f32 %v604_v0, %v516_v2 }
  0xbd   : > { %v680_v56 = vadd.f32 %v679_v53, %v1574_v4 }
  0xbe   : > { %v555_v5 = vpop.f32.mrf.mxu2 }
  0xbf   : > { %v644_v6 = vpop.f32.mrf.mxu3  ;;  %v556_v9 = vadd.f32 %v1559_v48, %v555_v5 }
  0xc0   : > { %v517_v7 = vpop.f32.mrf.mxu0 }
  0xc1   : > { %v606_v8 = vpop.f32.mrf.mxu1  ;;  %v518_v10 = vadd.f32 %v1559_v48, %v517_v7  ;;  %v1578_v11 = vadd.f32 %v644_v6, %v556_v9 }
  0xc3   : > { %v1580_v12 = vadd.f32 %v606_v8, %v518_v10 }
  0xc5   : > { %v681_v58 = vadd.f32 %v680_v56, %v1580_v12 }
  0xc6   : > { %v557_v13 = vpop.f32.mrf.mxu2 }
  0xc7   : > { %v646_v14 = vpop.f32.mrf.mxu3  ;;  %v558_v17 = vadd.f32 %v1559_v48, %v557_v13 }
  0xc8   : > { %v520_v15 = vpop.f32.mrf.mxu0 }
  0xc9   : > { %v609_v16 = vpop.f32.mrf.mxu1  ;;  %v521_v18 = vadd.f32 %v1559_v48, %v520_v15  ;;  %v1584_v19 = vadd.f32 %v646_v14, %v558_v17 }
  0xcb   : > { %v1586_v20 = vadd.f32 %v609_v16, %v521_v18 }
  0xcd   : > { %v682_v0 = vadd.f32 %v681_v58, %v1586_v20 }
  0xce   : > { %v560_v21 = vpop.f32.mrf.mxu2 }
  0xcf   : > { %v561_v24 = vadd.f32 %v1559_v48, %v560_v21  ;;  %v649_v25 = vpop.f32.mrf.mxu3 }
  0xd0   : > { %v522_v22 = vpop.f32.mrf.mxu0 }
  0xd1   : > { %v611_v23 = vpop.f32.mrf.mxu1  ;;  %v1589_v26 = vadd.f32 %v649_v25, %v561_v24  ;;  %v523_v54 = vadd.f32 %v1559_v48, %v522_v22 }
  0xd3   : > { %v1619_v61 = vadd.f32 %v611_v23, %v523_v54 }
  0xd5   : > { %v683_v7 = vadd.f32 %v682_v0, %v1619_v61 }
  0xd6   : > { %v1591_v27 = vpop.f32.mrf.mxu2 }
  0xd7   : > { %v1593_v30 = vpop.f32.mrf.mxu3 }
  0xd8   : > { %v525_v28 = vpop.f32.mrf.mxu0 }
  0xd9   : > { %v614_v29 = vpop.f32.mrf.mxu1  ;;  %v526_v57 = vadd.f32 %v1559_v48, %v525_v28 }
  0xdb   : > { %v1625_v1 = vadd.f32 %v614_v29, %v526_v57 }
  0xdd   : > { %v684_v10 = vadd.f32 %v683_v7, %v1625_v1 }
  0xde   : > { %v1595_v33 = vpop.f32.mrf.mxu2 }
  0xdf   : > { %v1597_v34 = vpop.f32.mrf.mxu3 }
  0xe0   : > { %v527_v31 = vpop.f32.mrf.mxu0 }
  0xe1   : > { %v616_v32 = vpop.f32.mrf.mxu1  ;;  %v528_v62 = vadd.f32 %v1559_v48, %v527_v31 }
  0xe3   : > { %v1629_v8 = vadd.f32 %v616_v32, %v528_v62 }
  0xe5   : > { %v685_v16 = vadd.f32 %v684_v10, %v1629_v8  ;;  %v566_v10 = vadd.f32 %v1559_v48, %v1595_v33 }
  0xe6   : > { %v1599_v37 = vpop.f32.mrf.mxu2 }
  0xe7   : > { %v1601_v38 = vpop.f32.mrf.mxu3 }
  0xe8   : > { %v530_v35 = vpop.f32.mrf.mxu0 }
  0xe9   : > { %v619_v36 = vpop.f32.mrf.mxu1  ;;  %v531_v2 = vadd.f32 %v1559_v48, %v530_v35 }
  0xeb   : > { %v1633_v13 = vadd.f32 %v619_v36, %v531_v2 }
  0xed   : > { %v686_v21 = vadd.f32 %v685_v16, %v1633_v13 }
  0xee   : > { %v1603_v41 = vpop.f32.mrf.mxu2 }
  0xef   : > { %v1605_v44 = vpop.f32.mrf.mxu3 }
  0xf0   : > { %v532_v39 = vpop.f32.mrf.mxu0 }
  0xf1   : > { %v621_v40 = vpop.f32.mrf.mxu1  ;;  %v533_v9 = vadd.f32 %v1559_v48, %v532_v39 }
  0xf3   : > { %v1637_v17 = vadd.f32 %v621_v40, %v533_v9 }
  0xf5   : > { %v687_v29 = vadd.f32 %v686_v21, %v1637_v17 }
  0xf6   : > { %v1607_v45 = vpop.f32.mrf.mxu2 }
  0xf7   : > { %v1609_v49 = vpop.f32.mrf.mxu3  ;;  %v573_v33 = vadd.f32 %v1559_v48, %v1607_v45 }
  0xf8   : > { %v535_v42 = vpop.f32.mrf.mxu0 }
  0xf9   : > { %v624_v43 = vpop.f32.mrf.mxu1  ;;  %v536_v14 = vadd.f32 %v1559_v48, %v535_v42 }
  0xfb   : > { %v1641_v22 = vadd.f32 %v624_v43, %v536_v14 }
  0xfd   : > { %v688_v35 = vadd.f32 %v687_v29, %v1641_v22 }
  0xfe   : > { %v1614_v55 = vpop.f32.mrf.mxu2 }
  0xff   : > { %v1622_v63 = vpop.f32.mrf.mxu3 }
 0x100   : > { %v537_v46 = vpop.f32.mrf.mxu0 }
 0x101   : > { %v626_v47 = vpop.f32.mrf.mxu1  ;;  %v538_v18 = vadd.f32 %v1559_v48, %v537_v46 }
 0x103   : > { %v1645_v31 = vadd.f32 %v626_v47, %v538_v18  ;;  %v568_v18 = vadd.f32 %v1559_v48, %v1599_v37  ;;  %v576_v37 = vadd.f32 %v1559_v48, %v1614_v55 }
 0x105   : > { %v689_v40 = vadd.f32 %v688_v35, %v1645_v31  ;;  %v657_v29 = vadd.f32 %v1601_v38, %v568_v18  ;;  %v665_v38 = vadd.f32 %v1622_v63, %v576_v37 }
 0x106   : > { %v577_v15 = vpop.f32.mrf.mxu2 }
 0x107   : > { %v666_v24 = vpop.f32.mrf.mxu3 }
 0x108   : > { %v540_v50 = vpop.f32.mrf.mxu0 }
 0x109   : > { %v629_v51 = vpop.f32.mrf.mxu1  ;;  %v541_v23 = vadd.f32 %v1559_v48, %v540_v50 }
 0x10b   : > { %v1649_v36 = vadd.f32 %v629_v51, %v541_v23  ;;  %v655_v23 = vadd.f32 %v1597_v34, %v566_v10  ;;  %v662_v34 = vadd.f32 %v1609_v49, %v573_v33 }
 0x10d   : > { %v690_v46 = vadd.f32 %v689_v40, %v1649_v36  ;;  %v578_v40 = vadd.f32 %v1559_v48, %v577_v15 }
 0x10e   : > { %v580_v43 = vpop.f32.mrf.mxu2 }
 0x10f   : > { %v669_v57 = vpop.f32.mrf.mxu3 }
 0x110   : > { %v542_v5 = vpop.f32.mrf.mxu0 }
 0x111   : > { %v631_v6 = vpop.f32.mrf.mxu1  ;;  %v543_v32 = vadd.f32 %v1559_v48, %v542_v5 }
 0x113   : > { %v1653_v42 = vadd.f32 %v631_v6, %v543_v32  ;;  %v563_v6 = vadd.f32 %v1559_v48, %v1591_v27  ;;  %v571_v27 = vadd.f32 %v1559_v48, %v1603_v41 }
 0x115   : > { %v691_v47 = vadd.f32 %v690_v46, %v1653_v42  ;;  %v652_v16 = vadd.f32 %v1593_v30, %v563_v6  ;;  %v660_v30 = vadd.f32 %v1605_v44, %v571_v27  ;;  %v1407_v46 = vmov 256.0  }
 0x116   : > { %v582_v2 = vpop.f32.mrf.mxu2  ;;  %1395 = vrcp.f32 %v1407_v46 }
 0x117   : > { %v671_v9 = vpop.f32.mrf.mxu3  ;;  %v583_v44 = vadd.f32 %v1559_v48, %v582_v2 }
 0x118   : > { %v545_v25 = vpop.f32.mrf.mxu0 }
 0x119   : > { %v634_v28 = vpop.f32.mrf.mxu1  ;;  %v546_v39 = vadd.f32 %v1559_v48, %v545_v25  ;;  %v672_v15 = vadd.f32 %v671_v9, %v583_v44 }
 0x11b   : > { %v1656_v50 = vadd.f32 %v634_v28, %v546_v39 }
 0x11c   : > { %v1396_v49 = vpop.eup %1395 }
 0x11d   : > { %v692_v51 = vadd.f32 %v691_v47, %v1656_v50  ;;  %v667_v47 = vadd.f32 %v666_v24, %v578_v40  ;;  %v717_v10 = vmul.f32 256.0, %v1396_v49  ;;  %vm721_vm0 = vweird.f32 %v1396_v49 }
 0x11e   : > { %v585_v28 = vpop.f32.mrf.mxu2 }
 0x11f   : > { %v674_v39 = vpop.f32.mrf.mxu3  ;;  %v718_v18 = vsub.f32 1.0, %v717_v10 }
 0x120   : > { %v547_v53 = vpop.f32.mrf.mxu0 }
 0x121   : > { %v548_v54 = vadd.f32 %v1559_v48, %v547_v53  ;;  %v636_v56 = vpop.f32.mrf.mxu1  ;;  %v581_v53 = vadd.f32 %v1559_v48, %v580_v43  ;;  %v719_v27 = vmul.f32 %v1396_v49, %v718_v18 }
 0x123   : > { %v1661_v58 = vadd.f32 %v636_v56, %v548_v54  ;;  %v670_v55 = vadd.f32 %v669_v57, %v581_v53  ;;  %v720_v33 = vadd.f32 %v1396_v49, %v719_v27 }
 0x125   : > { %v693_v62 = vadd.f32 %v692_v51, %v1661_v58  ;;  %v1692_v9 = vsel %vm721_vm0, %v1396_v49, %v720_v33 }
 0x126   : > { %v587_v56 = vpop.f32.mrf.mxu2 }
 0x127   : > { %v694_v0 = vadd.f32 %v693_v62, %v1566_v59  ;;  %v586_v62 = vadd.f32 %v1559_v48, %v585_v28  ;;  %v676_v6 = vpop.f32.mrf.mxu3 }
 0x129   : > { %v695_v5 = vadd.f32 %v694_v0, %v1572_v3  ;;  %v675_v63 = vadd.f32 %v674_v39, %v586_v62 }
 0x12b   : > { %v696_v7 = vadd.f32 %v695_v5, %v1578_v11  ;;  %v588_v5 = vadd.f32 %v1559_v48, %v587_v56 }
 0x12d   : > { %v697_v14 = vadd.f32 %v696_v7, %v1584_v19 }
 0x12f   : > { %v698_v21 = vadd.f32 %v697_v14, %v1589_v26  ;;  %v677_v14 = vadd.f32 %v676_v6, %v588_v5 }
 0x131   : > { %v699_v25 = vadd.f32 %v698_v21, %v652_v16 }
 0x133   : > { %v700_v32 = vadd.f32 %v699_v25, %v655_v23 }
 0x135   : > { %v701_v35 = vadd.f32 %v700_v32, %v657_v29 }
 0x137   : > { %v702_v41 = vadd.f32 %v701_v35, %v660_v30 }
 0x139   : > { %v703_v45 = vadd.f32 %v702_v41, %v662_v34 }
 0x13b   : > { %v704_v54 = vadd.f32 %v703_v45, %v665_v38 }
 0x13d   : > { %v705_v51 = vadd.f32 %v704_v54, %v667_v47 }
 0x13f   : > { %v706_v0 = vadd.f32 %v705_v51, %v670_v55 }
 0x141   : > { %v707_v7 = vadd.f32 %v706_v0, %v672_v15 }
 0x143   : > { %v708_v43 = vadd.f32 %v707_v7, %v675_v63 }
 0x145   : > { %v709_v24 = vadd.f32 %v708_v43, %v677_v14 }
 0x147   : > { %v710_v21 = vrot.slane %v709_v24, 4 }
 0x149   : > { %v711_v2 = vadd.f32 %v710_v21, %v709_v24 }
 0x14b   : > { %v712_v57 = vrot.slane %v711_v2, 2 }
 0x14d   : > { %v713_v25 = vadd.f32 %v712_v57, %v711_v2 }
 0x14f   : > { %v714_v28 = vrot.slane %v713_v25, 1 }
 0x151   : > { %v715_v32 = vadd.f32 %v714_v28, %v713_v25 }
 0x153   : > { %v723_v48 = vmul.f32 %v1692_v9, %v715_v32 }
 0x155   : > { %v1696_v37 = vsub.f32 %v1656_v50, %v723_v48  ;;  %v1699_v35 = vsub.f32 %v1661_v58, %v723_v48  ;;  %v1702_v39 = vsub.f32 %v1566_v59, %v723_v48  ;;  %v1705_v40 = vsub.f32 %v1572_v3, %v723_v48 }
 0x156   : > { %v1708_v41 = vsub.f32 %v1578_v11, %v723_v48  ;;  %v1711_v46 = vsub.f32 %v1584_v19, %v723_v48  ;;  %v1714_v53 = vsub.f32 %v1589_v26, %v723_v48  ;;  %v1716_v50 = vsub.f32 %v652_v16, %v723_v48 }
 0x157   : > { %v1718_v45 = vsub.f32 %v655_v23, %v723_v48  ;;  %v1720_v58 = vsub.f32 %v657_v29, %v723_v48  ;;  %v1722_v59 = vsub.f32 %v660_v30, %v723_v48  ;;  %v1724_v54 = vsub.f32 %v662_v34, %v723_v48 }
 0x158   : > { %v1726_v3 = vsub.f32 %v665_v38, %v723_v48  ;;  %v1728_v11 = vsub.f32 %v667_v47, %v723_v48  ;;  %v1730_v44 = vsub.f32 %v670_v55, %v723_v48  ;;  %v1732_v19 = vsub.f32 %v672_v15, %v723_v48 }
 0x159   : > { %v1734_v26 = vsub.f32 %v675_v63, %v723_v48  ;;  %v1736_v16 = vsub.f32 %v677_v14, %v723_v48  ;;  %v1739_v23 = vsub.f32 %v1562_v52, %v723_v48  ;;  %v1742_v29 = vsub.f32 %v1568_v60, %v723_v48 }
 0x15a   : > { %v1745_v30 = vsub.f32 %v1574_v4, %v723_v48  ;;  %v1752_v47 = vsub.f32 %v1580_v12, %v723_v48  ;;  %v1755_v56 = vsub.f32 %v1586_v20, %v723_v48  ;;  %v1760_v55 = vsub.f32 %v1619_v61, %v723_v48 }
 0x15b   : > { %v756_v34 = vmul.f32 %v1739_v23, %v1739_v23  ;;  %v757_v38 = vmul.f32 %v1742_v29, %v1742_v29  ;;  %v1765_v62 = vsub.f32 %v1625_v1, %v723_v48  ;;  %v1770_v20 = vsub.f32 %v1629_v8, %v723_v48 }
 0x15c   : > { %v758_v52 = vmul.f32 %v1745_v30, %v1745_v30  ;;  %v759_v4 = vmul.f32 %v1752_v47, %v1752_v47  ;;  %v760_v12 = vmul.f32 %v1755_v56, %v1755_v56  ;;  %v761_v0 = vmul.f32 %v1760_v55, %v1760_v55 }
 0x15d   : > { %v788_v60 = vadd.f32 %v757_v38, %v756_v34  ;;  %v1775_v61 = vsub.f32 %v1633_v13, %v723_v48  ;;  %v762_v5 = vmul.f32 %v1765_v62, %v1765_v62  ;;  %v1780_v1 = vsub.f32 %v1637_v17, %v723_v48 }
 0x15e   : > { %v763_v7 = vmul.f32 %v1770_v20, %v1770_v20  ;;  %v1785_v8 = vsub.f32 %v1641_v22, %v723_v48  ;;  %v1790_v13 = vsub.f32 %v1645_v31, %v723_v48  ;;  %v1795_v17 = vsub.f32 %v1649_v36, %v723_v48 }
 0x15f   : > { %v789_v51 = vadd.f32 %v788_v60, %v758_v52  ;;  %v764_v10 = vmul.f32 %v1775_v61, %v1775_v61  ;;  %v765_v14 = vmul.f32 %v1780_v1, %v1780_v1  ;;  %v1800_v22 = vsub.f32 %v1653_v42, %v723_v48 }
 0x160   : > { %v766_v18 = vmul.f32 %v1785_v8, %v1785_v8  ;;  %v767_v2 = vmul.f32 %v1790_v13, %v1790_v13  ;;  %v768_v31 = vmul.f32 %v1795_v17, %v1795_v17  ;;  %v770_v33 = vmul.f32 %v1696_v37, %v1696_v37 }
 0x161   : > { %v790_v49 = vadd.f32 %v789_v51, %v759_v4  ;;  %v769_v25 = vmul.f32 %v1800_v22, %v1800_v22  ;;  %v771_v42 = vmul.f32 %v1699_v35, %v1699_v35  ;;  %v772_v48 = vmul.f32 %v1702_v39, %v1702_v39 }
 0x162   : > { %v773_v38 = vmul.f32 %v1705_v40, %v1705_v40  ;;  %v774_v60 = vmul.f32 %v1708_v41, %v1708_v41  ;;  %v775_v51 = vmul.f32 %v1711_v46, %v1711_v46 }
 0x163   : > { %v791_v15 = vadd.f32 %v790_v49, %v760_v12  ;;  %v776_v49 = vmul.f32 %v1714_v53, %v1714_v53 }
 0x165   : > { %v792_v6 = vadd.f32 %v791_v15, %v761_v0  ;;  %v777_v15 = vmul.f32 %v1716_v50, %v1716_v50 }
 0x167   : > { %v793_v63 = vadd.f32 %v792_v6, %v762_v5  ;;  %v778_v6 = vmul.f32 %v1718_v45, %v1718_v45 }
 0x169   : > { %v794_v43 = vadd.f32 %v793_v63, %v763_v7  ;;  %v779_v63 = vmul.f32 %v1720_v58, %v1720_v58 }
 0x16b   : > { %v795_v24 = vadd.f32 %v794_v43, %v764_v10  ;;  %v780_v43 = vmul.f32 %v1722_v59, %v1722_v59 }
 0x16d   : > { %v796_v21 = vadd.f32 %v795_v24, %v765_v14  ;;  %v781_v24 = vmul.f32 %v1724_v54, %v1724_v54 }
 0x16f   : > { %v797_v27 = vadd.f32 %v796_v21, %v766_v18  ;;  %v782_v21 = vmul.f32 %v1726_v3, %v1726_v3 }
 0x171   : > { %v798_v57 = vadd.f32 %v797_v27, %v767_v2  ;;  %v783_v27 = vmul.f32 %v1728_v11, %v1728_v11 }
 0x173   : > { %v799_v36 = vadd.f32 %v798_v57, %v768_v31  ;;  %v784_v57 = vmul.f32 %v1730_v44, %v1730_v44 }
 0x175   : > { %v800_v28 = vadd.f32 %v799_v36, %v769_v25  ;;  %v785_v36 = vmul.f32 %v1732_v19, %v1732_v19 }
 0x177   : > { %v801_v32 = vadd.f32 %v800_v28, %v770_v33  ;;  %v786_v28 = vmul.f32 %v1734_v26, %v1734_v26 }
 0x179   : > { %v802_v34 = vadd.f32 %v801_v32, %v771_v42  ;;  %v787_v32 = vmul.f32 %v1736_v16, %v1736_v16 }
 0x17b   : > { %v803_v52 = vadd.f32 %v802_v34, %v772_v48 }
 0x17d   : > { %v804_v4 = vadd.f32 %v803_v52, %v773_v38 }
 0x17f   : > { %v805_v12 = vadd.f32 %v804_v4, %v774_v60 }
 0x181   : > { %v806_v0 = vadd.f32 %v805_v12, %v775_v51 }
 0x183   : > { %v807_v5 = vadd.f32 %v806_v0, %v776_v49 }
 0x185   : > { %v808_v7 = vadd.f32 %v807_v5, %v777_v15 }
 0x187   : > { %v809_v10 = vadd.f32 %v808_v7, %v778_v6 }
 0x189   : > { %v810_v14 = vadd.f32 %v809_v10, %v779_v63 }
 0x18b   : > { %v811_v18 = vadd.f32 %v810_v14, %v780_v43 }
 0x18d   : > { %v812_v2 = vadd.f32 %v811_v18, %v781_v24 }
 0x18f   : > { %v813_v31 = vadd.f32 %v812_v2, %v782_v21 }
 0x191   : > { %v814_v25 = vadd.f32 %v813_v31, %v783_v27 }
 0x193   : > { %v815_v33 = vadd.f32 %v814_v25, %v784_v57 }
 0x195   : > { %v816_v42 = vadd.f32 %v815_v33, %v785_v36 }
 0x197   : > { %v817_v48 = vadd.f32 %v816_v42, %v786_v28 }
 0x199   : > { %v818_v34 = vadd.f32 %v817_v48, %v787_v32 }
 0x19b   : > { %v819_v38 = vrot.slane %v818_v34, 4 }
 0x19d   : > { %v820_v52 = vadd.f32 %v819_v38, %v818_v34 }
 0x19f   : > { %v821_v60 = vrot.slane %v820_v52, 2 }
 0x1a1   : > { %v822_v4 = vadd.f32 %v821_v60, %v820_v52 }
 0x1a3   : > { %v823_v51 = vrot.slane %v822_v4, 1 }
 0x1a5   : > { %v824_v12 = vadd.f32 %v823_v51, %v822_v4 }
 0x1a7   : > { %v825_v49 = vmul.f32 %v824_v12, %v1692_v9 }
 0x1a9   : > { %v826_v0 = vadd.f32 1e-05, %v825_v49 }
 0x1ab   : > { %1397 = vrsqrt.f32 %v826_v0  ;;  %vm833_vm2 = vweird.f32 %v826_v0 }
 0x1b1   : > { %v1398_v15 = vpop.eup %1397 }
 0x1b2   : > { %v828_v5 = vmul.f32 %v1398_v15, %v826_v0  ;;  %vm834_vm1 = vweird.f32 %v1398_v15 }
 0x1b3   : > { %vm835_vm3 = vmor %vm833_vm2, %vm834_vm1 }
 0x1b4   : > { %v829_v6 = vmul.f32 %v1398_v15, %v828_v5 }
 0x1b6   : > { %v830_v7 = vmul.f32 0.5, %v829_v6 }
 0x1b8   : > { %v831_v63 = vsub.f32 1.5, %v830_v7 }
 0x1ba   : > { %v832_v10 = vmul.f32 %v1398_v15, %v831_v63 }
 0x1bc   : > { %v836_v43 = vsel %vm835_vm3, %v1398_v15, %v832_v10 }
 0x1bd   : > { %v837_v14 = vmul.f32 %v836_v43, %v1739_v23  ;;  %v838_v24 = vmul.f32 %v836_v43, %v1742_v29  ;;  %v839_v18 = vmul.f32 %v836_v43, %v1745_v30  ;;  %v840_v9 = vmul.f32 %v836_v43, %v1752_v47 }
 0x1be   : > { %v841_v21 = vmul.f32 %v836_v43, %v1755_v56  ;;  %v842_v2 = vmul.f32 %v836_v43, %v1760_v55  ;;  %v843_v27 = vmul.f32 %v836_v43, %v1765_v62  ;;  %v844_v31 = vmul.f32 %v836_v43, %v1770_v20 }
 0x1bf   : > { %v845_v57 = vmul.f32 %v836_v43, %v1775_v61  ;;  %v846_v25 = vmul.f32 %v836_v43, %v1780_v1  ;;  %v847_v23 = vmul.f32 %v836_v43, %v1785_v8  ;;  %v848_v29 = vmul.f32 %v836_v43, %v1790_v13 }
 0x1c0   : > { %v1858_v30 = vmul.f32 %v836_v43, %v1795_v17  ;;  %v1861_v47 = vmul.f32 %v836_v43, %v1800_v22  ;;  %v861_v56 = vmul.f32 %v836_v43, %v1722_v59  ;;  %v862_v55 = vmul.f32 %v836_v43, %v1724_v54 }
 0x1c1   : > { %v863_v62 = vmul.f32 %v836_v43, %v1726_v3  ;;  %v864_v20 = vmul.f32 %v836_v43, %v1728_v11  ;;  %v865_v61 = vmul.f32 %v836_v43, %v1730_v44  ;;  %v866_v1 = vmul.f32 %v836_v43, %v1732_v19 }
 0x1c2   : > { %v867_v8 = vmul.f32 %v836_v43, %v1734_v26  ;;  %v868_v13 = vmul.f32 %v836_v43, %v1736_v16  ;;  %v851_v17 = vmul.f32 %v836_v43, %v1696_v37  ;;  %v852_v22 = vmul.f32 %v836_v43, %v1699_v35 }
 0x1c3   : > { %v853_v59 = vmul.f32 %v836_v43, %v1702_v39  ;;  %v854_v54 = vmul.f32 %v836_v43, %v1705_v40  ;;  %v855_v3 = vmul.f32 %v836_v43, %v1708_v41  ;;  %v856_v11 = vmul.f32 %v836_v43, %v1711_v46 }
 0x1c4   : > { %v857_v44 = vmul.f32 %v836_v43, %v1714_v53  ;;  %v858_v19 = vmul.f32 %v836_v43, %v1716_v50  ;;  %v859_v26 = vmul.f32 %v836_v43, %v1718_v45  ;;  %v860_v16 = vmul.f32 %v836_v43, %v1720_v58 }
 0x1c5   : > { %v869_v37 = vmax.f32 %v837_v14, 0.0  ;;  %v870_v36 = vmax.f32 %v838_v24, 0.0  ;;  %v871_v33 = vmax.f32 %v839_v18, 0.0  ;;  %v872_v35 = vmax.f32 %v840_v9, 0.0 }
 0x1c6   : > { %v873_v28 = vmax.f32 %v841_v21, 0.0  ;;  %v874_v39 = vmax.f32 %v842_v2, 0.0  ;;  %v875_v40 = vmax.f32 %v843_v27, 0.0  ;;  %v876_v42 = vmax.f32 %v844_v31, 0.0 }
 0x1c7   : > { %v877_v41 = vmax.f32 %v845_v57, 0.0  ;;  %v878_v32 = vmax.f32 %v846_v25, 0.0  ;;  %v879_v46 = vmax.f32 %v847_v23, 0.0  ;;  %v880_v48 = vmax.f32 %v848_v29, 0.0 }
 0x1c8   : > { %v881_v53 = vmax.f32 %v1858_v30, 0.0  ;;  %v882_v50 = vmax.f32 %v1861_v47, 0.0  ;;  %v893_v45 = vmax.f32 %v861_v56, 0.0  ;;  %v894_v34 = vmax.f32 %v862_v55, 0.0 }
 0x1c9   : > { %v895_v58 = vmax.f32 %v863_v62, 0.0  ;;  %v896_v38 = vmax.f32 %v864_v20, 0.0  ;;  %v897_v52 = vmax.f32 %v865_v61, 0.0  ;;  %v898_v60 = vmax.f32 %v866_v1, 0.0 }
 0x1ca   : > { %v899_v4 = vmax.f32 %v867_v8, 0.0  ;;  %v900_v51 = vmax.f32 %v868_v13, 0.0  ;;  %v883_v12 = vmax.f32 %v851_v17, 0.0  ;;  %v1277_v49 = vpack.c.bf16 %v870_v36, %v869_v37 }
 0x1cb   : > { %v1282_v0 = vpack.c.bf16 %v872_v35, %v871_v33  ;;  %v1287_v15 = vpack.c.bf16 %v874_v39, %v873_v28  ;;  %v884_v5 = vmax.f32 %v852_v22, 0.0  ;;  %v885_v6 = vmax.f32 %v853_v59, 0.0 }
 0x1cc   : > { %v886_v7 = vmax.f32 %v854_v54, 0.0  ;;  %v1292_v63 = vpack.c.bf16 %v876_v42, %v875_v40  ;;  %v887_v10 = vmax.f32 %v855_v3, 0.0  ;;  %v888_v43 = vmax.f32 %v856_v11, 0.0  ;;  %1278 = vst [vmem:[%s1887_s4] sm:$0xff] %v1277_v49  }
 0x1cd   : > { %v1297_v14 = vpack.c.bf16 %v878_v32, %v877_v41  ;;  %v1302_v24 = vpack.c.bf16 %v880_v48, %v879_v46  ;;  %1354 = vst [vmem:[%s1887_s4 + $0x8] sm:$0xff] %v1282_v0   ;;  %v1337_v18 = vpack.c.bf16 %v894_v34, %v893_v45  ;;  %v1342_v9 = vpack.c.bf16 %v896_v38, %v895_v58 }
 0x1ce   : > { %v1347_v21 = vpack.c.bf16 %v898_v60, %v897_v52  ;;  %v1352_v2 = vpack.c.bf16 %v900_v51, %v899_v4  ;;  %v889_v27 = vmax.f32 %v857_v44, 0.0  ;;  %v890_v31 = vmax.f32 %v858_v19, 0.0  ;;  %1355 = vst [vmem:[%s1887_s4 + $0x10] sm:$0xff] %v1287_v15  }
 0x1cf   : > { %v1307_v57 = vpack.c.bf16 %v882_v50, %v881_v53  ;;  %v891_v25 = vmax.f32 %v859_v26, 0.0  ;;  %v892_v23 = vmax.f32 %v860_v16, 0.0  ;;  %1356 = vst [vmem:[%s1887_s4 + $0x18] sm:$0xff] %v1292_v63   ;;  %v1312_v29 = vpack.c.bf16 %v884_v5, %v883_v12 }
 0x1d0   : > { %1357 = vst [vmem:[%s1887_s4 + $0x20] sm:$0xff] %v1297_v14   ;;  %v1317_v30 = vpack.c.bf16 %v886_v7, %v885_v6  ;;  %v1322_v47 = vpack.c.bf16 %v888_v43, %v887_v10  ;;  %v1327_v56 = vpack.c.bf16 %v890_v31, %v889_v27 }
 0x1d1   : > { %1358 = vst [vmem:[%s1887_s4 + $0x28] sm:$0xff] %v1302_v24   ;;  %v1332_v55 = vpack.c.bf16 %v892_v23, %v891_v25 }
 0x1d2   : > { %1359 = vst [vmem:[%s1887_s4 + $0x30] sm:$0xff] %v1307_v57  }
 0x1d3   : > { %1360 = vst [vmem:[%s1887_s4 + $0x38] sm:$0xff] %v1312_v29  }
 0x1d4   : > { %1361 = vst [vmem:[%s1887_s4 + $0x40] sm:$0xff] %v1317_v30  }
 0x1d5   : > { %1362 = vst [vmem:[%s1887_s4 + $0x48] sm:$0xff] %v1322_v47  }
 0x1d6   : > { %1363 = vst [vmem:[%s1887_s4 + $0x50] sm:$0xff] %v1327_v56  }
 0x1d7   : > { %1364 = vst [vmem:[%s1887_s4 + $0x58] sm:$0xff] %v1332_v55  }
 0x1d8   : > { %1365 = vst [vmem:[%s1887_s4 + $0x60] sm:$0xff] %v1337_v18  }
 0x1d9   : > { %1366 = vst [vmem:[%s1887_s4 + $0x68] sm:$0xff] %v1342_v9  }
 0x1da   : > { %1367 = vst [vmem:[%s1887_s4 + $0x70] sm:$0xff] %v1347_v21  }
 0x1db   : > { %1368 = vst [vmem:[%s1887_s4 + $0x78] sm:$0xff] %v1352_v2  }
 0x1dc PF: > { %s13_s12 = sadd.s32 1, %s1405_s12  }
 0x1dd   : > { %p10_p4 = scmp.ge.s32.totalorder %s13_s12, 4  }
 0x1df   :  { %12 = sbr.rel (!%p10_p4) target bundleno = 1 (0x1), region = 62 }

// kernel: erdnet_forward.11
= control target key start
LH: loop header
LB: loop body
LE: loop exit
PB: predicated region body
PF: predicated region fallthrough
CT: control target
= control target key end

     0   :  { %s796_s12 = smov 0   ;;  %s894_s0 = inlined_call_operand.vmem [shape: bf16[128,256], index: 0, kind: input, shape index: {}]   ;;  %s895_s1 = inlined_call_operand.vmem [shape: bf16[256,128], index: 1, kind: input, shape index: {}]   ;;  %s896_s2 = inlined_call_operand.vmem [shape: f32[1,128], index: 2, kind: input, shape index: {}]   ;;  %s897_s3 = inlined_call_operand.vmem [shape: bf16[128,128], index: 3, kind: output, shape index: {}]  }
   0x1 LB: > { %s581_s13 = sadd.s32 4294967295, %s773_s12   ;;  %p585_p0 = scmp.ge.s32.totalorder %s773_s12, 1  ;;  %s773_s12 = sphi %s796_s12, %s13_s12  }
   0x2   : > { %p139_p1 = scmp.lt.s32.totalorder %s773_s12, 3 }
   0x4   : > { %p140_p2 = pnand %p585_p0, %p139_p1 }
   0x5   : > { %s586_s26 = sshll.u32 (!%p140_p2), %s581_s13, 3 }
   0x6   : > { %143 = sbr.rel (%p140_p2) target bundleno = 287 (0x11f), region = 32  ;;  %p165_p3 = scmp.lt.s32.totalorder (!%p140_p2), %s586_s26, 15 }
   0xb   : > { %v705_v0 = vld [vmem:[%s895_s1 + $0x38] sm:$0xff]  ;;  %v704_v2 = vld [vmem:[%s895_s1 + $0x30] sm:$0xff]  ;;  %v703_v4 = vld [vmem:[%s895_s1 + $0x28] sm:$0xff]  ;;  %s899_s26 = smov (!%p165_p3, %s586_s26), 15  ;;  %v775_v58 = vmov 64.0  }
   0xc   : > { %v713_v1 = vld [vmem:[%s895_s1 + $0x78] sm:$0xff]  ;;  %357 = vmatpush.bf16.msra.mxu0 %v705_v0  ;;  %737 = vmatpush.bf16.msra.mxu2 %v705_v0  ;;  %v712_v3 = vld [vmem:[%s895_s1 + $0x70] sm:$0xff]  ;;  %v711_v5 = vld [vmem:[%s895_s1 + $0x68] sm:$0xff]  ;;  %s689_s13 = sshll.u32 %s899_s26, 3  ;;  %763 = vrcp.f32 %v775_v58  ;;  %s590_s28 = sshll.u32 %s899_s26, 2 }
   0xd   : > { %386 = vmatpush.bf16.msra.mxu1 %v713_v1  ;;  %745 = vmatpush.bf16.msra.mxu3 %v713_v1  ;;  %v702_v6 = vld [vmem:[%s895_s1 + $0x20] sm:$0xff]  ;;  %v701_v8 = vld [vmem:[%s895_s1 + $0x18] sm:$0xff]  ;;  %v700_v10 = vld [vmem:[%s895_s1 + $0x10] sm:$0xff]  ;;  %s849_s18 = scalar_lea.vmem %s894_s0, %s689_s13  ;;  %s175_s26 = scalar_lea.vmem %s897_s3, %s590_s28 }
   0xe   : > { %v710_v7 = vld [vmem:[%s895_s1 + $0x60] sm:$0xff]  ;;  %v709_v9 = vld [vmem:[%s895_s1 + $0x58] sm:$0xff]  ;;  %v708_v11 = vld [vmem:[%s895_s1 + $0x50] sm:$0xff] }
   0xf   : > { %v699_v12 = vld [vmem:[%s895_s1 + $0x8] sm:$0xff]  ;;  %v698_v14 = vld [vmem:[%s895_s1] sm:$0xff]  ;;  %v601_v28 = vld [vmem:[%s849_s18 + $0x10] sm:$0xf] }
  0x10   : > { %358 = vmatpush.bf16.msra.mxu0 %v704_v2  ;;  %738 = vmatpush.bf16.msra.mxu2 %v704_v2  ;;  %v707_v13 = vld [vmem:[%s895_s1 + $0x48] sm:$0xff]  ;;  %v706_v15 = vld [vmem:[%s895_s1 + $0x40] sm:$0xff]  ;;  %v693_v29 = vld [vmem:[%s849_s18 + $0x14] sm:$0xf0] }
  0x11   : > { %387 = vmatpush.bf16.msra.mxu1 %v712_v3  ;;  %746 = vmatpush.bf16.msra.mxu3 %v712_v3  ;;  %v593_v16 = vld [vmem:[%s849_s18] sm:$0xf]  ;;  %v691_v17 = vld [vmem:[%s849_s18 + $0x4] sm:$0xf0]  ;;  %v690_v20 = vld [vmem:[%s849_s18 + $0x4] sm:$0xf]  ;;  %v602_v36 = vor.u32 %v693_v29, %v601_v28 }
  0x12   : > { %v609_v18 = vld [vmem:[%s849_s18 + $0x20] sm:$0xf]  ;;  %v695_v19 = vld [vmem:[%s849_s18 + $0x24] sm:$0xf0]  ;;  %v595_v21 = vld [vmem:[%s849_s18 + $0x8] sm:$0xf0]  ;;  %v594_v24 = vor.u32 %v691_v17, %v593_v16 }
  0x13   : > { %v694_v22 = vld [vmem:[%s849_s18 + $0x24] sm:$0xf]  ;;  %v611_v23 = vld [vmem:[%s849_s18 + $0x28] sm:$0xf0]  ;;  %v610_v25 = vor.u32 %v695_v19, %v609_v18  ;;  %v598_v26 = vor.u32 %v690_v20, %v595_v21  ;;  %v617_v30 = vld [vmem:[%s849_s18 + $0x30] sm:$0xf] }
  0x14   : > { %359 = vmatpush.bf16.msra.mxu0 %v703_v4  ;;  %739 = vmatpush.bf16.msra.mxu2 %v703_v4  ;;  %v614_v27 = vor.u32 %v694_v22, %v611_v23  ;;  %v697_v31 = vld [vmem:[%s849_s18 + $0x34] sm:$0xf0]  ;;  %v692_v32 = vld [vmem:[%s849_s18 + $0x14] sm:$0xf]  ;;  %v603_v33 = vld [vmem:[%s849_s18 + $0x18] sm:$0xf0]  ;;  %v764_v4 = vpop.eup %763 }
  0x15   : > { %388 = vmatpush.bf16.msra.mxu1 %v711_v5  ;;  %747 = vmatpush.bf16.msra.mxu3 %v711_v5  ;;  %v696_v34 = vld [vmem:[%s849_s18 + $0x34] sm:$0xf]  ;;  %v619_v35 = vld [vmem:[%s849_s18 + $0x38] sm:$0xf0]  ;;  %v618_v37 = vor.u32 %v697_v31, %v617_v30  ;;  %v606_v38 = vor.u32 %v692_v32, %v603_v33  ;;  %v762_v47 = vld [vmem:[%s896_s2] ss:$0 sm:$0xff]  ;;  %vm433_vm0 = vweird.f32 %v764_v4 }
  0x16   : > { %v622_v39 = vor.u32 %v696_v34, %v619_v35 }
  0x18   : > { %360 = vmatpush.bf16.msra.mxu0 %v702_v6  ;;  %740 = vmatpush.bf16.msra.mxu2 %v702_v6 }
  0x19   : > { %389 = vmatpush.bf16.msra.mxu1 %v710_v7  ;;  %748 = vmatpush.bf16.msra.mxu3 %v710_v7 }
  0x1c   : > { %361 = vmatpush.bf16.msra.mxu0 %v701_v8  ;;  %741 = vmatpush.bf16.msra.mxu2 %v701_v8 }
  0x1d   : > { %390 = vmatpush.bf16.msra.mxu1 %v709_v9  ;;  %749 = vmatpush.bf16.msra.mxu3 %v709_v9 }
  0x20   : > { %362 = vmatpush.bf16.msra.mxu0 %v700_v10  ;;  %742 = vmatpush.bf16.msra.mxu2 %v700_v10 }
  0x21   : > { %391 = vmatpush.bf16.msra.mxu1 %v708_v11  ;;  %750 = vmatpush.bf16.msra.mxu3 %v708_v11 }
  0x24   : > { %363 = vmatpush.bf16.msra.mxu0 %v699_v12  ;;  %743 = vmatpush.bf16.msra.mxu2 %v699_v12  ;;  %v429_v12 = vmul.f32 64.0, %v764_v4 }
  0x25   : > { %392 = vmatpush.bf16.msra.mxu1 %v707_v13  ;;  %751 = vmatpush.bf16.msra.mxu3 %v707_v13 }
  0x26   : > { %v430_v18 = vsub.f32 1.0, %v429_v12 }
  0x28   : > { %364 = vmatpush.bf16.msra.mxu0 %v698_v14  ;;  %744 = vmatpush.bf16.msra.mxu2 %v698_v14  ;;  %v431_v21 = vmul.f32 %v764_v4, %v430_v18 }
  0x29   : > { %393 = vmatpush.bf16.msra.mxu1 %v706_v15  ;;  %752 = vmatpush.bf16.msra.mxu3 %v706_v15 }
  0x2b   : > { %365 = vmatmul.bf16.vlgmr.msra.gmra.mxu0 %v594_v24  ;;  %375 = vmatmul.bf16.vlgmr.msra.gmra.mxu2 %v610_v25  ;;  %v432_v24 = vadd.f32 %v764_v4, %v431_v21 }
  0x2c   : > { %394 = vmatmul.bf16.vlgmr.msra.gmra.mxu1 %v598_v26  ;;  %404 = vmatmul.bf16.vlgmr.msra.gmra.mxu3 %v614_v27 }
  0x2d   : > { %v434_v27 = vsel %vm433_vm0, %v764_v4, %v432_v24 }
  0x3b   : > { %370 = vmatmul.bf16.gmra.mxu0 %v602_v36  ;;  %380 = vmatmul.bf16.gmra.mxu2 %v618_v37 }
  0x3c   : > { %399 = vmatmul.bf16.gmra.mxu1 %v606_v38  ;;  %409 = vmatmul.bf16.gmra.mxu3 %v622_v39 }
  0xa8   : > { %v366_v40 = vpop.f32.mrf.mxu0 }
  0xa9   : > { %v395_v41 = vpop.f32.mrf.mxu1  ;;  %v367_v52 = vadd.f32 %v762_v47, %v366_v40 }
  0xab   : > { %v396_v56 = vadd.f32 %v395_v41, %v367_v52 }
  0xae   : > { %v376_v42 = vpop.f32.mrf.mxu2 }
  0xaf   : > { %v405_v43 = vpop.f32.mrf.mxu3  ;;  %v377_v61 = vadd.f32 %v762_v47, %v376_v42 }
  0xb0   : > { %v368_v44 = vpop.f32.mrf.mxu0 }
  0xb1   : > { %v397_v45 = vpop.f32.mrf.mxu1  ;;  %v369_v50 = vadd.f32 %v762_v47, %v368_v44  ;;  %v406_v5 = vadd.f32 %v405_v43, %v377_v61 }
  0xb3   : > { %v398_v54 = vadd.f32 %v397_v45, %v369_v50 }
  0xb5   : > { %v415_v62 = vadd.f32 %v398_v54, %v396_v56 }
  0xb6   : > { %v378_v46 = vpop.f32.mrf.mxu2 }
  0xb7   : > { %v407_v48 = vpop.f32.mrf.mxu3  ;;  %v379_v1 = vadd.f32 %v762_v47, %v378_v46 }
  0xb8   : > { %v371_v49 = vpop.f32.mrf.mxu0 }
  0xb9   : > { %v400_v51 = vpop.f32.mrf.mxu1  ;;  %v372_v53 = vadd.f32 %v762_v47, %v371_v49  ;;  %v408_v9 = vadd.f32 %v407_v48, %v379_v1 }
  0xbb   : > { %v401_v57 = vadd.f32 %v400_v51, %v372_v53 }
  0xbd   : > { %v416_v2 = vadd.f32 %v415_v62, %v401_v57 }
  0xbe   : > { %v381_v55 = vpop.f32.mrf.mxu2 }
  0xbf   : > { %v410_v59 = vpop.f32.mrf.mxu3  ;;  %v382_v6 = vadd.f32 %v762_v47, %v381_v55 }
  0xc0   : > { %v373_v60 = vpop.f32.mrf.mxu0 }
  0xc1   : > { %v374_v63 = vadd.f32 %v762_v47, %v373_v60  ;;  %v402_v0 = vpop.f32.mrf.mxu1  ;;  %v411_v13 = vadd.f32 %v410_v59, %v382_v6 }
  0xc3   : > { %v403_v3 = vadd.f32 %v402_v0, %v374_v63 }
  0xc5   : > { %v417_v7 = vadd.f32 %v416_v2, %v403_v3 }
  0xc6   : > { %v383_v8 = vpop.f32.mrf.mxu2 }
  0xc7   : > { %v418_v10 = vadd.f32 %v417_v7, %v406_v5  ;;  %v384_v11 = vadd.f32 %v762_v47, %v383_v8  ;;  %v412_v15 = vpop.f32.mrf.mxu3 }
  0xc9   : > { %v419_v14 = vadd.f32 %v418_v10, %v408_v9  ;;  %v413_v16 = vadd.f32 %v412_v15, %v384_v11 }
  0xcb   : > { %v420_v17 = vadd.f32 %v419_v14, %v411_v13 }
  0xcd   : > { %v421_v19 = vadd.f32 %v420_v17, %v413_v16 }
  0xcf   : > { %v422_v20 = vrot.slane %v421_v19, 4 }
  0xd1   : > { %v423_v22 = vadd.f32 %v422_v20, %v421_v19 }
  0xd3   : > { %v424_v23 = vrot.slane %v423_v22, 2 }
  0xd5   : > { %v425_v25 = vadd.f32 %v424_v23, %v423_v22 }
  0xd7   : > { %v426_v26 = vrot.slane %v425_v25, 1 }
  0xd9   : > { %v427_v28 = vadd.f32 %v426_v26, %v425_v25 }
  0xdb   : > { %v435_v29 = vmul.f32 %v434_v27, %v427_v28 }
  0xdd   : > { %v436_v30 = vsub.f32 %v396_v56, %v435_v29  ;;  %v437_v31 = vsub.f32 %v398_v54, %v435_v29  ;;  %v438_v32 = vsub.f32 %v401_v57, %v435_v29  ;;  %v439_v33 = vsub.f32 %v403_v3, %v435_v29 }
  0xde   : > { %v440_v36 = vsub.f32 %v406_v5, %v435_v29  ;;  %v441_v39 = vsub.f32 %v408_v9, %v435_v29  ;;  %v442_v42 = vsub.f32 %v411_v13, %v435_v29  ;;  %v443_v45 = vsub.f32 %v413_v16, %v435_v29 }
  0xdf   : > { %v444_v34 = vmul.f32 %v436_v30, %v436_v30  ;;  %v445_v35 = vmul.f32 %v437_v31, %v437_v31  ;;  %v446_v37 = vmul.f32 %v438_v32, %v438_v32  ;;  %v447_v40 = vmul.f32 %v439_v33, %v439_v33 }
  0xe0   : > { %v448_v43 = vmul.f32 %v440_v36, %v440_v36  ;;  %v449_v46 = vmul.f32 %v441_v39, %v441_v39  ;;  %v450_v48 = vmul.f32 %v442_v42, %v442_v42  ;;  %v451_v50 = vmul.f32 %v443_v45, %v443_v45 }
  0xe1   : > { %v452_v38 = vadd.f32 %v445_v35, %v444_v34 }
  0xe3   : > { %v453_v41 = vadd.f32 %v452_v38, %v446_v37 }
  0xe5   : > { %v454_v44 = vadd.f32 %v453_v41, %v447_v40 }
  0xe7   : > { %v455_v47 = vadd.f32 %v454_v44, %v448_v43 }
  0xe9   : > { %v456_v49 = vadd.f32 %v455_v47, %v449_v46 }
  0xeb   : > { %v457_v51 = vadd.f32 %v456_v49, %v450_v48 }
  0xed   : > { %v458_v52 = vadd.f32 %v457_v51, %v451_v50 }
  0xef   : > { %v459_v53 = vrot.slane %v458_v52, 4 }
  0xf1   : > { %v460_v54 = vadd.f32 %v459_v53, %v458_v52 }
  0xf3   : > { %v461_v55 = vrot.slane %v460_v54, 2 }
  0xf5   : > { %v462_v56 = vadd.f32 %v461_v55, %v460_v54 }
  0xf7   : > { %v463_v57 = vrot.slane %v462_v56, 1 }
  0xf9   : > { %v464_v58 = vadd.f32 %v463_v57, %v462_v56 }
  0xfb   : > { %v465_v59 = vmul.f32 %v464_v58, %v434_v27 }
  0xfd   : > { %v466_v60 = vadd.f32 1e-05, %v465_v59 }
  0xff   : > { %765 = vrsqrt.f32 %v466_v60  ;;  %vm473_vm2 = vweird.f32 %v466_v60 }
 0x105   : > { %v766_v61 = vpop.eup %765 }
 0x106   : > { %v468_v62 = vmul.f32 %v766_v61, %v466_v60  ;;  %vm474_vm1 = vweird.f32 %v766_v61 }
 0x107   : > { %vm475_vm3 = vmor %vm473_vm2, %vm474_vm1 }
 0x108   : > { %v469_v63 = vmul.f32 %v766_v61, %v468_v62 }
 0x10a   : > { %v470_v0 = vmul.f32 0.5, %v469_v63 }
 0x10c   : > { %v471_v1 = vsub.f32 1.5, %v470_v0 }
 0x10e   : > { %v472_v2 = vmul.f32 %v766_v61, %v471_v1 }
 0x110   : > { %v476_v3 = vsel %vm475_vm3, %v766_v61, %v472_v2 }
 0x111   : > { %v477_v4 = vmul.f32 %v476_v3, %v436_v30  ;;  %v478_v5 = vmul.f32 %v476_v3, %v437_v31  ;;  %v479_v6 = vmul.f32 %v476_v3, %v438_v32  ;;  %v480_v7 = vmul.f32 %v476_v3, %v439_v33 }
 0x112   : > { %v481_v8 = vmul.f32 %v476_v3, %v440_v36  ;;  %v482_v9 = vmul.f32 %v476_v3, %v441_v39  ;;  %v483_v10 = vmul.f32 %v476_v3, %v442_v42  ;;  %v484_v11 = vmul.f32 %v476_v3, %v443_v45 }
 0x113   : > { %vm485_vm4 = vcmp.ge.f32.partialorder %v477_v4, 0.0  ;;  %vm486_vm5 = vcmp.ge.f32.partialorder %v478_v5, 0.0  ;;  %vm487_vm6 = vcmp.ge.f32.partialorder %v479_v6, 0.0  ;;  %vm488_vm7 = vcmp.ge.f32.partialorder %v480_v7, 0.0 }
 0x114   : > { %vm489_vm8 = vcmp.ge.f32.partialorder %v481_v8, 0.0  ;;  %vm490_vm9 = vcmp.ge.f32.partialorder %v482_v9, 0.0  ;;  %vm491_vm10 = vcmp.ge.f32.partialorder %v483_v10, 0.0  ;;  %vm492_vm11 = vcmp.ge.f32.partialorder %v484_v11, 0.0 }
 0x115   : > { %v493_v12 = vmul.f32 0.2, %v477_v4  ;;  %v494_v13 = vmul.f32 0.2, %v478_v5  ;;  %v495_v14 = vmul.f32 0.2, %v479_v6 }
 0x116   : > { %v496_v15 = vmul.f32 0.2, %v480_v7  ;;  %v497_v16 = vmul.f32 0.2, %v481_v8  ;;  %v498_v17 = vmul.f32 0.2, %v482_v9 }
 0x117   : > { %v499_v18 = vmul.f32 0.2, %v483_v10  ;;  %v500_v19 = vmul.f32 0.2, %v484_v11  ;;  %v501_v20 = vsel %vm485_vm4, %v477_v4, %v493_v12  ;;  %v502_v21 = vsel %vm486_vm5, %v478_v5, %v494_v13 }
 0x118   : > { %v503_v22 = vsel %vm487_vm6, %v479_v6, %v495_v14  ;;  %v504_v23 = vsel %vm488_vm7, %v480_v7, %v496_v15  ;;  %v505_v24 = vsel %vm489_vm8, %v481_v8, %v497_v16  ;;  %v506_v25 = vsel %vm490_vm9, %v482_v9, %v498_v17 }
 0x119   : > { %v507_v26 = vsel %vm491_vm10, %v483_v10, %v499_v18  ;;  %v508_v27 = vsel %vm492_vm11, %v484_v11, %v500_v19  ;;  %v717_v28 = vpack.c.bf16 %v502_v21, %v501_v20  ;;  %v722_v29 = vpack.c.bf16 %v504_v23, %v503_v22 }
 0x11a   : > { %v727_v30 = vpack.c.bf16 %v506_v25, %v505_v24  ;;  %v732_v31 = vpack.c.bf16 %v508_v27, %v507_v26 }
 0x11b   : > { %718 = vst [vmem:[%s175_s26] sm:$0xff] %v717_v28  }
 0x11c   : > { %734 = vst [vmem:[%s175_s26 + $0x8] sm:$0xff] %v722_v29  }
 0x11d   : > { %735 = vst [vmem:[%s175_s26 + $0x10] sm:$0xff] %v727_v30  }
 0x11e   : > { %736 = vst [vmem:[%s175_s26 + $0x18] sm:$0xff] %v732_v31  }
 0x11f PF: > { %s13_s12 = sadd.s32 1, %s773_s12  }
 0x120   : > { %p10_p4 = scmp.ge.s32.totalorder %s13_s12, 4  }
 0x122   :  { %12 = sbr.rel (!%p10_p4) target bundleno = 1 (0x1), region = 62 }

// kernel: mul.26
= control target key start
LH: loop header
LB: loop body
LE: loop exit
PB: predicated region body
PF: predicated region fallthrough
CT: control target
= control target key end

     0   :  { %s70_s0 = inlined_call_operand.vmem [shape: f32[2,64], index: 0, kind: input, shape index: {}]   ;;  %s71_s1 = inlined_call_operand.vmem [shape: f32[2,4,4,64], index: 1, kind: output, shape index: {}]  }
   0x1   :  { %v4_v0 = vld [vmem:[%s70_s0] ss:$0 sm:$0xff]  ;;  %v22_v1 = vld [vmem:[%s70_s0 + $0x1] ss:$0 sm:$0xff] }
   0x2   :  { %5 = vst [vmem:[%s71_s1] sm:$0xf] %v4_v0 }
   0x3   :  { %23 = vst [vmem:[%s71_s1 + $0x10] sm:$0xf] %v22_v1 }
   0x4   :  { %24 = vst [vmem:[%s71_s1 + $0x4] sm:$0xf] %v4_v0 }
   0x5   :  { %25 = vst [vmem:[%s71_s1 + $0x14] sm:$0xf] %v22_v1 }
   0x6   :  { %26 = vst [vmem:[%s71_s1 + $0x8] sm:$0xf] %v4_v0 }
   0x7   :  { %27 = vst [vmem:[%s71_s1 + $0x18] sm:$0xf] %v22_v1 }
   0x8   :  { %28 = vst [vmem:[%s71_s1 + $0xc] sm:$0xf] %v4_v0 }
   0x9   :  { %29 = vst [vmem:[%s71_s1 + $0x1c] sm:$0xf] %v22_v1 }

// kernel: erdnet_forward.12
= control target key start
LH: loop header
LB: loop body
LE: loop exit
PB: predicated region body
PF: predicated region fallthrough
CT: control target
= control target key end

     0   :  { %s864_s12 = smov 0   ;;  %s984_s0 = inlined_call_operand.vmem [shape: bf16[32,512], index: 0, kind: input, shape index: {}]   ;;  %s985_s1 = inlined_call_operand.vmem [shape: bf16[512,128], index: 1, kind: input, shape index: {}]   ;;  %s986_s2 = inlined_call_operand.vmem [shape: f32[1,128], index: 2, kind: input, shape index: {}]   ;;  %s987_s3 = inlined_call_operand.vmem [shape: bf16[32,128], index: 3, kind: output, shape index: {}]  }
   0x1 LB: > { %s623_s13 = sadd.s32 4294967295, %s841_s12   ;;  %p627_p0 = scmp.ge.s32.totalorder %s841_s12, 1  ;;  %s841_s12 = sphi %s864_s12, %s13_s12  }
   0x2   : > { %p139_p1 = scmp.lt.s32.totalorder %s841_s12, 3 }
   0x4   : > { %p140_p2 = pnand %p627_p0, %p139_p1 }
   0x5   : > { %s628_s11 = sshll.u32 (!%p140_p2), %s623_s13, 1 }
   0x6   : > { %143 = sbr.rel (%p140_p2) target bundleno = 253 (0xfd), region = 32  ;;  %p165_p3 = scmp.lt.s32.totalorder (!%p140_p2), %s628_s11, 3 }
   0xb   : > { %v791_v0 = vld [vmem:[%s985_s1 + $0x38] sm:$0xff]  ;;  %v790_v4 = vld [vmem:[%s985_s1 + $0x30] sm:$0xff]  ;;  %v789_v8 = vld [vmem:[%s985_s1 + $0x28] sm:$0xff]  ;;  %s989_s11 = smov (!%p165_p3, %s628_s11), 3  ;;  %v843_v48 = vmov 16.0  }
   0xc   : > { %v799_v1 = vld [vmem:[%s985_s1 + $0x78] sm:$0xff]  ;;  %461 = vmatpush.bf16.msra.mxu0 %v791_v0  ;;  %v798_v5 = vld [vmem:[%s985_s1 + $0x70] sm:$0xff]  ;;  %v797_v9 = vld [vmem:[%s985_s1 + $0x68] sm:$0xff]  ;;  %s779_s10 = sshll.u32 %s989_s11, 4  ;;  %831 = vrcp.f32 %v843_v48  ;;  %s632_s7 = sshll.u32 %s989_s11, 2 }
   0xd   : > { %v807_v2 = vld [vmem:[%s985_s1 + $0xb8] sm:$0xff]  ;;  %475 = vmatpush.bf16.msra.mxu1 %v799_v1  ;;  %v806_v6 = vld [vmem:[%s985_s1 + $0xb0] sm:$0xff]  ;;  %v805_v10 = vld [vmem:[%s985_s1 + $0xa8] sm:$0xff]  ;;  %s169_s20 = scalar_lea.vmem %s984_s0, %s779_s10  ;;  %s175_s10 = scalar_lea.vmem %s987_s3, %s632_s7 }
   0xe   : > { %v815_v3 = vld [vmem:[%s985_s1 + $0xf8] sm:$0xff]  ;;  %489 = vmatpush.bf16.msra.mxu2 %v807_v2  ;;  %v814_v7 = vld [vmem:[%s985_s1 + $0xf0] sm:$0xff]  ;;  %v813_v11 = vld [vmem:[%s985_s1 + $0xe8] sm:$0xff] }
   0xf   : > { %503 = vmatpush.bf16.msra.mxu3 %v815_v3  ;;  %v788_v12 = vld [vmem:[%s985_s1 + $0x20] sm:$0xff]  ;;  %v787_v16 = vld [vmem:[%s985_s1 + $0x18] sm:$0xff]  ;;  %v786_v20 = vld [vmem:[%s985_s1 + $0x10] sm:$0xff] }
  0x10   : > { %462 = vmatpush.bf16.msra.mxu0 %v790_v4  ;;  %v796_v13 = vld [vmem:[%s985_s1 + $0x60] sm:$0xff]  ;;  %v795_v17 = vld [vmem:[%s985_s1 + $0x58] sm:$0xff]  ;;  %v794_v21 = vld [vmem:[%s985_s1 + $0x50] sm:$0xff] }
  0x11   : > { %476 = vmatpush.bf16.msra.mxu1 %v798_v5  ;;  %v804_v14 = vld [vmem:[%s985_s1 + $0xa0] sm:$0xff]  ;;  %v803_v18 = vld [vmem:[%s985_s1 + $0x98] sm:$0xff]  ;;  %v802_v22 = vld [vmem:[%s985_s1 + $0x90] sm:$0xff] }
  0x12   : > { %490 = vmatpush.bf16.msra.mxu2 %v806_v6  ;;  %v812_v15 = vld [vmem:[%s985_s1 + $0xe0] sm:$0xff]  ;;  %v811_v19 = vld [vmem:[%s985_s1 + $0xd8] sm:$0xff]  ;;  %v810_v23 = vld [vmem:[%s985_s1 + $0xd0] sm:$0xff]  ;;  %v832_v54 = vpop.eup %831 }
  0x13   : > { %504 = vmatpush.bf16.msra.mxu3 %v814_v7  ;;  %v785_v24 = vld [vmem:[%s985_s1 + $0x8] sm:$0xff]  ;;  %v784_v28 = vld [vmem:[%s985_s1] sm:$0xff]  ;;  %v782_v33 = vld [vmem:[%s169_s20 + $0xc] sm:$0xf0]  ;;  %v525_v59 = vmul.f32 16.0, %v832_v54  ;;  %vm529_vm0 = vweird.f32 %v832_v54 }
  0x14   : > { %463 = vmatpush.bf16.msra.mxu0 %v789_v8  ;;  %v793_v25 = vld [vmem:[%s985_s1 + $0x48] sm:$0xff]  ;;  %v792_v29 = vld [vmem:[%s985_s1 + $0x40] sm:$0xff]  ;;  %v637_v35 = vld [vmem:[%s169_s20 + $0x10] sm:$0xf0] }
  0x15   : > { %477 = vmatpush.bf16.msra.mxu1 %v797_v9  ;;  %v801_v26 = vld [vmem:[%s985_s1 + $0x88] sm:$0xff]  ;;  %v800_v30 = vld [vmem:[%s985_s1 + $0x80] sm:$0xff]  ;;  %v783_v37 = vld [vmem:[%s169_s20 + $0x14] sm:$0xf0]  ;;  %v526_v0 = vsub.f32 1.0, %v525_v59 }
  0x16   : > { %491 = vmatpush.bf16.msra.mxu2 %v805_v10  ;;  %v809_v27 = vld [vmem:[%s985_s1 + $0xc8] sm:$0xff]  ;;  %v808_v31 = vld [vmem:[%s985_s1 + $0xc0] sm:$0xff]  ;;  %v645_v39 = vld [vmem:[%s169_s20 + $0x18] sm:$0xf0] }
  0x17   : > { %505 = vmatpush.bf16.msra.mxu3 %v813_v11  ;;  %v635_v32 = vld [vmem:[%s169_s20] sm:$0xf]  ;;  %v780_v34 = vld [vmem:[%s169_s20 + $0x4] sm:$0xf]  ;;  %v643_v36 = vld [vmem:[%s169_s20 + $0x8] sm:$0xf]  ;;  %v527_v3 = vmul.f32 %v832_v54, %v526_v0 }
  0x18   : > { %464 = vmatpush.bf16.msra.mxu0 %v788_v12  ;;  %v781_v38 = vld [vmem:[%s169_s20 + $0xc] sm:$0xf]  ;;  %v636_v40 = vor.u32 %v782_v33, %v635_v32  ;;  %v640_v41 = vor.u32 %v780_v34, %v637_v35  ;;  %v644_v42 = vor.u32 %v783_v37, %v643_v36  ;;  %v830_v45 = vld [vmem:[%s986_s2] ss:$0 sm:$0xff] }
  0x19   : > { %478 = vmatpush.bf16.msra.mxu1 %v796_v13  ;;  %v648_v43 = vor.u32 %v781_v38, %v645_v39  ;;  %v528_v6 = vadd.f32 %v832_v54, %v527_v3 }
  0x1a   : > { %492 = vmatpush.bf16.msra.mxu2 %v804_v14 }
  0x1b   : > { %506 = vmatpush.bf16.msra.mxu3 %v812_v15  ;;  %v530_v9 = vsel %vm529_vm0, %v832_v54, %v528_v6 }
  0x1c   : > { %465 = vmatpush.bf16.msra.mxu0 %v787_v16 }
  0x1d   : > { %479 = vmatpush.bf16.msra.mxu1 %v795_v17 }
  0x1e   : > { %493 = vmatpush.bf16.msra.mxu2 %v803_v18 }
  0x1f   : > { %507 = vmatpush.bf16.msra.mxu3 %v811_v19 }
  0x20   : > { %466 = vmatpush.bf16.msra.mxu0 %v786_v20 }
  0x21   : > { %480 = vmatpush.bf16.msra.mxu1 %v794_v21 }
  0x22   : > { %494 = vmatpush.bf16.msra.mxu2 %v802_v22 }
  0x23   : > { %508 = vmatpush.bf16.msra.mxu3 %v810_v23 }
  0x24   : > { %467 = vmatpush.bf16.msra.mxu0 %v785_v24 }
  0x25   : > { %481 = vmatpush.bf16.msra.mxu1 %v793_v25 }
  0x26   : > { %495 = vmatpush.bf16.msra.mxu2 %v801_v26 }
  0x27   : > { %509 = vmatpush.bf16.msra.mxu3 %v809_v27 }
  0x28   : > { %468 = vmatpush.bf16.msra.mxu0 %v784_v28 }
  0x29   : > { %482 = vmatpush.bf16.msra.mxu1 %v792_v29 }
  0x2a   : > { %496 = vmatpush.bf16.msra.mxu2 %v800_v30 }
  0x2b   : > { %510 = vmatpush.bf16.msra.mxu3 %v808_v31  ;;  %469 = vmatmul.bf16.vlgmr.msra.gmra.mxu0 %v636_v40 }
  0x2c   : > { %483 = vmatmul.bf16.vlgmr.msra.gmra.mxu1 %v640_v41 }
  0x2d   : > { %497 = vmatmul.bf16.vlgmr.msra.gmra.mxu2 %v644_v42 }
  0x2e   : > { %511 = vmatmul.bf16.vlgmr.msra.gmra.mxu3 %v648_v43 }
  0xa8   : > { %v470_v44 = vpop.f32.mrf.mxu0 }
  0xa9   : > { %v484_v46 = vpop.f32.mrf.mxu1  ;;  %v471_v47 = vadd.f32 %v830_v45, %v470_v44 }
  0xab   : > { %v485_v52 = vadd.f32 %v484_v46, %v471_v47 }
  0xb0   : > { %v498_v49 = vpop.f32.mrf.mxu2  ;;  %v472_v51 = vpop.f32.mrf.mxu0 }
  0xb1   : > { %v512_v50 = vpop.f32.mrf.mxu3  ;;  %v473_v53 = vadd.f32 %v830_v45, %v472_v51  ;;  %v486_v55 = vpop.f32.mrf.mxu1  ;;  %v499_v56 = vadd.f32 %v498_v49, %v485_v52 }
  0xb3   : > { %v487_v57 = vadd.f32 %v486_v55, %v473_v53  ;;  %v513_v62 = vadd.f32 %v512_v50, %v499_v56 }
  0xb8   : > { %v500_v58 = vpop.f32.mrf.mxu2 }
  0xb9   : > { %v501_v60 = vadd.f32 %v500_v58, %v487_v57  ;;  %v514_v61 = vpop.f32.mrf.mxu3 }
  0xbb   : > { %v515_v63 = vadd.f32 %v514_v61, %v501_v60 }
  0xbd   : > { %v517_v1 = vadd.f32 %v515_v63, %v513_v62 }
  0xbf   : > { %v518_v2 = vrot.slane %v517_v1, 4 }
  0xc1   : > { %v519_v4 = vadd.f32 %v518_v2, %v517_v1 }
  0xc3   : > { %v520_v5 = vrot.slane %v519_v4, 2 }
  0xc5   : > { %v521_v7 = vadd.f32 %v520_v5, %v519_v4 }
  0xc7   : > { %v522_v8 = vrot.slane %v521_v7, 1 }
  0xc9   : > { %v523_v10 = vadd.f32 %v522_v8, %v521_v7 }
  0xcb   : > { %v531_v11 = vmul.f32 %v530_v9, %v523_v10 }
  0xcd   : > { %v532_v12 = vsub.f32 %v513_v62, %v531_v11  ;;  %v533_v13 = vsub.f32 %v515_v63, %v531_v11 }
  0xcf   : > { %v534_v14 = vmul.f32 %v532_v12, %v532_v12  ;;  %v535_v15 = vmul.f32 %v533_v13, %v533_v13 }
  0xd1   : > { %v536_v16 = vadd.f32 %v535_v15, %v534_v14 }
  0xd3   : > { %v537_v17 = vrot.slane %v536_v16, 4 }
  0xd5   : > { %v538_v18 = vadd.f32 %v537_v17, %v536_v16 }
  0xd7   : > { %v539_v19 = vrot.slane %v538_v18, 2 }
  0xd9   : > { %v540_v20 = vadd.f32 %v539_v19, %v538_v18 }
  0xdb   : > { %v541_v21 = vrot.slane %v540_v20, 1 }
  0xdd   : > { %v542_v22 = vadd.f32 %v541_v21, %v540_v20 }
  0xdf   : > { %v543_v23 = vmul.f32 %v542_v22, %v530_v9 }
  0xe1   : > { %v544_v24 = vadd.f32 1e-05, %v543_v23 }
  0xe3   : > { %833 = vrsqrt.f32 %v544_v24  ;;  %vm551_vm2 = vweird.f32 %v544_v24 }
  0xe9   : > { %v834_v25 = vpop.eup %833 }
  0xea   : > { %v546_v26 = vmul.f32 %v834_v25, %v544_v24  ;;  %vm552_vm1 = vweird.f32 %v834_v25 }
  0xeb   : > { %vm553_vm3 = vmor %vm551_vm2, %vm552_vm1 }
  0xec   : > { %v547_v27 = vmul.f32 %v834_v25, %v546_v26 }
  0xee   : > { %v548_v28 = vmul.f32 0.5, %v547_v27 }
  0xf0   : > { %v549_v29 = vsub.f32 1.5, %v548_v28 }
  0xf2   : > { %v550_v30 = vmul.f32 %v834_v25, %v549_v29 }
  0xf4   : > { %v554_v31 = vsel %vm553_vm3, %v834_v25, %v550_v30 }
  0xf5   : > { %v555_v32 = vmul.f32 %v554_v31, %v532_v12  ;;  %v556_v33 = vmul.f32 %v554_v31, %v533_v13 }
  0xf7   : > { %vm557_vm4 = vcmp.ge.f32.partialorder %v555_v32, 0.0  ;;  %vm558_vm5 = vcmp.ge.f32.partialorder %v556_v33, 0.0  ;;  %v559_v34 = vmul.f32 0.2, %v555_v32  ;;  %v560_v35 = vmul.f32 0.2, %v556_v33 }
  0xf9   : > { %v561_v36 = vsel %vm557_vm4, %v555_v32, %v559_v34  ;;  %v562_v37 = vsel %vm558_vm5, %v556_v33, %v560_v35 }
  0xfa   : > { %v819_v38 = vpack.c.bf16 %v562_v37, %v561_v36 }
  0xfc   : > { %820 = vst [vmem:[%s175_s10] sm:$0xff] %v819_v38  }
  0xfd PF: > { %s13_s12 = sadd.s32 1, %s841_s12  }
  0xfe   : > { %p10_p4 = scmp.ge.s32.totalorder %s13_s12, 4  }
 0x100   :  { %12 = sbr.rel (!%p10_p4) target bundleno = 1 (0x1), region = 62 }

// kernel: erdnet_forward.14
= control target key start
LH: loop header
LB: loop body
LE: loop exit
PB: predicated region body
PF: predicated region fallthrough
CT: control target
= control target key end

     0   :  { %s1066_s15 = smov 0   ;;  %s1225_s0 = inlined_call_operand.vmem [shape: bf16[32,640], index: 0, kind: input, shape index: {}]   ;;  %s1226_s1 = inlined_call_operand.vmem [shape: bf16[640,128], index: 1, kind: input, shape index: {}]   ;;  %s1227_s2 = inlined_call_operand.vmem [shape: f32[1,128], index: 2, kind: input, shape index: {}]   ;;  %s1228_s3 = inlined_call_operand.vmem [shape: bf16[32,128], index: 3, kind: input, shape index: {}]   ;;  %s1229_s4 = inlined_call_operand.vmem [shape: bf16[32,128], index: 4, kind: output, shape index: {}]  }
   0x1 LB: > { %s770_s16 = sadd.s32 4294967295, %s1038_s15   ;;  %p774_p0 = scmp.ge.s32.totalorder %s1038_s15, 1  ;;  %s1038_s15 = sphi %s1066_s15, %s14_s15  }
   0x2   : > { %p175_p1 = scmp.lt.s32.totalorder %s1038_s15, 3 }
   0x4   : > { %p176_p2 = pnand %p774_p0, %p175_p1 }
   0x5   : > { %s775_s17 = sshll.u32 (!%p176_p2), %s770_s16, 1 }
   0x6   : > { %179 = sbr.rel (%p176_p2) target bundleno = 274 (0x112), region = 36  ;;  %p208_p3 = scmp.lt.s32.totalorder (!%p176_p2), %s775_s17, 3 }
   0xb   : > { %v975_v0 = vld [vmem:[%s1226_s1 + $0x38] sm:$0xff]  ;;  %v974_v4 = vld [vmem:[%s1226_s1 + $0x30] sm:$0xff]  ;;  %v973_v8 = vld [vmem:[%s1226_s1 + $0x28] sm:$0xff]  ;;  %s1231_s17 = smov (!%p208_p3, %s775_s17), 3 }
   0xc   : > { %v991_v1 = vld [vmem:[%s1226_s1 + $0xb8] sm:$0xff]  ;;  %582 = vmatpush.bf16.msra.mxu0 %v975_v0  ;;  %v990_v5 = vld [vmem:[%s1226_s1 + $0xb0] sm:$0xff]  ;;  %v989_v9 = vld [vmem:[%s1226_s1 + $0xa8] sm:$0xff]  ;;  %s1017_s11 = smul.u32 20, %s1231_s17  ;;  %v1040_v0 = vmov 16.0  }
   0xd   : > { %v999_v2 = vld [vmem:[%s1226_s1 + $0xf8] sm:$0xff]  ;;  %610 = vmatpush.bf16.msra.mxu2 %v991_v1  ;;  %v998_v6 = vld [vmem:[%s1226_s1 + $0xf0] sm:$0xff]  ;;  %v997_v10 = vld [vmem:[%s1226_s1 + $0xe8] sm:$0xff]  ;;  %1028 = vrcp.f32 %v1040_v0 }
   0xe   : > { %v983_v3 = vld [vmem:[%s1226_s1 + $0x78] sm:$0xff]  ;;  %624 = vmatpush.bf16.msra.mxu3 %v999_v2  ;;  %v982_v7 = vld [vmem:[%s1226_s1 + $0x70] sm:$0xff]  ;;  %v981_v11 = vld [vmem:[%s1226_s1 + $0x68] sm:$0xff]  ;;  %s1158_s25 = scalar_lea.vmem %s1225_s0, %s1017_s11 }
   0xf   : > { %596 = vmatpush.bf16.msra.mxu1 %v983_v3  ;;  %v972_v12 = vld [vmem:[%s1226_s1 + $0x20] sm:$0xff]  ;;  %v971_v16 = vld [vmem:[%s1226_s1 + $0x18] sm:$0xff]  ;;  %v970_v20 = vld [vmem:[%s1226_s1 + $0x10] sm:$0xff] }
  0x10   : > { %583 = vmatpush.bf16.msra.mxu0 %v974_v4  ;;  %v988_v13 = vld [vmem:[%s1226_s1 + $0xa0] sm:$0xff]  ;;  %v987_v17 = vld [vmem:[%s1226_s1 + $0x98] sm:$0xff]  ;;  %v986_v21 = vld [vmem:[%s1226_s1 + $0x90] sm:$0xff] }
  0x11   : > { %611 = vmatpush.bf16.msra.mxu2 %v990_v5  ;;  %v996_v14 = vld [vmem:[%s1226_s1 + $0xe0] sm:$0xff]  ;;  %v995_v18 = vld [vmem:[%s1226_s1 + $0xd8] sm:$0xff]  ;;  %v994_v22 = vld [vmem:[%s1226_s1 + $0xd0] sm:$0xff] }
  0x12   : > { %625 = vmatpush.bf16.msra.mxu3 %v998_v6  ;;  %v980_v15 = vld [vmem:[%s1226_s1 + $0x60] sm:$0xff]  ;;  %v979_v19 = vld [vmem:[%s1226_s1 + $0x58] sm:$0xff]  ;;  %v978_v23 = vld [vmem:[%s1226_s1 + $0x50] sm:$0xff] }
  0x13   : > { %597 = vmatpush.bf16.msra.mxu1 %v982_v7  ;;  %v969_v24 = vld [vmem:[%s1226_s1 + $0x8] sm:$0xff]  ;;  %v968_v28 = vld [vmem:[%s1226_s1] sm:$0xff]  ;;  %v1007_v29 = vld [vmem:[%s1226_s1 + $0x138] sm:$0xff]  ;;  %v1029_v5 = vpop.eup %1028 }
  0x14   : > { %584 = vmatpush.bf16.msra.mxu0 %v973_v8  ;;  %v985_v25 = vld [vmem:[%s1226_s1 + $0x88] sm:$0xff]  ;;  %v984_v30 = vld [vmem:[%s1226_s1 + $0x80] sm:$0xff]  ;;  %v966_v32 = vld [vmem:[%s1158_s25 + $0x18] sm:$0xf0]  ;;  %vm664_vm0 = vweird.f32 %v1029_v5 }
  0x15   : > { %612 = vmatpush.bf16.msra.mxu2 %v989_v9  ;;  %v993_v26 = vld [vmem:[%s1226_s1 + $0xc8] sm:$0xff]  ;;  %v783_v33 = vld [vmem:[%s1158_s25] sm:$0xf]  ;;  %v965_v34 = vld [vmem:[%s1158_s25 + $0x10] sm:$0xf0]  ;;  %v660_v9 = vmul.f32 16.0, %v1029_v5 }
  0x16   : > { %626 = vmatpush.bf16.msra.mxu3 %v997_v10  ;;  %v977_v27 = vld [vmem:[%s1226_s1 + $0x48] sm:$0xff]  ;;  %v992_v35 = vld [vmem:[%s1226_s1 + $0xc0] sm:$0xff]  ;;  %v785_v40 = vld [vmem:[%s1158_s25 + $0x14] sm:$0xf0]  ;;  %v784_v42 = vor.u32 %v965_v34, %v783_v33 }
  0x17   : > { %598 = vmatpush.bf16.msra.mxu1 %v981_v11  ;;  %v791_v31 = vld [vmem:[%s1158_s25 + $0x8] sm:$0xf]  ;;  %v964_v36 = vld [vmem:[%s1158_s25 + $0xc] sm:$0xf]  ;;  %v793_v37 = vld [vmem:[%s1158_s25 + $0x1c] sm:$0xf0] }
  0x18   : > { %585 = vmatpush.bf16.msra.mxu0 %v972_v12  ;;  %v976_v38 = vld [vmem:[%s1226_s1 + $0x40] sm:$0xff]  ;;  %v792_v41 = vor.u32 %v966_v32, %v791_v31  ;;  %v796_v43 = vor.u32 %v964_v36, %v793_v37  ;;  %v1006_v44 = vld [vmem:[%s1226_s1 + $0x130] sm:$0xff]  ;;  %v1005_v46 = vld [vmem:[%s1226_s1 + $0x128] sm:$0xff] }
  0x19   : > { %613 = vmatpush.bf16.msra.mxu2 %v988_v13  ;;  %v963_v39 = vld [vmem:[%s1158_s25 + $0x4] sm:$0xf]  ;;  %v1003_v48 = vld [vmem:[%s1226_s1 + $0x118] sm:$0xff]  ;;  %v1002_v49 = vld [vmem:[%s1226_s1 + $0x110] sm:$0xff] }
  0x1a   : > { %627 = vmatpush.bf16.msra.mxu3 %v996_v14  ;;  %v788_v45 = vor.u32 %v963_v39, %v785_v40  ;;  %v1004_v47 = vld [vmem:[%s1226_s1 + $0x120] sm:$0xff]  ;;  %v1001_v50 = vld [vmem:[%s1226_s1 + $0x108] sm:$0xff]  ;;  %v799_v52 = vld [vmem:[%s1158_s25 + $0x10] sm:$0xf] }
  0x1b   : > { %599 = vmatpush.bf16.msra.mxu1 %v980_v15  ;;  %v1000_v51 = vld [vmem:[%s1226_s1 + $0x100] sm:$0xff]  ;;  %v661_v15 = vsub.f32 1.0, %v660_v9 }
  0x1c   : > { %586 = vmatpush.bf16.msra.mxu0 %v971_v16  ;;  %v967_v53 = vld [vmem:[%s1158_s25 + $0x20] sm:$0xf0]  ;;  %v1027_v58 = vld [vmem:[%s1227_s2] ss:$0 sm:$0xff]  ;;  %s778_s25 = sshll.u32 %s1231_s17, 2 }
  0x1d   : > { %614 = vmatpush.bf16.msra.mxu2 %v987_v17  ;;  %v800_v54 = vor.u32 %v967_v53, %v799_v52  ;;  %s218_s8 = scalar_lea.vmem %s1228_s3, %s778_s25  ;;  %s224_s10 = scalar_lea.vmem %s1229_s4, %s778_s25 }
  0x1e   : > { %628 = vmatpush.bf16.msra.mxu3 %v995_v18  ;;  %v662_v18 = vmul.f32 %v1029_v5, %v661_v15 }
  0x1f   : > { %600 = vmatpush.bf16.msra.mxu1 %v979_v19 }
  0x20   : > { %587 = vmatpush.bf16.msra.mxu0 %v970_v20 }
  0x21   : > { %615 = vmatpush.bf16.msra.mxu2 %v986_v21  ;;  %v663_v21 = vadd.f32 %v1029_v5, %v662_v18 }
  0x22   : > { %629 = vmatpush.bf16.msra.mxu3 %v994_v22 }
  0x23   : > { %601 = vmatpush.bf16.msra.mxu1 %v978_v23 }
  0x24   : > { %588 = vmatpush.bf16.msra.mxu0 %v969_v24  ;;  %v665_v24 = vsel %vm664_vm0, %v1029_v5, %v663_v21 }
  0x25   : > { %616 = vmatpush.bf16.msra.mxu2 %v985_v25 }
  0x26   : > { %630 = vmatpush.bf16.msra.mxu3 %v993_v26 }
  0x27   : > { %602 = vmatpush.bf16.msra.mxu1 %v977_v27 }
  0x28   : > { %589 = vmatpush.bf16.msra.mxu0 %v968_v28 }
  0x29   : > { %617 = vmatpush.bf16.msra.mxu2 %v984_v30 }
  0x2a   : > { %631 = vmatpush.bf16.msra.mxu3 %v992_v35 }
  0x2b   : > { %603 = vmatpush.bf16.msra.mxu1 %v976_v38  ;;  %590 = vmatmul.bf16.vlgmr.msra.gmra.mxu0 %v784_v42 }
  0x2c   : > { %638 = vmatpush.bf16.msrb.mxu0 %v1007_v29  ;;  %618 = vmatmul.bf16.vlgmr.msra.gmra.mxu2 %v792_v41 }
  0x2d   : > { %632 = vmatmul.bf16.vlgmr.msra.gmra.mxu3 %v796_v43 }
  0x2e   : > { %604 = vmatmul.bf16.vlgmr.msra.gmra.mxu1 %v788_v45  ;;  %v1009_v45 = vld [vmem:[%s218_s8] sm:$0xff]  }
  0x30   : > { %639 = vmatpush.bf16.msrb.mxu0 %v1006_v44 }
  0x34   : > { %640 = vmatpush.bf16.msrb.mxu0 %v1005_v46 }
  0x38   : > { %641 = vmatpush.bf16.msrb.mxu0 %v1004_v47  ;;  %v1010_v47 = vunpack.c.l.bf16 %v1009_v45 }
  0x3c   : > { %642 = vmatpush.bf16.msrb.mxu0 %v1003_v48  ;;  %v1011_v48 = vunpack.c.h.bf16 %v1009_v45 }
  0x40   : > { %643 = vmatpush.bf16.msrb.mxu0 %v1002_v49 }
  0x44   : > { %644 = vmatpush.bf16.msrb.mxu0 %v1001_v50 }
  0x48   : > { %645 = vmatpush.bf16.msrb.mxu0 %v1000_v51 }
  0x4b   : > { %646 = vmatmul.bf16.vlgmr.msrb.gmra.mxu0 %v800_v54 }
  0xa8   : > { %v591_v55 = vpop.f32.mrf.mxu0 }
  0xa9   : > { %v592_v61 = vadd.f32 %v1027_v58, %v591_v55 }
  0xab   : > { %v605_v56 = vpop.f32.mrf.mxu1 }
  0xac   : > { %v606_v1 = vadd.f32 %v605_v56, %v592_v61 }
  0xaf   : > { %v619_v57 = vpop.f32.mrf.mxu2 }
  0xb0   : > { %v593_v59 = vpop.f32.mrf.mxu0  ;;  %v633_v60 = vpop.f32.mrf.mxu3  ;;  %v620_v6 = vadd.f32 %v619_v57, %v606_v1 }
  0xb1   : > { %v594_v62 = vadd.f32 %v1027_v58, %v593_v59 }
  0xb2   : > { %v634_v10 = vadd.f32 %v633_v60, %v620_v6 }
  0xb3   : > { %v607_v63 = vpop.f32.mrf.mxu1 }
  0xb4   : > { %v608_v2 = vadd.f32 %v607_v63, %v594_v62 }
  0xb7   : > { %v621_v3 = vpop.f32.mrf.mxu2 }
  0xb8   : > { %v622_v7 = vadd.f32 %v621_v3, %v608_v2  ;;  %v635_v8 = vpop.f32.mrf.mxu3 }
  0xba   : > { %v636_v11 = vadd.f32 %v635_v8, %v622_v7 }
  0xc8   : > { %v647_v4 = vpop.f32.mrf.mxu0 }
  0xc9   : > { %v648_v13 = vadd.f32 %v647_v4, %v634_v10 }
  0xd0   : > { %v649_v12 = vpop.f32.mrf.mxu0 }
  0xd1   : > { %v650_v14 = vadd.f32 %v649_v12, %v636_v11 }
  0xd3   : > { %v652_v16 = vadd.f32 %v650_v14, %v648_v13 }
  0xd5   : > { %v653_v17 = vrot.slane %v652_v16, 4 }
  0xd7   : > { %v654_v19 = vadd.f32 %v653_v17, %v652_v16 }
  0xd9   : > { %v655_v20 = vrot.slane %v654_v19, 2 }
  0xdb   : > { %v656_v22 = vadd.f32 %v655_v20, %v654_v19 }
  0xdd   : > { %v657_v23 = vrot.slane %v656_v22, 1 }
  0xdf   : > { %v658_v25 = vadd.f32 %v657_v23, %v656_v22 }
  0xe1   : > { %v666_v26 = vmul.f32 %v665_v24, %v658_v25 }
  0xe3   : > { %v667_v27 = vsub.f32 %v648_v13, %v666_v26  ;;  %v668_v28 = vsub.f32 %v650_v14, %v666_v26 }
  0xe5   : > { %v669_v29 = vmul.f32 %v667_v27, %v667_v27  ;;  %v670_v30 = vmul.f32 %v668_v28, %v668_v28 }
  0xe7   : > { %v671_v31 = vadd.f32 %v670_v30, %v669_v29 }
  0xe9   : > { %v672_v32 = vrot.slane %v671_v31, 4 }
  0xeb   : > { %v673_v33 = vadd.f32 %v672_v32, %v671_v31 }
  0xed   : > { %v674_v34 = vrot.slane %v673_v33, 2 }
  0xef   : > { %v675_v35 = vadd.f32 %v674_v34, %v673_v33 }
  0xf1   : > { %v676_v36 = vrot.slane %v675_v35, 1 }
  0xf3   : > { %v677_v37 = vadd.f32 %v676_v36, %v675_v35 }
  0xf5   : > { %v678_v38 = vmul.f32 %v677_v37, %v665_v24 }
  0xf7   : > { %v679_v39 = vadd.f32 1e-05, %v678_v38 }
  0xf9   : > { %1030 = vrsqrt.f32 %v679_v39  ;;  %vm686_vm2 = vweird.f32 %v679_v39 }
  0xff   : > { %v1031_v40 = vpop.eup %1030 }
 0x100   : > { %v681_v41 = vmul.f32 %v1031_v40, %v679_v39  ;;  %vm687_vm1 = vweird.f32 %v1031_v40 }
 0x101   : > { %vm688_vm3 = vmor %vm686_vm2, %vm687_vm1 }
 0x102   : > { %v682_v42 = vmul.f32 %v1031_v40, %v681_v41 }
 0x104   : > { %v683_v43 = vmul.f32 0.5, %v682_v42 }
 0x106   : > { %v684_v44 = vsub.f32 1.5, %v683_v43 }
 0x108   : > { %v685_v46 = vmul.f32 %v1031_v40, %v684_v44 }
 0x10a   : > { %v689_v49 = vsel %vm688_vm3, %v1031_v40, %v685_v46 }
 0x10b   : > { %v690_v50 = vmul.f32 %v689_v49, %v667_v27  ;;  %v691_v51 = vmul.f32 %v689_v49, %v668_v28 }
 0x10d   : > { %v696_v52 = vadd.f32 %v1010_v47, %v690_v50  ;;  %v697_v53 = vadd.f32 %v1011_v48, %v691_v51 }
 0x10f   : > { %v1015_v54 = vpack.c.bf16 %v697_v53, %v696_v52 }
 0x111   : > { %1016 = vst [vmem:[%s224_s10] sm:$0xff] %v1015_v54  }
 0x112 PF: > { %s14_s15 = sadd.s32 1, %s1038_s15  }
 0x113   : > { %p11_p4 = scmp.ge.s32.totalorder %s14_s15, 4  }
 0x115   :  { %13 = sbr.rel (!%p11_p4) target bundleno = 1 (0x1), region = 69 }

// kernel: erdnet_forward.13
= control target key start
LH: loop header
LB: loop body
LE: loop exit
PB: predicated region body
PF: predicated region fallthrough
CT: control target
= control target key end

     0   :  { %s990_s12 = smov 0   ;;  %s1146_s0 = inlined_call_operand.vmem [shape: bf16[32,640], index: 0, kind: input, shape index: {}]   ;;  %s1147_s1 = inlined_call_operand.vmem [shape: bf16[640,128], index: 1, kind: input, shape index: {}]   ;;  %s1148_s2 = inlined_call_operand.vmem [shape: f32[1,128], index: 2, kind: input, shape index: {}]   ;;  %s1149_s3 = inlined_call_operand.vmem [shape: bf16[32,128], index: 3, kind: output, shape index: {}]  }
   0x1 LB: > { %s705_s13 = sadd.s32 4294967295, %s967_s12   ;;  %p709_p0 = scmp.ge.s32.totalorder %s967_s12, 1  ;;  %s967_s12 = sphi %s990_s12, %s13_s12  }
   0x2   : > { %p139_p1 = scmp.lt.s32.totalorder %s967_s12, 3 }
   0x4   : > { %p140_p2 = pnand %p709_p0, %p139_p1 }
   0x5   : > { %s710_s11 = sshll.u32 (!%p140_p2), %s705_s13, 1 }
   0x6   : > { %143 = sbr.rel (%p140_p2) target bundleno = 274 (0x112), region = 32  ;;  %p165_p3 = scmp.lt.s32.totalorder (!%p140_p2), %s710_s11, 3 }
   0xb   : > { %v908_v0 = vld [vmem:[%s1147_s1 + $0x38] sm:$0xff]  ;;  %v907_v4 = vld [vmem:[%s1147_s1 + $0x30] sm:$0xff]  ;;  %v906_v8 = vld [vmem:[%s1147_s1 + $0x28] sm:$0xff]  ;;  %s1151_s11 = smov (!%p165_p3, %s710_s11), 3 }
   0xc   : > { %v924_v1 = vld [vmem:[%s1147_s1 + $0xb8] sm:$0xff]  ;;  %533 = vmatpush.bf16.msra.mxu0 %v908_v0  ;;  %v923_v5 = vld [vmem:[%s1147_s1 + $0xb0] sm:$0xff]  ;;  %v922_v9 = vld [vmem:[%s1147_s1 + $0xa8] sm:$0xff]  ;;  %s946_s6 = smul.u32 20, %s1151_s11  ;;  %v969_v0 = vmov 16.0  }
   0xd   : > { %v932_v2 = vld [vmem:[%s1147_s1 + $0xf8] sm:$0xff]  ;;  %561 = vmatpush.bf16.msra.mxu2 %v924_v1  ;;  %v931_v6 = vld [vmem:[%s1147_s1 + $0xf0] sm:$0xff]  ;;  %v930_v10 = vld [vmem:[%s1147_s1 + $0xe8] sm:$0xff]  ;;  %957 = vrcp.f32 %v969_v0 }
   0xe   : > { %v916_v3 = vld [vmem:[%s1147_s1 + $0x78] sm:$0xff]  ;;  %575 = vmatpush.bf16.msra.mxu3 %v932_v2  ;;  %v915_v7 = vld [vmem:[%s1147_s1 + $0x70] sm:$0xff]  ;;  %v914_v11 = vld [vmem:[%s1147_s1 + $0x68] sm:$0xff]  ;;  %s1082_s20 = scalar_lea.vmem %s1146_s0, %s946_s6 }
   0xf   : > { %547 = vmatpush.bf16.msra.mxu1 %v916_v3  ;;  %v905_v12 = vld [vmem:[%s1147_s1 + $0x20] sm:$0xff]  ;;  %v904_v16 = vld [vmem:[%s1147_s1 + $0x18] sm:$0xff]  ;;  %v903_v20 = vld [vmem:[%s1147_s1 + $0x10] sm:$0xff] }
  0x10   : > { %534 = vmatpush.bf16.msra.mxu0 %v907_v4  ;;  %v921_v13 = vld [vmem:[%s1147_s1 + $0xa0] sm:$0xff]  ;;  %v920_v17 = vld [vmem:[%s1147_s1 + $0x98] sm:$0xff]  ;;  %v919_v21 = vld [vmem:[%s1147_s1 + $0x90] sm:$0xff] }
  0x11   : > { %562 = vmatpush.bf16.msra.mxu2 %v923_v5  ;;  %v929_v14 = vld [vmem:[%s1147_s1 + $0xe0] sm:$0xff]  ;;  %v928_v18 = vld [vmem:[%s1147_s1 + $0xd8] sm:$0xff]  ;;  %v927_v22 = vld [vmem:[%s1147_s1 + $0xd0] sm:$0xff] }
  0x12   : > { %576 = vmatpush.bf16.msra.mxu3 %v931_v6  ;;  %v913_v15 = vld [vmem:[%s1147_s1 + $0x60] sm:$0xff]  ;;  %v912_v19 = vld [vmem:[%s1147_s1 + $0x58] sm:$0xff]  ;;  %v911_v23 = vld [vmem:[%s1147_s1 + $0x50] sm:$0xff] }
  0x13   : > { %548 = vmatpush.bf16.msra.mxu1 %v915_v7  ;;  %v902_v24 = vld [vmem:[%s1147_s1 + $0x8] sm:$0xff]  ;;  %v901_v28 = vld [vmem:[%s1147_s1] sm:$0xff]  ;;  %v940_v29 = vld [vmem:[%s1147_s1 + $0x138] sm:$0xff]  ;;  %v958_v5 = vpop.eup %957 }
  0x14   : > { %535 = vmatpush.bf16.msra.mxu0 %v906_v8  ;;  %v918_v25 = vld [vmem:[%s1147_s1 + $0x88] sm:$0xff]  ;;  %v917_v30 = vld [vmem:[%s1147_s1 + $0x80] sm:$0xff]  ;;  %v899_v32 = vld [vmem:[%s1082_s20 + $0x18] sm:$0xf0]  ;;  %vm615_vm0 = vweird.f32 %v958_v5 }
  0x15   : > { %563 = vmatpush.bf16.msra.mxu2 %v922_v9  ;;  %v926_v26 = vld [vmem:[%s1147_s1 + $0xc8] sm:$0xff]  ;;  %v716_v33 = vld [vmem:[%s1082_s20] sm:$0xf]  ;;  %v898_v34 = vld [vmem:[%s1082_s20 + $0x10] sm:$0xf0]  ;;  %v611_v9 = vmul.f32 16.0, %v958_v5 }
  0x16   : > { %577 = vmatpush.bf16.msra.mxu3 %v930_v10  ;;  %v910_v27 = vld [vmem:[%s1147_s1 + $0x48] sm:$0xff]  ;;  %v925_v35 = vld [vmem:[%s1147_s1 + $0xc0] sm:$0xff]  ;;  %v718_v40 = vld [vmem:[%s1082_s20 + $0x14] sm:$0xf0]  ;;  %v717_v42 = vor.u32 %v898_v34, %v716_v33 }
  0x17   : > { %549 = vmatpush.bf16.msra.mxu1 %v914_v11  ;;  %v724_v31 = vld [vmem:[%s1082_s20 + $0x8] sm:$0xf]  ;;  %v897_v36 = vld [vmem:[%s1082_s20 + $0xc] sm:$0xf]  ;;  %v726_v37 = vld [vmem:[%s1082_s20 + $0x1c] sm:$0xf0] }
  0x18   : > { %536 = vmatpush.bf16.msra.mxu0 %v905_v12  ;;  %v909_v38 = vld [vmem:[%s1147_s1 + $0x40] sm:$0xff]  ;;  %v725_v41 = vor.u32 %v899_v32, %v724_v31  ;;  %v729_v43 = vor.u32 %v897_v36, %v726_v37  ;;  %v939_v44 = vld [vmem:[%s1147_s1 + $0x130] sm:$0xff]  ;;  %v938_v46 = vld [vmem:[%s1147_s1 + $0x128] sm:$0xff] }
  0x19   : > { %564 = vmatpush.bf16.msra.mxu2 %v921_v13  ;;  %v896_v39 = vld [vmem:[%s1082_s20 + $0x4] sm:$0xf]  ;;  %v936_v48 = vld [vmem:[%s1147_s1 + $0x118] sm:$0xff]  ;;  %v935_v49 = vld [vmem:[%s1147_s1 + $0x110] sm:$0xff] }
  0x1a   : > { %578 = vmatpush.bf16.msra.mxu3 %v929_v14  ;;  %v721_v45 = vor.u32 %v896_v39, %v718_v40  ;;  %v937_v47 = vld [vmem:[%s1147_s1 + $0x120] sm:$0xff]  ;;  %v934_v50 = vld [vmem:[%s1147_s1 + $0x108] sm:$0xff]  ;;  %v732_v52 = vld [vmem:[%s1082_s20 + $0x10] sm:$0xf] }
  0x1b   : > { %550 = vmatpush.bf16.msra.mxu1 %v913_v15  ;;  %v933_v51 = vld [vmem:[%s1147_s1 + $0x100] sm:$0xff]  ;;  %v612_v15 = vsub.f32 1.0, %v611_v9 }
  0x1c   : > { %537 = vmatpush.bf16.msra.mxu0 %v904_v16  ;;  %v900_v53 = vld [vmem:[%s1082_s20 + $0x20] sm:$0xf0]  ;;  %v956_v58 = vld [vmem:[%s1148_s2] ss:$0 sm:$0xff]  ;;  %s713_s20 = sshll.u32 %s1151_s11, 2 }
  0x1d   : > { %565 = vmatpush.bf16.msra.mxu2 %v920_v17  ;;  %v733_v54 = vor.u32 %v900_v53, %v732_v52  ;;  %s175_s28 = scalar_lea.vmem %s1149_s3, %s713_s20 }
  0x1e   : > { %579 = vmatpush.bf16.msra.mxu3 %v928_v18  ;;  %v613_v18 = vmul.f32 %v958_v5, %v612_v15 }
  0x1f   : > { %551 = vmatpush.bf16.msra.mxu1 %v912_v19 }
  0x20   : > { %538 = vmatpush.bf16.msra.mxu0 %v903_v20 }
  0x21   : > { %566 = vmatpush.bf16.msra.mxu2 %v919_v21  ;;  %v614_v21 = vadd.f32 %v958_v5, %v613_v18 }
  0x22   : > { %580 = vmatpush.bf16.msra.mxu3 %v927_v22 }
  0x23   : > { %552 = vmatpush.bf16.msra.mxu1 %v911_v23 }
  0x24   : > { %539 = vmatpush.bf16.msra.mxu0 %v902_v24  ;;  %v616_v24 = vsel %vm615_vm0, %v958_v5, %v614_v21 }
  0x25   : > { %567 = vmatpush.bf16.msra.mxu2 %v918_v25 }
  0x26   : > { %581 = vmatpush.bf16.msra.mxu3 %v926_v26 }
  0x27   : > { %553 = vmatpush.bf16.msra.mxu1 %v910_v27 }
  0x28   : > { %540 = vmatpush.bf16.msra.mxu0 %v901_v28 }
  0x29   : > { %568 = vmatpush.bf16.msra.mxu2 %v917_v30 }
  0x2a   : > { %582 = vmatpush.bf16.msra.mxu3 %v925_v35 }
  0x2b   : > { %554 = vmatpush.bf16.msra.mxu1 %v909_v38  ;;  %541 = vmatmul.bf16.vlgmr.msra.gmra.mxu0 %v717_v42 }
  0x2c   : > { %589 = vmatpush.bf16.msrb.mxu0 %v940_v29  ;;  %569 = vmatmul.bf16.vlgmr.msra.gmra.mxu2 %v725_v41 }
  0x2d   : > { %583 = vmatmul.bf16.vlgmr.msra.gmra.mxu3 %v729_v43 }
  0x2e   : > { %555 = vmatmul.bf16.vlgmr.msra.gmra.mxu1 %v721_v45 }
  0x30   : > { %590 = vmatpush.bf16.msrb.mxu0 %v939_v44 }
  0x34   : > { %591 = vmatpush.bf16.msrb.mxu0 %v938_v46 }
  0x38   : > { %592 = vmatpush.bf16.msrb.mxu0 %v937_v47 }
  0x3c   : > { %593 = vmatpush.bf16.msrb.mxu0 %v936_v48 }
  0x40   : > { %594 = vmatpush.bf16.msrb.mxu0 %v935_v49 }
  0x44   : > { %595 = vmatpush.bf16.msrb.mxu0 %v934_v50 }
  0x48   : > { %596 = vmatpush.bf16.msrb.mxu0 %v933_v51 }
  0x4b   : > { %597 = vmatmul.bf16.vlgmr.msrb.gmra.mxu0 %v733_v54 }
  0xa8   : > { %v542_v55 = vpop.f32.mrf.mxu0 }
  0xa9   : > { %v543_v61 = vadd.f32 %v956_v58, %v542_v55 }
  0xab   : > { %v556_v56 = vpop.f32.mrf.mxu1 }
  0xac   : > { %v557_v1 = vadd.f32 %v556_v56, %v543_v61 }
  0xaf   : > { %v570_v57 = vpop.f32.mrf.mxu2 }
  0xb0   : > { %v544_v59 = vpop.f32.mrf.mxu0  ;;  %v584_v60 = vpop.f32.mrf.mxu3  ;;  %v571_v6 = vadd.f32 %v570_v57, %v557_v1 }
  0xb1   : > { %v545_v62 = vadd.f32 %v956_v58, %v544_v59 }
  0xb2   : > { %v585_v10 = vadd.f32 %v584_v60, %v571_v6 }
  0xb3   : > { %v558_v63 = vpop.f32.mrf.mxu1 }
  0xb4   : > { %v559_v2 = vadd.f32 %v558_v63, %v545_v62 }
  0xb7   : > { %v572_v3 = vpop.f32.mrf.mxu2 }
  0xb8   : > { %v573_v7 = vadd.f32 %v572_v3, %v559_v2  ;;  %v586_v8 = vpop.f32.mrf.mxu3 }
  0xba   : > { %v587_v11 = vadd.f32 %v586_v8, %v573_v7 }
  0xc8   : > { %v598_v4 = vpop.f32.mrf.mxu0 }
  0xc9   : > { %v599_v13 = vadd.f32 %v598_v4, %v585_v10 }
  0xd0   : > { %v600_v12 = vpop.f32.mrf.mxu0 }
  0xd1   : > { %v601_v14 = vadd.f32 %v600_v12, %v587_v11 }
  0xd3   : > { %v603_v16 = vadd.f32 %v601_v14, %v599_v13 }
  0xd5   : > { %v604_v17 = vrot.slane %v603_v16, 4 }
  0xd7   : > { %v605_v19 = vadd.f32 %v604_v17, %v603_v16 }
  0xd9   : > { %v606_v20 = vrot.slane %v605_v19, 2 }
  0xdb   : > { %v607_v22 = vadd.f32 %v606_v20, %v605_v19 }
  0xdd   : > { %v608_v23 = vrot.slane %v607_v22, 1 }
  0xdf   : > { %v609_v25 = vadd.f32 %v608_v23, %v607_v22 }
  0xe1   : > { %v617_v26 = vmul.f32 %v616_v24, %v609_v25 }
  0xe3   : > { %v618_v27 = vsub.f32 %v599_v13, %v617_v26  ;;  %v619_v28 = vsub.f32 %v601_v14, %v617_v26 }
  0xe5   : > { %v620_v29 = vmul.f32 %v618_v27, %v618_v27  ;;  %v621_v30 = vmul.f32 %v619_v28, %v619_v28 }
  0xe7   : > { %v622_v31 = vadd.f32 %v621_v30, %v620_v29 }
  0xe9   : > { %v623_v32 = vrot.slane %v622_v31, 4 }
  0xeb   : > { %v624_v33 = vadd.f32 %v623_v32, %v622_v31 }
  0xed   : > { %v625_v34 = vrot.slane %v624_v33, 2 }
  0xef   : > { %v626_v35 = vadd.f32 %v625_v34, %v624_v33 }
  0xf1   : > { %v627_v36 = vrot.slane %v626_v35, 1 }
  0xf3   : > { %v628_v37 = vadd.f32 %v627_v36, %v626_v35 }
  0xf5   : > { %v629_v38 = vmul.f32 %v628_v37, %v616_v24 }
  0xf7   : > { %v630_v39 = vadd.f32 1e-05, %v629_v38 }
  0xf9   : > { %959 = vrsqrt.f32 %v630_v39  ;;  %vm637_vm2 = vweird.f32 %v630_v39 }
  0xff   : > { %v960_v40 = vpop.eup %959 }
 0x100   : > { %v632_v41 = vmul.f32 %v960_v40, %v630_v39  ;;  %vm638_vm1 = vweird.f32 %v960_v40 }
 0x101   : > { %vm639_vm3 = vmor %vm637_vm2, %vm638_vm1 }
 0x102   : > { %v633_v42 = vmul.f32 %v960_v40, %v632_v41 }
 0x104   : > { %v634_v43 = vmul.f32 0.5, %v633_v42 }
 0x106   : > { %v635_v44 = vsub.f32 1.5, %v634_v43 }
 0x108   : > { %v636_v45 = vmul.f32 %v960_v40, %v635_v44 }
 0x10a   : > { %v640_v46 = vsel %vm639_vm3, %v960_v40, %v636_v45 }
 0x10b   : > { %v641_v47 = vmul.f32 %v640_v46, %v618_v27  ;;  %v642_v48 = vmul.f32 %v640_v46, %v619_v28 }
 0x10d   : > { %v643_v49 = vmax.f32 %v641_v47, 0.0  ;;  %v644_v50 = vmax.f32 %v642_v48, 0.0 }
 0x10f   : > { %v944_v51 = vpack.c.bf16 %v644_v50, %v643_v49 }
 0x111   : > { %945 = vst [vmem:[%s175_s28] sm:$0xff] %v944_v51  }
 0x112 PF: > { %s13_s12 = sadd.s32 1, %s967_s12  }
 0x113   : > { %p10_p4 = scmp.ge.s32.totalorder %s13_s12, 4  }
 0x115   :  { %12 = sbr.rel (!%p10_p4) target bundleno = 1 (0x1), region = 62 }

// kernel: erdnet_forward.17
= control target key start
LH: loop header
LB: loop body
LE: loop exit
PB: predicated region body
PF: predicated region fallthrough
CT: control target
= control target key end

     0   :  { %s1826_s12 = smov 0   ;;  %s2137_s0 = inlined_call_operand.vmem [shape: bf16[128,1024], index: 0, kind: input, shape index: {}]   ;;  %s2138_s1 = inlined_call_operand.vmem [shape: bf16[1024,128], index: 1, kind: input, shape index: {}]   ;;  %s2139_s2 = inlined_call_operand.vmem [shape: f32[1,128], index: 2, kind: input, shape index: {}]   ;;  %s2140_s3 = inlined_call_operand.vmem [shape: bf16[128,128], index: 3, kind: output, shape index: {}]  }
   0x1 LB: > { %s1267_s13 = sadd.s32 4294967295, %s1803_s12   ;;  %p1271_p0 = scmp.ge.s32.totalorder %s1803_s12, 1  ;;  %s1803_s12 = sphi %s1826_s12, %s13_s12  }
   0x2   : > { %p139_p1 = scmp.lt.s32.totalorder %s1803_s12, 3 }
   0x4   : > { %p140_p2 = pnand %p1271_p0, %p139_p1 }
   0x5   : > { %s1272_s11 = sshll.u32 (!%p140_p2), %s1267_s13, 3 }
   0x6   : > { %143 = sbr.rel (%p140_p2) target bundleno = 379 (0x17b), region = 32  ;;  %p165_p3 = scmp.lt.s32.totalorder (!%p140_p2), %s1272_s11, 15 }
   0xb   : > { %v1703_v0 = vld [vmem:[%s2138_s1 + $0x38] sm:$0xff]  ;;  %v1702_v4 = vld [vmem:[%s2138_s1 + $0x30] sm:$0xff]  ;;  %v1701_v8 = vld [vmem:[%s2138_s1 + $0x28] sm:$0xff]  ;;  %s2142_s11 = smov (!%p165_p3, %s1272_s11), 15 }
   0xc   : > { %v1711_v1 = vld [vmem:[%s2138_s1 + $0x78] sm:$0xff]  ;;  %885 = vmatpush.bf16.msra.mxu0 %v1703_v0  ;;  %v1710_v5 = vld [vmem:[%s2138_s1 + $0x70] sm:$0xff]  ;;  %v1709_v9 = vld [vmem:[%s2138_s1 + $0x68] sm:$0xff]  ;;  %s1663_s10 = sshll.u32 %s2142_s11, 5 }
   0xd   : > { %v1719_v2 = vld [vmem:[%s2138_s1 + $0xb8] sm:$0xff]  ;;  %914 = vmatpush.bf16.msra.mxu1 %v1711_v1  ;;  %v1718_v6 = vld [vmem:[%s2138_s1 + $0xb0] sm:$0xff]  ;;  %v1717_v10 = vld [vmem:[%s2138_s1 + $0xa8] sm:$0xff]  ;;  %s1918_s20 = scalar_lea.vmem %s2137_s0, %s1663_s10 }
   0xe   : > { %v1727_v3 = vld [vmem:[%s2138_s1 + $0xf8] sm:$0xff]  ;;  %943 = vmatpush.bf16.msra.mxu2 %v1719_v2  ;;  %v1726_v7 = vld [vmem:[%s2138_s1 + $0xf0] sm:$0xff]  ;;  %v1725_v11 = vld [vmem:[%s2138_s1 + $0xe8] sm:$0xff] }
   0xf   : > { %972 = vmatpush.bf16.msra.mxu3 %v1727_v3  ;;  %v1700_v12 = vld [vmem:[%s2138_s1 + $0x20] sm:$0xff]  ;;  %v1699_v16 = vld [vmem:[%s2138_s1 + $0x18] sm:$0xff]  ;;  %v1698_v20 = vld [vmem:[%s2138_s1 + $0x10] sm:$0xff] }
  0x10   : > { %886 = vmatpush.bf16.msra.mxu0 %v1702_v4  ;;  %v1708_v13 = vld [vmem:[%s2138_s1 + $0x60] sm:$0xff]  ;;  %v1707_v17 = vld [vmem:[%s2138_s1 + $0x58] sm:$0xff]  ;;  %v1706_v21 = vld [vmem:[%s2138_s1 + $0x50] sm:$0xff] }
  0x11   : > { %915 = vmatpush.bf16.msra.mxu1 %v1710_v5  ;;  %v1716_v14 = vld [vmem:[%s2138_s1 + $0xa0] sm:$0xff]  ;;  %v1715_v18 = vld [vmem:[%s2138_s1 + $0x98] sm:$0xff]  ;;  %v1714_v22 = vld [vmem:[%s2138_s1 + $0x90] sm:$0xff] }
  0x12   : > { %944 = vmatpush.bf16.msra.mxu2 %v1718_v6  ;;  %v1724_v15 = vld [vmem:[%s2138_s1 + $0xe0] sm:$0xff]  ;;  %v1723_v19 = vld [vmem:[%s2138_s1 + $0xd8] sm:$0xff]  ;;  %v1722_v23 = vld [vmem:[%s2138_s1 + $0xd0] sm:$0xff] }
  0x13   : > { %973 = vmatpush.bf16.msra.mxu3 %v1726_v7  ;;  %v1697_v24 = vld [vmem:[%s2138_s1 + $0x8] sm:$0xff]  ;;  %v1696_v28 = vld [vmem:[%s2138_s1] sm:$0xff]  ;;  %v1751_v40 = vld [vmem:[%s2138_s1 + $0x1b8] sm:$0xff] }
  0x14   : > { %887 = vmatpush.bf16.msra.mxu0 %v1701_v8  ;;  %v1705_v25 = vld [vmem:[%s2138_s1 + $0x48] sm:$0xff]  ;;  %v1704_v29 = vld [vmem:[%s2138_s1 + $0x40] sm:$0xff]  ;;  %v1735_v41 = vld [vmem:[%s2138_s1 + $0x138] sm:$0xff] }
  0x15   : > { %916 = vmatpush.bf16.msra.mxu1 %v1709_v9  ;;  %v1713_v26 = vld [vmem:[%s2138_s1 + $0x88] sm:$0xff]  ;;  %v1712_v30 = vld [vmem:[%s2138_s1 + $0x80] sm:$0xff]  ;;  %v1759_v46 = vld [vmem:[%s2138_s1 + $0x1f8] sm:$0xff] }
  0x16   : > { %945 = vmatpush.bf16.msra.mxu2 %v1717_v10  ;;  %v1721_v27 = vld [vmem:[%s2138_s1 + $0xc8] sm:$0xff]  ;;  %v1720_v31 = vld [vmem:[%s2138_s1 + $0xc0] sm:$0xff]  ;;  %v1743_v47 = vld [vmem:[%s2138_s1 + $0x178] sm:$0xff] }
  0x17   : > { %974 = vmatpush.bf16.msra.mxu3 %v1725_v11  ;;  %v1279_v32 = vld [vmem:[%s1918_s20] sm:$0xf]  ;;  %v1664_v34 = vld [vmem:[%s1918_s20 + $0x4] sm:$0xf]  ;;  %v1287_v36 = vld [vmem:[%s1918_s20 + $0x8] sm:$0xf] }
  0x18   : > { %888 = vmatpush.bf16.msra.mxu0 %v1700_v12  ;;  %v1668_v33 = vld [vmem:[%s1918_s20 + $0x1c] sm:$0xf0]  ;;  %v1281_v35 = vld [vmem:[%s1918_s20 + $0x20] sm:$0xf0]  ;;  %v1669_v37 = vld [vmem:[%s1918_s20 + $0x24] sm:$0xf0] }
  0x19   : > { %917 = vmatpush.bf16.msra.mxu1 %v1708_v13  ;;  %v1665_v38 = vld [vmem:[%s1918_s20 + $0xc] sm:$0xf]  ;;  %v1280_v42 = vor.u32 %v1668_v33, %v1279_v32  ;;  %v1284_v43 = vor.u32 %v1664_v34, %v1281_v35  ;;  %v1288_v44 = vor.u32 %v1669_v37, %v1287_v36  ;;  %v1750_v48 = vld [vmem:[%s2138_s1 + $0x1b0] sm:$0xff]  ;;  %v1311_v56 = vld [vmem:[%s1918_s20 + $0x40] sm:$0xf] }
  0x1a   : > { %946 = vmatpush.bf16.msra.mxu2 %v1716_v14  ;;  %v1289_v39 = vld [vmem:[%s1918_s20 + $0x28] sm:$0xf0]  ;;  %v1734_v49 = vld [vmem:[%s2138_s1 + $0x130] sm:$0xff]  ;;  %v1748_v57 = vld [vmem:[%s2138_s1 + $0x1a0] sm:$0xff] }
  0x1b   : > { %975 = vmatpush.bf16.msra.mxu3 %v1724_v15  ;;  %v1292_v45 = vor.u32 %v1665_v38, %v1289_v39  ;;  %v1758_v50 = vld [vmem:[%s2138_s1 + $0x1f0] sm:$0xff]  ;;  %v1749_v52 = vld [vmem:[%s2138_s1 + $0x1a8] sm:$0xff]  ;;  %v1732_v58 = vld [vmem:[%s2138_s1 + $0x120] sm:$0xff] }
  0x1c   : > { %889 = vmatpush.bf16.msra.mxu0 %v1699_v16  ;;  %v1742_v51 = vld [vmem:[%s2138_s1 + $0x170] sm:$0xff]  ;;  %v1733_v53 = vld [vmem:[%s2138_s1 + $0x128] sm:$0xff]  ;;  %v1676_v59 = vld [vmem:[%s1918_s20 + $0x5c] sm:$0xf0] }
  0x1d   : > { %918 = vmatpush.bf16.msra.mxu1 %v1707_v17  ;;  %v1757_v54 = vld [vmem:[%s2138_s1 + $0x1e8] sm:$0xff]  ;;  %v1672_v60 = vld [vmem:[%s1918_s20 + $0x44] sm:$0xf]  ;;  %v1747_v4 = vld [vmem:[%s2138_s1 + $0x198] sm:$0xff]  ;;  %v1312_v6 = vor.u32 %v1676_v59, %v1311_v56 }
  0x1e   : > { %947 = vmatpush.bf16.msra.mxu2 %v1715_v18  ;;  %v1741_v55 = vld [vmem:[%s2138_s1 + $0x168] sm:$0xff]  ;;  %v1313_v61 = vld [vmem:[%s1918_s20 + $0x60] sm:$0xf0]  ;;  %v1731_v5 = vld [vmem:[%s2138_s1 + $0x118] sm:$0xff] }
  0x1f   : > { %976 = vmatpush.bf16.msra.mxu3 %v1723_v19  ;;  %v1319_v62 = vld [vmem:[%s1918_s20 + $0x48] sm:$0xf]  ;;  %v1673_v0 = vld [vmem:[%s1918_s20 + $0x4c] sm:$0xf]  ;;  %v1756_v2 = vld [vmem:[%s2138_s1 + $0x1e0] sm:$0xff]  ;;  %v1316_v7 = vor.u32 %v1672_v60, %v1313_v61 }
  0x20   : > { %890 = vmatpush.bf16.msra.mxu0 %v1698_v20  ;;  %v1677_v63 = vld [vmem:[%s1918_s20 + $0x64] sm:$0xf0]  ;;  %v1321_v1 = vld [vmem:[%s1918_s20 + $0x68] sm:$0xf0]  ;;  %v1740_v3 = vld [vmem:[%s2138_s1 + $0x160] sm:$0xff] }
  0x21   : > { %919 = vmatpush.bf16.msra.mxu1 %v1706_v21  ;;  %v1320_v8 = vor.u32 %v1677_v63, %v1319_v62  ;;  %v1324_v9 = vor.u32 %v1673_v0, %v1321_v1  ;;  %v1755_v10 = vld [vmem:[%s2138_s1 + $0x1d8] sm:$0xff]  ;;  %v1746_v12 = vld [vmem:[%s2138_s1 + $0x190] sm:$0xff]  ;;  %v1745_v16 = vld [vmem:[%s2138_s1 + $0x188] sm:$0xff] }
  0x22   : > { %948 = vmatpush.bf16.msra.mxu2 %v1714_v22  ;;  %v1739_v11 = vld [vmem:[%s2138_s1 + $0x158] sm:$0xff]  ;;  %v1730_v13 = vld [vmem:[%s2138_s1 + $0x110] sm:$0xff]  ;;  %v1729_v17 = vld [vmem:[%s2138_s1 + $0x108] sm:$0xff] }
  0x23   : > { %977 = vmatpush.bf16.msra.mxu3 %v1722_v23  ;;  %v1754_v14 = vld [vmem:[%s2138_s1 + $0x1d0] sm:$0xff]  ;;  %v1753_v18 = vld [vmem:[%s2138_s1 + $0x1c8] sm:$0xff]  ;;  %v1343_v20 = vld [vmem:[%s1918_s20 + $0x80] sm:$0xf] }
  0x24   : > { %891 = vmatpush.bf16.msra.mxu0 %v1697_v24  ;;  %v1738_v15 = vld [vmem:[%s2138_s1 + $0x150] sm:$0xff]  ;;  %v1737_v19 = vld [vmem:[%s2138_s1 + $0x148] sm:$0xff]  ;;  %v1744_v21 = vld [vmem:[%s2138_s1 + $0x180] sm:$0xff] }
  0x25   : > { %920 = vmatpush.bf16.msra.mxu1 %v1705_v25  ;;  %v1728_v22 = vld [vmem:[%s2138_s1 + $0x100] sm:$0xff]  ;;  %v1327_v60 = vld [vmem:[%s1918_s20 + $0x50] sm:$0xf]  ;;  %v1674_v62 = vld [vmem:[%s1918_s20 + $0x54] sm:$0xf] }
  0x26   : > { %949 = vmatpush.bf16.msra.mxu2 %v1713_v26  ;;  %v1684_v23 = vld [vmem:[%s1918_s20 + $0x9c] sm:$0xf0]  ;;  %v1680_v24 = vld [vmem:[%s1918_s20 + $0x84] sm:$0xf]  ;;  %v1351_v26 = vld [vmem:[%s1918_s20 + $0x88] sm:$0xf] }
  0x27   : > { %978 = vmatpush.bf16.msra.mxu3 %v1721_v27  ;;  %v1345_v25 = vld [vmem:[%s1918_s20 + $0xa0] sm:$0xf0]  ;;  %v1685_v27 = vld [vmem:[%s1918_s20 + $0xa4] sm:$0xf0]  ;;  %v1344_v32 = vor.u32 %v1684_v23, %v1343_v20  ;;  %v1375_v36 = vld [vmem:[%s1918_s20 + $0xc0] sm:$0xf] }
  0x28   : > { %892 = vmatpush.bf16.msra.mxu0 %v1696_v28  ;;  %v1681_v28 = vld [vmem:[%s1918_s20 + $0x8c] sm:$0xf]  ;;  %v1348_v33 = vor.u32 %v1680_v24, %v1345_v25  ;;  %v1352_v34 = vor.u32 %v1685_v27, %v1351_v26  ;;  %v1692_v37 = vld [vmem:[%s1918_s20 + $0xdc] sm:$0xf0]  ;;  %v1688_v38 = vld [vmem:[%s1918_s20 + $0xc4] sm:$0xf] }
  0x29   : > { %921 = vmatpush.bf16.msra.mxu1 %v1704_v29  ;;  %v1353_v29 = vld [vmem:[%s1918_s20 + $0xa8] sm:$0xf0]  ;;  %v1377_v39 = vld [vmem:[%s1918_s20 + $0xe0] sm:$0xf0]  ;;  %v1678_v61 = vld [vmem:[%s1918_s20 + $0x6c] sm:$0xf0] }
  0x2a   : > { %950 = vmatpush.bf16.msra.mxu2 %v1712_v30  ;;  %v1752_v30 = vld [vmem:[%s2138_s1 + $0x1c0] sm:$0xff]  ;;  %v1356_v35 = vor.u32 %v1681_v28, %v1353_v29  ;;  %v1329_v63 = vld [vmem:[%s1918_s20 + $0x70] sm:$0xf0]  ;;  %v1335_v0 = vld [vmem:[%s1918_s20 + $0x58] sm:$0xf] }
  0x2b   : > { %979 = vmatpush.bf16.msra.mxu3 %v1720_v31  ;;  %893 = vmatmul.bf16.vlgmr.msra.gmra.mxu0 %v1280_v42  ;;  %v1736_v31 = vld [vmem:[%s2138_s1 + $0x140] sm:$0xff]  ;;  %v1689_v42 = vld [vmem:[%s1918_s20 + $0xcc] sm:$0xf]  ;;  %v1679_v1 = vld [vmem:[%s1918_s20 + $0x74] sm:$0xf0] }
  0x2c   : > { %1001 = vmatpush.bf16.msrb.mxu0 %v1735_v41  ;;  %922 = vmatmul.bf16.vlgmr.msra.gmra.mxu1 %v1284_v43  ;;  %v1693_v41 = vld [vmem:[%s1918_s20 + $0xe4] sm:$0xf0]  ;;  %v1385_v43 = vld [vmem:[%s1918_s20 + $0xe8] sm:$0xf0]  ;;  %v1391_v20 = vld [vmem:[%s1918_s20 + $0xd0] sm:$0xf] }
  0x2d   : > { %951 = vmatmul.bf16.vlgmr.msra.gmra.mxu2 %v1288_v44  ;;  %1030 = vmatpush.bf16.msrb.mxu1 %v1743_v47  ;;  %v1376_v44 = vor.u32 %v1692_v37, %v1375_v36  ;;  %v1388_v47 = vor.u32 %v1689_v42, %v1385_v43  ;;  %v1393_v23 = vld [vmem:[%s1918_s20 + $0xf0] sm:$0xf0]  ;;  %v1399_v24 = vld [vmem:[%s1918_s20 + $0xd8] sm:$0xf]  ;;  %v1691_v26 = vld [vmem:[%s1918_s20 + $0xdc] sm:$0xf] }
  0x2e   : > { %1059 = vmatpush.bf16.msrb.mxu2 %v1751_v40  ;;  %980 = vmatmul.bf16.vlgmr.msra.gmra.mxu3 %v1292_v45  ;;  %v1383_v40 = vld [vmem:[%s1918_s20 + $0xc8] sm:$0xf]  ;;  %v1380_v45 = vor.u32 %v1688_v38, %v1377_v39  ;;  %v1695_v25 = vld [vmem:[%s1918_s20 + $0xf4] sm:$0xf0]  ;;  %v1401_v27 = vld [vmem:[%s1918_s20 + $0xf8] sm:$0xf0] }
  0x2f   : > { %1088 = vmatpush.bf16.msrb.mxu3 %v1759_v46  ;;  %v1384_v46 = vor.u32 %v1693_v41, %v1383_v40 }
  0x30   : > { %1002 = vmatpush.bf16.msrb.mxu0 %v1734_v49  ;;  %v1670_v49 = vld [vmem:[%s1918_s20 + $0x2c] sm:$0xf0] }
  0x31   : > { %1031 = vmatpush.bf16.msrb.mxu1 %v1742_v51  ;;  %v1297_v51 = vld [vmem:[%s1918_s20 + $0x30] sm:$0xf0] }
  0x32   : > { %1060 = vmatpush.bf16.msrb.mxu2 %v1750_v48  ;;  %v1295_v48 = vld [vmem:[%s1918_s20 + $0x10] sm:$0xf] }
  0x33   : > { %1089 = vmatpush.bf16.msrb.mxu3 %v1758_v50  ;;  %v1666_v50 = vld [vmem:[%s1918_s20 + $0x14] sm:$0xf]  ;;  %v1296_v56 = vor.u32 %v1670_v49, %v1295_v48 }
  0x34   : > { %1003 = vmatpush.bf16.msrb.mxu0 %v1733_v53  ;;  %v1671_v53 = vld [vmem:[%s1918_s20 + $0x34] sm:$0xf0] }
  0x35   : > { %1032 = vmatpush.bf16.msrb.mxu1 %v1741_v55  ;;  %v1305_v55 = vld [vmem:[%s1918_s20 + $0x38] sm:$0xf0] }
  0x36   : > { %1061 = vmatpush.bf16.msrb.mxu2 %v1749_v52  ;;  %v1303_v52 = vld [vmem:[%s1918_s20 + $0x18] sm:$0xf] }
  0x37   : > { %1090 = vmatpush.bf16.msrb.mxu3 %v1757_v54  ;;  %v1667_v54 = vld [vmem:[%s1918_s20 + $0x1c] sm:$0xf] }
  0x38   : > { %1004 = vmatpush.bf16.msrb.mxu0 %v1732_v58  ;;  %v1304_v58 = vor.u32 %v1671_v53, %v1303_v52  ;;  %v1308_v59 = vor.u32 %v1667_v54, %v1305_v55 }
  0x39   : > { %1033 = vmatpush.bf16.msrb.mxu1 %v1740_v3  ;;  %v1337_v3 = vld [vmem:[%s1918_s20 + $0x78] sm:$0xf0] }
  0x3a   : > { %1062 = vmatpush.bf16.msrb.mxu2 %v1748_v57  ;;  %v1300_v57 = vor.u32 %v1666_v50, %v1297_v51 }
  0x3b   : > { %1091 = vmatpush.bf16.msrb.mxu3 %v1756_v2  ;;  %898 = vmatmul.bf16.gmra.mxu0 %v1312_v6  ;;  %v1675_v2 = vld [vmem:[%s1918_s20 + $0x5c] sm:$0xf]  ;;  %v1336_v6 = vor.u32 %v1679_v1, %v1335_v0 }
  0x3c   : > { %1005 = vmatpush.bf16.msrb.mxu0 %v1731_v5  ;;  %927 = vmatmul.bf16.gmra.mxu1 %v1316_v7  ;;  %v1332_v5 = vor.u32 %v1674_v62, %v1329_v63  ;;  %v1340_v7 = vor.u32 %v1675_v2, %v1337_v3 }
  0x3d   : > { %956 = vmatmul.bf16.gmra.mxu2 %v1320_v8  ;;  %1034 = vmatpush.bf16.msrb.mxu1 %v1739_v11  ;;  %v1359_v8 = vld [vmem:[%s1918_s20 + $0x90] sm:$0xf]  ;;  %v1361_v11 = vld [vmem:[%s1918_s20 + $0xb0] sm:$0xf0] }
  0x3e   : > { %1063 = vmatpush.bf16.msrb.mxu2 %v1747_v4  ;;  %985 = vmatmul.bf16.gmra.mxu3 %v1324_v9  ;;  %v1328_v4 = vor.u32 %v1678_v61, %v1327_v60  ;;  %v1686_v9 = vld [vmem:[%s1918_s20 + $0xac] sm:$0xf0] }
  0x3f   : > { %1092 = vmatpush.bf16.msrb.mxu3 %v1755_v10  ;;  %v1682_v10 = vld [vmem:[%s1918_s20 + $0x94] sm:$0xf] }
  0x40   : > { %1006 = vmatpush.bf16.msrb.mxu0 %v1730_v13  ;;  %v1687_v13 = vld [vmem:[%s1918_s20 + $0xb4] sm:$0xf0] }
  0x41   : > { %1035 = vmatpush.bf16.msrb.mxu1 %v1738_v15  ;;  %v1369_v15 = vld [vmem:[%s1918_s20 + $0xb8] sm:$0xf0] }
  0x42   : > { %1064 = vmatpush.bf16.msrb.mxu2 %v1746_v12  ;;  %v1367_v12 = vld [vmem:[%s1918_s20 + $0x98] sm:$0xf] }
  0x43   : > { %1093 = vmatpush.bf16.msrb.mxu3 %v1754_v14  ;;  %v1683_v14 = vld [vmem:[%s1918_s20 + $0x9c] sm:$0xf] }
  0x44   : > { %1007 = vmatpush.bf16.msrb.mxu0 %v1729_v17  ;;  %v1364_v17 = vor.u32 %v1682_v10, %v1361_v11 }
  0x45   : > { %1036 = vmatpush.bf16.msrb.mxu1 %v1737_v19  ;;  %v1372_v19 = vor.u32 %v1683_v14, %v1369_v15 }
  0x46   : > { %1065 = vmatpush.bf16.msrb.mxu2 %v1745_v16  ;;  %v1360_v16 = vor.u32 %v1686_v9, %v1359_v8 }
  0x47   : > { %1094 = vmatpush.bf16.msrb.mxu3 %v1753_v18  ;;  %v1368_v18 = vor.u32 %v1687_v13, %v1367_v12 }
  0x48   : > { %1008 = vmatpush.bf16.msrb.mxu0 %v1728_v22  ;;  %v1690_v22 = vld [vmem:[%s1918_s20 + $0xd4] sm:$0xf] }
  0x49   : > { %1037 = vmatpush.bf16.msrb.mxu1 %v1736_v31  ;;  %v1396_v29 = vor.u32 %v1690_v22, %v1393_v23  ;;  %v1404_v31 = vor.u32 %v1691_v26, %v1401_v27 }
  0x4a   : > { %1066 = vmatpush.bf16.msrb.mxu2 %v1744_v21  ;;  %v1694_v21 = vld [vmem:[%s1918_s20 + $0xec] sm:$0xf0]  ;;  %s1276_s20 = sshll.u32 %s2142_s11, 2 }
  0x4b   : > { %1095 = vmatpush.bf16.msrb.mxu3 %v1752_v30  ;;  %903 = vmatmul.bf16.gmra.mxu0 %v1344_v32  ;;  %v1392_v28 = vor.u32 %v1694_v21, %v1391_v20  ;;  %v1400_v30 = vor.u32 %v1695_v25, %v1399_v24  ;;  %v2101_v32 = vld [vmem:[%s2139_s2] ss:$0 sm:$0xff]  ;;  %s175_s28 = scalar_lea.vmem %s2140_s3, %s1276_s20 }
  0x4c   : > { %932 = vmatmul.bf16.gmra.mxu1 %v1348_v33 }
  0x4d   : > { %961 = vmatmul.bf16.gmra.mxu2 %v1352_v34 }
  0x4e   : > { %990 = vmatmul.bf16.gmra.mxu3 %v1356_v35 }
  0x5b   : > { %908 = vmatmul.bf16.gmra.mxu0 %v1376_v44 }
  0x5c   : > { %937 = vmatmul.bf16.gmra.mxu1 %v1380_v45 }
  0x5d   : > { %966 = vmatmul.bf16.gmra.mxu2 %v1384_v46 }
  0x5e   : > { %995 = vmatmul.bf16.gmra.mxu3 %v1388_v47 }
  0x6b   : > { %1009 = vmatmul.bf16.vlgmr.msrb.gmra.mxu0 %v1296_v56 }
  0x6c   : > { %1038 = vmatmul.bf16.vlgmr.msrb.gmra.mxu1 %v1300_v57 }
  0x6d   : > { %1067 = vmatmul.bf16.vlgmr.msrb.gmra.mxu2 %v1304_v58 }
  0x6e   : > { %1096 = vmatmul.bf16.vlgmr.msrb.gmra.mxu3 %v1308_v59 }
  0x7b   : > { %1014 = vmatmul.bf16.gmra.mxu0 %v1328_v4 }
  0x7c   : > { %1043 = vmatmul.bf16.gmra.mxu1 %v1332_v5 }
  0x7d   : > { %1072 = vmatmul.bf16.gmra.mxu2 %v1336_v6 }
  0x7e   : > { %1101 = vmatmul.bf16.gmra.mxu3 %v1340_v7 }
  0x8b   : > { %1019 = vmatmul.bf16.gmra.mxu0 %v1360_v16 }
  0x8c   : > { %1048 = vmatmul.bf16.gmra.mxu1 %v1364_v17 }
  0x8d   : > { %1077 = vmatmul.bf16.gmra.mxu2 %v1368_v18 }
  0x8e   : > { %1106 = vmatmul.bf16.gmra.mxu3 %v1372_v19 }
  0x9b   : > { %1024 = vmatmul.bf16.gmra.mxu0 %v1392_v28 }
  0x9c   : > { %1053 = vmatmul.bf16.gmra.mxu1 %v1396_v29 }
  0x9d   : > { %1082 = vmatmul.bf16.gmra.mxu2 %v1400_v30 }
  0x9e   : > { %1111 = vmatmul.bf16.gmra.mxu3 %v1404_v31 }
  0xa8   : > { %v894_v33 = vpop.f32.mrf.mxu0 }
  0xa9   : > { %v923_v34 = vpop.f32.mrf.mxu1  ;;  %v895_v35 = vadd.f32 %v2101_v32, %v894_v33 }
  0xab   : > { %v924_v36 = vadd.f32 %v923_v34, %v895_v35 }
  0xb0   : > { %v952_v37 = vpop.f32.mrf.mxu2  ;;  %v896_v40 = vpop.f32.mrf.mxu0 }
  0xb1   : > { %v981_v38 = vpop.f32.mrf.mxu3  ;;  %v953_v39 = vadd.f32 %v952_v37, %v924_v36  ;;  %v925_v41 = vpop.f32.mrf.mxu1  ;;  %v897_v42 = vadd.f32 %v2101_v32, %v896_v40 }
  0xb3   : > { %v982_v43 = vadd.f32 %v981_v38, %v953_v39  ;;  %v926_v44 = vadd.f32 %v925_v41, %v897_v42 }
  0xb8   : > { %v954_v45 = vpop.f32.mrf.mxu2  ;;  %v899_v48 = vpop.f32.mrf.mxu0 }
  0xb9   : > { %v983_v46 = vpop.f32.mrf.mxu3  ;;  %v955_v47 = vadd.f32 %v954_v45, %v926_v44  ;;  %v928_v49 = vpop.f32.mrf.mxu1  ;;  %v900_v50 = vadd.f32 %v2101_v32, %v899_v48 }
  0xbb   : > { %v984_v51 = vadd.f32 %v983_v46, %v955_v47  ;;  %v929_v52 = vadd.f32 %v928_v49, %v900_v50 }
  0xc0   : > { %v957_v53 = vpop.f32.mrf.mxu2  ;;  %v901_v56 = vpop.f32.mrf.mxu0 }
  0xc1   : > { %v986_v54 = vpop.f32.mrf.mxu3  ;;  %v958_v55 = vadd.f32 %v957_v53, %v929_v52  ;;  %v930_v57 = vpop.f32.mrf.mxu1  ;;  %v902_v58 = vadd.f32 %v2101_v32, %v901_v56 }
  0xc3   : > { %v987_v59 = vadd.f32 %v986_v54, %v958_v55  ;;  %v931_v60 = vadd.f32 %v930_v57, %v902_v58 }
  0xc8   : > { %v959_v61 = vpop.f32.mrf.mxu2  ;;  %v904_v0 = vpop.f32.mrf.mxu0 }
  0xc9   : > { %v988_v62 = vpop.f32.mrf.mxu3  ;;  %v960_v63 = vadd.f32 %v959_v61, %v931_v60  ;;  %v933_v1 = vpop.f32.mrf.mxu1  ;;  %v905_v2 = vadd.f32 %v2101_v32, %v904_v0 }
  0xcb   : > { %v989_v3 = vadd.f32 %v988_v62, %v960_v63  ;;  %v934_v4 = vadd.f32 %v933_v1, %v905_v2 }
  0xd0   : > { %v962_v5 = vpop.f32.mrf.mxu2  ;;  %v906_v8 = vpop.f32.mrf.mxu0 }
  0xd1   : > { %v991_v6 = vpop.f32.mrf.mxu3  ;;  %v963_v7 = vadd.f32 %v962_v5, %v934_v4  ;;  %v935_v9 = vpop.f32.mrf.mxu1  ;;  %v907_v10 = vadd.f32 %v2101_v32, %v906_v8 }
  0xd3   : > { %v992_v11 = vadd.f32 %v991_v6, %v963_v7  ;;  %v936_v12 = vadd.f32 %v935_v9, %v907_v10 }
  0xd8   : > { %v964_v13 = vpop.f32.mrf.mxu2  ;;  %v909_v16 = vpop.f32.mrf.mxu0 }
  0xd9   : > { %v993_v14 = vpop.f32.mrf.mxu3  ;;  %v965_v15 = vadd.f32 %v964_v13, %v936_v12  ;;  %v938_v17 = vpop.f32.mrf.mxu1  ;;  %v910_v0 = vadd.f32 %v2101_v32, %v909_v16 }
  0xdb   : > { %v994_v18 = vadd.f32 %v993_v14, %v965_v15  ;;  %v939_v7 = vadd.f32 %v938_v17, %v910_v0 }
  0xe0   : > { %v967_v19 = vpop.f32.mrf.mxu2  ;;  %v911_v21 = vpop.f32.mrf.mxu0 }
  0xe1   : > { %v996_v20 = vpop.f32.mrf.mxu3  ;;  %v940_v22 = vpop.f32.mrf.mxu1  ;;  %v968_v12 = vadd.f32 %v967_v19, %v939_v7  ;;  %v912_v13 = vadd.f32 %v2101_v32, %v911_v21 }
  0xe3   : > { %v941_v16 = vadd.f32 %v940_v22, %v912_v13 }
  0xe8   : > { %v969_v23 = vpop.f32.mrf.mxu2  ;;  %v1010_v25 = vpop.f32.mrf.mxu0 }
  0xe9   : > { %v2109_v24 = vpop.f32.mrf.mxu3  ;;  %v1039_v26 = vpop.f32.mrf.mxu1  ;;  %v1011_v29 = vadd.f32 %v1010_v25, %v982_v43 }
  0xeb   : > { %v1040_v34 = vadd.f32 %v1039_v26, %v1011_v29 }
  0xf0   : > { %v1068_v27 = vpop.f32.mrf.mxu2  ;;  %v1012_v30 = vpop.f32.mrf.mxu0 }
  0xf1   : > { %v1097_v28 = vpop.f32.mrf.mxu3  ;;  %v1041_v31 = vpop.f32.mrf.mxu1  ;;  %v1013_v33 = vadd.f32 %v1012_v30, %v984_v51  ;;  %v1069_v35 = vadd.f32 %v1068_v27, %v1040_v34  ;;  %v997_v27 = vadd.f32 %v996_v20, %v968_v12  ;;  %v970_v30 = vadd.f32 %v969_v23, %v941_v16 }
  0xf2   : > { %v1805_v34 = vmov 64.0  }
  0xf3   : > { %v1042_v36 = vadd.f32 %v1041_v31, %v1013_v33  ;;  %v2111_v42 = vadd.f32 %v1097_v28, %v1069_v35  ;;  %1793 = vrcp.f32 %v1805_v34  ;;  %v999_v19 = vadd.f32 %v2109_v24, %v970_v30 }
  0xf8   : > { %v1070_v37 = vpop.f32.mrf.mxu2  ;;  %v1015_v40 = vpop.f32.mrf.mxu0 }
  0xf9   : > { %v1099_v38 = vpop.f32.mrf.mxu3  ;;  %v1071_v39 = vadd.f32 %v1070_v37, %v1042_v36  ;;  %v1044_v41 = vpop.f32.mrf.mxu1  ;;  %v1016_v45 = vadd.f32 %v1015_v40, %v987_v59 }
  0xfa   : > { %v1794_v37 = vpop.eup %1793 }
  0xfb   : > { %v2113_v44 = vadd.f32 %v1099_v38, %v1071_v39  ;;  %v1045_v43 = vadd.f32 %v1044_v41, %v1016_v45  ;;  %v1131_v40 = vmul.f32 64.0, %v1794_v37  ;;  %vm1135_vm0 = vweird.f32 %v1794_v37 }
  0xfd   : > { %v1117_v46 = vadd.f32 %v2113_v44, %v2111_v42 }
 0x100   : > { %v1073_v47 = vpop.f32.mrf.mxu2  ;;  %v1017_v50 = vpop.f32.mrf.mxu0 }
 0x101   : > { %v1102_v48 = vpop.f32.mrf.mxu3  ;;  %v1074_v49 = vadd.f32 %v1073_v47, %v1045_v43  ;;  %v1046_v51 = vpop.f32.mrf.mxu1  ;;  %v1018_v53 = vadd.f32 %v1017_v50, %v989_v3  ;;  %v1132_v43 = vsub.f32 1.0, %v1131_v40 }
 0x103   : > { %v2117_v52 = vadd.f32 %v1102_v48, %v1074_v49  ;;  %v1047_v55 = vadd.f32 %v1046_v51, %v1018_v53  ;;  %v1133_v49 = vmul.f32 %v1794_v37, %v1132_v43 }
 0x105   : > { %v1118_v54 = vadd.f32 %v1117_v46, %v2117_v52  ;;  %v1134_v51 = vadd.f32 %v1794_v37, %v1133_v49 }
 0x108   : > { %v1075_v56 = vpop.f32.mrf.mxu2  ;;  %v1020_v60 = vpop.f32.mrf.mxu0 }
 0x109   : > { %v1104_v57 = vpop.f32.mrf.mxu3  ;;  %v1076_v58 = vadd.f32 %v1075_v56, %v1047_v55  ;;  %v1049_v59 = vpop.f32.mrf.mxu1  ;;  %v1021_v62 = vadd.f32 %v1020_v60, %v992_v11  ;;  %v1136_v55 = vsel %vm1135_vm0, %v1794_v37, %v1134_v51 }
 0x10b   : > { %v2120_v61 = vadd.f32 %v1104_v57, %v1076_v58  ;;  %v1050_v1 = vadd.f32 %v1049_v59, %v1021_v62 }
 0x10d   : > { %v1119_v63 = vadd.f32 %v1118_v54, %v2120_v61 }
 0x110   : > { %v1078_v2 = vpop.f32.mrf.mxu2  ;;  %v1022_v3 = vpop.f32.mrf.mxu0 }
 0x111   : > { %v1107_v4 = vpop.f32.mrf.mxu3  ;;  %v1079_v5 = vadd.f32 %v1078_v2, %v1050_v1  ;;  %v1051_v6 = vpop.f32.mrf.mxu1  ;;  %v1023_v9 = vadd.f32 %v1022_v3, %v994_v18 }
 0x113   : > { %v1108_v8 = vadd.f32 %v1107_v4, %v1079_v5  ;;  %v1052_v14 = vadd.f32 %v1051_v6, %v1023_v9 }
 0x115   : > { %v1120_v10 = vadd.f32 %v1119_v63, %v1108_v8 }
 0x118   : > { %v1080_v15 = vpop.f32.mrf.mxu2  ;;  %v1025_v26 = vpop.f32.mrf.mxu0 }
 0x119   : > { %v1109_v11 = vpop.f32.mrf.mxu3  ;;  %v1081_v25 = vadd.f32 %v1080_v15, %v1052_v14  ;;  %v1054_v29 = vpop.f32.mrf.mxu1  ;;  %v1026_v33 = vadd.f32 %v1025_v26, %v997_v27 }
 0x11b   : > { %v1110_v28 = vadd.f32 %v1109_v11, %v1081_v25  ;;  %v1055_v35 = vadd.f32 %v1054_v29, %v1026_v33 }
 0x11d   : > { %v1121_v31 = vadd.f32 %v1120_v10, %v1110_v28 }
 0x120   : > { %v1083_v17 = vpop.f32.mrf.mxu2  ;;  %v1027_v32 = vpop.f32.mrf.mxu0 }
 0x121   : > { %v1112_v18 = vpop.f32.mrf.mxu3  ;;  %v1084_v21 = vadd.f32 %v1083_v17, %v1055_v35  ;;  %v1028_v36 = vadd.f32 %v1027_v32, %v999_v19  ;;  %v1056_v38 = vpop.f32.mrf.mxu1 }
 0x123   : > { %v1113_v39 = vadd.f32 %v1112_v18, %v1084_v21  ;;  %v1057_v20 = vadd.f32 %v1056_v38, %v1028_v36 }
 0x125   : > { %v1122_v45 = vadd.f32 %v1121_v31, %v1113_v39 }
 0x128   : > { %v1085_v22 = vpop.f32.mrf.mxu2 }
 0x129   : > { %v1086_v41 = vadd.f32 %v1085_v22, %v1057_v20  ;;  %v1114_v23 = vpop.f32.mrf.mxu3 }
 0x12b   : > { %v1115_v46 = vadd.f32 %v1114_v23, %v1086_v41 }
 0x12d   : > { %v1123_v47 = vadd.f32 %v1122_v45, %v1115_v46 }
 0x12f   : > { %v1124_v48 = vrot.slane %v1123_v47, 4 }
 0x131   : > { %v1125_v50 = vadd.f32 %v1124_v48, %v1123_v47 }
 0x133   : > { %v1126_v24 = vrot.slane %v1125_v50, 2 }
 0x135   : > { %v1127_v53 = vadd.f32 %v1126_v24, %v1125_v50 }
 0x137   : > { %v1128_v54 = vrot.slane %v1127_v53, 1 }
 0x139   : > { %v1129_v56 = vadd.f32 %v1128_v54, %v1127_v53 }
 0x13b   : > { %v1137_v57 = vmul.f32 %v1136_v55, %v1129_v56 }
 0x13d   : > { %v1138_v58 = vsub.f32 %v2111_v42, %v1137_v57  ;;  %v1139_v60 = vsub.f32 %v2113_v44, %v1137_v57  ;;  %v1140_v59 = vsub.f32 %v2117_v52, %v1137_v57  ;;  %v1141_v62 = vsub.f32 %v2120_v61, %v1137_v57 }
 0x13e   : > { %v1142_v63 = vsub.f32 %v1108_v8, %v1137_v57  ;;  %v1143_v0 = vsub.f32 %v1110_v28, %v1137_v57  ;;  %v1144_v7 = vsub.f32 %v1113_v39, %v1137_v57  ;;  %v1145_v12 = vsub.f32 %v1115_v46, %v1137_v57 }
 0x13f   : > { %v1146_v1 = vmul.f32 %v1138_v58, %v1138_v58  ;;  %v1147_v2 = vmul.f32 %v1139_v60, %v1139_v60  ;;  %v1148_v4 = vmul.f32 %v1140_v59, %v1140_v59  ;;  %v1149_v3 = vmul.f32 %v1141_v62, %v1141_v62 }
 0x140   : > { %v1150_v9 = vmul.f32 %v1142_v63, %v1142_v63  ;;  %v1151_v13 = vmul.f32 %v1143_v0, %v1143_v0  ;;  %v1152_v14 = vmul.f32 %v1144_v7, %v1144_v7  ;;  %v1153_v15 = vmul.f32 %v1145_v12, %v1145_v12 }
 0x141   : > { %v1154_v5 = vadd.f32 %v1147_v2, %v1146_v1 }
 0x143   : > { %v1155_v6 = vadd.f32 %v1154_v5, %v1148_v4 }
 0x145   : > { %v1156_v10 = vadd.f32 %v1155_v6, %v1149_v3 }
 0x147   : > { %v1157_v42 = vadd.f32 %v1156_v10, %v1150_v9 }
 0x149   : > { %v1158_v44 = vadd.f32 %v1157_v42, %v1151_v13 }
 0x14b   : > { %v1159_v52 = vadd.f32 %v1158_v44, %v1152_v14 }
 0x14d   : > { %v1160_v11 = vadd.f32 %v1159_v52, %v1153_v15 }
 0x14f   : > { %v1161_v61 = vrot.slane %v1160_v11, 4 }
 0x151   : > { %v1162_v8 = vadd.f32 %v1161_v61, %v1160_v11 }
 0x153   : > { %v1163_v25 = vrot.slane %v1162_v8, 2 }
 0x155   : > { %v1164_v26 = vadd.f32 %v1163_v25, %v1162_v8 }
 0x157   : > { %v1165_v27 = vrot.slane %v1164_v26, 1 }
 0x159   : > { %v1166_v16 = vadd.f32 %v1165_v27, %v1164_v26 }
 0x15b   : > { %v1167_v28 = vmul.f32 %v1166_v16, %v1136_v55 }
 0x15d   : > { %v1168_v29 = vadd.f32 1e-05, %v1167_v28 }
 0x15f   : > { %1795 = vrsqrt.f32 %v1168_v29  ;;  %vm1175_vm2 = vweird.f32 %v1168_v29 }
 0x165   : > { %v1796_v30 = vpop.eup %1795 }
 0x166   : > { %v1170_v31 = vmul.f32 %v1796_v30, %v1168_v29  ;;  %vm1176_vm1 = vweird.f32 %v1796_v30 }
 0x167   : > { %vm1177_vm3 = vmor %vm1175_vm2, %vm1176_vm1 }
 0x168   : > { %v1171_v33 = vmul.f32 %v1796_v30, %v1170_v31 }
 0x16a   : > { %v1172_v34 = vmul.f32 0.5, %v1171_v33 }
 0x16c   : > { %v1173_v17 = vsub.f32 1.5, %v1172_v34 }
 0x16e   : > { %v1174_v18 = vmul.f32 %v1796_v30, %v1173_v17 }
 0x170   : > { %v1178_v19 = vsel %vm1177_vm3, %v1796_v30, %v1174_v18 }
 0x171   : > { %v1179_v35 = vmul.f32 %v1178_v19, %v1138_v58  ;;  %v1180_v32 = vmul.f32 %v1178_v19, %v1139_v60  ;;  %v1181_v21 = vmul.f32 %v1178_v19, %v1140_v59  ;;  %v1182_v36 = vmul.f32 %v1178_v19, %v1141_v62 }
 0x172   : > { %v1183_v37 = vmul.f32 %v1178_v19, %v1142_v63  ;;  %v1184_v38 = vmul.f32 %v1178_v19, %v1143_v0  ;;  %v1185_v39 = vmul.f32 %v1178_v19, %v1144_v7  ;;  %v1186_v20 = vmul.f32 %v1178_v19, %v1145_v12 }
 0x173   : > { %v1187_v22 = vmax.f32 %v1179_v35, 0.0  ;;  %v1188_v40 = vmax.f32 %v1180_v32, 0.0  ;;  %v1189_v41 = vmax.f32 %v1181_v21, 0.0  ;;  %v1190_v23 = vmax.f32 %v1182_v36, 0.0 }
 0x174   : > { %v1191_v45 = vmax.f32 %v1183_v37, 0.0  ;;  %v1192_v46 = vmax.f32 %v1184_v38, 0.0  ;;  %v1193_v43 = vmax.f32 %v1185_v39, 0.0  ;;  %v1194_v47 = vmax.f32 %v1186_v20, 0.0 }
 0x175   : > { %v1763_v48 = vpack.c.bf16 %v1188_v40, %v1187_v22  ;;  %v1768_v49 = vpack.c.bf16 %v1190_v23, %v1189_v41 }
 0x176   : > { %v1773_v50 = vpack.c.bf16 %v1192_v46, %v1191_v45  ;;  %v1778_v24 = vpack.c.bf16 %v1194_v47, %v1193_v43 }
 0x177   : > { %1764 = vst [vmem:[%s175_s28] sm:$0xff] %v1763_v48  }
 0x178   : > { %1780 = vst [vmem:[%s175_s28 + $0x8] sm:$0xff] %v1768_v49  }
 0x179   : > { %1781 = vst [vmem:[%s175_s28 + $0x10] sm:$0xff] %v1773_v50  }
 0x17a   : > { %1782 = vst [vmem:[%s175_s28 + $0x18] sm:$0xff] %v1778_v24  }
 0x17b PF: > { %s13_s12 = sadd.s32 1, %s1803_s12  }
 0x17c   : > { %p10_p4 = scmp.ge.s32.totalorder %s13_s12, 4  }
 0x17e   :  { %12 = sbr.rel (!%p10_p4) target bundleno = 1 (0x1), region = 62 }

// kernel: erdnet_forward.18
= control target key start
LH: loop header
LB: loop body
LE: loop exit
PB: predicated region body
PF: predicated region fallthrough
CT: control target
= control target key end

     0   :  { %s2150_s12 = smov 0   ;;  %s2766_s0 = inlined_call_operand.vmem [shape: bf16[512,512], index: 0, kind: input, shape index: {}]   ;;  %s2767_s1 = inlined_call_operand.vmem [shape: bf16[512,128], index: 1, kind: input, shape index: {}]   ;;  %s2768_s2 = inlined_call_operand.vmem [shape: f32[1,128], index: 2, kind: input, shape index: {}]   ;;  %s2769_s3 = inlined_call_operand.vmem [shape: bf16[512,128], index: 3, kind: output, shape index: {}]  }
   0x1 LB: > { %s1519_s13 = sadd.s32 4294967295, %s2127_s12   ;;  %p1523_p0 = scmp.ge.s32.totalorder %s2127_s12, 1  ;;  %s2127_s12 = sphi %s2150_s12, %s13_s12  }
   0x2   : > { %p139_p1 = scmp.lt.s32.totalorder %s2127_s12, 3 }
   0x4   : > { %p140_p2 = pnand %p1523_p0, %p139_p1 }
   0x6   : > { %143 = sbr.rel (%p140_p2) target bundleno = 576 (0x240), region = 32 }
   0xb   : > { %v1987_v0 = vld [vmem:[%s2767_s1 + $0x38] sm:$0xff]  ;;  %v1986_v4 = vld [vmem:[%s2767_s1 + $0x30] sm:$0xff]  ;;  %v1985_v8 = vld [vmem:[%s2767_s1 + $0x28] sm:$0xff]  ;;  %s1524_s11 = sshll.u32 %s1519_s13, 5 }
   0xc   : > { %v1995_v1 = vld [vmem:[%s2767_s1 + $0x78] sm:$0xff]  ;;  %821 = vmatpush.bf16.msra.mxu0 %v1987_v0  ;;  %v1994_v5 = vld [vmem:[%s2767_s1 + $0x70] sm:$0xff]  ;;  %v1993_v9 = vld [vmem:[%s2767_s1 + $0x68] sm:$0xff]  ;;  %p165_p3 = scmp.lt.s32.totalorder %s1524_s11, 63 }
   0xd   : > { %v2003_v2 = vld [vmem:[%s2767_s1 + $0xb8] sm:$0xff]  ;;  %910 = vmatpush.bf16.msra.mxu1 %v1995_v1  ;;  %v2002_v6 = vld [vmem:[%s2767_s1 + $0xb0] sm:$0xff]  ;;  %v2001_v10 = vld [vmem:[%s2767_s1 + $0xa8] sm:$0xff] }
   0xe   : > { %v2011_v3 = vld [vmem:[%s2767_s1 + $0xf8] sm:$0xff]  ;;  %999 = vmatpush.bf16.msra.mxu2 %v2003_v2  ;;  %v2010_v7 = vld [vmem:[%s2767_s1 + $0xf0] sm:$0xff]  ;;  %v2009_v11 = vld [vmem:[%s2767_s1 + $0xe8] sm:$0xff]  ;;  %s2783_s11 = smov (!%p165_p3, %s1524_s11), 63 }
   0xf   : > { %1088 = vmatpush.bf16.msra.mxu3 %v2011_v3  ;;  %v1984_v12 = vld [vmem:[%s2767_s1 + $0x20] sm:$0xff]  ;;  %v1983_v16 = vld [vmem:[%s2767_s1 + $0x18] sm:$0xff]  ;;  %v1982_v20 = vld [vmem:[%s2767_s1 + $0x10] sm:$0xff]  ;;  %s1915_s10 = sshll.u32 %s2783_s11, 4  ;;  %s1528_s7 = sshll.u32 %s2783_s11, 2 }
  0x10   : > { %822 = vmatpush.bf16.msra.mxu0 %v1986_v4  ;;  %v1992_v13 = vld [vmem:[%s2767_s1 + $0x60] sm:$0xff]  ;;  %v1991_v17 = vld [vmem:[%s2767_s1 + $0x58] sm:$0xff]  ;;  %v1990_v21 = vld [vmem:[%s2767_s1 + $0x50] sm:$0xff]  ;;  %s2242_s20 = scalar_lea.vmem %s2766_s0, %s1915_s10  ;;  %s2744_s10 = scalar_lea.vmem %s2769_s3, %s1528_s7 }
  0x11   : > { %911 = vmatpush.bf16.msra.mxu1 %v1994_v5  ;;  %v2000_v14 = vld [vmem:[%s2767_s1 + $0xa0] sm:$0xff]  ;;  %v1999_v18 = vld [vmem:[%s2767_s1 + $0x98] sm:$0xff]  ;;  %v1998_v22 = vld [vmem:[%s2767_s1 + $0x90] sm:$0xff] }
  0x12   : > { %1000 = vmatpush.bf16.msra.mxu2 %v2002_v6  ;;  %v2008_v15 = vld [vmem:[%s2767_s1 + $0xe0] sm:$0xff]  ;;  %v2007_v19 = vld [vmem:[%s2767_s1 + $0xd8] sm:$0xff]  ;;  %v2006_v23 = vld [vmem:[%s2767_s1 + $0xd0] sm:$0xff] }
  0x13   : > { %1089 = vmatpush.bf16.msra.mxu3 %v2010_v7  ;;  %v1981_v24 = vld [vmem:[%s2767_s1 + $0x8] sm:$0xff]  ;;  %v1980_v28 = vld [vmem:[%s2767_s1] sm:$0xff]  ;;  %v1918_v33 = vld [vmem:[%s2242_s20 + $0xc] sm:$0xf0] }
  0x14   : > { %823 = vmatpush.bf16.msra.mxu0 %v1985_v8  ;;  %v1989_v25 = vld [vmem:[%s2767_s1 + $0x48] sm:$0xff]  ;;  %v1988_v29 = vld [vmem:[%s2767_s1 + $0x40] sm:$0xff]  ;;  %v1533_v35 = vld [vmem:[%s2242_s20 + $0x10] sm:$0xf0] }
  0x15   : > { %912 = vmatpush.bf16.msra.mxu1 %v1993_v9  ;;  %v1997_v26 = vld [vmem:[%s2767_s1 + $0x88] sm:$0xff]  ;;  %v1996_v30 = vld [vmem:[%s2767_s1 + $0x80] sm:$0xff]  ;;  %v1919_v37 = vld [vmem:[%s2242_s20 + $0x14] sm:$0xf0] }
  0x16   : > { %1001 = vmatpush.bf16.msra.mxu2 %v2001_v10  ;;  %v2005_v27 = vld [vmem:[%s2767_s1 + $0xc8] sm:$0xff]  ;;  %v2004_v31 = vld [vmem:[%s2767_s1 + $0xc0] sm:$0xff]  ;;  %v1541_v39 = vld [vmem:[%s2242_s20 + $0x18] sm:$0xf0] }
  0x17   : > { %1090 = vmatpush.bf16.msra.mxu3 %v2009_v11  ;;  %v1531_v32 = vld [vmem:[%s2242_s20] sm:$0xf]  ;;  %v1916_v34 = vld [vmem:[%s2242_s20 + $0x4] sm:$0xf]  ;;  %v1539_v36 = vld [vmem:[%s2242_s20 + $0x8] sm:$0xf] }
  0x18   : > { %824 = vmatpush.bf16.msra.mxu0 %v1984_v12  ;;  %v1917_v38 = vld [vmem:[%s2242_s20 + $0xc] sm:$0xf]  ;;  %v1532_v40 = vor.u32 %v1918_v33, %v1531_v32  ;;  %v1536_v41 = vor.u32 %v1916_v34, %v1533_v35  ;;  %v1540_v42 = vor.u32 %v1919_v37, %v1539_v36  ;;  %v1547_v44 = vld [vmem:[%s2242_s20 + $0x20] sm:$0xf]  ;;  %v1922_v45 = vld [vmem:[%s2242_s20 + $0x2c] sm:$0xf0] }
  0x19   : > { %913 = vmatpush.bf16.msra.mxu1 %v1992_v13  ;;  %v1544_v43 = vor.u32 %v1917_v38, %v1541_v39  ;;  %v1920_v46 = vld [vmem:[%s2242_s20 + $0x24] sm:$0xf]  ;;  %v1549_v47 = vld [vmem:[%s2242_s20 + $0x30] sm:$0xf0]  ;;  %v1555_v48 = vld [vmem:[%s2242_s20 + $0x28] sm:$0xf]  ;;  %v1548_v52 = vor.u32 %v1922_v45, %v1547_v44 }
  0x1a   : > { %1002 = vmatpush.bf16.msra.mxu2 %v2000_v14  ;;  %v1923_v49 = vld [vmem:[%s2242_s20 + $0x34] sm:$0xf0]  ;;  %v1921_v50 = vld [vmem:[%s2242_s20 + $0x2c] sm:$0xf]  ;;  %v1557_v51 = vld [vmem:[%s2242_s20 + $0x38] sm:$0xf0]  ;;  %v1552_v53 = vor.u32 %v1920_v46, %v1549_v47 }
  0x1b   : > { %1091 = vmatpush.bf16.msra.mxu3 %v2008_v15  ;;  %v1556_v54 = vor.u32 %v1923_v49, %v1555_v48  ;;  %v1560_v55 = vor.u32 %v1921_v50, %v1557_v51  ;;  %v1563_v56 = vld [vmem:[%s2242_s20 + $0x40] sm:$0xf]  ;;  %v1926_v57 = vld [vmem:[%s2242_s20 + $0x4c] sm:$0xf0]  ;;  %v1924_v58 = vld [vmem:[%s2242_s20 + $0x44] sm:$0xf] }
  0x1c   : > { %825 = vmatpush.bf16.msra.mxu0 %v1983_v16  ;;  %v1565_v59 = vld [vmem:[%s2242_s20 + $0x50] sm:$0xf0]  ;;  %v1571_v60 = vld [vmem:[%s2242_s20 + $0x48] sm:$0xf]  ;;  %v1927_v61 = vld [vmem:[%s2242_s20 + $0x54] sm:$0xf0]  ;;  %v1564_v0 = vor.u32 %v1926_v57, %v1563_v56 }
  0x1d   : > { %914 = vmatpush.bf16.msra.mxu1 %v1991_v17  ;;  %v1925_v62 = vld [vmem:[%s2242_s20 + $0x4c] sm:$0xf]  ;;  %v1573_v63 = vld [vmem:[%s2242_s20 + $0x58] sm:$0xf0]  ;;  %v1568_v1 = vor.u32 %v1924_v58, %v1565_v59  ;;  %v1572_v2 = vor.u32 %v1927_v61, %v1571_v60  ;;  %v1579_v4 = vld [vmem:[%s2242_s20 + $0x60] sm:$0xf] }
  0x1e   : > { %1003 = vmatpush.bf16.msra.mxu2 %v1999_v18  ;;  %v1576_v3 = vor.u32 %v1925_v62, %v1573_v63  ;;  %v1930_v5 = vld [vmem:[%s2242_s20 + $0x6c] sm:$0xf0]  ;;  %v1928_v6 = vld [vmem:[%s2242_s20 + $0x64] sm:$0xf]  ;;  %v1581_v7 = vld [vmem:[%s2242_s20 + $0x70] sm:$0xf0] }
  0x1f   : > { %1092 = vmatpush.bf16.msra.mxu3 %v2007_v19  ;;  %v1587_v8 = vld [vmem:[%s2242_s20 + $0x68] sm:$0xf]  ;;  %v1931_v9 = vld [vmem:[%s2242_s20 + $0x74] sm:$0xf0]  ;;  %v1929_v10 = vld [vmem:[%s2242_s20 + $0x6c] sm:$0xf]  ;;  %v1580_v12 = vor.u32 %v1930_v5, %v1579_v4  ;;  %v1584_v13 = vor.u32 %v1928_v6, %v1581_v7 }
  0x20   : > { %826 = vmatpush.bf16.msra.mxu0 %v1982_v20  ;;  %v1589_v11 = vld [vmem:[%s2242_s20 + $0x78] sm:$0xf0]  ;;  %v1588_v14 = vor.u32 %v1931_v9, %v1587_v8  ;;  %v1595_v16 = vld [vmem:[%s2242_s20 + $0x80] sm:$0xf]  ;;  %v1934_v17 = vld [vmem:[%s2242_s20 + $0x8c] sm:$0xf0] }
  0x21   : > { %915 = vmatpush.bf16.msra.mxu1 %v1990_v21  ;;  %v1592_v15 = vor.u32 %v1929_v10, %v1589_v11  ;;  %v1932_v18 = vld [vmem:[%s2242_s20 + $0x84] sm:$0xf]  ;;  %v1597_v19 = vld [vmem:[%s2242_s20 + $0x90] sm:$0xf0]  ;;  %v1603_v20 = vld [vmem:[%s2242_s20 + $0x88] sm:$0xf] }
  0x22   : > { %1004 = vmatpush.bf16.msra.mxu2 %v1998_v22  ;;  %v1935_v21 = vld [vmem:[%s2242_s20 + $0x94] sm:$0xf0]  ;;  %v1933_v22 = vld [vmem:[%s2242_s20 + $0x8c] sm:$0xf]  ;;  %v1619_v32 = vld [vmem:[%s2242_s20 + $0xa8] sm:$0xf] }
  0x23   : > { %1093 = vmatpush.bf16.msra.mxu3 %v2006_v23  ;;  %v1605_v23 = vld [vmem:[%s2242_s20 + $0x98] sm:$0xf0]  ;;  %v1939_v33 = vld [vmem:[%s2242_s20 + $0xb4] sm:$0xf0]  ;;  %v1937_v34 = vld [vmem:[%s2242_s20 + $0xac] sm:$0xf] }
  0x24   : > { %827 = vmatpush.bf16.msra.mxu0 %v1981_v24  ;;  %v1596_v24 = vor.u32 %v1934_v17, %v1595_v16  ;;  %v1621_v35 = vld [vmem:[%s2242_s20 + $0xb8] sm:$0xf0]  ;;  %v1620_v38 = vor.u32 %v1939_v33, %v1619_v32  ;;  %v1635_v44 = vld [vmem:[%s2242_s20 + $0xc8] sm:$0xf]  ;;  %v1943_v45 = vld [vmem:[%s2242_s20 + $0xd4] sm:$0xf0] }
  0x25   : > { %916 = vmatpush.bf16.msra.mxu1 %v1989_v25  ;;  %v1600_v25 = vor.u32 %v1932_v18, %v1597_v19  ;;  %v1624_v39 = vor.u32 %v1937_v34, %v1621_v35  ;;  %v1941_v46 = vld [vmem:[%s2242_s20 + $0xcc] sm:$0xf]  ;;  %v1637_v47 = vld [vmem:[%s2242_s20 + $0xd8] sm:$0xf0]  ;;  %v1636_v50 = vor.u32 %v1943_v45, %v1635_v44  ;;  %v1651_v56 = vld [vmem:[%s2242_s20 + $0xe8] sm:$0xf] }
  0x26   : > { %1005 = vmatpush.bf16.msra.mxu2 %v1997_v26  ;;  %v1604_v26 = vor.u32 %v1935_v21, %v1603_v20  ;;  %v1640_v51 = vor.u32 %v1941_v46, %v1637_v47  ;;  %v1947_v57 = vld [vmem:[%s2242_s20 + $0xf4] sm:$0xf0]  ;;  %v1945_v58 = vld [vmem:[%s2242_s20 + $0xec] sm:$0xf]  ;;  %v1653_v59 = vld [vmem:[%s2242_s20 + $0xf8] sm:$0xf0] }
  0x27   : > { %1094 = vmatpush.bf16.msra.mxu3 %v2005_v27  ;;  %v1608_v27 = vor.u32 %v1933_v22, %v1605_v23  ;;  %v1652_v62 = vor.u32 %v1947_v57, %v1651_v56  ;;  %v1656_v63 = vor.u32 %v1945_v58, %v1653_v59  ;;  %v1661_v4 = vld [vmem:[%s2242_s20 + $0x110] sm:$0xf0]  ;;  %v1667_v5 = vld [vmem:[%s2242_s20 + $0x108] sm:$0xf]  ;;  %v1951_v6 = vld [vmem:[%s2242_s20 + $0x114] sm:$0xf0] }
  0x28   : > { %828 = vmatpush.bf16.msra.mxu0 %v1980_v28  ;;  %v1611_v28 = vld [vmem:[%s2242_s20 + $0xa0] sm:$0xf]  ;;  %v1949_v7 = vld [vmem:[%s2242_s20 + $0x10c] sm:$0xf]  ;;  %v1669_v8 = vld [vmem:[%s2242_s20 + $0x118] sm:$0xf0] }
  0x29   : > { %917 = vmatpush.bf16.msra.mxu1 %v1988_v29  ;;  %v1938_v29 = vld [vmem:[%s2242_s20 + $0xac] sm:$0xf0]  ;;  %v1685_v32 = vld [vmem:[%s2242_s20 + $0x138] sm:$0xf0]  ;;  %v1693_v56 = vld [vmem:[%s2242_s20 + $0x150] sm:$0xf0] }
  0x2a   : > { %1006 = vmatpush.bf16.msra.mxu2 %v1996_v30  ;;  %v1936_v30 = vld [vmem:[%s2242_s20 + $0xa4] sm:$0xf]  ;;  %v1612_v36 = vor.u32 %v1938_v29, %v1611_v28  ;;  %v1677_v28 = vld [vmem:[%s2242_s20 + $0x130] sm:$0xf0]  ;;  %v1683_v29 = vld [vmem:[%s2242_s20 + $0x128] sm:$0xf] }
  0x2b   : > { %1095 = vmatpush.bf16.msra.mxu3 %v2004_v31  ;;  %829 = vmatmul.bf16.vlgmr.msra.gmra.mxu0 %v1532_v40  ;;  %v1613_v31 = vld [vmem:[%s2242_s20 + $0xb0] sm:$0xf0]  ;;  %v1627_v40 = vld [vmem:[%s2242_s20 + $0xc0] sm:$0xf]  ;;  %v1699_v57 = vld [vmem:[%s2242_s20 + $0x148] sm:$0xf] }
  0x2c   : > { %918 = vmatmul.bf16.vlgmr.msra.gmra.mxu1 %v1536_v41  ;;  %v1616_v37 = vor.u32 %v1936_v30, %v1613_v31  ;;  %v1942_v41 = vld [vmem:[%s2242_s20 + $0xcc] sm:$0xf0]  ;;  %v1955_v30 = vld [vmem:[%s2242_s20 + $0x134] sm:$0xf0]  ;;  %v1953_v31 = vld [vmem:[%s2242_s20 + $0x12c] sm:$0xf] }
  0x2d   : > { %1007 = vmatmul.bf16.vlgmr.msra.gmra.mxu2 %v1540_v42  ;;  %v1940_v42 = vld [vmem:[%s2242_s20 + $0xc4] sm:$0xf]  ;;  %v1628_v48 = vor.u32 %v1942_v41, %v1627_v40  ;;  %v1684_v40 = vor.u32 %v1955_v30, %v1683_v29  ;;  %v1688_v41 = vor.u32 %v1953_v31, %v1685_v32  ;;  %v1959_v58 = vld [vmem:[%s2242_s20 + $0x154] sm:$0xf0]  ;;  %v1957_v59 = vld [vmem:[%s2242_s20 + $0x14c] sm:$0xf] }
  0x2e   : > { %1096 = vmatmul.bf16.vlgmr.msra.gmra.mxu3 %v1544_v43  ;;  %v1629_v43 = vld [vmem:[%s2242_s20 + $0xd0] sm:$0xf0] }
  0x2f   : > { %v1632_v49 = vor.u32 %v1940_v42, %v1629_v43 }
  0x3b   : > { %834 = vmatmul.bf16.gmra.mxu0 %v1548_v52  ;;  %v1643_v52 = vld [vmem:[%s2242_s20 + $0xe0] sm:$0xf] }
  0x3c   : > { %923 = vmatmul.bf16.gmra.mxu1 %v1552_v53  ;;  %v1946_v53 = vld [vmem:[%s2242_s20 + $0xec] sm:$0xf0] }
  0x3d   : > { %1012 = vmatmul.bf16.gmra.mxu2 %v1556_v54  ;;  %v1944_v54 = vld [vmem:[%s2242_s20 + $0xe4] sm:$0xf]  ;;  %v1644_v60 = vor.u32 %v1946_v53, %v1643_v52  ;;  %v1691_v53 = vld [vmem:[%s2242_s20 + $0x140] sm:$0xf] }
  0x3e   : > { %1101 = vmatmul.bf16.gmra.mxu3 %v1560_v55  ;;  %v1645_v55 = vld [vmem:[%s2242_s20 + $0xf0] sm:$0xf0] }
  0x3f   : > { %v1648_v61 = vor.u32 %v1944_v54, %v1645_v55  ;;  %v1958_v54 = vld [vmem:[%s2242_s20 + $0x14c] sm:$0xf0]  ;;  %v1956_v55 = vld [vmem:[%s2242_s20 + $0x144] sm:$0xf] }
  0x4b   : > { %839 = vmatmul.bf16.gmra.mxu0 %v1564_v0  ;;  %v2329_v0 = vld [vmem:[%s2768_s2] ss:$0 sm:$0xff] }
  0x4c   : > { %928 = vmatmul.bf16.gmra.mxu1 %v1568_v1  ;;  %v1659_v1 = vld [vmem:[%s2242_s20 + $0x100] sm:$0xf] }
  0x4d   : > { %1017 = vmatmul.bf16.gmra.mxu2 %v1572_v2  ;;  %v1950_v2 = vld [vmem:[%s2242_s20 + $0x10c] sm:$0xf0] }
  0x4e   : > { %1106 = vmatmul.bf16.gmra.mxu3 %v1576_v3  ;;  %v1948_v3 = vld [vmem:[%s2242_s20 + $0x104] sm:$0xf]  ;;  %v1660_v9 = vor.u32 %v1950_v2, %v1659_v1  ;;  %v1696_v1 = vor.u32 %v1956_v55, %v1693_v56  ;;  %v1965_v55 = vld [vmem:[%s2242_s20 + $0x18c] sm:$0xf]  ;;  %v1733_v56 = vld [vmem:[%s2242_s20 + $0x198] sm:$0xf0] }
  0x4f   : > { %v1664_v10 = vor.u32 %v1948_v3, %v1661_v4 }
  0x5b   : > { %844 = vmatmul.bf16.gmra.mxu0 %v1580_v12 }
  0x5c   : > { %933 = vmatmul.bf16.gmra.mxu1 %v1584_v13  ;;  %v1668_v13 = vor.u32 %v1951_v6, %v1667_v5  ;;  %v1700_v5 = vor.u32 %v1959_v58, %v1699_v57 }
  0x5d   : > { %1022 = vmatmul.bf16.gmra.mxu2 %v1588_v14  ;;  %v1672_v14 = vor.u32 %v1949_v7, %v1669_v8 }
  0x5e   : > { %1111 = vmatmul.bf16.gmra.mxu3 %v1592_v15 }
  0x6b   : > { %849 = vmatmul.bf16.gmra.mxu0 %v1596_v24 }
  0x6c   : > { %938 = vmatmul.bf16.gmra.mxu1 %v1600_v25  ;;  %v1675_v25 = vld [vmem:[%s2242_s20 + $0x120] sm:$0xf] }
  0x6d   : > { %1027 = vmatmul.bf16.gmra.mxu2 %v1604_v26  ;;  %v1954_v26 = vld [vmem:[%s2242_s20 + $0x12c] sm:$0xf0] }
  0x6e   : > { %1116 = vmatmul.bf16.gmra.mxu3 %v1608_v27  ;;  %v1952_v27 = vld [vmem:[%s2242_s20 + $0x124] sm:$0xf]  ;;  %v1676_v35 = vor.u32 %v1954_v26, %v1675_v25  ;;  %v1961_v25 = vld [vmem:[%s2242_s20 + $0x16c] sm:$0xf]  ;;  %v1717_v26 = vld [vmem:[%s2242_s20 + $0x178] sm:$0xf0] }
  0x7b   : > { %854 = vmatmul.bf16.gmra.mxu0 %v1612_v36  ;;  %v1680_v36 = vor.u32 %v1952_v27, %v1677_v28 }
  0x7c   : > { %943 = vmatmul.bf16.gmra.mxu1 %v1616_v37 }
  0x7d   : > { %1032 = vmatmul.bf16.gmra.mxu2 %v1620_v38 }
  0x7e   : > { %1121 = vmatmul.bf16.gmra.mxu3 %v1624_v39 }
  0x8b   : > { %859 = vmatmul.bf16.gmra.mxu0 %v1628_v48 }
  0x8c   : > { %948 = vmatmul.bf16.gmra.mxu1 %v1632_v49 }
  0x8d   : > { %1037 = vmatmul.bf16.gmra.mxu2 %v1636_v50 }
  0x8e   : > { %1126 = vmatmul.bf16.gmra.mxu3 %v1640_v51 }
  0x9b   : > { %864 = vmatmul.bf16.gmra.mxu0 %v1644_v60  ;;  %v1701_v60 = vld [vmem:[%s2242_s20 + $0x158] sm:$0xf0] }
  0x9c   : > { %953 = vmatmul.bf16.gmra.mxu1 %v1648_v61  ;;  %v1704_v6 = vor.u32 %v1957_v59, %v1701_v60 }
  0x9d   : > { %1042 = vmatmul.bf16.gmra.mxu2 %v1652_v62 }
  0x9e   : > { %1131 = vmatmul.bf16.gmra.mxu3 %v1656_v63  ;;  %v1692_v63 = vor.u32 %v1958_v54, %v1691_v53  ;;  %v1731_v53 = vld [vmem:[%s2242_s20 + $0x188] sm:$0xf]  ;;  %v1967_v54 = vld [vmem:[%s2242_s20 + $0x194] sm:$0xf0] }
  0xa8   : > { %v830_v11 = vpop.f32.mrf.mxu0 }
  0xa9   : > { %v919_v12 = vpop.f32.mrf.mxu1  ;;  %v831_v15 = vadd.f32 %v2329_v0, %v830_v11 }
  0xab   : > { %v920_v16 = vadd.f32 %v919_v12, %v831_v15  ;;  %869 = vmatmul.bf16.gmra.mxu0 %v1660_v9 }
  0xac   : > { %958 = vmatmul.bf16.gmra.mxu1 %v1664_v10 }
  0xad   : > { %1047 = vmatmul.bf16.gmra.mxu2 %v1668_v13 }
  0xae   : > { %1136 = vmatmul.bf16.gmra.mxu3 %v1672_v14 }
  0xb0   : > { %v1008_v17 = vpop.f32.mrf.mxu2  ;;  %v832_v20 = vpop.f32.mrf.mxu0 }
  0xb1   : > { %v1097_v18 = vpop.f32.mrf.mxu3  ;;  %v1009_v19 = vadd.f32 %v1008_v17, %v920_v16  ;;  %v921_v21 = vpop.f32.mrf.mxu1  ;;  %v833_v22 = vadd.f32 %v2329_v0, %v832_v20  ;;  %v1960_v20 = vld [vmem:[%s2242_s20 + $0x164] sm:$0xf] }
  0xb3   : > { %v2341_v23 = vadd.f32 %v1097_v18, %v1009_v19  ;;  %v922_v24 = vadd.f32 %v921_v21, %v833_v22  ;;  %v1707_v18 = vld [vmem:[%s2242_s20 + $0x160] sm:$0xf]  ;;  %v1962_v19 = vld [vmem:[%s2242_s20 + $0x16c] sm:$0xf0]  ;;  %v1709_v21 = vld [vmem:[%s2242_s20 + $0x170] sm:$0xf0] }
  0xb4   : > { %v1715_v22 = vld [vmem:[%s2242_s20 + $0x168] sm:$0xf]  ;;  %v1708_v29 = vor.u32 %v1962_v19, %v1707_v18  ;;  %v1712_v30 = vor.u32 %v1960_v20, %v1709_v21  ;;  %v1968_v18 = vld [vmem:[%s2242_s20 + $0x1a4] sm:$0xf]  ;;  %v1741_v19 = vld [vmem:[%s2242_s20 + $0x1b0] sm:$0xf0] }
  0xb5   : > { %v1747_v20 = vld [vmem:[%s2242_s20 + $0x1a8] sm:$0xf]  ;;  %v1971_v21 = vld [vmem:[%s2242_s20 + $0x1b4] sm:$0xf0] }
  0xb8   : > { %v1010_v33 = vpop.f32.mrf.mxu2  ;;  %v835_v38 = vpop.f32.mrf.mxu0 }
  0xb9   : > { %v1099_v34 = vpop.f32.mrf.mxu3  ;;  %v1011_v37 = vadd.f32 %v1010_v33, %v922_v24  ;;  %v924_v39 = vpop.f32.mrf.mxu1  ;;  %v836_v42 = vadd.f32 %v2329_v0, %v835_v38  ;;  %v1963_v24 = vld [vmem:[%s2242_s20 + $0x174] sm:$0xf0] }
  0xbb   : > { %v2352_v43 = vadd.f32 %v1099_v34, %v1011_v37  ;;  %v925_v44 = vadd.f32 %v924_v39, %v836_v42  ;;  %874 = vmatmul.bf16.gmra.mxu0 %v1676_v35  ;;  %v1716_v34 = vor.u32 %v1963_v24, %v1715_v22  ;;  %v1720_v35 = vor.u32 %v1961_v25, %v1717_v26  ;;  %v1969_v22 = vld [vmem:[%s2242_s20 + $0x1ac] sm:$0xf]  ;;  %v1749_v24 = vld [vmem:[%s2242_s20 + $0x1b8] sm:$0xf0] }
  0xbc   : > { %963 = vmatmul.bf16.gmra.mxu1 %v1680_v36 }
  0xbd   : > { %1052 = vmatmul.bf16.gmra.mxu2 %v1684_v40 }
  0xbe   : > { %1141 = vmatmul.bf16.gmra.mxu3 %v1688_v41 }
  0xc0   : > { %v1013_v45 = vpop.f32.mrf.mxu2  ;;  %v837_v48 = vpop.f32.mrf.mxu0 }
  0xc1   : > { %v1102_v46 = vpop.f32.mrf.mxu3  ;;  %v1014_v47 = vadd.f32 %v1013_v45, %v925_v44  ;;  %v926_v49 = vpop.f32.mrf.mxu1  ;;  %v838_v50 = vadd.f32 %v2329_v0, %v837_v48  ;;  %v1723_v48 = vld [vmem:[%s2242_s20 + $0x180] sm:$0xf] }
  0xc3   : > { %v2355_v51 = vadd.f32 %v1102_v46, %v1014_v47  ;;  %v927_v52 = vadd.f32 %v926_v49, %v838_v50  ;;  %v1966_v49 = vld [vmem:[%s2242_s20 + $0x18c] sm:$0xf0]  ;;  %v1964_v50 = vld [vmem:[%s2242_s20 + $0x184] sm:$0xf] }
  0xc4   : > { %v1724_v59 = vor.u32 %v1966_v49, %v1723_v48  ;;  %v1755_v48 = vld [vmem:[%s2242_s20 + $0x1c0] sm:$0xf]  ;;  %v1974_v49 = vld [vmem:[%s2242_s20 + $0x1cc] sm:$0xf0] }
  0xc8   : > { %v1015_v61 = vpop.f32.mrf.mxu2  ;;  %v840_v3 = vpop.f32.mrf.mxu0 }
  0xc9   : > { %v1104_v62 = vpop.f32.mrf.mxu3  ;;  %v1016_v2 = vadd.f32 %v1015_v61, %v927_v52  ;;  %v929_v4 = vpop.f32.mrf.mxu1  ;;  %v841_v7 = vadd.f32 %v2329_v0, %v840_v3  ;;  %v1725_v52 = vld [vmem:[%s2242_s20 + $0x190] sm:$0xf0] }
  0xca   : > { %v1728_v60 = vor.u32 %v1964_v50, %v1725_v52  ;;  %v1972_v50 = vld [vmem:[%s2242_s20 + $0x1c4] sm:$0xf]  ;;  %v1757_v52 = vld [vmem:[%s2242_s20 + $0x1d0] sm:$0xf0] }
  0xcb   : > { %v2366_v8 = vadd.f32 %v1104_v62, %v1016_v2  ;;  %v930_v9 = vadd.f32 %v929_v4, %v841_v7  ;;  %879 = vmatmul.bf16.gmra.mxu0 %v1692_v63  ;;  %v1736_v2 = vor.u32 %v1965_v55, %v1733_v56  ;;  %v1973_v55 = vld [vmem:[%s2242_s20 + $0x1cc] sm:$0xf]  ;;  %v1765_v56 = vld [vmem:[%s2242_s20 + $0x1d8] sm:$0xf0] }
  0xcc   : > { %968 = vmatmul.bf16.gmra.mxu1 %v1696_v1  ;;  %v1732_v1 = vor.u32 %v1967_v54, %v1731_v53  ;;  %v1763_v53 = vld [vmem:[%s2242_s20 + $0x1c8] sm:$0xf]  ;;  %v1975_v54 = vld [vmem:[%s2242_s20 + $0x1d4] sm:$0xf0] }
  0xcd   : > { %1057 = vmatmul.bf16.gmra.mxu2 %v1700_v5 }
  0xce   : > { %1146 = vmatmul.bf16.gmra.mxu3 %v1704_v6 }
  0xd0   : > { %v1018_v10 = vpop.f32.mrf.mxu2  ;;  %v842_v13 = vpop.f32.mrf.mxu0 }
  0xd1   : > { %v1107_v11 = vpop.f32.mrf.mxu3  ;;  %v1019_v12 = vadd.f32 %v1018_v10, %v930_v9  ;;  %v931_v14 = vpop.f32.mrf.mxu1  ;;  %v843_v15 = vadd.f32 %v2329_v0, %v842_v13 }
  0xd3   : > { %v2369_v16 = vadd.f32 %v1107_v11, %v1019_v12  ;;  %v932_v17 = vadd.f32 %v931_v14, %v843_v15  ;;  %v1739_v15 = vld [vmem:[%s2242_s20 + $0x1a0] sm:$0xf] }
  0xd8   : > { %v1020_v27 = vpop.f32.mrf.mxu2  ;;  %v845_v32 = vpop.f32.mrf.mxu0 }
  0xd9   : > { %v1109_v28 = vpop.f32.mrf.mxu3  ;;  %v1021_v31 = vadd.f32 %v1020_v27, %v932_v17  ;;  %v934_v33 = vpop.f32.mrf.mxu1  ;;  %v846_v36 = vadd.f32 %v2329_v0, %v845_v32  ;;  %v1970_v17 = vld [vmem:[%s2242_s20 + $0x1ac] sm:$0xf0]  ;;  %v1748_v32 = vor.u32 %v1971_v21, %v1747_v20  ;;  %v1976_v20 = vld [vmem:[%s2242_s20 + $0x1e4] sm:$0xf]  ;;  %v1773_v21 = vld [vmem:[%s2242_s20 + $0x1f0] sm:$0xf0] }
  0xda   : > { %v1740_v27 = vor.u32 %v1970_v17, %v1739_v15 }
  0xdb   : > { %v2380_v37 = vadd.f32 %v1109_v28, %v1021_v31  ;;  %v935_v38 = vadd.f32 %v934_v33, %v846_v36  ;;  %884 = vmatmul.bf16.gmra.mxu0 %v1708_v29  ;;  %v1744_v28 = vor.u32 %v1968_v18, %v1741_v19  ;;  %v1752_v33 = vor.u32 %v1969_v22, %v1749_v24  ;;  %v1771_v18 = vld [vmem:[%s2242_s20 + $0x1e0] sm:$0xf]  ;;  %v1978_v19 = vld [vmem:[%s2242_s20 + $0x1ec] sm:$0xf0]  ;;  %v1779_v22 = vld [vmem:[%s2242_s20 + $0x1e8] sm:$0xf] }
  0xdc   : > { %973 = vmatmul.bf16.gmra.mxu1 %v1712_v30  ;;  %v1979_v24 = vld [vmem:[%s2242_s20 + $0x1f4] sm:$0xf0] }
  0xdd   : > { %1062 = vmatmul.bf16.gmra.mxu2 %v1716_v34 }
  0xde   : > { %1151 = vmatmul.bf16.gmra.mxu3 %v1720_v35 }
  0xe0   : > { %v1023_v39 = vpop.f32.mrf.mxu2  ;;  %v847_v42 = vpop.f32.mrf.mxu0 }
  0xe1   : > { %v1112_v40 = vpop.f32.mrf.mxu3  ;;  %v1024_v41 = vadd.f32 %v1023_v39, %v935_v38  ;;  %v936_v44 = vpop.f32.mrf.mxu1  ;;  %v848_v45 = vadd.f32 %v2329_v0, %v847_v42 }
  0xe3   : > { %v2383_v46 = vadd.f32 %v1112_v40, %v1024_v41  ;;  %v937_v47 = vadd.f32 %v936_v44, %v848_v45 }
  0xe8   : > { %v1025_v57 = vpop.f32.mrf.mxu2  ;;  %v850_v62 = vpop.f32.mrf.mxu0 }
  0xe9   : > { %v1114_v58 = vpop.f32.mrf.mxu3  ;;  %v1026_v61 = vadd.f32 %v1025_v57, %v937_v47  ;;  %v939_v63 = vpop.f32.mrf.mxu1  ;;  %v851_v3 = vadd.f32 %v2329_v0, %v850_v62 }
  0xeb   : > { %v2394_v4 = vadd.f32 %v1114_v58, %v1026_v61  ;;  %v940_v5 = vadd.f32 %v939_v63, %v851_v3  ;;  %889 = vmatmul.bf16.gmra.mxu0 %v1724_v59  ;;  %v1756_v59 = vor.u32 %v1974_v49, %v1755_v48 }
  0xec   : > { %978 = vmatmul.bf16.gmra.mxu1 %v1728_v60  ;;  %v1760_v60 = vor.u32 %v1972_v50, %v1757_v52 }
  0xed   : > { %1067 = vmatmul.bf16.gmra.mxu2 %v1732_v1  ;;  %v1764_v1 = vor.u32 %v1975_v54, %v1763_v53 }
  0xee   : > { %1156 = vmatmul.bf16.gmra.mxu3 %v1736_v2  ;;  %v1768_v2 = vor.u32 %v1973_v55, %v1765_v56 }
  0xf0   : > { %v1028_v6 = vpop.f32.mrf.mxu2  ;;  %v852_v10 = vpop.f32.mrf.mxu0 }
  0xf1   : > { %v1117_v7 = vpop.f32.mrf.mxu3  ;;  %v1029_v9 = vadd.f32 %v1028_v6, %v940_v5  ;;  %v941_v11 = vpop.f32.mrf.mxu1  ;;  %v853_v12 = vadd.f32 %v2329_v0, %v852_v10 }
  0xf3   : > { %v2397_v13 = vadd.f32 %v1117_v7, %v1029_v9  ;;  %v942_v14 = vadd.f32 %v941_v11, %v853_v12 }
  0xf8   : > { %v1030_v25 = vpop.f32.mrf.mxu2  ;;  %v855_v30 = vpop.f32.mrf.mxu0 }
  0xf9   : > { %v1119_v26 = vpop.f32.mrf.mxu3  ;;  %v1031_v29 = vadd.f32 %v1030_v25, %v942_v14  ;;  %v944_v31 = vpop.f32.mrf.mxu1  ;;  %v856_v34 = vadd.f32 %v2329_v0, %v855_v30  ;;  %v1977_v25 = vld [vmem:[%s2242_s20 + $0x1ec] sm:$0xf]  ;;  %v1776_v30 = vor.u32 %v1976_v20, %v1773_v21 }
  0xfb   : > { %v2408_v35 = vadd.f32 %v1119_v26, %v1031_v29  ;;  %v945_v36 = vadd.f32 %v944_v31, %v856_v34  ;;  %894 = vmatmul.bf16.gmra.mxu0 %v1740_v27  ;;  %v1781_v26 = vld [vmem:[%s2242_s20 + $0x1f8] sm:$0xf0]  ;;  %v1772_v29 = vor.u32 %v1978_v19, %v1771_v18  ;;  %v1780_v34 = vor.u32 %v1979_v24, %v1779_v22 }
  0xfc   : > { %983 = vmatmul.bf16.gmra.mxu1 %v1744_v28 }
  0xfd   : > { %1072 = vmatmul.bf16.gmra.mxu2 %v1748_v32 }
  0xfe   : > { %1161 = vmatmul.bf16.gmra.mxu3 %v1752_v33 }
 0x100   : > { %v1033_v38 = vpop.f32.mrf.mxu2  ;;  %v857_v41 = vpop.f32.mrf.mxu0 }
 0x101   : > { %v1122_v39 = vpop.f32.mrf.mxu3  ;;  %v1034_v40 = vadd.f32 %v1033_v38, %v945_v36  ;;  %v946_v42 = vpop.f32.mrf.mxu1  ;;  %v858_v44 = vadd.f32 %v2329_v0, %v857_v41  ;;  %v1784_v36 = vor.u32 %v1977_v25, %v1781_v26 }
 0x103   : > { %v2411_v45 = vadd.f32 %v1122_v39, %v1034_v40  ;;  %v947_v47 = vadd.f32 %v946_v42, %v858_v44 }
 0x108   : > { %v1035_v57 = vpop.f32.mrf.mxu2  ;;  %v860_v62 = vpop.f32.mrf.mxu0 }
 0x109   : > { %v1124_v58 = vpop.f32.mrf.mxu3  ;;  %v1036_v61 = vadd.f32 %v1035_v57, %v947_v47  ;;  %v949_v63 = vpop.f32.mrf.mxu1  ;;  %v861_v3 = vadd.f32 %v2329_v0, %v860_v62 }
 0x10b   : > { %v2422_v5 = vadd.f32 %v1124_v58, %v1036_v61  ;;  %v950_v6 = vadd.f32 %v949_v63, %v861_v3  ;;  %899 = vmatmul.bf16.gmra.mxu0 %v1756_v59 }
 0x10c   : > { %988 = vmatmul.bf16.gmra.mxu1 %v1760_v60 }
 0x10d   : > { %2774 = vst [vmem:[#allocation2_spill] sm:$0xff] %v2422_v5  ;;  %1077 = vmatmul.bf16.gmra.mxu2 %v1764_v1 }
 0x10e   : > { %1166 = vmatmul.bf16.gmra.mxu3 %v1768_v2 }
 0x110   : > { %v1038_v7 = vpop.f32.mrf.mxu2  ;;  %v862_v11 = vpop.f32.mrf.mxu0 }
 0x111   : > { %v1127_v9 = vpop.f32.mrf.mxu3  ;;  %v1039_v10 = vadd.f32 %v1038_v7, %v950_v6  ;;  %v951_v12 = vpop.f32.mrf.mxu1  ;;  %v863_v14 = vadd.f32 %v2329_v0, %v862_v11 }
 0x113   : > { %v2425_v15 = vadd.f32 %v1127_v9, %v1039_v10  ;;  %v952_v17 = vadd.f32 %v951_v12, %v863_v14 }
 0x115   : > { %2775 = vst [vmem:[#allocation3_spill] sm:$0xff] %v2425_v15 }
 0x118   : > { %v1040_v27 = vpop.f32.mrf.mxu2  ;;  %v865_v32 = vpop.f32.mrf.mxu0 }
 0x119   : > { %v1129_v28 = vpop.f32.mrf.mxu3  ;;  %v1041_v31 = vadd.f32 %v1040_v27, %v952_v17  ;;  %v954_v33 = vpop.f32.mrf.mxu1  ;;  %v866_v38 = vadd.f32 %v2329_v0, %v865_v32 }
 0x11b   : > { %v2436_v39 = vadd.f32 %v1129_v28, %v1041_v31  ;;  %v955_v40 = vadd.f32 %v954_v33, %v866_v38  ;;  %904 = vmatmul.bf16.gmra.mxu0 %v1772_v29 }
 0x11c   : > { %993 = vmatmul.bf16.gmra.mxu1 %v1776_v30 }
 0x11d   : > { %2776 = vst [vmem:[#allocation4_spill] sm:$0xff] %v2436_v39  ;;  %1082 = vmatmul.bf16.gmra.mxu2 %v1780_v34 }
 0x11e   : > { %1171 = vmatmul.bf16.gmra.mxu3 %v1784_v36 }
 0x120   : > { %v1043_v41 = vpop.f32.mrf.mxu2  ;;  %v867_v47 = vpop.f32.mrf.mxu0 }
 0x121   : > { %v1132_v42 = vpop.f32.mrf.mxu3  ;;  %v1044_v44 = vadd.f32 %v1043_v41, %v955_v40  ;;  %v956_v48 = vpop.f32.mrf.mxu1  ;;  %v868_v49 = vadd.f32 %v2329_v0, %v867_v47 }
 0x123   : > { %v2439_v50 = vadd.f32 %v1132_v42, %v1044_v44  ;;  %v957_v52 = vadd.f32 %v956_v48, %v868_v49 }
 0x125   : > { %2777 = vst [vmem:[#allocation5_spill] sm:$0xff] %v2439_v50 }
 0x128   : > { %v1045_v53 = vpop.f32.mrf.mxu2  ;;  %v870_v56 = vpop.f32.mrf.mxu0 }
 0x129   : > { %v1134_v54 = vpop.f32.mrf.mxu3  ;;  %v1046_v55 = vadd.f32 %v1045_v53, %v957_v52  ;;  %v959_v57 = vpop.f32.mrf.mxu1  ;;  %v871_v58 = vadd.f32 %v2329_v0, %v870_v56 }
 0x12b   : > { %v2442_v59 = vadd.f32 %v1134_v54, %v1046_v55  ;;  %v960_v60 = vadd.f32 %v959_v57, %v871_v58 }
 0x130   : > { %v1048_v61 = vpop.f32.mrf.mxu2  ;;  %v872_v1 = vpop.f32.mrf.mxu0 }
 0x131   : > { %v1137_v62 = vpop.f32.mrf.mxu3  ;;  %v1049_v63 = vadd.f32 %v1048_v61, %v960_v60  ;;  %v961_v2 = vpop.f32.mrf.mxu1  ;;  %v873_v3 = vadd.f32 %v2329_v0, %v872_v1  ;;  %v1177_v1 = vadd.f32 %v2352_v43, %v2341_v23 }
 0x133   : > { %v2445_v6 = vadd.f32 %v1137_v62, %v1049_v63  ;;  %v962_v7 = vadd.f32 %v961_v2, %v873_v3 }
 0x138   : > { %v1050_v9 = vpop.f32.mrf.mxu2  ;;  %v875_v12 = vpop.f32.mrf.mxu0 }
 0x139   : > { %v1139_v10 = vpop.f32.mrf.mxu3  ;;  %v1051_v11 = vadd.f32 %v1050_v9, %v962_v7  ;;  %v964_v14 = vpop.f32.mrf.mxu1  ;;  %v876_v17 = vadd.f32 %v2329_v0, %v875_v12  ;;  %v1178_v7 = vadd.f32 %v1177_v1, %v2355_v51 }
 0x13b   : > { %v2448_v18 = vadd.f32 %v1139_v10, %v1051_v11  ;;  %v965_v19 = vadd.f32 %v964_v14, %v876_v17  ;;  %v1179_v11 = vadd.f32 %v1178_v7, %v2366_v8 }
 0x13d   : > { %v1180_v12 = vadd.f32 %v1179_v11, %v2369_v16 }
 0x13f   : > { %v1181_v14 = vadd.f32 %v1180_v12, %v2380_v37 }
 0x140   : > { %v1053_v20 = vpop.f32.mrf.mxu2  ;;  %v877_v24 = vpop.f32.mrf.mxu0 }
 0x141   : > { %v1142_v21 = vpop.f32.mrf.mxu3  ;;  %v1054_v22 = vadd.f32 %v1053_v20, %v965_v19  ;;  %v966_v25 = vpop.f32.mrf.mxu1  ;;  %v878_v26 = vadd.f32 %v2329_v0, %v877_v24  ;;  %v1182_v20 = vadd.f32 %v1181_v14, %v2383_v46 }
 0x143   : > { %v2451_v27 = vadd.f32 %v1142_v21, %v1054_v22  ;;  %v967_v28 = vadd.f32 %v966_v25, %v878_v26  ;;  %v1183_v24 = vadd.f32 %v1182_v20, %v2394_v4 }
 0x145   : > { %v1184_v25 = vadd.f32 %v1183_v24, %v2397_v13 }
 0x147   : > { %v1185_v26 = vadd.f32 %v1184_v25, %v2408_v35 }
 0x148   : > { %v1055_v29 = vpop.f32.mrf.mxu2  ;;  %v880_v32 = vpop.f32.mrf.mxu0 }
 0x149   : > { %v1144_v30 = vpop.f32.mrf.mxu3  ;;  %v1056_v31 = vadd.f32 %v1055_v29, %v967_v28  ;;  %v969_v33 = vpop.f32.mrf.mxu1  ;;  %v881_v34 = vadd.f32 %v2329_v0, %v880_v32 }
 0x14b   : > { %v2454_v36 = vadd.f32 %v1144_v30, %v1056_v31  ;;  %v970_v38 = vadd.f32 %v969_v33, %v881_v34  ;;  %v1186_v30 = vadd.f32 %v1185_v26, %v2411_v45 }
 0x14d   : > { %v1187_v33 = vadd.f32 %v1186_v30, %v2422_v5 }
 0x14f   : > { %v1188_v34 = vadd.f32 %v1187_v33, %v2425_v15 }
 0x150   : > { %v1058_v40 = vpop.f32.mrf.mxu2  ;;  %v882_v44 = vpop.f32.mrf.mxu0 }
 0x151   : > { %v1147_v41 = vpop.f32.mrf.mxu3  ;;  %v1059_v42 = vadd.f32 %v1058_v40, %v970_v38  ;;  %v971_v47 = vpop.f32.mrf.mxu1  ;;  %v1189_v38 = vadd.f32 %v1188_v34, %v2436_v39  ;;  %v883_v11 = vadd.f32 %v2329_v0, %v882_v44 }
 0x153   : > { %v2456_v48 = vadd.f32 %v1147_v41, %v1059_v42  ;;  %v1190_v42 = vadd.f32 %v1189_v38, %v2439_v50  ;;  %v972_v24 = vadd.f32 %v971_v47, %v883_v11 }
 0x155   : > { %v1191_v14 = vadd.f32 %v1190_v42, %v2442_v59 }
 0x157   : > { %v1192_v20 = vadd.f32 %v1191_v14, %v2445_v6 }
 0x158   : > { %v1060_v49 = vpop.f32.mrf.mxu2  ;;  %v885_v53 = vpop.f32.mrf.mxu0 }
 0x159   : > { %v1149_v52 = vpop.f32.mrf.mxu3  ;;  %v974_v54 = vpop.f32.mrf.mxu1  ;;  %v886_v12 = vadd.f32 %v2329_v0, %v885_v53  ;;  %v1193_v33 = vadd.f32 %v1192_v20, %v2448_v18  ;;  %v1061_v34 = vadd.f32 %v1060_v49, %v972_v24 }
 0x15b   : > { %v975_v25 = vadd.f32 %v974_v54, %v886_v12  ;;  %v1194_v39 = vadd.f32 %v1193_v33, %v2451_v27 }
 0x15d   : > { %v1195_v54 = vadd.f32 %v1194_v39, %v2454_v36 }
 0x15f   : > { %v1196_v49 = vadd.f32 %v1195_v54, %v2456_v48 }
 0x160   : > { %v1063_v55 = vpop.f32.mrf.mxu2  ;;  %v887_v57 = vpop.f32.mrf.mxu0 }
 0x161   : > { %v1152_v56 = vpop.f32.mrf.mxu3  ;;  %v976_v58 = vpop.f32.mrf.mxu1  ;;  %v888_v26 = vadd.f32 %v2329_v0, %v887_v57  ;;  %v1064_v15 = vadd.f32 %v1063_v55, %v975_v25  ;;  %v2490_v57 = vadd.f32 %v1149_v52, %v1061_v34 }
 0x163   : > { %v977_v53 = vadd.f32 %v976_v58, %v888_v26  ;;  %v2493_v11 = vadd.f32 %v1152_v56, %v1064_v15 }
 0x168   : > { %v1065_v60 = vpop.f32.mrf.mxu2  ;;  %v890_v62 = vpop.f32.mrf.mxu0 }
 0x169   : > { %v2458_v61 = vpop.f32.mrf.mxu3  ;;  %v979_v63 = vpop.f32.mrf.mxu1  ;;  %v891_v30 = vadd.f32 %v2329_v0, %v890_v62  ;;  %v1066_v62 = vadd.f32 %v1065_v60, %v977_v53 }
 0x16b   : > { %v980_v5 = vadd.f32 %v979_v63, %v891_v30  ;;  %v1197_v63 = vadd.f32 %v1196_v49, %v2490_v57 }
 0x16d   : > { %v1198_v25 = vadd.f32 %v1197_v63, %v2493_v11 }
 0x170   : > { %v1068_v2 = vpop.f32.mrf.mxu2  ;;  %v892_v9 = vpop.f32.mrf.mxu0 }
 0x171   : > { %v2462_v3 = vpop.f32.mrf.mxu3  ;;  %v981_v10 = vpop.f32.mrf.mxu1  ;;  %v893_v47 = vadd.f32 %v2329_v0, %v892_v9  ;;  %v1069_v12 = vadd.f32 %v1068_v2, %v980_v5  ;;  %v2499_v9 = vadd.f32 %v2458_v61, %v1066_v62 }
 0x173   : > { %v982_v24 = vadd.f32 %v981_v10, %v893_v47  ;;  %v2503_v15 = vadd.f32 %v2462_v3, %v1069_v12 }
 0x178   : > { %v1070_v17 = vpop.f32.mrf.mxu2  ;;  %v895_v21 = vpop.f32.mrf.mxu0 }
 0x179   : > { %v2468_v19 = vpop.f32.mrf.mxu3  ;;  %v984_v22 = vpop.f32.mrf.mxu1  ;;  %v896_v42 = vadd.f32 %v2329_v0, %v895_v21  ;;  %v1071_v21 = vadd.f32 %v1070_v17, %v982_v24 }
 0x17b   : > { %v985_v20 = vadd.f32 %v984_v22, %v896_v42 }
 0x180   : > { %v1073_v28 = vpop.f32.mrf.mxu2  ;;  %v897_v31 = vpop.f32.mrf.mxu0 }
 0x181   : > { %v1162_v29 = vpop.f32.mrf.mxu3  ;;  %v986_v32 = vpop.f32.mrf.mxu1  ;;  %v898_v55 = vadd.f32 %v2329_v0, %v897_v31  ;;  %v1074_v5 = vadd.f32 %v1073_v28, %v985_v20  ;;  %v1199_v31 = vadd.f32 %v1198_v25, %v2499_v9 }
 0x183   : > { %v987_v56 = vadd.f32 %v986_v32, %v898_v55  ;;  %v1200_v26 = vadd.f32 %v1199_v31, %v2503_v15  ;;  %v2512_v30 = vadd.f32 %v1162_v29, %v1074_v5 }
 0x188   : > { %v1075_v40 = vpop.f32.mrf.mxu2  ;;  %v900_v1 = vpop.f32.mrf.mxu0 }
 0x189   : > { %v1164_v41 = vpop.f32.mrf.mxu3  ;;  %v989_v7 = vpop.f32.mrf.mxu1  ;;  %v901_v58 = vadd.f32 %v2329_v0, %v900_v1  ;;  %v2509_v1 = vadd.f32 %v2468_v19, %v1071_v21  ;;  %v1076_v17 = vadd.f32 %v1075_v40, %v987_v56 }
 0x18b   : > { %v990_v2 = vadd.f32 %v989_v7, %v901_v58  ;;  %v1201_v34 = vadd.f32 %v1200_v26, %v2509_v1 }
 0x18d   : > { %v1202_v47 = vadd.f32 %v1201_v34, %v2512_v30 }
 0x190   : > { %v1078_v38 = vpop.f32.mrf.mxu2  ;;  %v902_v44 = vpop.f32.mrf.mxu0 }
 0x191   : > { %v1167_v50 = vpop.f32.mrf.mxu3  ;;  %v991_v14 = vpop.f32.mrf.mxu1  ;;  %v903_v10 = vadd.f32 %v2329_v0, %v902_v44  ;;  %v1079_v3 = vadd.f32 %v1078_v38, %v990_v2  ;;  %v2515_v44 = vadd.f32 %v1164_v41, %v1076_v17 }
 0x193   : > { %v992_v33 = vadd.f32 %v991_v14, %v903_v10  ;;  %v2518_v19 = vadd.f32 %v1167_v50, %v1079_v3  ;;  %v1203_v29 = vadd.f32 %v1202_v47, %v2515_v44  ;;  %v2129_v14 = vmov 256.0  }
 0x194   : > { %2117 = vrcp.f32 %v2129_v14 }
 0x195   : > { %v1204_v49 = vadd.f32 %v1203_v29, %v2518_v19 }
 0x198   : > { %v1080_v39 = vpop.f32.mrf.mxu2  ;;  %v905_v60 = vpop.f32.mrf.mxu0 }
 0x199   : > { %v1169_v52 = vpop.f32.mrf.mxu3  ;;  %v906_v22 = vadd.f32 %v2329_v0, %v905_v60  ;;  %v994_v61 = vpop.f32.mrf.mxu1  ;;  %v1081_v53 = vadd.f32 %v1080_v39, %v992_v33 }
 0x19a   : > { %v2118_v58 = vpop.eup %2117 }
 0x19b   : > { %v995_v28 = vadd.f32 %v994_v61, %v906_v22  ;;  %v2522_v38 = vadd.f32 %v1169_v52, %v1081_v53  ;;  %v1215_v52 = vmul.f32 256.0, %v2118_v58  ;;  %vm1219_vm0 = vweird.f32 %v2118_v58 }
 0x19d   : > { %v1205_v24 = vadd.f32 %v1204_v49, %v2522_v38  ;;  %v1216_v25 = vsub.f32 1.0, %v1215_v52  ;;  %v2780_v52 = vld [vmem:[#allocation4_spill] sm:$0xff] }
 0x19f   : > { %v1217_v2 = vmul.f32 %v2118_v58, %v1216_v25 }
 0x1a0   : > { %v1083_v32 = vpop.f32.mrf.mxu2  ;;  %v907_v42 = vpop.f32.mrf.mxu0 }
 0x1a1   : > { %v1172_v7 = vpop.f32.mrf.mxu3  ;;  %v1084_v40 = vadd.f32 %v1083_v32, %v995_v28  ;;  %v908_v54 = vadd.f32 %v2329_v0, %v907_v42  ;;  %v996_v62 = vpop.f32.mrf.mxu1  ;;  %v1218_v22 = vadd.f32 %v2118_v58, %v1217_v2 }
 0x1a3   : > { %v2525_v41 = vadd.f32 %v1172_v7, %v1084_v40  ;;  %v997_v12 = vadd.f32 %v996_v62, %v908_v54  ;;  %v2532_v61 = vsel %vm1219_vm0, %v2118_v58, %v1218_v22  ;;  %v2779_v58 = vld [vmem:[#allocation3_spill] sm:$0xff] }
 0x1a5   : > { %v1206_v0 = vadd.f32 %v1205_v24, %v2525_v41  ;;  %v2778_v24 = vld [vmem:[#allocation2_spill] sm:$0xff] }
 0x1a8   : > { %v1085_v20 = vpop.f32.mrf.mxu2 }
 0x1a9   : > { %v1086_v50 = vadd.f32 %v1085_v20, %v997_v12  ;;  %v1174_v55 = vpop.f32.mrf.mxu3 }
 0x1ab   : > { %v2529_v63 = vadd.f32 %v1174_v55, %v1086_v50 }
 0x1ad   : > { %v1207_v39 = vadd.f32 %v1206_v0, %v2529_v63 }
 0x1af   : > { %v1208_v21 = vrot.slane %v1207_v39, 4 }
 0x1b1   : > { %v1209_v60 = vadd.f32 %v1208_v21, %v1207_v39 }
 0x1b3   : > { %v1210_v5 = vrot.slane %v1209_v60, 2 }
 0x1b5   : > { %v1211_v56 = vadd.f32 %v1210_v5, %v1209_v60  ;;  %v2781_v5 = vld [vmem:[#allocation5_spill] sm:$0xff] }
 0x1b7   : > { %v1212_v10 = vrot.slane %v1211_v56, 1 }
 0x1b9   : > { %v1213_v31 = vadd.f32 %v1212_v10, %v1211_v56 }
 0x1bb   : > { %v2535_v17 = vmul.f32 %v2532_v61, %v1213_v31 }
 0x1bd   : > { %v2539_v26 = vsub.f32 %v2341_v23, %v2535_v17  ;;  %v2543_v3 = vsub.f32 %v2352_v43, %v2535_v17  ;;  %v2547_v33 = vsub.f32 %v2355_v51, %v2535_v17  ;;  %v2555_v7 = vsub.f32 %v2366_v8, %v2535_v17 }
 0x1be   : > { %v2559_v23 = vsub.f32 %v2369_v16, %v2535_v17  ;;  %v2565_v51 = vsub.f32 %v2380_v37, %v2535_v17  ;;  %v2571_v8 = vsub.f32 %v2383_v46, %v2535_v17  ;;  %v2577_v40 = vsub.f32 %v2394_v4, %v2535_v17 }
 0x1bf   : > { %v1254_v28 = vmul.f32 %v2539_v26, %v2539_v26  ;;  %v1255_v32 = vmul.f32 %v2543_v3, %v2543_v3  ;;  %v1256_v43 = vmul.f32 %v2547_v33, %v2547_v33  ;;  %v1257_v53 = vmul.f32 %v2555_v7, %v2555_v7 }
 0x1c0   : > { %v1258_v16 = vmul.f32 %v2559_v23, %v2559_v23  ;;  %v1259_v37 = vmul.f32 %v2565_v51, %v2565_v51  ;;  %v2583_v29 = vsub.f32 %v2397_v13, %v2535_v17  ;;  %v1260_v46 = vmul.f32 %v2571_v8, %v2571_v8 }
 0x1c1   : > { %v1286_v34 = vadd.f32 %v1255_v32, %v1254_v28  ;;  %v2589_v62 = vsub.f32 %v2408_v35, %v2535_v17  ;;  %v1261_v4 = vmul.f32 %v2577_v40, %v2577_v40  ;;  %v2595_v12 = vsub.f32 %v2411_v45, %v2535_v17 }
 0x1c2   : > { %v1262_v13 = vmul.f32 %v2583_v29, %v2583_v29  ;;  %v2601_v50 = vsub.f32 %v2778_v24, %v2535_v17  ;;  %v2607_v0 = vsub.f32 %v2779_v58, %v2535_v17  ;;  %v2613_v21 = vsub.f32 %v2780_v52, %v2535_v17 }
 0x1c3   : > { %v1287_v42 = vadd.f32 %v1286_v34, %v1256_v43  ;;  %v1263_v35 = vmul.f32 %v2589_v62, %v2589_v62  ;;  %v1264_v45 = vmul.f32 %v2595_v12, %v2595_v12  ;;  %v2619_v56 = vsub.f32 %v2781_v5, %v2535_v17 }
 0x1c4   : > { %v1265_v60 = vmul.f32 %v2601_v50, %v2601_v50  ;;  %v1266_v2 = vmul.f32 %v2607_v0, %v2607_v0  ;;  %v2625_v22 = vsub.f32 %v2442_v59, %v2535_v17  ;;  %v1267_v31 = vmul.f32 %v2613_v21, %v2613_v21 }
 0x1c5   : > { %v1288_v47 = vadd.f32 %v1287_v42, %v1257_v53  ;;  %v2631_v32 = vsub.f32 %v2445_v6, %v2535_v17  ;;  %v1268_v43 = vmul.f32 %v2619_v56, %v2619_v56  ;;  %v2637_v53 = vsub.f32 %v2448_v18, %v2535_v17 }
 0x1c6   : > { %v1269_v59 = vmul.f32 %v2625_v22, %v2625_v22  ;;  %v2673_v24 = vsub.f32 %v2499_v9, %v2535_v17  ;;  %v1248_v52 = vsub.f32 %v2512_v30, %v2535_v17 }
 0x1c7   : > { %v1289_v54 = vadd.f32 %v1288_v47, %v1258_v16  ;;  %v2643_v16 = vsub.f32 %v2451_v27, %v2535_v17  ;;  %v1270_v6 = vmul.f32 %v2631_v32, %v2631_v32  ;;  %v1271_v18 = vmul.f32 %v2637_v53, %v2637_v53 }
 0x1c8   : > { %v1277_v9 = vmul.f32 %v2673_v24, %v2673_v24 }
 0x1c9   : > { %v1290_v14 = vadd.f32 %v1289_v54, %v1259_v37  ;;  %v2649_v37 = vsub.f32 %v2454_v36, %v2535_v17  ;;  %v1272_v27 = vmul.f32 %v2643_v16, %v2643_v16 }
 0x1cb   : > { %v1291_v49 = vadd.f32 %v1290_v14, %v1260_v46  ;;  %v2655_v46 = vsub.f32 %v2456_v48, %v2535_v17  ;;  %v1273_v36 = vmul.f32 %v2649_v37, %v2649_v37 }
 0x1cd   : > { %v1292_v20 = vadd.f32 %v1291_v49, %v1261_v4  ;;  %v2661_v4 = vsub.f32 %v2490_v57, %v2535_v17  ;;  %v1274_v48 = vmul.f32 %v2655_v46, %v2655_v46 }
 0x1cf   : > { %v1293_v55 = vadd.f32 %v1292_v20, %v1262_v13  ;;  %v2667_v13 = vsub.f32 %v2493_v11, %v2535_v17  ;;  %v1275_v57 = vmul.f32 %v2661_v4, %v2661_v4 }
 0x1d1   : > { %v1294_v39 = vadd.f32 %v1293_v55, %v1263_v35  ;;  %v2679_v55 = vsub.f32 %v2503_v15, %v2535_v17  ;;  %v1276_v11 = vmul.f32 %v2667_v13, %v2667_v13 }
 0x1d3   : > { %v1295_v25 = vadd.f32 %v1294_v39, %v1264_v45  ;;  %v2685_v45 = vsub.f32 %v2509_v1, %v2535_v17  ;;  %v1250_v1 = vsub.f32 %v2518_v19, %v2535_v17 }
 0x1d5   : > { %v1296_v10 = vadd.f32 %v1295_v25, %v1265_v60  ;;  %v1278_v60 = vmul.f32 %v2679_v55, %v2679_v55  ;;  %v1249_v25 = vsub.f32 %v2515_v44, %v2535_v17  ;;  %v1279_v5 = vmul.f32 %v2685_v45, %v2685_v45 }
 0x1d6   : > { %v1253_v44 = vsub.f32 %v2529_v63, %v2535_v17 }
 0x1d7   : > { %v1297_v28 = vadd.f32 %v1296_v10, %v1266_v2  ;;  %v1280_v10 = vmul.f32 %v1248_v52, %v1248_v52  ;;  %v1281_v30 = vmul.f32 %v1249_v25, %v1249_v25 }
 0x1d8   : > { %v1285_v19 = vmul.f32 %v1253_v44, %v1253_v44 }
 0x1d9   : > { %v1298_v34 = vadd.f32 %v1297_v28, %v1267_v31  ;;  %v1251_v28 = vsub.f32 %v2522_v38, %v2535_v17 }
 0x1db   : > { %v1299_v42 = vadd.f32 %v1298_v34, %v1268_v43  ;;  %v1252_v34 = vsub.f32 %v2525_v41, %v2535_v17 }
 0x1dd   : > { %v1300_v47 = vadd.f32 %v1299_v42, %v1269_v59  ;;  %v1282_v59 = vmul.f32 %v1250_v1, %v1250_v1 }
 0x1df   : > { %v1301_v54 = vadd.f32 %v1300_v47, %v1270_v6  ;;  %v1283_v6 = vmul.f32 %v1251_v28, %v1251_v28 }
 0x1e1   : > { %v1302_v14 = vadd.f32 %v1301_v54, %v1271_v18  ;;  %v1284_v18 = vmul.f32 %v1252_v34, %v1252_v34 }
 0x1e3   : > { %v1303_v49 = vadd.f32 %v1302_v14, %v1272_v27 }
 0x1e5   : > { %v1304_v20 = vadd.f32 %v1303_v49, %v1273_v36 }
 0x1e7   : > { %v1305_v35 = vadd.f32 %v1304_v20, %v1274_v48 }
 0x1e9   : > { %v1306_v58 = vadd.f32 %v1305_v35, %v1275_v57 }
 0x1eb   : > { %v1307_v39 = vadd.f32 %v1306_v58, %v1276_v11 }
 0x1ed   : > { %v1308_v15 = vadd.f32 %v1307_v39, %v1277_v9 }
 0x1ef   : > { %v1309_v2 = vadd.f32 %v1308_v15, %v1278_v60 }
 0x1f1   : > { %v1310_v31 = vadd.f32 %v1309_v2, %v1279_v5 }
 0x1f3   : > { %v1311_v43 = vadd.f32 %v1310_v31, %v1280_v10 }
 0x1f5   : > { %v1312_v42 = vadd.f32 %v1311_v43, %v1281_v30 }
 0x1f7   : > { %v1313_v47 = vadd.f32 %v1312_v42, %v1282_v59 }
 0x1f9   : > { %v1314_v54 = vadd.f32 %v1313_v47, %v1283_v6 }
 0x1fb   : > { %v1315_v27 = vadd.f32 %v1314_v54, %v1284_v18 }
 0x1fd   : > { %v1316_v14 = vadd.f32 %v1315_v27, %v1285_v19 }
 0x1ff   : > { %v1317_v36 = vrot.slane %v1316_v14, 4 }
 0x201   : > { %v1318_v49 = vadd.f32 %v1317_v36, %v1316_v14 }
 0x203   : > { %v1319_v38 = vrot.slane %v1318_v49, 2 }
 0x205   : > { %v1320_v48 = vadd.f32 %v1319_v38, %v1318_v49 }
 0x207   : > { %v1321_v20 = vrot.slane %v1320_v48, 1 }
 0x209   : > { %v1322_v57 = vadd.f32 %v1321_v20, %v1320_v48 }
 0x20b   : > { %v1323_v41 = vmul.f32 %v1322_v57, %v2532_v61 }
 0x20d   : > { %v1324_v35 = vadd.f32 1e-05, %v1323_v41 }
 0x20f   : > { %2119 = vrsqrt.f32 %v1324_v35  ;;  %vm1331_vm2 = vweird.f32 %v1324_v35 }
 0x215   : > { %v2120_v11 = vpop.eup %2119 }
 0x216   : > { %v1326_v58 = vmul.f32 %v2120_v11, %v1324_v35  ;;  %vm1332_vm1 = vweird.f32 %v2120_v11 }
 0x217   : > { %vm1333_vm3 = vmor %vm1331_vm2, %vm1332_vm1 }
 0x218   : > { %v1327_v63 = vmul.f32 %v2120_v11, %v1326_v58 }
 0x21a   : > { %v1328_v17 = vmul.f32 0.5, %v1327_v63 }
 0x21c   : > { %v1329_v9 = vsub.f32 1.5, %v1328_v17 }
 0x21e   : > { %v1330_v39 = vmul.f32 %v2120_v11, %v1329_v9 }
 0x220   : > { %v1334_v60 = vsel %vm1333_vm3, %v2120_v11, %v1330_v39 }
 0x221   : > { %v1335_v15 = vmul.f32 %v1334_v60, %v2539_v26  ;;  %v1336_v5 = vmul.f32 %v1334_v60, %v2543_v3  ;;  %v1337_v2 = vmul.f32 %v1334_v60, %v2547_v33  ;;  %v1338_v61 = vmul.f32 %v1334_v60, %v2555_v7 }
 0x222   : > { %v1339_v10 = vmul.f32 %v1334_v60, %v2559_v23  ;;  %v1340_v31 = vmul.f32 %v1334_v60, %v2565_v51  ;;  %v1341_v30 = vmul.f32 %v1334_v60, %v2571_v8  ;;  %v1342_v43 = vmul.f32 %v1334_v60, %v2577_v40 }
 0x223   : > { %v1343_v59 = vmul.f32 %v1334_v60, %v2583_v29  ;;  %v1344_v42 = vmul.f32 %v1334_v60, %v2589_v62  ;;  %v1345_v26 = vmul.f32 %v1334_v60, %v2595_v12  ;;  %v1346_v3 = vmul.f32 %v1334_v60, %v2601_v50 }
 0x224   : > { %v2719_v33 = vmul.f32 %v1334_v60, %v2607_v0  ;;  %v2722_v7 = vmul.f32 %v1334_v60, %v2613_v21  ;;  %v2725_v23 = vmul.f32 %v1334_v60, %v2619_v56  ;;  %v1359_v51 = vmul.f32 %v1334_v60, %v2679_v55 }
 0x225   : > { %v1361_v8 = vmul.f32 %v1334_v60, %v1248_v52  ;;  %v1362_v40 = vmul.f32 %v1334_v60, %v1249_v25  ;;  %v1363_v29 = vmul.f32 %v1334_v60, %v1250_v1  ;;  %v1364_v6 = vmul.f32 %v1334_v60, %v1251_v28 }
 0x226   : > { %v1365_v62 = vmul.f32 %v1334_v60, %v1252_v34  ;;  %v1366_v47 = vmul.f32 %v1334_v60, %v1253_v44  ;;  %v1350_v12 = vmul.f32 %v1334_v60, %v2625_v22  ;;  %v1351_v50 = vmul.f32 %v1334_v60, %v2631_v32 }
 0x227   : > { %v1352_v0 = vmul.f32 %v1334_v60, %v2637_v53  ;;  %v1353_v21 = vmul.f32 %v1334_v60, %v2643_v16  ;;  %v1354_v56 = vmul.f32 %v1334_v60, %v2649_v37  ;;  %v1355_v18 = vmul.f32 %v1334_v60, %v2655_v46 }
 0x228   : > { %v1356_v55 = vmul.f32 %v1334_v60, %v2661_v4  ;;  %v1357_v52 = vmul.f32 %v1334_v60, %v2667_v13  ;;  %v1358_v25 = vmul.f32 %v1334_v60, %v2673_v24  ;;  %v1360_v1 = vmul.f32 %v1334_v60, %v2685_v45 }
 0x229   : > { %v1367_v22 = vmax.f32 %v1335_v15, 0.0  ;;  %v1368_v28 = vmax.f32 %v1336_v5, 0.0  ;;  %v1369_v34 = vmax.f32 %v1337_v2, 0.0  ;;  %v1370_v32 = vmax.f32 %v1338_v61, 0.0 }
 0x22a   : > { %v1371_v44 = vmax.f32 %v1339_v10, 0.0  ;;  %v1372_v53 = vmax.f32 %v1340_v31, 0.0  ;;  %v1373_v16 = vmax.f32 %v1341_v30, 0.0  ;;  %v1374_v54 = vmax.f32 %v1342_v43, 0.0 }
 0x22b   : > { %v1375_v37 = vmax.f32 %v1343_v59, 0.0  ;;  %v1376_v19 = vmax.f32 %v1344_v42, 0.0  ;;  %v1377_v46 = vmax.f32 %v1345_v26, 0.0  ;;  %v1378_v27 = vmax.f32 %v1346_v3, 0.0 }
 0x22c   : > { %v1379_v4 = vmax.f32 %v2719_v33, 0.0  ;;  %v1380_v13 = vmax.f32 %v2722_v7, 0.0  ;;  %v1391_v24 = vmax.f32 %v1359_v51, 0.0  ;;  %v1392_v14 = vmax.f32 %v1360_v1, 0.0 }
 0x22d   : > { %v1393_v45 = vmax.f32 %v1361_v8, 0.0  ;;  %v1394_v36 = vmax.f32 %v1362_v40, 0.0  ;;  %v1395_v49 = vmax.f32 %v1363_v29, 0.0  ;;  %v1396_v38 = vmax.f32 %v1364_v6, 0.0 }
 0x22e   : > { %v1397_v48 = vmax.f32 %v1365_v62, 0.0  ;;  %v1398_v20 = vmax.f32 %v1366_v47, 0.0  ;;  %v1381_v57 = vmax.f32 %v2725_v23, 0.0  ;;  %v2015_v41 = vpack.c.bf16 %v1368_v28, %v1367_v22 }
 0x22f   : > { %v2020_v35 = vpack.c.bf16 %v1370_v32, %v1369_v34  ;;  %v2025_v11 = vpack.c.bf16 %v1372_v53, %v1371_v44  ;;  %v1382_v58 = vmax.f32 %v1350_v12, 0.0  ;;  %v1383_v63 = vmax.f32 %v1351_v50, 0.0 }
 0x230   : > { %v1384_v17 = vmax.f32 %v1352_v0, 0.0  ;;  %v2030_v9 = vpack.c.bf16 %v1374_v54, %v1373_v16  ;;  %v1385_v39 = vmax.f32 %v1353_v21, 0.0  ;;  %v1386_v60 = vmax.f32 %v1354_v56, 0.0  ;;  %2016 = vst [vmem:[%s2744_s10] sm:$0xff] %v2015_v41  }
 0x231   : > { %v2035_v15 = vpack.c.bf16 %v1376_v19, %v1375_v37  ;;  %v2040_v5 = vpack.c.bf16 %v1378_v27, %v1377_v46  ;;  %2092 = vst [vmem:[%s2744_s10 + $0x8] sm:$0xff] %v2020_v35   ;;  %v2075_v2 = vpack.c.bf16 %v1392_v14, %v1391_v24  ;;  %v2080_v61 = vpack.c.bf16 %v1394_v36, %v1393_v45 }
 0x232   : > { %v2085_v10 = vpack.c.bf16 %v1396_v38, %v1395_v49  ;;  %v2090_v31 = vpack.c.bf16 %v1398_v20, %v1397_v48  ;;  %v1387_v30 = vmax.f32 %v1355_v18, 0.0  ;;  %v1388_v43 = vmax.f32 %v1356_v55, 0.0  ;;  %2093 = vst [vmem:[%s2744_s10 + $0x10] sm:$0xff] %v2025_v11  }
 0x233   : > { %v2045_v59 = vpack.c.bf16 %v1380_v13, %v1379_v4  ;;  %v1389_v42 = vmax.f32 %v1357_v52, 0.0  ;;  %v1390_v26 = vmax.f32 %v1358_v25, 0.0  ;;  %2094 = vst [vmem:[%s2744_s10 + $0x18] sm:$0xff] %v2030_v9   ;;  %v2050_v3 = vpack.c.bf16 %v1382_v58, %v1381_v57 }
 0x234   : > { %2095 = vst [vmem:[%s2744_s10 + $0x20] sm:$0xff] %v2035_v15   ;;  %v2055_v33 = vpack.c.bf16 %v1384_v17, %v1383_v63  ;;  %v2060_v7 = vpack.c.bf16 %v1386_v60, %v1385_v39  ;;  %v2065_v23 = vpack.c.bf16 %v1388_v43, %v1387_v30 }
 0x235   : > { %2096 = vst [vmem:[%s2744_s10 + $0x28] sm:$0xff] %v2040_v5   ;;  %v2070_v51 = vpack.c.bf16 %v1390_v26, %v1389_v42 }
 0x236   : > { %2097 = vst [vmem:[%s2744_s10 + $0x30] sm:$0xff] %v2045_v59  }
 0x237   : > { %2098 = vst [vmem:[%s2744_s10 + $0x38] sm:$0xff] %v2050_v3  }
 0x238   : > { %2099 = vst [vmem:[%s2744_s10 + $0x40] sm:$0xff] %v2055_v33  }
 0x239   : > { %2100 = vst [vmem:[%s2744_s10 + $0x48] sm:$0xff] %v2060_v7  }
 0x23a   : > { %2101 = vst [vmem:[%s2744_s10 + $0x50] sm:$0xff] %v2065_v23  }
 0x23b   : > { %2102 = vst [vmem:[%s2744_s10 + $0x58] sm:$0xff] %v2070_v51  }
 0x23c   : > { %2103 = vst [vmem:[%s2744_s10 + $0x60] sm:$0xff] %v2075_v2  }
 0x23d   : > { %2104 = vst [vmem:[%s2744_s10 + $0x68] sm:$0xff] %v2080_v61  }
 0x23e   : > { %2105 = vst [vmem:[%s2744_s10 + $0x70] sm:$0xff] %v2085_v10  }
 0x23f   : > { %2106 = vst [vmem:[%s2744_s10 + $0x78] sm:$0xff] %v2090_v31  }
 0x240 PF: > { %s13_s12 = sadd.s32 1, %s2127_s12  }
 0x241   : > { %p10_p4 = scmp.ge.s32.totalorder %s13_s12, 4  }
 0x243   :  { %12 = sbr.rel (!%p10_p4) target bundleno = 1 (0x1), region = 62 }

// kernel: erdnet_forward.19
= control target key start
LH: loop header
LB: loop body
LE: loop exit
PB: predicated region body
PF: predicated region fallthrough
CT: control target
= control target key end

     0   :  { %s3725_s12 = smov 0   ;;  %s4511_s0 = inlined_call_operand.vmem [shape: bf16[512,896], index: 0, kind: input, shape index: {}]   ;;  %s4512_s1 = inlined_call_operand.vmem [shape: bf16[896,128], index: 1, kind: input, shape index: {}]   ;;  %s4513_s2 = inlined_call_operand.vmem [shape: f32[1,128], index: 2, kind: input, shape index: {}]   ;;  %s4514_s3 = inlined_call_operand.vmem [shape: f32[512,128], index: 3, kind: output, shape index: {}]  }
   0x1 LB: > { %s2652_s13 = sadd.s32 4294967295, %s3703_s12   ;;  %p2656_p0 = scmp.ge.s32.totalorder %s3703_s12, 1  ;;  %s3703_s12 = sphi %s3725_s12, %s13_s12  }
   0x2   : > { %p139_p1 = scmp.lt.s32.totalorder %s3703_s12, 3 }
   0x4   : > { %p140_p2 = pnand %p2656_p0, %p139_p1 }
   0x5   : > { %s2657_s5 = sshll.u32 (!%p140_p2), %s2652_s13, 5 }
   0x6   : > { %143 = sbr.rel (%p140_p2) target bundleno = 652 (0x28c), region = 32  ;;  %p165_p3 = scmp.lt.s32.totalorder (!%p140_p2), %s2657_s5, 63 }
   0xb   : > { %v3486_v0 = vld [vmem:[%s4512_s1 + $0x38] sm:$0xff]  ;;  %v3485_v3 = vld [vmem:[%s4512_s1 + $0x30] sm:$0xff]  ;;  %v3484_v6 = vld [vmem:[%s4512_s1 + $0x28] sm:$0xff]  ;;  %s4516_s5 = smov (!%p165_p3, %s2657_s5), 63 }
   0xc   : > { %v3739_v1 = vld [vmem:[%s4512_s1 + $0xb8] sm:$0xff]  ;;  %1333 = vmatpush.bf16.msra.mxu0 %v3486_v0  ;;  %3535 = vmatpush.bf16.msra.mxu3 %v3486_v0  ;;  %v3754_v4 = vld [vmem:[%s4512_s1 + $0xb0] sm:$0xff]  ;;  %v3769_v7 = vld [vmem:[%s4512_s1 + $0xa8] sm:$0xff]  ;;  %s3559_s21 = smul.u32 28, %s4516_s5  ;;  %s2660_s9 = sshll.u32 %s4516_s5, 3 }
   0xd   : > { %v3744_v2 = vld [vmem:[%s4512_s1 + $0x78] sm:$0xff]  ;;  %1511 = vmatpush.bf16.msra.mxu2 %v3739_v1  ;;  %v3759_v5 = vld [vmem:[%s4512_s1 + $0x70] sm:$0xff]  ;;  %v3774_v8 = vld [vmem:[%s4512_s1 + $0x68] sm:$0xff]  ;;  %s4318_s13 = scalar_lea.vmem %s4514_s3, %s2660_s9 }
   0xe   : > { %1422 = vmatpush.bf16.msra.mxu1 %v3744_v2  ;;  %v3483_v9 = vld [vmem:[%s4512_s1 + $0x20] sm:$0xff]  ;;  %v3482_v12 = vld [vmem:[%s4512_s1 + $0x18] sm:$0xff]  ;;  %v3481_v15 = vld [vmem:[%s4512_s1 + $0x10] sm:$0xff]  ;;  %s3830_s30 = scalar_lea.vmem %s4511_s0, %s3559_s21 }
   0xf   : > { %v3784_v10 = vld [vmem:[%s4512_s1 + $0xa0] sm:$0xff]  ;;  %v3801_v13 = vld [vmem:[%s4512_s1 + $0x98] sm:$0xff]  ;;  %v3817_v16 = vld [vmem:[%s4512_s1 + $0x90] sm:$0xff] }
  0x10   : > { %1334 = vmatpush.bf16.msra.mxu0 %v3485_v3  ;;  %3536 = vmatpush.bf16.msra.mxu3 %v3485_v3  ;;  %v3789_v11 = vld [vmem:[%s4512_s1 + $0x60] sm:$0xff]  ;;  %v3806_v14 = vld [vmem:[%s4512_s1 + $0x58] sm:$0xff]  ;;  %v3822_v17 = vld [vmem:[%s4512_s1 + $0x50] sm:$0xff] }
  0x11   : > { %1512 = vmatpush.bf16.msra.mxu2 %v3754_v4  ;;  %v3480_v18 = vld [vmem:[%s4512_s1 + $0x8] sm:$0xff]  ;;  %v3479_v21 = vld [vmem:[%s4512_s1] sm:$0xff]  ;;  %v3370_v25 = vld [vmem:[%s3830_s30 + $0x18] sm:$0xf0] }
  0x12   : > { %1423 = vmatpush.bf16.msra.mxu1 %v3759_v5  ;;  %v3837_v19 = vld [vmem:[%s4512_s1 + $0x88] sm:$0xff]  ;;  %v3850_v22 = vld [vmem:[%s4512_s1 + $0x80] sm:$0xff]  ;;  %v3454_v27 = vld [vmem:[%s3830_s30 + $0x2b8] sm:$0xf0] }
  0x13   : > { %v3842_v20 = vld [vmem:[%s4512_s1 + $0x48] sm:$0xff]  ;;  %v3855_v23 = vld [vmem:[%s4512_s1 + $0x40] sm:$0xff]  ;;  %v3534_v32 = vld [vmem:[%s4512_s1 + $0x1b8] sm:$0xff] }
  0x14   : > { %1335 = vmatpush.bf16.msra.mxu0 %v3484_v6  ;;  %3537 = vmatpush.bf16.msra.mxu3 %v3484_v6  ;;  %v2663_v24 = vld [vmem:[%s3830_s30] sm:$0xf]  ;;  %v2671_v28 = vld [vmem:[%s3830_s30 + $0x8] sm:$0xf]  ;;  %v3371_v29 = vld [vmem:[%s3830_s30 + $0x20] sm:$0xf0] }
  0x15   : > { %1513 = vmatpush.bf16.msra.mxu2 %v3769_v7  ;;  %v2999_v26 = vld [vmem:[%s3830_s30 + $0x2a0] sm:$0xf]  ;;  %v3367_v30 = vld [vmem:[%s3830_s30 + $0x4] sm:$0xf]  ;;  %v2664_v33 = vor.u32 %v3370_v25, %v2663_v24  ;;  %v2672_v35 = vor.u32 %v3371_v29, %v2671_v28  ;;  %v3518_v37 = vld [vmem:[%s4512_s1 + $0x138] sm:$0xff] }
  0x16   : > { %1424 = vmatpush.bf16.msra.mxu1 %v3774_v8  ;;  %v2665_v31 = vld [vmem:[%s3830_s30 + $0x1c] sm:$0xf0]  ;;  %v3000_v34 = vor.u32 %v3454_v27, %v2999_v26  ;;  %v3526_v38 = vld [vmem:[%s4512_s1 + $0x178] sm:$0xff]  ;;  %v3533_v39 = vld [vmem:[%s4512_s1 + $0x1b0] sm:$0xff] }
  0x17   : > { %v2668_v36 = vor.u32 %v3367_v30, %v2665_v31  ;;  %v3517_v40 = vld [vmem:[%s4512_s1 + $0x130] sm:$0xff]  ;;  %v2691_v42 = vld [vmem:[%s3830_s30 + $0x38] sm:$0xf]  ;;  %v2699_v46 = vld [vmem:[%s3830_s30 + $0x40] sm:$0xf] }
  0x18   : > { %1336 = vmatpush.bf16.msra.mxu0 %v3483_v9  ;;  %3538 = vmatpush.bf16.msra.mxu3 %v3483_v9  ;;  %v3525_v41 = vld [vmem:[%s4512_s1 + $0x170] sm:$0xff]  ;;  %v3027_v44 = vld [vmem:[%s3830_s30 + $0x2d8] sm:$0xf]  ;;  %v3378_v47 = vld [vmem:[%s3830_s30 + $0x58] sm:$0xf0] }
  0x19   : > { %1514 = vmatpush.bf16.msra.mxu2 %v3784_v10  ;;  %v3377_v43 = vld [vmem:[%s3830_s30 + $0x50] sm:$0xf0]  ;;  %v3374_v48 = vld [vmem:[%s3830_s30 + $0x3c] sm:$0xf]  ;;  %v2693_v49 = vld [vmem:[%s3830_s30 + $0x54] sm:$0xf0]  ;;  %v2700_v52 = vor.u32 %v3378_v47, %v2699_v46 }
  0x1a   : > { %1425 = vmatpush.bf16.msra.mxu1 %v3789_v11  ;;  %v3461_v45 = vld [vmem:[%s3830_s30 + $0x2f0] sm:$0xf0]  ;;  %v2692_v50 = vor.u32 %v3377_v43, %v2691_v42  ;;  %v2696_v53 = vor.u32 %v3374_v48, %v2693_v49  ;;  %v3532_v54 = vld [vmem:[%s4512_s1 + $0x1a8] sm:$0xff]  ;;  %v2719_v57 = vld [vmem:[%s3830_s30 + $0x70] sm:$0xf] }
  0x1b   : > { %v3028_v51 = vor.u32 %v3461_v45, %v3027_v44  ;;  %v3516_v55 = vld [vmem:[%s4512_s1 + $0x128] sm:$0xff]  ;;  %v3055_v59 = vld [vmem:[%s3830_s30 + $0x310] sm:$0xf]  ;;  %v2727_v61 = vld [vmem:[%s3830_s30 + $0x78] sm:$0xf] }
  0x1c   : > { %1337 = vmatpush.bf16.msra.mxu0 %v3482_v12  ;;  %3539 = vmatpush.bf16.msra.mxu3 %v3482_v12  ;;  %v3524_v56 = vld [vmem:[%s4512_s1 + $0x168] sm:$0xff]  ;;  %v3385_v62 = vld [vmem:[%s3830_s30 + $0x90] sm:$0xf0]  ;;  %v2721_v0 = vld [vmem:[%s3830_s30 + $0x8c] sm:$0xf0] }
  0x1d   : > { %1515 = vmatpush.bf16.msra.mxu2 %v3801_v13  ;;  %v3384_v58 = vld [vmem:[%s3830_s30 + $0x88] sm:$0xf0]  ;;  %v3381_v63 = vld [vmem:[%s3830_s30 + $0x74] sm:$0xf]  ;;  %v2747_v9 = vld [vmem:[%s3830_s30 + $0xa8] sm:$0xf] }
  0x1e   : > { %1426 = vmatpush.bf16.msra.mxu1 %v3806_v14  ;;  %v3468_v60 = vld [vmem:[%s3830_s30 + $0x328] sm:$0xf0]  ;;  %v2724_v6 = vor.u32 %v3381_v63, %v2721_v0  ;;  %v3475_v12 = vld [vmem:[%s3830_s30 + $0x360] sm:$0xf0]  ;;  %v3398_v24 = vld [vmem:[%s3830_s30 + $0xf8] sm:$0xf0] }
  0x1f   : > { %v3056_v3 = vor.u32 %v3468_v60, %v3055_v59  ;;  %v3451_v25 = vld [vmem:[%s3830_s30 + $0x2a4] sm:$0xf]  ;;  %v3001_v26 = vld [vmem:[%s3830_s30 + $0x2bc] sm:$0xf0]  ;;  %v2783_v27 = vld [vmem:[%s3830_s30 + $0xe8] sm:$0xf] }
  0x20   : > { %1338 = vmatpush.bf16.msra.mxu0 %v3481_v15  ;;  %3540 = vmatpush.bf16.msra.mxu3 %v3481_v15  ;;  %v3392_v15 = vld [vmem:[%s3830_s30 + $0xc8] sm:$0xf0]  ;;  %v3399_v28 = vld [vmem:[%s3830_s30 + $0x100] sm:$0xf0]  ;;  %v2777_v30 = vld [vmem:[%s3830_s30 + $0xfc] sm:$0xf0] }
  0x21   : > { %1516 = vmatpush.bf16.msra.mxu2 %v3817_v16  ;;  %v3395_v29 = vld [vmem:[%s3830_s30 + $0xe4] sm:$0xf]  ;;  %v2805_v42 = vld [vmem:[%s3830_s30 + $0x134] sm:$0xf0]  ;;  %v2831_v47 = vld [vmem:[%s3830_s30 + $0x150] sm:$0xf] }
  0x22   : > { %1427 = vmatpush.bf16.msra.mxu1 %v3822_v17  ;;  %v3412_v48 = vld [vmem:[%s3830_s30 + $0x168] sm:$0xf0]  ;;  %v3465_v49 = vld [vmem:[%s3830_s30 + $0x314] sm:$0xf]  ;;  %v3510_v60 = vld [vmem:[%s4512_s1 + $0xf8] sm:$0xff] }
  0x23   : > { %v3529_v59 = vld [vmem:[%s4512_s1 + $0x190] sm:$0xff]  ;;  %v2859_v63 = vld [vmem:[%s3830_s30 + $0x188] sm:$0xf]  ;;  %v3419_v0 = vld [vmem:[%s3830_s30 + $0x1a0] sm:$0xf0] }
  0x24   : > { %1339 = vmatpush.bf16.msra.mxu0 %v3480_v18  ;;  %3541 = vmatpush.bf16.msra.mxu3 %v3480_v18  ;;  %v2749_v18 = vld [vmem:[%s3830_s30 + $0xc4] sm:$0xf0] }
  0x25   : > { %1517 = vmatpush.bf16.msra.mxu2 %v3837_v19 }
  0x26   : > { %1428 = vmatpush.bf16.msra.mxu1 %v3842_v20 }
  0x28   : > { %1340 = vmatpush.bf16.msra.mxu0 %v3479_v21  ;;  %3542 = vmatpush.bf16.msra.mxu3 %v3479_v21 }
  0x29   : > { %1518 = vmatpush.bf16.msra.mxu2 %v3850_v22 }
  0x2a   : > { %1429 = vmatpush.bf16.msra.mxu1 %v3855_v23 }
  0x2b   : > { %1341 = vmatmul.bf16.vlgmr.msra.gmra.mxu0 %v2664_v33  ;;  %1401 = vmatmul.bf16.vlgmr.msra.gmra.mxu3 %v3000_v34  ;;  %v2780_v33 = vor.u32 %v3395_v29, %v2777_v30  ;;  %v3522_v34 = vld [vmem:[%s4512_s1 + $0x158] sm:$0xff] }
  0x2c   : > { %3543 = vmatpush.bf16.msrb.mxu3 %v3744_v2  ;;  %1519 = vmatmul.bf16.vlgmr.msra.gmra.mxu2 %v2672_v35  ;;  %v2720_v2 = vor.u32 %v3384_v58, %v2719_v57  ;;  %v2803_v35 = vld [vmem:[%s3830_s30 + $0x118] sm:$0xf] }
  0x2d   : > { %1867 = vmatpush.bf16.msrb.mxu2 %v3534_v32  ;;  %1430 = vmatmul.bf16.vlgmr.msra.gmra.mxu1 %v2668_v36  ;;  %v3004_v32 = vor.u32 %v3451_v25, %v3001_v26  ;;  %v3405_v36 = vld [vmem:[%s3830_s30 + $0x130] sm:$0xf0]  ;;  %v3427_v25 = vld [vmem:[%s3830_s30 + $0x1e0] sm:$0xf0] }
  0x2e   : > { %1689 = vmatpush.bf16.msrb.mxu0 %v3518_v37  ;;  %1778 = vmatpush.bf16.msrb.mxu1 %v3526_v38  ;;  %v3458_v37 = vld [vmem:[%s3830_s30 + $0x2dc] sm:$0xf]  ;;  %v3029_v38 = vld [vmem:[%s3830_s30 + $0x2f4] sm:$0xf0]  ;;  %v2804_v43 = vor.u32 %v3405_v36, %v2803_v35  ;;  %v3423_v26 = vld [vmem:[%s3830_s30 + $0x1c4] sm:$0xf] }
  0x2f   : > { %v3032_v44 = vor.u32 %v3458_v37, %v3029_v38 }
  0x30   : > { %3544 = vmatpush.bf16.msrb.mxu3 %v3759_v5  ;;  %v2728_v5 = vor.u32 %v3385_v62, %v2727_v61  ;;  %v3513_v61 = vld [vmem:[%s4512_s1 + $0x110] sm:$0xff] }
  0x31   : > { %1868 = vmatpush.bf16.msrb.mxu2 %v3533_v39  ;;  %v2811_v39 = vld [vmem:[%s3830_s30 + $0x120] sm:$0xf]  ;;  %v3521_v62 = vld [vmem:[%s4512_s1 + $0x150] sm:$0xff] }
  0x32   : > { %1690 = vmatpush.bf16.msrb.mxu0 %v3517_v40  ;;  %1779 = vmatpush.bf16.msrb.mxu1 %v3525_v41  ;;  %v3406_v40 = vld [vmem:[%s3830_s30 + $0x138] sm:$0xf0] }
  0x33   : > { %v3402_v41 = vld [vmem:[%s3830_s30 + $0x11c] sm:$0xf]  ;;  %v2812_v45 = vor.u32 %v3406_v40, %v2811_v39 }
  0x34   : > { %3545 = vmatpush.bf16.msrb.mxu3 %v3774_v8  ;;  %v3531_v8 = vld [vmem:[%s4512_s1 + $0x1a0] sm:$0xff]  ;;  %v2808_v46 = vor.u32 %v3402_v41, %v2805_v42  ;;  %v2915_v42 = vld [vmem:[%s3830_s30 + $0x1f8] sm:$0xf] }
  0x35   : > { %1869 = vmatpush.bf16.msrb.mxu2 %v3532_v54  ;;  %v2833_v54 = vld [vmem:[%s3830_s30 + $0x16c] sm:$0xf0] }
  0x36   : > { %1691 = vmatpush.bf16.msrb.mxu0 %v3516_v55  ;;  %1780 = vmatpush.bf16.msrb.mxu1 %v3524_v56  ;;  %v2832_v55 = vor.u32 %v3412_v48, %v2831_v47  ;;  %v3462_v47 = vld [vmem:[%s3830_s30 + $0x2f8] sm:$0xf0] }
  0x37   : > { %v3434_v48 = vld [vmem:[%s3830_s30 + $0x218] sm:$0xf0] }
  0x38   : > { %3546 = vmatpush.bf16.msrb.mxu3 %v3789_v11  ;;  %v3083_v11 = vld [vmem:[%s3830_s30 + $0x348] sm:$0xf] }
  0x39   : > { %1870 = vmatpush.bf16.msrb.mxu2 %v3531_v8  ;;  %v3084_v21 = vor.u32 %v3475_v12, %v3083_v11  ;;  %v3420_v8 = vld [vmem:[%s3830_s30 + $0x1a8] sm:$0xf0]  ;;  %v2860_v11 = vor.u32 %v3419_v0, %v2859_v63  ;;  %v3511_v0 = vld [vmem:[%s4512_s1 + $0x100] sm:$0xff] }
  0x3a   : > { %v3504_v63 = vld [vmem:[%s4512_s1 + $0xc8] sm:$0xff] }
  0x3b   : > { %1346 = vmatmul.bf16.gmra.mxu0 %v2692_v50  ;;  %1406 = vmatmul.bf16.gmra.mxu3 %v3028_v51  ;;  %v3057_v50 = vld [vmem:[%s3830_s30 + $0x32c] sm:$0xf0]  ;;  %v2839_v51 = vld [vmem:[%s3830_s30 + $0x158] sm:$0xf] }
  0x3c   : > { %3547 = vmatpush.bf16.msrb.mxu3 %v3806_v14  ;;  %1524 = vmatmul.bf16.gmra.mxu2 %v2700_v52  ;;  %v2755_v14 = vld [vmem:[%s3830_s30 + $0xb0] sm:$0xf]  ;;  %v3413_v52 = vld [vmem:[%s3830_s30 + $0x170] sm:$0xf0]  ;;  %v3060_v56 = vor.u32 %v3465_v49, %v3057_v50  ;;  %v3430_v49 = vld [vmem:[%s3830_s30 + $0x1fc] sm:$0xf] }
  0x3d   : > { %1435 = vmatmul.bf16.gmra.mxu1 %v2696_v53  ;;  %v3409_v53 = vld [vmem:[%s3830_s30 + $0x154] sm:$0xf]  ;;  %v2840_v57 = vor.u32 %v3413_v52, %v2839_v51  ;;  %v2917_v50 = vld [vmem:[%s3830_s30 + $0x214] sm:$0xf0] }
  0x3e   : > { %v2836_v58 = vor.u32 %v3409_v53, %v2833_v54 }
  0x40   : > { %3548 = vmatpush.bf16.msrb.mxu3 %v3822_v17  ;;  %v3388_v17 = vld [vmem:[%s3830_s30 + $0xac] sm:$0xf] }
  0x44   : > { %3549 = vmatpush.bf16.msrb.mxu3 %v3842_v20 }
  0x48   : > { %3550 = vmatpush.bf16.msrb.mxu3 %v3855_v23  ;;  %v2756_v23 = vor.u32 %v3392_v15, %v2755_v14 }
  0x4b   : > { %1351 = vmatmul.bf16.gmra.mxu0 %v2720_v2  ;;  %1411 = vmatmul.bf16.gmra.mxu3 %v3056_v3  ;;  %v3509_v2 = vld [vmem:[%s4512_s1 + $0xf0] sm:$0xff]  ;;  %v3472_v3 = vld [vmem:[%s3830_s30 + $0x34c] sm:$0xf] }
  0x4c   : > { %3551 = vmatpush.bf16.msra.mxu3 %v3739_v1  ;;  %1529 = vmatmul.bf16.gmra.mxu2 %v2728_v5  ;;  %v3391_v1 = vld [vmem:[%s3830_s30 + $0xc0] sm:$0xf0]  ;;  %v3085_v5 = vld [vmem:[%s3830_s30 + $0x364] sm:$0xf0] }
  0x4d   : > { %1440 = vmatmul.bf16.gmra.mxu1 %v2724_v6  ;;  %v2748_v20 = vor.u32 %v3391_v1, %v2747_v9  ;;  %v2867_v6 = vld [vmem:[%s3830_s30 + $0x190] sm:$0xf]  ;;  %v3416_v9 = vld [vmem:[%s3830_s30 + $0x18c] sm:$0xf]  ;;  %v2861_v1 = vld [vmem:[%s3830_s30 + $0x1a4] sm:$0xf0]  ;;  %v3088_v12 = vor.u32 %v3472_v3, %v3085_v5 }
  0x4e   : > { %v2868_v14 = vor.u32 %v3420_v8, %v2867_v6  ;;  %v2864_v15 = vor.u32 %v3416_v9, %v2861_v1 }
  0x50   : > { %3552 = vmatpush.bf16.msra.mxu3 %v3754_v4  ;;  %v2752_v4 = vor.u32 %v3388_v17, %v2749_v18  ;;  %v3508_v17 = vld [vmem:[%s4512_s1 + $0xe8] sm:$0xff] }
  0x51   : > { %v3528_v18 = vld [vmem:[%s4512_s1 + $0x188] sm:$0xff] }
  0x54   : > { %3553 = vmatpush.bf16.msra.mxu3 %v3769_v7  ;;  %v3515_v7 = vld [vmem:[%s4512_s1 + $0x120] sm:$0xff] }
  0x55   : > { %1692 = vmatpush.bf16.msrb.mxu0 %v3515_v7  ;;  %v3520_v7 = vld [vmem:[%s4512_s1 + $0x148] sm:$0xff] }
  0x58   : > { %3554 = vmatpush.bf16.msra.mxu3 %v3784_v10  ;;  %v3523_v10 = vld [vmem:[%s4512_s1 + $0x160] sm:$0xff] }
  0x59   : > { %1781 = vmatpush.bf16.msrb.mxu1 %v3523_v10  ;;  %v2895_v10 = vld [vmem:[%s3830_s30 + $0x1c8] sm:$0xf] }
  0x5b   : > { %1356 = vmatmul.bf16.gmra.mxu0 %v2748_v20  ;;  %1416 = vmatmul.bf16.gmra.mxu3 %v3084_v21  ;;  %v2887_v20 = vld [vmem:[%s3830_s30 + $0x1c0] sm:$0xf]  ;;  %v3426_v21 = vld [vmem:[%s3830_s30 + $0x1d8] sm:$0xf0] }
  0x5c   : > { %3555 = vmatpush.bf16.msra.mxu3 %v3801_v13  ;;  %1534 = vmatmul.bf16.gmra.mxu2 %v2756_v23  ;;  %v2775_v13 = vld [vmem:[%s3830_s30 + $0xe0] sm:$0xf]  ;;  %v2888_v29 = vor.u32 %v3426_v21, %v2887_v20  ;;  %v3469_v20 = vld [vmem:[%s3830_s30 + $0x330] sm:$0xf0] }
  0x5d   : > { %1445 = vmatmul.bf16.gmra.mxu1 %v2752_v4  ;;  %v2776_v31 = vor.u32 %v3398_v24, %v2775_v13  ;;  %v3507_v23 = vld [vmem:[%s4512_s1 + $0xe0] sm:$0xff]  ;;  %v3512_v4 = vld [vmem:[%s4512_s1 + $0x108] sm:$0xff]  ;;  %v3441_v21 = vld [vmem:[%s3830_s30 + $0x250] sm:$0xf0] }
  0x5e   : > { %1782 = vmatpush.bf16.msrb.mxu1 %v3522_v34  ;;  %v3007_v13 = vld [vmem:[%s3830_s30 + $0x2a8] sm:$0xf]  ;;  %v3455_v24 = vld [vmem:[%s3830_s30 + $0x2c0] sm:$0xf0]  ;;  %v3506_v34 = vld [vmem:[%s4512_s1 + $0xd8] sm:$0xff] }
  0x5f   : > { %v3008_v30 = vor.u32 %v3455_v24, %v3007_v13 }
  0x60   : > { %3556 = vmatpush.bf16.msra.mxu3 %v3817_v16  ;;  %v2784_v16 = vor.u32 %v3399_v28, %v2783_v27  ;;  %v2889_v27 = vld [vmem:[%s3830_s30 + $0x1dc] sm:$0xf0] }
  0x61   : > { %v4027_v28 = vld [vmem:[%s4513_s2] ss:$0 sm:$0xff] }
  0x62   : > { %1783 = vmatpush.bf16.msrb.mxu1 %v3521_v62 }
  0x64   : > { %3557 = vmatpush.bf16.msra.mxu3 %v3837_v19  ;;  %v3530_v19 = vld [vmem:[%s4512_s1 + $0x198] sm:$0xff] }
  0x65   : > { %1871 = vmatpush.bf16.msrb.mxu2 %v3530_v19 }
  0x66   : > { %1784 = vmatpush.bf16.msrb.mxu1 %v3520_v7 }
  0x68   : > { %3558 = vmatpush.bf16.msra.mxu3 %v3850_v22  ;;  %v3514_v22 = vld [vmem:[%s4512_s1 + $0x118] sm:$0xff] }
  0x69   : > { %1693 = vmatpush.bf16.msrb.mxu0 %v3514_v22  ;;  %1872 = vmatpush.bf16.msrb.mxu2 %v3529_v59 }
  0x6b   : > { %1361 = vmatmul.bf16.gmra.mxu0 %v2776_v31  ;;  %1490 = vmatmul.bf16.vlgmr.msrb.gmra.mxu3 %v3004_v32  ;;  %v2896_v32 = vor.u32 %v3427_v25, %v2895_v10 }
  0x6c   : > { %1539 = vmatmul.bf16.gmra.mxu2 %v2784_v16  ;;  %1600 = vmatpush.bf16.msrb.mxu3 %v3510_v60  ;;  %v2892_v16 = vor.u32 %v3423_v26, %v2889_v27 }
  0x6d   : > { %1450 = vmatmul.bf16.gmra.mxu1 %v2780_v33  ;;  %1694 = vmatpush.bf16.msrb.mxu0 %v3513_v61  ;;  %v3527_v61 = vld [vmem:[%s4512_s1 + $0x180] sm:$0xff] }
  0x6e   : > { %1873 = vmatpush.bf16.msrb.mxu2 %v3528_v18  ;;  %v3063_v18 = vld [vmem:[%s3830_s30 + $0x318] sm:$0xf] }
  0x6f   : > { %v3064_v24 = vor.u32 %v3469_v20, %v3063_v18 }
  0x70   : > { %1601 = vmatpush.bf16.msrb.mxu3 %v3509_v2  ;;  %v3519_v2 = vld [vmem:[%s4512_s1 + $0x140] sm:$0xff] }
  0x71   : > { %1695 = vmatpush.bf16.msrb.mxu0 %v3512_v4  ;;  %1785 = vmatpush.bf16.msrb.mxu1 %v3519_v2  ;;  %v2945_v4 = vld [vmem:[%s3830_s30 + $0x24c] sm:$0xf0] }
  0x72   : > { %1874 = vmatpush.bf16.msrb.mxu2 %v3527_v61 }
  0x74   : > { %1602 = vmatpush.bf16.msrb.mxu3 %v3508_v17  ;;  %v2951_v17 = vld [vmem:[%s3830_s30 + $0x238] sm:$0xf] }
  0x75   : > { %1696 = vmatpush.bf16.msrb.mxu0 %v3511_v0  ;;  %v2952_v27 = vor.u32 %v3441_v21, %v2951_v17  ;;  %v2681_v17 = vld [vmem:[%s3830_s30 + $0x2c] sm:$0xf0] }
  0x78   : > { %1603 = vmatpush.bf16.msrb.mxu3 %v3507_v23  ;;  %v3437_v23 = vld [vmem:[%s3830_s30 + $0x234] sm:$0xf] }
  0x7b   : > { %1366 = vmatmul.bf16.gmra.mxu0 %v2804_v43  ;;  %1495 = vmatmul.bf16.gmra.mxu3 %v3032_v44  ;;  %v3433_v43 = vld [vmem:[%s3830_s30 + $0x210] sm:$0xf0] }
  0x7c   : > { %1544 = vmatmul.bf16.gmra.mxu2 %v2812_v45  ;;  %1604 = vmatpush.bf16.msrb.mxu3 %v3506_v34  ;;  %v3505_v44 = vld [vmem:[%s4512_s1 + $0xd0] sm:$0xff]  ;;  %v2923_v45 = vld [vmem:[%s3830_s30 + $0x200] sm:$0xf]  ;;  %v2916_v53 = vor.u32 %v3433_v43, %v2915_v42  ;;  %v3476_v43 = vld [vmem:[%s3830_s30 + $0x368] sm:$0xf0] }
  0x7d   : > { %1455 = vmatmul.bf16.gmra.mxu1 %v2808_v46  ;;  %v3035_v46 = vld [vmem:[%s3830_s30 + $0x2e0] sm:$0xf]  ;;  %v3091_v42 = vld [vmem:[%s3830_s30 + $0x350] sm:$0xf] }
  0x7e   : > { %v3036_v54 = vor.u32 %v3462_v47, %v3035_v46  ;;  %v2973_v46 = vld [vmem:[%s3830_s30 + $0x284] sm:$0xf0] }
  0x80   : > { %1605 = vmatpush.bf16.msrb.mxu3 %v3505_v44  ;;  %v3448_v44 = vld [vmem:[%s3830_s30 + $0x288] sm:$0xf0] }
  0x84   : > { %1606 = vmatpush.bf16.msrb.mxu3 %v3504_v63 }
  0x8b   : > { %1371 = vmatmul.bf16.gmra.mxu0 %v2832_v55  ;;  %1500 = vmatmul.bf16.gmra.mxu3 %v3060_v56 }
  0x8c   : > { %1549 = vmatmul.bf16.gmra.mxu2 %v2840_v57  ;;  %v2924_v57 = vor.u32 %v3434_v48, %v2923_v45  ;;  %v3444_v45 = vld [vmem:[%s3830_s30 + $0x26c] sm:$0xf] }
  0x8d   : > { %1460 = vmatmul.bf16.gmra.mxu1 %v2836_v58  ;;  %v2920_v58 = vor.u32 %v3430_v49, %v2917_v50  ;;  %v3092_v50 = vor.u32 %v3476_v43, %v3091_v42  ;;  %v2707_v42 = vld [vmem:[%s3830_s30 + $0x48] sm:$0xf]  ;;  %v3379_v43 = vld [vmem:[%s3830_s30 + $0x60] sm:$0xf0] }
  0x9b   : > { %1376 = vmatmul.bf16.gmra.mxu0 %v2860_v11  ;;  %1505 = vmatmul.bf16.gmra.mxu3 %v3088_v12  ;;  %v2943_v12 = vld [vmem:[%s3830_s30 + $0x230] sm:$0xf] }
  0x9c   : > { %1554 = vmatmul.bf16.gmra.mxu2 %v2868_v14  ;;  %v3440_v14 = vld [vmem:[%s3830_s30 + $0x248] sm:$0xf0] }
  0x9d   : > { %1465 = vmatmul.bf16.gmra.mxu1 %v2864_v15  ;;  %v3503_v15 = vld [vmem:[%s4512_s1 + $0xc0] sm:$0xff]  ;;  %v2944_v13 = vor.u32 %v3440_v14, %v2943_v12  ;;  %v2687_v12 = vld [vmem:[%s3830_s30 + $0x18] sm:$0xf]  ;;  %v3373_v14 = vld [vmem:[%s3830_s30 + $0x30] sm:$0xf0] }
  0x9e   : > { %1607 = vmatpush.bf16.msrb.mxu3 %v3503_v15  ;;  %v3369_v15 = vld [vmem:[%s3830_s30 + $0x14] sm:$0xf] }
  0xa8   : > { %v1342_v31 = vpop.f32.mrf.mxu0 }
  0xa9   : > { %v1343_v33 = vadd.f32 %v4027_v28, %v1342_v31 }
  0xaa   : > { %v1431_v19 = vpop.f32.mrf.mxu1 }
  0xab   : > { %v1432_v22 = vadd.f32 %v1431_v19, %v1343_v33  ;;  %1381 = vmatmul.bf16.gmra.mxu0 %v2888_v29  ;;  %1579 = vmatmul.bf16.vlgmr.msra.gmra.mxu3 %v3008_v30  ;;  %v2948_v29 = vor.u32 %v3437_v23, %v2945_v4 }
  0xac   : > { %1559 = vmatmul.bf16.gmra.mxu2 %v2896_v32 }
  0xad   : > { %1470 = vmatmul.bf16.gmra.mxu1 %v2892_v16 }
  0xae   : > { %v4033_v35 = vpop.f32.mrf.mxu3 }
  0xaf   : > { %v1520_v36 = vpop.f32.mrf.mxu2 }
  0xb0   : > { %v4035_v37 = vadd.f32 %v1520_v36, %v1432_v22  ;;  %v1344_v38 = vpop.f32.mrf.mxu0 }
  0xb1   : > { %v1345_v39 = vadd.f32 %v4027_v28, %v1344_v38 }
  0xb2   : > { %v1433_v40 = vpop.f32.mrf.mxu1 }
  0xb3   : > { %v1434_v41 = vadd.f32 %v1433_v40, %v1345_v39  ;;  %v2971_v39 = vld [vmem:[%s3830_s30 + $0x268] sm:$0xf]  ;;  %v3447_v40 = vld [vmem:[%s3830_s30 + $0x280] sm:$0xf0] }
  0xb4   : > { %v2972_v49 = vor.u32 %v3447_v40, %v2971_v39  ;;  %v3375_v40 = vld [vmem:[%s3830_s30 + $0x44] sm:$0xf] }
  0xb6   : > { %v4049_v51 = vpop.f32.mrf.mxu3 }
  0xb7   : > { %v1522_v52 = vpop.f32.mrf.mxu2 }
  0xb8   : > { %v4051_v55 = vadd.f32 %v1522_v52, %v1434_v41  ;;  %v1347_v56 = vpop.f32.mrf.mxu0  ;;  %v2979_v41 = vld [vmem:[%s3830_s30 + $0x270] sm:$0xf] }
  0xb9   : > { %v1348_v59 = vadd.f32 %v4027_v28, %v1347_v56  ;;  %v2976_v56 = vor.u32 %v3444_v45, %v2973_v46  ;;  %v3380_v45 = vld [vmem:[%s3830_s30 + $0x68] sm:$0xf0] }
  0xba   : > { %v1436_v60 = vpop.f32.mrf.mxu1  ;;  %v3376_v46 = vld [vmem:[%s3830_s30 + $0x4c] sm:$0xf] }
  0xbb   : > { %v1437_v62 = vadd.f32 %v1436_v60, %v1348_v59  ;;  %1386 = vmatmul.bf16.gmra.mxu0 %v2916_v53  ;;  %1584 = vmatmul.bf16.gmra.mxu3 %v3036_v54  ;;  %v2980_v54 = vor.u32 %v3448_v44, %v2979_v41  ;;  %v2701_v41 = vld [vmem:[%s3830_s30 + $0x5c] sm:$0xf0]  ;;  %v2715_v44 = vld [vmem:[%s3830_s30 + $0x50] sm:$0xf] }
  0xbc   : > { %1564 = vmatmul.bf16.gmra.mxu2 %v2924_v57 }
  0xbd   : > { %1475 = vmatmul.bf16.gmra.mxu1 %v2920_v58 }
  0xbe   : > { %v4066_v3 = vpop.f32.mrf.mxu3 }
  0xbf   : > { %v1525_v5 = vpop.f32.mrf.mxu2 }
  0xc0   : > { %v4068_v6 = vadd.f32 %v1525_v5, %v1437_v62  ;;  %v1349_v8 = vpop.f32.mrf.mxu0 }
  0xc1   : > { %v1350_v9 = vadd.f32 %v4027_v28, %v1349_v8  ;;  %v3368_v8 = vld [vmem:[%s3830_s30 + $0xc] sm:$0xf] }
  0xc2   : > { %v1438_v1 = vpop.f32.mrf.mxu1 }
  0xc3   : > { %v1439_v11 = vadd.f32 %v1438_v1, %v1350_v9  ;;  %v2673_v9 = vld [vmem:[%s3830_s30 + $0x24] sm:$0xf0]  ;;  %v2679_v1 = vld [vmem:[%s3830_s30 + $0x10] sm:$0xf] }
  0xc4   : > { %v2676_v21 = vor.u32 %v3368_v8, %v2673_v9 }
  0xc6   : > { %v4082_v7 = vpop.f32.mrf.mxu3 }
  0xc7   : > { %v1527_v10 = vpop.f32.mrf.mxu2 }
  0xc8   : > { %v4084_v25 = vadd.f32 %v1527_v10, %v1439_v11  ;;  %v1352_v26 = vpop.f32.mrf.mxu0  ;;  %v3372_v11 = vld [vmem:[%s3830_s30 + $0x28] sm:$0xf0] }
  0xc9   : > { %v1353_v30 = vadd.f32 %v4027_v28, %v1352_v26  ;;  %v2680_v23 = vor.u32 %v3372_v11, %v2679_v1 }
  0xca   : > { %v1441_v31 = vpop.f32.mrf.mxu1 }
  0xcb   : > { %v1442_v32 = vadd.f32 %v1441_v31, %v1353_v30  ;;  %1391 = vmatmul.bf16.gmra.mxu0 %v2944_v13  ;;  %1589 = vmatmul.bf16.gmra.mxu3 %v3064_v24  ;;  %v2688_v13 = vor.u32 %v3373_v14, %v2687_v12  ;;  %v2684_v24 = vor.u32 %v3369_v15, %v2681_v17  ;;  %v3382_v17 = vld [vmem:[%s3830_s30 + $0x7c] sm:$0xf] }
  0xcc   : > { %1569 = vmatmul.bf16.gmra.mxu2 %v2952_v27  ;;  %v1403_v30 = vadd.f32 %v4027_v28, %v4033_v35  ;;  %v1405_v35 = vadd.f32 %v4027_v28, %v4049_v51 }
  0xcd   : > { %1480 = vmatmul.bf16.gmra.mxu1 %v2948_v29 }
  0xce   : > { %v4087_v16 = vpop.f32.mrf.mxu3 }
  0xcf   : > { %v1530_v33 = vpop.f32.mrf.mxu2 }
  0xd0   : > { %v4089_v19 = vadd.f32 %v1530_v33, %v1442_v32  ;;  %v1354_v22 = vpop.f32.mrf.mxu0 }
  0xd1   : > { %v1355_v34 = vadd.f32 %v4027_v28, %v1354_v22 }
  0xd2   : > { %v1443_v36 = vpop.f32.mrf.mxu1 }
  0xd3   : > { %v1444_v38 = vadd.f32 %v1443_v36, %v1355_v34 }
  0xd6   : > { %v4100_v47 = vpop.f32.mrf.mxu3 }
  0xd7   : > { %v1532_v48 = vpop.f32.mrf.mxu2 }
  0xd8   : > { %v4102_v52 = vadd.f32 %v1532_v48, %v1444_v38  ;;  %v1357_v53 = vpop.f32.mrf.mxu0  ;;  %v2709_v48 = vld [vmem:[%s3830_s30 + $0x64] sm:$0xf0] }
  0xd9   : > { %v1358_v57 = vadd.f32 %v4027_v28, %v1357_v53 }
  0xda   : > { %v1446_v58 = vpop.f32.mrf.mxu1 }
  0xdb   : > { %v1447_v59 = vadd.f32 %v1446_v58, %v1358_v57  ;;  %1396 = vmatmul.bf16.gmra.mxu0 %v2972_v49  ;;  %1594 = vmatmul.bf16.gmra.mxu3 %v3092_v50 }
  0xdc   : > { %1574 = vmatmul.bf16.gmra.mxu2 %v2980_v54  ;;  %v2704_v54 = vor.u32 %v3375_v40, %v2701_v41 }
  0xdd   : > { %1485 = vmatmul.bf16.gmra.mxu1 %v2976_v56  ;;  %v2708_v56 = vor.u32 %v3379_v43, %v2707_v42  ;;  %v1413_v42 = vadd.f32 %v4027_v28, %v4087_v16  ;;  %v1415_v16 = vadd.f32 %v4027_v28, %v4100_v47 }
  0xde   : > { %v4105_v60 = vpop.f32.mrf.mxu3 }
  0xdf   : > { %v1535_v61 = vpop.f32.mrf.mxu2 }
  0xe0   : > { %v4107_v62 = vadd.f32 %v1535_v61, %v1447_v59  ;;  %v1359_v63 = vpop.f32.mrf.mxu0  ;;  %v2716_v59 = vor.u32 %v3380_v45, %v2715_v44  ;;  %v2712_v61 = vor.u32 %v3376_v46, %v2709_v48 }
  0xe1   : > { %v1360_v0 = vadd.f32 %v4027_v28, %v1359_v63 }
  0xe2   : > { %v1448_v2 = vpop.f32.mrf.mxu1 }
  0xe3   : > { %v1449_v5 = vadd.f32 %v1448_v2, %v1360_v0  ;;  %v1408_v2 = vadd.f32 %v4027_v28, %v4066_v3  ;;  %v1410_v3 = vadd.f32 %v4027_v28, %v4082_v7 }
  0xe6   : > { %v4118_v18 = vpop.f32.mrf.mxu3 }
  0xe7   : > { %v1537_v20 = vpop.f32.mrf.mxu2 }
  0xe8   : > { %v4120_v4 = vadd.f32 %v1537_v20, %v1449_v5  ;;  %v1362_v10 = vpop.f32.mrf.mxu0  ;;  %v2729_v20 = vld [vmem:[%s3830_s30 + $0x94] sm:$0xf0] }
  0xe9   : > { %v1363_v26 = vadd.f32 %v4027_v28, %v1362_v10  ;;  %v2743_v10 = vld [vmem:[%s3830_s30 + $0x88] sm:$0xf] }
  0xea   : > { %v1451_v27 = vpop.f32.mrf.mxu1 }
  0xeb   : > { %v1452_v29 = vadd.f32 %v1451_v27, %v1363_v26  ;;  %1608 = vmatmul.bf16.vlgmr.msrb.gmra.mxu3 %v2676_v21  ;;  %1697 = vmatmul.bf16.vlgmr.msrb.gmra.mxu0 %v2680_v23  ;;  %v2735_v21 = vld [vmem:[%s3830_s30 + $0x80] sm:$0xf]  ;;  %v3386_v23 = vld [vmem:[%s3830_s30 + $0x98] sm:$0xf0] }
  0xec   : > { %1875 = vmatmul.bf16.vlgmr.msrb.gmra.mxu2 %v2688_v13  ;;  %v3387_v13 = vld [vmem:[%s3830_s30 + $0xa0] sm:$0xf0]  ;;  %v2737_v26 = vld [vmem:[%s3830_s30 + $0x9c] sm:$0xf0] }
  0xed   : > { %1786 = vmatmul.bf16.vlgmr.msrb.gmra.mxu1 %v2684_v24  ;;  %v3383_v24 = vld [vmem:[%s3830_s30 + $0x84] sm:$0xf] }
  0xee   : > { %v1491_v31 = vpop.f32.mrf.mxu3 }
  0xef   : > { %v4125_v32 = vadd.f32 %v1491_v31, %v1403_v30  ;;  %v1540_v33 = vpop.f32.mrf.mxu2  ;;  %v2732_v31 = vor.u32 %v3382_v17, %v2729_v20 }
  0xf0   : > { %v4127_v22 = vadd.f32 %v1540_v33, %v1452_v29  ;;  %v1364_v34 = vpop.f32.mrf.mxu0  ;;  %v2736_v33 = vor.u32 %v3386_v23, %v2735_v21 }
  0xf1   : > { %v1365_v36 = vadd.f32 %v4027_v28, %v1364_v34 }
  0xf2   : > { %v1453_v38 = vpop.f32.mrf.mxu1 }
  0xf3   : > { %v1454_v39 = vadd.f32 %v1453_v38, %v1365_v36  ;;  %v2744_v38 = vor.u32 %v3387_v13, %v2743_v10  ;;  %v1418_v10 = vadd.f32 %v4027_v28, %v4105_v60  ;;  %v1420_v60 = vadd.f32 %v4027_v28, %v4118_v18 }
  0xf6   : > { %v1493_v49 = vpop.f32.mrf.mxu3 }
  0xf7   : > { %v4140_v50 = vadd.f32 %v1493_v49, %v1405_v35  ;;  %v1542_v53 = vpop.f32.mrf.mxu2 }
  0xf8   : > { %v4142_v57 = vadd.f32 %v1542_v53, %v1454_v39  ;;  %v1367_v58 = vpop.f32.mrf.mxu0  ;;  %v2740_v39 = vor.u32 %v3383_v24, %v2737_v26 }
  0xf9   : > { %v1368_v63 = vadd.f32 %v4027_v28, %v1367_v58  ;;  %v2763_v58 = vld [vmem:[%s3830_s30 + $0xb8] sm:$0xf] }
  0xfa   : > { %v1456_v0 = vpop.f32.mrf.mxu1 }
  0xfb   : > { %v1457_v51 = vadd.f32 %v1456_v0, %v1368_v63  ;;  %1613 = vmatmul.bf16.gmra.mxu3 %v2704_v54  ;;  %1702 = vmatmul.bf16.gmra.mxu0 %v2708_v56  ;;  %v3389_v54 = vld [vmem:[%s3830_s30 + $0xb4] sm:$0xf]  ;;  %v2757_v56 = vld [vmem:[%s3830_s30 + $0xcc] sm:$0xf0]  ;;  %v3394_v63 = vld [vmem:[%s3830_s30 + $0xd8] sm:$0xf0] }
  0xfc   : > { %1880 = vmatmul.bf16.gmra.mxu2 %v2716_v59  ;;  %v3393_v59 = vld [vmem:[%s3830_s30 + $0xd0] sm:$0xf0]  ;;  %v3390_v0 = vld [vmem:[%s3830_s30 + $0xbc] sm:$0xf] }
  0xfd   : > { %1791 = vmatmul.bf16.gmra.mxu1 %v2712_v61  ;;  %v2771_v61 = vld [vmem:[%s3830_s30 + $0xc0] sm:$0xf] }
  0xfe   : > { %v1496_v5 = vpop.f32.mrf.mxu3  ;;  %v2772_v17 = vor.u32 %v3394_v63, %v2771_v61 }
  0xff   : > { %v4147_v8 = vadd.f32 %v1496_v5, %v1408_v2  ;;  %v1545_v9 = vpop.f32.mrf.mxu2 }
 0x100   : > { %v4149_v1 = vadd.f32 %v1545_v9, %v1457_v51  ;;  %v1369_v11 = vpop.f32.mrf.mxu0  ;;  %v2765_v51 = vld [vmem:[%s3830_s30 + $0xd4] sm:$0xf0] }
 0x101   : > { %v1370_v12 = vadd.f32 %v4027_v28, %v1369_v11  ;;  %v2760_v11 = vor.u32 %v3389_v54, %v2757_v56  ;;  %v2768_v20 = vor.u32 %v3390_v0, %v2765_v51 }
 0x102   : > { %v1458_v14 = vpop.f32.mrf.mxu1 }
 0x103   : > { %v1459_v15 = vadd.f32 %v1458_v14, %v1370_v12  ;;  %v2764_v12 = vor.u32 %v3393_v59, %v2763_v58 }
 0x106   : > { %v1498_v27 = vpop.f32.mrf.mxu3 }
 0x107   : > { %v4162_v29 = vadd.f32 %v1498_v27, %v1410_v3  ;;  %v1547_v30 = vpop.f32.mrf.mxu2 }
 0x108   : > { %v4164_v34 = vadd.f32 %v1547_v30, %v1459_v15  ;;  %v1372_v36 = vpop.f32.mrf.mxu0 }
 0x109   : > { %v1373_v40 = vadd.f32 %v4027_v28, %v1372_v36  ;;  %v3396_v36 = vld [vmem:[%s3830_s30 + $0xec] sm:$0xf] }
 0x10a   : > { %v1461_v41 = vpop.f32.mrf.mxu1 }
 0x10b   : > { %v1462_v7 = vadd.f32 %v1461_v41, %v1373_v40  ;;  %1618 = vmatmul.bf16.gmra.mxu3 %v2732_v31  ;;  %1707 = vmatmul.bf16.gmra.mxu0 %v2736_v33  ;;  %v3400_v40 = vld [vmem:[%s3830_s30 + $0x108] sm:$0xf0]  ;;  %v2799_v41 = vld [vmem:[%s3830_s30 + $0xf8] sm:$0xf] }
 0x10c   : > { %1885 = vmatmul.bf16.gmra.mxu2 %v2744_v38  ;;  %v2785_v38 = vld [vmem:[%s3830_s30 + $0x104] sm:$0xf0] }
 0x10d   : > { %1796 = vmatmul.bf16.gmra.mxu1 %v2740_v39  ;;  %v2791_v39 = vld [vmem:[%s3830_s30 + $0xf0] sm:$0xf] }
 0x10e   : > { %v1501_v43 = vpop.f32.mrf.mxu3 }
 0x10f   : > { %v4169_v44 = vadd.f32 %v1501_v43, %v1413_v42  ;;  %v1550_v35 = vpop.f32.mrf.mxu2  ;;  %v3397_v42 = vld [vmem:[%s3830_s30 + $0xf4] sm:$0xf]  ;;  %v2793_v43 = vld [vmem:[%s3830_s30 + $0x10c] sm:$0xf0] }
 0x110   : > { %v4171_v45 = vadd.f32 %v1550_v35, %v1462_v7  ;;  %v1374_v46 = vpop.f32.mrf.mxu0  ;;  %v3401_v7 = vld [vmem:[%s3830_s30 + $0x110] sm:$0xf0]  ;;  %v2796_v59 = vor.u32 %v3397_v42, %v2793_v43 }
 0x111   : > { %v1375_v48 = vadd.f32 %v4027_v28, %v1374_v46  ;;  %v2800_v58 = vor.u32 %v3401_v7, %v2799_v41 }
 0x112   : > { %v1463_v49 = vpop.f32.mrf.mxu1 }
 0x113   : > { %v1464_v53 = vadd.f32 %v1463_v49, %v1375_v48  ;;  %v2788_v49 = vor.u32 %v3396_v36, %v2785_v38 }
 0x116   : > { %v1503_v2 = vpop.f32.mrf.mxu3 }
 0x117   : > { %v4184_v5 = vadd.f32 %v1503_v2, %v1415_v16  ;;  %v1552_v9 = vpop.f32.mrf.mxu2 }
 0x118   : > { %v4186_v14 = vadd.f32 %v1552_v9, %v1464_v53  ;;  %v1377_v15 = vpop.f32.mrf.mxu0  ;;  %v2792_v53 = vor.u32 %v3400_v40, %v2791_v39 }
 0x119   : > { %v1378_v21 = vadd.f32 %v4027_v28, %v1377_v15 }
 0x11a   : > { %v1466_v23 = vpop.f32.mrf.mxu1 }
 0x11b   : > { %v1467_v47 = vadd.f32 %v1466_v23, %v1378_v21  ;;  %1623 = vmatmul.bf16.gmra.mxu3 %v2760_v11  ;;  %1712 = vmatmul.bf16.gmra.mxu0 %v2764_v12  ;;  %v2819_v21 = vld [vmem:[%s3830_s30 + $0x128] sm:$0xf]  ;;  %v3407_v23 = vld [vmem:[%s3830_s30 + $0x140] sm:$0xf0] }
 0x11c   : > { %1890 = vmatmul.bf16.gmra.mxu2 %v2772_v17  ;;  %v3403_v17 = vld [vmem:[%s3830_s30 + $0x124] sm:$0xf] }
 0x11d   : > { %1801 = vmatmul.bf16.gmra.mxu1 %v2768_v20  ;;  %v2813_v20 = vld [vmem:[%s3830_s30 + $0x13c] sm:$0xf0] }
 0x11e   : > { %v1506_v3 = vpop.f32.mrf.mxu3 }
 0x11f   : > { %v4191_v13 = vadd.f32 %v1506_v3, %v1418_v10  ;;  %v1555_v24 = vpop.f32.mrf.mxu2  ;;  %v3408_v10 = vld [vmem:[%s3830_s30 + $0x148] sm:$0xf0] }
 0x120   : > { %v4193_v26 = vadd.f32 %v1555_v24, %v1467_v47  ;;  %v1379_v27 = vpop.f32.mrf.mxu0  ;;  %v2827_v47 = vld [vmem:[%s3830_s30 + $0x130] sm:$0xf]  ;;  %v3404_v3 = vld [vmem:[%s3830_s30 + $0x12c] sm:$0xf]  ;;  %v2821_v24 = vld [vmem:[%s3830_s30 + $0x144] sm:$0xf0] }
 0x121   : > { %v1380_v30 = vadd.f32 %v4027_v28, %v1379_v27  ;;  %v2828_v39 = vor.u32 %v3408_v10, %v2827_v47  ;;  %v2824_v40 = vor.u32 %v3404_v3, %v2821_v24 }
 0x122   : > { %v1468_v31 = vpop.f32.mrf.mxu1 }
 0x123   : > { %v1469_v33 = vadd.f32 %v1468_v31, %v1380_v30  ;;  %v2816_v31 = vor.u32 %v3403_v17, %v2813_v20 }
 0x126   : > { %v1508_v35 = vpop.f32.mrf.mxu3 }
 0x127   : > { %v4206_v46 = vadd.f32 %v1508_v35, %v1420_v60  ;;  %v1557_v48 = vpop.f32.mrf.mxu2 }
 0x128   : > { %v4208_v54 = vadd.f32 %v1557_v48, %v1469_v33  ;;  %v1382_v56 = vpop.f32.mrf.mxu0  ;;  %v2820_v33 = vor.u32 %v3407_v23, %v2819_v21 }
 0x129   : > { %v1383_v61 = vadd.f32 %v4027_v28, %v1382_v56 }
 0x12a   : > { %v1471_v16 = vpop.f32.mrf.mxu1 }
 0x12b   : > { %v1472_v18 = vadd.f32 %v1471_v16, %v1383_v61  ;;  %1628 = vmatmul.bf16.gmra.mxu3 %v2788_v49  ;;  %1717 = vmatmul.bf16.gmra.mxu0 %v2792_v53  ;;  %v2847_v61 = vld [vmem:[%s3830_s30 + $0x160] sm:$0xf]  ;;  %v3414_v16 = vld [vmem:[%s3830_s30 + $0x178] sm:$0xf0] }
 0x12c   : > { %1895 = vmatmul.bf16.gmra.mxu2 %v2800_v58  ;;  %v3410_v58 = vld [vmem:[%s3830_s30 + $0x15c] sm:$0xf]  ;;  %v2848_v17 = vor.u32 %v3414_v16, %v2847_v61 }
 0x12d   : > { %1806 = vmatmul.bf16.gmra.mxu1 %v2796_v59  ;;  %v2841_v59 = vld [vmem:[%s3830_s30 + $0x174] sm:$0xf0] }
 0x12e   : > { %v1580_v63 = vpop.f32.mrf.mxu3 }
 0x12f   : > { %v1560_v0 = vpop.f32.mrf.mxu2  ;;  %v4212_v51 = vadd.f32 %v1580_v63, %v4125_v32  ;;  %v3415_v63 = vld [vmem:[%s3830_s30 + $0x180] sm:$0xf0] }
 0x130   : > { %v4214_v2 = vadd.f32 %v1560_v0, %v1472_v18  ;;  %v1384_v9 = vpop.f32.mrf.mxu0  ;;  %v2855_v18 = vld [vmem:[%s3830_s30 + $0x168] sm:$0xf]  ;;  %v3411_v0 = vld [vmem:[%s3830_s30 + $0x164] sm:$0xf] }
 0x131   : > { %v1385_v11 = vadd.f32 %v4027_v28, %v1384_v9  ;;  %v2849_v9 = vld [vmem:[%s3830_s30 + $0x17c] sm:$0xf0]  ;;  %v2856_v23 = vor.u32 %v3415_v63, %v2855_v18 }
 0x132   : > { %v1473_v12 = vpop.f32.mrf.mxu1  ;;  %v2852_v47 = vor.u32 %v3411_v0, %v2849_v9 }
 0x133   : > { %v1474_v15 = vadd.f32 %v1473_v12, %v1385_v11 }
 0x136   : > { %v1582_v27 = vpop.f32.mrf.mxu3 }
 0x137   : > { %v1562_v30 = vpop.f32.mrf.mxu2  ;;  %v4226_v32 = vadd.f32 %v1582_v27, %v4140_v50 }
 0x138   : > { %v4228_v36 = vadd.f32 %v1562_v30, %v1474_v15  ;;  %v1387_v38 = vpop.f32.mrf.mxu0  ;;  %v2844_v15 = vor.u32 %v3410_v58, %v2841_v59 }
 0x139   : > { %v1388_v41 = vadd.f32 %v4027_v28, %v1387_v38 }
 0x13a   : > { %v1476_v60 = vpop.f32.mrf.mxu1 }
 0x13b   : > { %v1477_v7 = vadd.f32 %v1476_v60, %v1388_v41  ;;  %1633 = vmatmul.bf16.gmra.mxu3 %v2816_v31  ;;  %1722 = vmatmul.bf16.gmra.mxu0 %v2820_v33  ;;  %v3417_v41 = vld [vmem:[%s3830_s30 + $0x194] sm:$0xf]  ;;  %v2869_v60 = vld [vmem:[%s3830_s30 + $0x1ac] sm:$0xf0] }
 0x13c   : > { %1900 = vmatmul.bf16.gmra.mxu2 %v2828_v39  ;;  %v2872_v59 = vor.u32 %v3417_v41, %v2869_v60  ;;  %v2905_v41 = vld [vmem:[%s3830_s30 + $0x1ec] sm:$0xf0] }
 0x13d   : > { %1811 = vmatmul.bf16.gmra.mxu1 %v2824_v40 }
 0x13e   : > { %v1585_v50 = vpop.f32.mrf.mxu3 }
 0x13f   : > { %v1565_v42 = vpop.f32.mrf.mxu2  ;;  %v4232_v43 = vadd.f32 %v1585_v50, %v4147_v8  ;;  %v3421_v50 = vld [vmem:[%s3830_s30 + $0x1b0] sm:$0xf0] }
 0x140   : > { %v4234_v35 = vadd.f32 %v1565_v42, %v1477_v7  ;;  %v1389_v48 = vpop.f32.mrf.mxu0  ;;  %v2875_v7 = vld [vmem:[%s3830_s30 + $0x198] sm:$0xf]  ;;  %v2883_v42 = vld [vmem:[%s3830_s30 + $0x1a0] sm:$0xf] }
 0x141   : > { %v1390_v49 = vadd.f32 %v4027_v28, %v1389_v48  ;;  %v3422_v48 = vld [vmem:[%s3830_s30 + $0x1b8] sm:$0xf0]  ;;  %v2876_v61 = vor.u32 %v3421_v50, %v2875_v7 }
 0x142   : > { %v1478_v53 = vpop.f32.mrf.mxu1  ;;  %v2884_v63 = vor.u32 %v3422_v48, %v2883_v42 }
 0x143   : > { %v1479_v56 = vadd.f32 %v1478_v53, %v1390_v49  ;;  %v3418_v49 = vld [vmem:[%s3830_s30 + $0x19c] sm:$0xf]  ;;  %v2877_v53 = vld [vmem:[%s3830_s30 + $0x1b4] sm:$0xf0] }
 0x144   : > { %v2880_v0 = vor.u32 %v3418_v49, %v2877_v53 }
 0x146   : > { %v1587_v11 = vpop.f32.mrf.mxu3 }
 0x147   : > { %v1567_v12 = vpop.f32.mrf.mxu2  ;;  %v4246_v8 = vadd.f32 %v1587_v11, %v4162_v29 }
 0x148   : > { %v4248_v20 = vadd.f32 %v1567_v12, %v1479_v56  ;;  %v1392_v21 = vpop.f32.mrf.mxu0 }
 0x149   : > { %v1393_v10 = vadd.f32 %v4027_v28, %v1392_v21 }
 0x14a   : > { %v1481_v3 = vpop.f32.mrf.mxu1 }
 0x14b   : > { %v1482_v24 = vadd.f32 %v1481_v3, %v1393_v10  ;;  %1638 = vmatmul.bf16.gmra.mxu3 %v2844_v15  ;;  %1727 = vmatmul.bf16.gmra.mxu0 %v2848_v17 }
 0x14c   : > { %1905 = vmatmul.bf16.gmra.mxu2 %v2856_v23 }
 0x14d   : > { %1816 = vmatmul.bf16.gmra.mxu1 %v2852_v47 }
 0x14e   : > { %v1590_v29 = vpop.f32.mrf.mxu3 }
 0x14f   : > { %v1570_v27 = vpop.f32.mrf.mxu2  ;;  %v4252_v30 = vadd.f32 %v1590_v29, %v4169_v44  ;;  %v2897_v29 = vld [vmem:[%s3830_s30 + $0x1e4] sm:$0xf0] }
 0x150   : > { %v4254_v31 = vadd.f32 %v1570_v27, %v1482_v24  ;;  %v1394_v33 = vpop.f32.mrf.mxu0  ;;  %v3424_v24 = vld [vmem:[%s3830_s30 + $0x1cc] sm:$0xf]  ;;  %v2903_v27 = vld [vmem:[%s3830_s30 + $0x1d0] sm:$0xf] }
 0x151   : > { %v1395_v38 = vadd.f32 %v4027_v28, %v1394_v33  ;;  %v3428_v33 = vld [vmem:[%s3830_s30 + $0x1e8] sm:$0xf0]  ;;  %v2900_v50 = vor.u32 %v3424_v24, %v2897_v29 }
 0x152   : > { %v1483_v39 = vpop.f32.mrf.mxu1  ;;  %v2904_v42 = vor.u32 %v3428_v33, %v2903_v27 }
 0x153   : > { %v1484_v40 = vadd.f32 %v1483_v39, %v1395_v38  ;;  %v2911_v38 = vld [vmem:[%s3830_s30 + $0x1d8] sm:$0xf]  ;;  %v3429_v39 = vld [vmem:[%s3830_s30 + $0x1f0] sm:$0xf0] }
 0x154   : > { %v2912_v49 = vor.u32 %v3429_v39, %v2911_v38 }
 0x156   : > { %v1592_v56 = vpop.f32.mrf.mxu3 }
 0x157   : > { %v1572_v58 = vpop.f32.mrf.mxu2  ;;  %v4266_v44 = vadd.f32 %v1592_v56, %v4184_v5 }
 0x158   : > { %v4268_v16 = vadd.f32 %v1572_v58, %v1484_v40  ;;  %v1397_v18 = vpop.f32.mrf.mxu0  ;;  %v3425_v40 = vld [vmem:[%s3830_s30 + $0x1d4] sm:$0xf] }
 0x159   : > { %v1398_v9 = vadd.f32 %v4027_v28, %v1397_v18  ;;  %v2908_v53 = vor.u32 %v3425_v40, %v2905_v41 }
 0x15a   : > { %v1486_v11 = vpop.f32.mrf.mxu1 }
 0x15b   : > { %v1487_v12 = vadd.f32 %v1486_v11, %v1398_v9  ;;  %1643 = vmatmul.bf16.gmra.mxu3 %v2872_v59  ;;  %1732 = vmatmul.bf16.gmra.mxu0 %v2876_v61  ;;  %v3431_v9 = vld [vmem:[%s3830_s30 + $0x204] sm:$0xf]  ;;  %v2925_v11 = vld [vmem:[%s3830_s30 + $0x21c] sm:$0xf0] }
 0x15c   : > { %1910 = vmatmul.bf16.gmra.mxu2 %v2884_v63 }
 0x15d   : > { %1821 = vmatmul.bf16.gmra.mxu1 %v2880_v0 }
 0x15e   : > { %v1595_v5 = vpop.f32.mrf.mxu3 }
 0x15f   : > { %v1575_v15 = vpop.f32.mrf.mxu2  ;;  %v4272_v17 = vadd.f32 %v1595_v5, %v4191_v13  ;;  %v3435_v5 = vld [vmem:[%s3830_s30 + $0x220] sm:$0xf0] }
 0x160   : > { %v4274_v21 = vadd.f32 %v1575_v15, %v1487_v12  ;;  %v1399_v23 = vpop.f32.mrf.mxu0  ;;  %v2931_v12 = vld [vmem:[%s3830_s30 + $0x208] sm:$0xf]  ;;  %v2939_v15 = vld [vmem:[%s3830_s30 + $0x210] sm:$0xf] }
 0x161   : > { %v1400_v47 = vadd.f32 %v4027_v28, %v1399_v23  ;;  %v2932_v38 = vor.u32 %v3435_v5, %v2931_v12  ;;  %v2967_v12 = vld [vmem:[%s3830_s30 + $0x248] sm:$0xf] }
 0x162   : > { %v1488_v10 = vpop.f32.mrf.mxu1 }
 0x163   : > { %v1489_v3 = vadd.f32 %v1488_v10, %v1400_v47  ;;  %v3436_v47 = vld [vmem:[%s3830_s30 + $0x228] sm:$0xf0] }
 0x164   : > { %v3432_v10 = vld [vmem:[%s3830_s30 + $0x20c] sm:$0xf]  ;;  %v2940_v40 = vor.u32 %v3436_v47, %v2939_v15  ;;  %v3443_v15 = vld [vmem:[%s3830_s30 + $0x260] sm:$0xf0]  ;;  %v2961_v47 = vld [vmem:[%s3830_s30 + $0x25c] sm:$0xf0] }
 0x166   : > { %v1597_v60 = vpop.f32.mrf.mxu3 }
 0x167   : > { %v1577_v7 = vpop.f32.mrf.mxu2  ;;  %v4286_v13 = vadd.f32 %v1597_v60, %v4206_v46 }
 0x168   : > { %v4288_v48 = vadd.f32 %v1577_v7, %v1489_v3  ;;  %v1698_v28 = vpop.f32.mrf.mxu0  ;;  %v2933_v3 = vld [vmem:[%s3830_s30 + $0x224] sm:$0xf0] }
 0x169   : > { %v2936_v41 = vor.u32 %v3432_v10, %v2933_v3 }
 0x16a   : > { %v1787_v56 = vpop.f32.mrf.mxu1 }
 0x16b   : > { %1648 = vmatmul.bf16.gmra.mxu3 %v2900_v50  ;;  %1737 = vmatmul.bf16.gmra.mxu0 %v2904_v42 }
 0x16c   : > { %1915 = vmatmul.bf16.gmra.mxu2 %v2912_v49 }
 0x16d   : > { %1826 = vmatmul.bf16.gmra.mxu1 %v2908_v53 }
 0x16e   : > { %v1609_v46 = vpop.f32.mrf.mxu3 }
 0x16f   : > { %v1610_v58 = vadd.f32 %v1609_v46, %v4035_v37  ;;  %v1876_v59 = vpop.f32.mrf.mxu2  ;;  %v2928_v37 = vor.u32 %v3431_v9, %v2925_v11  ;;  %v2959_v9 = vld [vmem:[%s3830_s30 + $0x240] sm:$0xf]  ;;  %v3442_v11 = vld [vmem:[%s3830_s30 + $0x258] sm:$0xf0] }
 0x170   : > { %v1700_v61 = vpop.f32.mrf.mxu0 }
 0x171   : > { %v1699_v18 = vadd.f32 %v1698_v28, %v1610_v58 }
 0x172   : > { %v1789_v63 = vpop.f32.mrf.mxu1 }
 0x173   : > { %v1788_v0 = vadd.f32 %v1787_v56, %v1699_v18 }
 0x175   : > { %v1877_v23 = vadd.f32 %v1876_v59, %v1788_v0  ;;  %v2953_v0 = vld [vmem:[%s3830_s30 + $0x254] sm:$0xf0] }
 0x176   : > { %v1611_v24 = vpop.f32.mrf.mxu3 }
 0x177   : > { %v3333_v29 = vmul.f32 -1.442695, %v1877_v23  ;;  %v1612_v27 = vadd.f32 %v1611_v24, %v4051_v55  ;;  %v1878_v33 = vpop.f32.mrf.mxu2  ;;  %v3439_v23 = vld [vmem:[%s3830_s30 + $0x244] sm:$0xf] }
 0x178   : > { %v1703_v39 = vpop.f32.mrf.mxu0 }
 0x179   : > { %3569 = vpow2.f32 %v3333_v29  ;;  %v1701_v60 = vadd.f32 %v1700_v61, %v1612_v27 }
 0x17a   : > { %v1792_v7 = vpop.f32.mrf.mxu1 }
 0x17b   : > { %v1790_v50 = vadd.f32 %v1789_v63, %v1701_v60  ;;  %1653 = vmatmul.bf16.gmra.mxu3 %v2928_v37  ;;  %1742 = vmatmul.bf16.gmra.mxu0 %v2932_v38  ;;  %v3438_v63 = vld [vmem:[%s3830_s30 + $0x23c] sm:$0xf] }
 0x17c   : > { %1920 = vmatmul.bf16.gmra.mxu2 %v2940_v40  ;;  %v2956_v27 = vor.u32 %v3438_v63, %v2953_v0  ;;  %v2968_v40 = vor.u32 %v3443_v15, %v2967_v12 }
 0x17d   : > { %1831 = vmatmul.bf16.gmra.mxu1 %v2936_v41  ;;  %v1879_v42 = vadd.f32 %v1878_v33, %v1790_v50  ;;  %v2960_v33 = vor.u32 %v3442_v11, %v2959_v9  ;;  %v2964_v41 = vor.u32 %v3439_v23, %v2961_v47  ;;  %v3445_v23 = vld [vmem:[%s3830_s30 + $0x274] sm:$0xf]  ;;  %v2981_v47 = vld [vmem:[%s3830_s30 + $0x28c] sm:$0xf0] }
 0x17e   : > { %v1614_v55 = vpop.f32.mrf.mxu3 }
 0x17f   : > { %v3570_v28 = vpop.eup %3569  ;;  %v3334_v49 = vmul.f32 -1.442695, %v1879_v42  ;;  %v1615_v53 = vadd.f32 %v1614_v55, %v4068_v6  ;;  %v1881_v56 = vpop.f32.mrf.mxu2 }
 0x180   : > { %v2052_v46 = vadd.f32 1.0, %v3570_v28  ;;  %v1705_v58 = vpop.f32.mrf.mxu0 }
 0x181   : > { %3571 = vpow2.f32 %v3334_v49  ;;  %v1704_v59 = vadd.f32 %v1703_v39, %v1615_v53 }
 0x182   : > { %v1794_v61 = vpop.f32.mrf.mxu1  ;;  %3573 = vrcp.f32 %v2052_v46  ;;  %v2093_v49 = vand.u32 2147483647, %v2052_v46  ;;  %vm2089_vm1 = vweird.f32 %v2052_v46 }
 0x183   : > { %v1793_v18 = vadd.f32 %v1792_v7, %v1704_v59 }
 0x184   : > { %vm2094_vm3 = vcmp.eq.f32.partialorder %v2093_v49, 8.507059e+37 }
 0x185   : > { %v1882_v5 = vadd.f32 %v1881_v56, %v1793_v18 }
 0x186   : > { %v1616_v6 = vpop.f32.mrf.mxu3 }
 0x187   : > { %v3572_v10 = vpop.eup %3571  ;;  %v3335_v3 = vmul.f32 -1.442695, %v1882_v5  ;;  %v1617_v24 = vadd.f32 %v1616_v6, %v4084_v25  ;;  %v1883_v29 = vpop.f32.mrf.mxu2  ;;  %v2095_v25 = vand.u32 2147483648, %v2052_v46 }
 0x188   : > { %v3574_v37 = vpop.eup %3573  ;;  %v4310_v38 = vadd.f32 1.0, %v3572_v10  ;;  %v1708_v39 = vpop.f32.mrf.mxu0 }
 0x189   : > { %v2085_v60 = vmul.f32 %v3574_v37, %v2052_v46  ;;  %3575 = vpow2.f32 %v3335_v3  ;;  %v1706_v7 = vadd.f32 %v1705_v58, %v1617_v24  ;;  %vm2090_vm0 = vweird.f32 %v3574_v37  ;;  %v2987_v3 = vld [vmem:[%s3830_s30 + $0x278] sm:$0xf]  ;;  %v3449_v24 = vld [vmem:[%s3830_s30 + $0x290] sm:$0xf0] }
 0x18a   : > { %v1797_v50 = vpop.f32.mrf.mxu1  ;;  %3577 = vrcp.f32 %v4310_v38  ;;  %vm2091_vm2 = vmor %vm2089_vm1, %vm2090_vm0  ;;  %v2096_v9 = vor.u32 1.1754944e-38, %v2095_v25  ;;  %v2988_v25 = vor.u32 %v3449_v24, %v2987_v3  ;;  %vm2104_vm5 = vweird.f32 %v4310_v38 }
 0x18b   : > { %v2086_v42 = vsub.f32 1.0, %v2085_v60  ;;  %v1795_v55 = vadd.f32 %v1794_v61, %v1706_v7  ;;  %1658 = vmatmul.bf16.gmra.mxu3 %v2956_v27  ;;  %1747 = vmatmul.bf16.gmra.mxu0 %v2960_v33  ;;  %v2995_v27 = vld [vmem:[%s3830_s30 + $0x280] sm:$0xf]  ;;  %v3450_v33 = vld [vmem:[%s3830_s30 + $0x298] sm:$0xf0] }
 0x18c   : > { %1925 = vmatmul.bf16.gmra.mxu2 %v2968_v40  ;;  %v2108_v40 = vand.u32 2147483647, %v4310_v38  ;;  %v3446_v60 = vld [vmem:[%s3830_s30 + $0x27c] sm:$0xf]  ;;  %v2989_v7 = vld [vmem:[%s3830_s30 + $0x294] sm:$0xf0] }
 0x18d   : > { %1836 = vmatmul.bf16.gmra.mxu1 %v2964_v41  ;;  %v2087_v28 = vmul.f32 %v3574_v37, %v2086_v42  ;;  %v1884_v53 = vadd.f32 %v1883_v29, %v1795_v55  ;;  %v2110_v29 = vand.u32 2147483648, %v4310_v38  ;;  %v2984_v55 = vor.u32 %v3445_v23, %v2981_v47 }
 0x18e   : > { %v1619_v56 = vpop.f32.mrf.mxu3  ;;  %vm2109_vm7 = vcmp.eq.f32.partialorder %v2108_v40, 8.507059e+37 }
 0x18f   : > { %v3576_v59 = vpop.eup %3575  ;;  %v2088_v18 = vadd.f32 %v3574_v37, %v2087_v28  ;;  %v3336_v58 = vmul.f32 -1.442695, %v1884_v53  ;;  %v1620_v63 = vadd.f32 %v1619_v56, %v4089_v19  ;;  %v1886_v61 = vpop.f32.mrf.mxu2 }
 0x190   : > { %v3578_v0 = vpop.eup %3577  ;;  %v4320_v11 = vadd.f32 1.0, %v3576_v59  ;;  %v1710_v46 = vpop.f32.mrf.mxu0 }
 0x191   : > { %v2092_v12 = vsel %vm2091_vm2, %v3574_v37, %v2088_v18  ;;  %v2100_v19 = vmul.f32 %v3578_v0, %v4310_v38  ;;  %3579 = vpow2.f32 %v3336_v58  ;;  %v1709_v10 = vadd.f32 %v1708_v39, %v1620_v63 }
 0x192   : > { %v1799_v5 = vpop.f32.mrf.mxu1  ;;  %v2097_v15 = vsel %vm2094_vm3, %v2096_v9, %v2092_v12  ;;  %3581 = vrcp.f32 %v4320_v11  ;;  %vm2105_vm4 = vweird.f32 %v3578_v0  ;;  %v2111_v18 = vor.u32 1.1754944e-38, %v2110_v29 }
 0x193   : > { %2564 = vst [vmem:[%s4318_s13] sm:$0xff] %v2097_v15  ;;  %v2101_v6 = vsub.f32 1.0, %v2100_v19  ;;  %v1798_v41 = vadd.f32 %v1797_v50, %v1709_v10  ;;  %vm2106_vm6 = vmor %vm2104_vm5, %vm2105_vm4  ;;  %v2996_v63 = vor.u32 %v3450_v33, %v2995_v27  ;;  %v2992_v9 = vor.u32 %v3446_v60, %v2989_v7 }
 0x194   : > { %v2125_v47 = vand.u32 2147483648, %v4320_v11  ;;  %vm2119_vm9 = vweird.f32 %v4320_v11 }
 0x195   : > { %v2102_v37 = vmul.f32 %v3578_v0, %v2101_v6  ;;  %v1887_v39 = vadd.f32 %v1886_v61, %v1798_v41 }
 0x196   : > { %v1621_v42 = vpop.f32.mrf.mxu3 }
 0x197   : > { %v3580_v28 = vpop.eup %3579  ;;  %v2103_v49 = vadd.f32 %v3578_v0, %v2102_v37  ;;  %v1622_v53 = vadd.f32 %v1621_v42, %v4102_v52  ;;  %v1888_v56 = vpop.f32.mrf.mxu2  ;;  %v3337_v15 = vmul.f32 -1.442695, %v1887_v39  ;;  %v2126_v37 = vor.u32 1.1754944e-38, %v2125_v47  ;;  %v3015_v39 = vld [vmem:[%s3830_s30 + $0x2b0] sm:$0xf] }
 0x198   : > { %v3582_v59 = vpop.eup %3581  ;;  %v4338_v58 = vadd.f32 1.0, %v3580_v28  ;;  %v1713_v50 = vpop.f32.mrf.mxu0  ;;  %v3009_v28 = vld [vmem:[%s3830_s30 + $0x2c4] sm:$0xf0] }
 0x199   : > { %v2107_v12 = vsel %vm2106_vm6, %v3578_v0, %v2103_v49  ;;  %v2115_v19 = vmul.f32 %v3582_v59, %v4320_v11  ;;  %v1711_v23 = vadd.f32 %v1710_v46, %v1622_v53  ;;  %vm2120_vm8 = vweird.f32 %v3582_v59  ;;  %v3456_v53 = vld [vmem:[%s3830_s30 + $0x2c8] sm:$0xf0] }
 0x19a   : > { %v1802_v38 = vpop.f32.mrf.mxu1  ;;  %v2112_v61 = vsel %vm2109_vm7, %v2111_v18, %v2107_v12  ;;  %3583 = vrcp.f32 %v4338_v58  ;;  %v2123_v0 = vand.u32 2147483647, %v4320_v11  ;;  %vm2121_vm10 = vmor %vm2119_vm9, %vm2120_vm8  ;;  %v3457_v18 = vld [vmem:[%s3830_s30 + $0x2d0] sm:$0xf0]  ;;  %vm2134_vm13 = vweird.f32 %v4338_v58 }
 0x19b   : > { %2565 = vst [vmem:[%s4318_s13 + $0x8] sm:$0xff] %v2112_v61  ;;  %v2116_v52 = vsub.f32 1.0, %v2115_v19  ;;  %3585 = vpow2.f32 %v3337_v15  ;;  %1663 = vmatmul.bf16.gmra.mxu3 %v2984_v55  ;;  %1752 = vmatmul.bf16.gmra.mxu0 %v2988_v25  ;;  %v1800_v10 = vadd.f32 %v1799_v5, %v1711_v23  ;;  %v3452_v25 = vld [vmem:[%s3830_s30 + $0x2ac] sm:$0xf]  ;;  %v3453_v12 = vld [vmem:[%s3830_s30 + $0x2b4] sm:$0xf] }
 0x19c   : > { %1930 = vmatmul.bf16.gmra.mxu2 %v2996_v63  ;;  %vm2124_vm11 = vcmp.eq.f32.partialorder %v2123_v0, 8.507059e+37  ;;  %v3017_v19 = vld [vmem:[%s3830_s30 + $0x2cc] sm:$0xf0]  ;;  %v3012_v61 = vor.u32 %v3452_v25, %v3009_v28 }
 0x19d   : > { %1841 = vmatmul.bf16.gmra.mxu1 %v2992_v9  ;;  %v2117_v6 = vmul.f32 %v3582_v59, %v2116_v52  ;;  %v1889_v29 = vadd.f32 %v1888_v56, %v1800_v10  ;;  %v2140_v56 = vand.u32 2147483648, %v4338_v58  ;;  %v2138_v9 = vand.u32 2147483647, %v4338_v58 }
 0x19e   : > { %v1624_v3 = vpop.f32.mrf.mxu3  ;;  %v3016_v52 = vor.u32 %v3456_v53, %v3015_v39 }
 0x19f   : > { %v2118_v24 = vadd.f32 %v3582_v59, %v2117_v6  ;;  %v1625_v27 = vadd.f32 %v1624_v3, %v4107_v62  ;;  %v1891_v46 = vpop.f32.mrf.mxu2  ;;  %v3338_v11 = vmul.f32 -1.442695, %v1889_v29  ;;  %v2141_v10 = vor.u32 1.1754944e-38, %v2140_v56 }
 0x1a0   : > { %v3584_v33 = vpop.eup %3583  ;;  %v1715_v40 = vpop.f32.mrf.mxu0  ;;  %v3020_v29 = vor.u32 %v3453_v12, %v3017_v19  ;;  %vm2139_vm15 = vcmp.eq.f32.partialorder %v2138_v9, 8.507059e+37  ;;  %v3037_v19 = vld [vmem:[%s3830_s30 + $0x2fc] sm:$0xf0] }
 0x1a1   : > { %v3586_v41 = vpop.eup %3585  ;;  %v2122_v60 = vsel %vm2121_vm10, %v3582_v59, %v2118_v24  ;;  %v2130_v5 = vmul.f32 %v3584_v33, %v4338_v58  ;;  %v1714_v55 = vadd.f32 %v1713_v50, %v1625_v27  ;;  %3587 = vpow2.f32 %v3338_v11  ;;  %v3023_v59 = vld [vmem:[%s3830_s30 + $0x2b8] sm:$0xf] }
 0x1a2   : > { %v1804_v7 = vpop.f32.mrf.mxu1  ;;  %v2127_v42 = vsel %vm2124_vm11, %v2126_v37, %v2122_v60  ;;  %v4348_v62 = vadd.f32 1.0, %v3586_v41  ;;  %vm2135_vm12 = vweird.f32 %v3584_v33  ;;  %v3024_v24 = vor.u32 %v3457_v18, %v3023_v59 }
 0x1a3   : > { %2566 = vst [vmem:[%s4318_s13 + $0x10] sm:$0xff] %v2127_v42  ;;  %v2131_v49 = vsub.f32 1.0, %v2130_v5  ;;  %v1803_v50 = vadd.f32 %v1802_v38, %v1714_v55  ;;  %vm2136_vm14 = vmor %vm2134_vm13, %vm2135_vm12 }
 0x1a4   : > { %3589 = vrcp.f32 %v4348_v62  ;;  %v2155_v55 = vand.u32 2147483648, %v4348_v62  ;;  %vm2149_vm1 = vweird.f32 %v4348_v62 }
 0x1a5   : > { %v2132_v63 = vmul.f32 %v3584_v33, %v2131_v49  ;;  %v1892_v47 = vadd.f32 %v1891_v46, %v1803_v50 }
 0x1a6   : > { %v1626_v15 = vpop.f32.mrf.mxu3  ;;  %v2156_v50 = vor.u32 1.1754944e-38, %v2155_v55 }
 0x1a7   : > { %v2133_v23 = vadd.f32 %v3584_v33, %v2132_v63  ;;  %v1627_v6 = vadd.f32 %v1626_v15, %v4120_v4  ;;  %v1893_v0 = vpop.f32.mrf.mxu2  ;;  %v3588_v27 = vpop.eup %3587  ;;  %v3339_v37 = vmul.f32 -1.442695, %v1892_v47 }
 0x1a8   : > { %v1718_v3 = vpop.f32.mrf.mxu0  ;;  %v4364_v42 = vadd.f32 1.0, %v3588_v27 }
 0x1a9   : > { %v2137_v38 = vsel %vm2136_vm14, %v3584_v33, %v2133_v23  ;;  %v1716_v41 = vadd.f32 %v1715_v40, %v1627_v6  ;;  %3591 = vpow2.f32 %v3339_v37  ;;  %v2153_v40 = vand.u32 2147483647, %v4348_v62  ;;  %v3463_v23 = vld [vmem:[%s3830_s30 + $0x300] sm:$0xf0]  ;;  %v3051_v6 = vld [vmem:[%s3830_s30 + $0x2f0] sm:$0xf] }
 0x1aa   : > { %v1807_v60 = vpop.f32.mrf.mxu1  ;;  %v3590_v5 = vpop.eup %3589  ;;  %v2142_v11 = vsel %vm2139_vm15, %v2141_v10, %v2137_v38  ;;  %3593 = vrcp.f32 %v4364_v42  ;;  %v2168_v27 = vand.u32 2147483647, %v4364_v42  ;;  %v2170_v38 = vand.u32 2147483648, %v4364_v42 }
 0x1ab   : > { %2567 = vst [vmem:[%s4318_s13 + $0x18] sm:$0xff] %v2142_v11  ;;  %v2145_v4 = vmul.f32 %v3590_v5, %v4348_v62  ;;  %v1805_v58 = vadd.f32 %v1804_v7, %v1716_v41  ;;  %1668 = vmatmul.bf16.gmra.mxu3 %v3012_v61  ;;  %1757 = vmatmul.bf16.gmra.mxu0 %v3016_v52  ;;  %vm2150_vm0 = vweird.f32 %v3590_v5  ;;  %vm2154_vm3 = vcmp.eq.f32.partialorder %v2153_v40, 8.507059e+37  ;;  %v3043_v52 = vld [vmem:[%s3830_s30 + $0x2e8] sm:$0xf] }
 0x1ac   : > { %1935 = vmatmul.bf16.gmra.mxu2 %v3024_v24  ;;  %vm2151_vm2 = vmor %vm2149_vm1, %vm2150_vm0  ;;  %v3460_v24 = vld [vmem:[%s3830_s30 + $0x2ec] sm:$0xf]  ;;  %vm2164_vm5 = vweird.f32 %v4364_v42  ;;  %vm2169_vm7 = vcmp.eq.f32.partialorder %v2168_v27, 8.507059e+37  ;;  %v3071_v27 = vld [vmem:[%s3830_s30 + $0x320] sm:$0xf] }
 0x1ad   : > { %1846 = vmatmul.bf16.gmra.mxu1 %v3020_v29  ;;  %v2146_v46 = vsub.f32 1.0, %v2145_v4  ;;  %v1894_v33 = vadd.f32 %v1893_v0, %v1805_v58  ;;  %v3464_v0 = vld [vmem:[%s3830_s30 + $0x308] sm:$0xf0]  ;;  %v3045_v29 = vld [vmem:[%s3830_s30 + $0x304] sm:$0xf0] }
 0x1ae   : > { %v1629_v25 = vpop.f32.mrf.mxu3  ;;  %v3052_v55 = vor.u32 %v3464_v0, %v3051_v6 }
 0x1af   : > { %v2147_v28 = vmul.f32 %v3590_v5, %v2146_v46  ;;  %v3340_v49 = vmul.f32 -1.442695, %v1894_v33  ;;  %v1630_v7 = vadd.f32 %v1629_v25, %v4127_v22  ;;  %v1896_v39 = vpop.f32.mrf.mxu2  ;;  %v3592_v56 = vpop.eup %3591  ;;  %v3459_v22 = vld [vmem:[%s3830_s30 + $0x2e4] sm:$0xf]  ;;  %v3048_v25 = vor.u32 %v3460_v24, %v3045_v29  ;;  %v3466_v24 = vld [vmem:[%s3830_s30 + $0x31c] sm:$0xf] }
 0x1b0   : > { %v1720_v53 = vpop.f32.mrf.mxu0  ;;  %v3594_v9 = vpop.eup %3593  ;;  %v4373_v12 = vadd.f32 1.0, %v3592_v56  ;;  %v3040_v41 = vor.u32 %v3459_v22, %v3037_v19  ;;  %v2171_v56 = vor.u32 1.1754944e-38, %v2170_v38  ;;  %v3065_v29 = vld [vmem:[%s3830_s30 + $0x334] sm:$0xf0] }
 0x1b1   : > { %v2148_v59 = vadd.f32 %v3590_v5, %v2147_v28  ;;  %3595 = vpow2.f32 %v3340_v49  ;;  %v1719_v18 = vadd.f32 %v1718_v3, %v1630_v7  ;;  %v2160_v61 = vmul.f32 %v3594_v9, %v4364_v42 }
 0x1b2   : > { %v1809_v63 = vpop.f32.mrf.mxu1  ;;  %3597 = vrcp.f32 %v4373_v12  ;;  %vm2165_vm4 = vweird.f32 %v3594_v9  ;;  %v2185_v19 = vand.u32 2147483648, %v4373_v12  ;;  %vm2179_vm9 = vweird.f32 %v4373_v12 }
 0x1b3   : > { %v2152_v15 = vsel %vm2151_vm2, %v3590_v5, %v2148_v59  ;;  %v1808_v62 = vadd.f32 %v1807_v60, %v1719_v18  ;;  %v2161_v10 = vsub.f32 1.0, %v2160_v61  ;;  %v3044_v5 = vor.u32 %v3463_v23, %v3043_v52  ;;  %vm2166_vm6 = vmor %vm2164_vm5, %vm2165_vm4 }
 0x1b4   : > { %v2157_v47 = vsel %vm2154_vm3, %v2156_v50, %v2152_v15 }
 0x1b5   : > { %2568 = vst [vmem:[%s4318_s13 + $0x20] sm:$0xff] %v2157_v47  ;;  %v1897_v3 = vadd.f32 %v1896_v39, %v1808_v62  ;;  %v2162_v11 = vmul.f32 %v3594_v9, %v2161_v10 }
 0x1b6   : > { %v1631_v37 = vpop.f32.mrf.mxu3 }
 0x1b7   : > { %v3596_v60 = vpop.eup %3595  ;;  %v3341_v4 = vmul.f32 -1.442695, %v1897_v3  ;;  %v1632_v58 = vadd.f32 %v1631_v37, %v4142_v57  ;;  %v1898_v46 = vpop.f32.mrf.mxu2  ;;  %v2163_v28 = vadd.f32 %v3594_v9, %v2162_v11 }
 0x1b8   : > { %v4389_v33 = vadd.f32 1.0, %v3596_v60  ;;  %v1723_v40 = vpop.f32.mrf.mxu0  ;;  %v3598_v39 = vpop.eup %3597 }
 0x1b9   : > { %3599 = vpow2.f32 %v3341_v4  ;;  %v1721_v49 = vadd.f32 %v1720_v53, %v1632_v58  ;;  %v2167_v59 = vsel %vm2166_vm6, %v3594_v9, %v2163_v28  ;;  %v2175_v57 = vmul.f32 %v3598_v39, %v4373_v12  ;;  %v3471_v4 = vld [vmem:[%s3830_s30 + $0x340] sm:$0xf0]  ;;  %v3073_v28 = vld [vmem:[%s3830_s30 + $0x33c] sm:$0xf0] }
 0x1ba   : > { %v1812_v7 = vpop.f32.mrf.mxu1  ;;  %3601 = vrcp.f32 %v4389_v33  ;;  %v2172_v50 = vsel %vm2169_vm7, %v2171_v56, %v2167_v59  ;;  %v2183_v53 = vand.u32 2147483647, %v4373_v12  ;;  %vm2180_vm8 = vweird.f32 %v3598_v39  ;;  %v3470_v12 = vld [vmem:[%s3830_s30 + $0x338] sm:$0xf0]  ;;  %v3467_v58 = vld [vmem:[%s3830_s30 + $0x324] sm:$0xf] }
 0x1bb   : > { %v1810_v18 = vadd.f32 %v1809_v63, %v1721_v49  ;;  %1673 = vmatmul.bf16.gmra.mxu3 %v3040_v41  ;;  %1762 = vmatmul.bf16.gmra.mxu0 %v3044_v5  ;;  %2569 = vst [vmem:[%s4318_s13 + $0x28] sm:$0xff] %v2172_v50  ;;  %v2176_v42 = vsub.f32 1.0, %v2175_v57  ;;  %vm2181_vm10 = vmor %vm2179_vm9, %vm2180_vm8  ;;  %v3079_v5 = vld [vmem:[%s3830_s30 + $0x328] sm:$0xf]  ;;  %v2200_v11 = vand.u32 2147483648, %v4389_v33  ;;  %v3068_v56 = vor.u32 %v3466_v24, %v3065_v29 }
 0x1bc   : > { %1940 = vmatmul.bf16.gmra.mxu2 %v3052_v55  ;;  %vm2184_vm11 = vcmp.eq.f32.partialorder %v2183_v53, 8.507059e+37  ;;  %v2198_v55 = vand.u32 2147483647, %v4389_v33  ;;  %vm2194_vm13 = vweird.f32 %v4389_v33 }
 0x1bd   : > { %1851 = vmatmul.bf16.gmra.mxu1 %v3048_v25  ;;  %v1899_v22 = vadd.f32 %v1898_v46, %v1810_v18  ;;  %v2177_v9 = vmul.f32 %v3598_v39, %v2176_v42 }
 0x1be   : > { %v1634_v15 = vpop.f32.mrf.mxu3  ;;  %vm2199_vm15 = vcmp.eq.f32.partialorder %v2198_v55, 8.507059e+37  ;;  %v3093_v55 = vld [vmem:[%s3830_s30 + $0x36c] sm:$0xf0] }
 0x1bf   : > { %v3600_v61 = vpop.eup %3599  ;;  %v3342_v62 = vmul.f32 -1.442695, %v1899_v22  ;;  %v1635_v63 = vadd.f32 %v1634_v15, %v4149_v1  ;;  %v1901_v52 = vpop.f32.mrf.mxu2  ;;  %v2178_v0 = vadd.f32 %v3598_v39, %v2177_v9  ;;  %v2186_v1 = vor.u32 1.1754944e-38, %v2185_v19 }
 0x1c0   : > { %v3602_v23 = vpop.eup %3601  ;;  %v4398_v47 = vadd.f32 1.0, %v3600_v61  ;;  %v1725_v6 = vpop.f32.mrf.mxu0  ;;  %v2201_v22 = vor.u32 1.1754944e-38, %v2200_v11  ;;  %v3076_v15 = vor.u32 %v3467_v58, %v3073_v28  ;;  %v3099_v28 = vld [vmem:[%s3830_s30 + $0x358] sm:$0xf] }
 0x1c1   : > { %v2190_v10 = vmul.f32 %v3602_v23, %v4389_v33  ;;  %3603 = vpow2.f32 %v3342_v62  ;;  %v2182_v38 = vsel %vm2181_vm10, %v3598_v39, %v2178_v0  ;;  %v1724_v41 = vadd.f32 %v1723_v40, %v1635_v63 }
 0x1c2   : > { %v1814_v3 = vpop.f32.mrf.mxu1  ;;  %3605 = vrcp.f32 %v4398_v47  ;;  %v2187_v60 = vsel %vm2184_vm11, %v2186_v1, %v2182_v38  ;;  %vm2195_vm12 = vweird.f32 %v3602_v23  ;;  %v3072_v39 = vor.u32 %v3470_v12, %v3071_v27 }
 0x1c3   : > { %v2191_v37 = vsub.f32 1.0, %v2190_v10  ;;  %2570 = vst [vmem:[%s4318_s13 + $0x30] sm:$0xff] %v2187_v60  ;;  %v1813_v25 = vadd.f32 %v1812_v7, %v1724_v41  ;;  %vm2196_vm14 = vmor %vm2194_vm13, %vm2195_vm12  ;;  %v3080_v7 = vor.u32 %v3471_v4, %v3079_v5  ;;  %v2215_v0 = vand.u32 2147483648, %v4398_v47 }
 0x1c4   : > { %vm2209_vm1 = vweird.f32 %v4398_v47 }
 0x1c5   : > { %v2192_v46 = vmul.f32 %v3602_v23, %v2191_v37  ;;  %v1902_v40 = vadd.f32 %v1901_v52, %v1813_v25  ;;  %v2216_v41 = vor.u32 1.1754944e-38, %v2215_v0 }
 0x1c6   : > { %v1636_v49 = vpop.f32.mrf.mxu3 }
 0x1c7   : > { %v3604_v59 = vpop.eup %3603  ;;  %v2193_v57 = vadd.f32 %v3602_v23, %v2192_v46  ;;  %v1637_v18 = vadd.f32 %v1636_v49, %v4164_v34  ;;  %v1903_v50 = vpop.f32.mrf.mxu2  ;;  %v3343_v62 = vmul.f32 -1.442695, %v1902_v40  ;;  %v3473_v46 = vld [vmem:[%s3830_s30 + $0x354] sm:$0xf] }
 0x1c8   : > { %v3606_v42 = vpop.eup %3605  ;;  %v4416_v53 = vadd.f32 1.0, %v3604_v59  ;;  %v1728_v19 = vpop.f32.mrf.mxu0  ;;  %v3477_v49 = vld [vmem:[%s3830_s30 + $0x370] sm:$0xf0]  ;;  %v3478_v59 = vld [vmem:[%s3830_s30 + $0x378] sm:$0xf0] }
 0x1c9   : > { %v2197_v61 = vsel %vm2196_vm14, %v3602_v23, %v2193_v57  ;;  %v2205_v9 = vmul.f32 %v3606_v42, %v4398_v47  ;;  %v1726_v52 = vadd.f32 %v1725_v6, %v1637_v18  ;;  %vm2210_vm0 = vweird.f32 %v3606_v42 }
 0x1ca   : > { %v1817_v63 = vpop.f32.mrf.mxu1  ;;  %v2202_v33 = vsel %vm2199_vm15, %v2201_v22, %v2197_v61  ;;  %3607 = vrcp.f32 %v4416_v53  ;;  %v2213_v23 = vand.u32 2147483647, %v4398_v47  ;;  %vm2211_vm2 = vmor %vm2209_vm1, %vm2210_vm0  ;;  %v2228_v40 = vand.u32 2147483647, %v4416_v53 }
 0x1cb   : > { %2571 = vst [vmem:[%s4318_s13 + $0x38] sm:$0xff] %v2202_v33  ;;  %v2206_v34 = vsub.f32 1.0, %v2205_v9  ;;  %3609 = vpow2.f32 %v3343_v62  ;;  %1678 = vmatmul.bf16.gmra.mxu3 %v3068_v56  ;;  %1767 = vmatmul.bf16.gmra.mxu0 %v3072_v39  ;;  %v1815_v24 = vadd.f32 %v1814_v3, %v1726_v52  ;;  %v2230_v56 = vand.u32 2147483648, %v4416_v53  ;;  %v3107_v39 = vld [vmem:[%s3830_s30 + $0x360] sm:$0xf] }
 0x1cc   : > { %1945 = vmatmul.bf16.gmra.mxu2 %v3080_v7  ;;  %vm2214_vm3 = vcmp.eq.f32.partialorder %v2213_v23, 8.507059e+37  ;;  %v3100_v7 = vor.u32 %v3477_v49, %v3099_v28  ;;  %vm2224_vm5 = vweird.f32 %v4416_v53  ;;  %v3108_v52 = vor.u32 %v3478_v59, %v3107_v39 }
 0x1cd   : > { %1856 = vmatmul.bf16.gmra.mxu1 %v3076_v15  ;;  %v2207_v10 = vmul.f32 %v3606_v42, %v2206_v34  ;;  %v1904_v27 = vadd.f32 %v1903_v50, %v1815_v24  ;;  %v3474_v50 = vld [vmem:[%s3830_s30 + $0x35c] sm:$0xf]  ;;  %v2231_v33 = vor.u32 1.1754944e-38, %v2230_v56  ;;  %vm2229_vm7 = vcmp.eq.f32.partialorder %v2228_v40, 8.507059e+37 }
 0x1ce   : > { %v1639_v1 = vpop.f32.mrf.mxu3 }
 0x1cf   : > { %v2208_v29 = vadd.f32 %v3606_v42, %v2207_v10  ;;  %v1640_v38 = vadd.f32 %v1639_v1, %v4171_v45  ;;  %v1906_v6 = vpop.f32.mrf.mxu2  ;;  %v3344_v47 = vmul.f32 -1.442695, %v1904_v27 }
 0x1d0   : > { %v3608_v37 = vpop.eup %3607  ;;  %v1730_v12 = vpop.f32.mrf.mxu0 }
 0x1d1   : > { %v3610_v5 = vpop.eup %3609  ;;  %v2212_v60 = vsel %vm2211_vm2, %v3606_v42, %v2208_v29  ;;  %v2220_v3 = vmul.f32 %v3608_v37, %v4416_v53  ;;  %v1729_v58 = vadd.f32 %v1728_v19, %v1640_v38  ;;  %3611 = vpow2.f32 %v3344_v47  ;;  %v3101_v42 = vld [vmem:[%s3830_s30 + $0x374] sm:$0xf0] }
 0x1d2   : > { %v1819_v11 = vpop.f32.mrf.mxu1  ;;  %v2217_v4 = vsel %vm2214_vm3, %v2216_v41, %v2212_v60  ;;  %v4426_v45 = vadd.f32 1.0, %v3610_v5  ;;  %vm2225_vm4 = vweird.f32 %v3608_v37  ;;  %v3096_v19 = vor.u32 %v3473_v46, %v3093_v55 }
 0x1d3   : > { %2572 = vst [vmem:[%s4318_s13 + $0x40] sm:$0xff] %v2217_v4  ;;  %v2221_v25 = vsub.f32 1.0, %v2220_v3  ;;  %v1818_v18 = vadd.f32 %v1817_v63, %v1729_v58  ;;  %vm2226_vm6 = vmor %vm2224_vm5, %vm2225_vm4  ;;  %v3104_v0 = vor.u32 %v3474_v50, %v3101_v42 }
 0x1d4   : > { %3613 = vrcp.f32 %v4426_v45  ;;  %vm2239_vm9 = vweird.f32 %v4426_v45 }
 0x1d5   : > { %v2222_v57 = vmul.f32 %v3608_v37, %v2221_v25  ;;  %v1907_v61 = vadd.f32 %v1906_v6, %v1818_v18 }
 0x1d6   : > { %v1641_v22 = vpop.f32.mrf.mxu3 }
 0x1d7   : > { %v2223_v15 = vadd.f32 %v3608_v37, %v2222_v57  ;;  %v1642_v9 = vadd.f32 %v1641_v22, %v4186_v14  ;;  %v1908_v62 = vpop.f32.mrf.mxu2  ;;  %v3612_v10 = vpop.eup %3611  ;;  %v3345_v23 = vmul.f32 -1.442695, %v1907_v61 }
 0x1d8   : > { %v1733_v34 = vpop.f32.mrf.mxu0  ;;  %v2063_v38 = vadd.f32 1.0, %v3612_v10 }
 0x1d9   : > { %v2227_v63 = vsel %vm2226_vm6, %v3608_v37, %v2223_v15  ;;  %v1731_v24 = vadd.f32 %v1730_v12, %v1642_v9  ;;  %3615 = vpow2.f32 %v3345_v23  ;;  %v2243_v37 = vand.u32 2147483647, %v4426_v45 }
 0x1da   : > { %v1822_v1 = vpop.f32.mrf.mxu1  ;;  %v3614_v29 = vpop.eup %3613  ;;  %v2232_v27 = vsel %vm2229_vm7, %v2231_v33, %v2227_v63  ;;  %3617 = vrcp.f32 %v2063_v38  ;;  %v2245_v12 = vand.u32 2147483648, %v4426_v45  ;;  %v2258_v50 = vand.u32 2147483647, %v2063_v38 }
 0x1db   : > { %2573 = vst [vmem:[%s4318_s13 + $0x48] sm:$0xff] %v2232_v27  ;;  %v2235_v53 = vmul.f32 %v3614_v29, %v4426_v45  ;;  %v1820_v14 = vadd.f32 %v1819_v11, %v1731_v24  ;;  %1683 = vmatmul.bf16.gmra.mxu3 %v3096_v19  ;;  %1772 = vmatmul.bf16.gmra.mxu0 %v3100_v7  ;;  %vm2240_vm8 = vweird.f32 %v3614_v29  ;;  %vm2244_vm11 = vcmp.eq.f32.partialorder %v2243_v37, 8.507059e+37 }
 0x1dc   : > { %1950 = vmatmul.bf16.gmra.mxu2 %v3108_v52  ;;  %vm2241_vm10 = vmor %vm2239_vm9, %vm2240_vm8  ;;  %v2246_v49 = vor.u32 1.1754944e-38, %v2245_v12  ;;  %v2260_v42 = vand.u32 2147483648, %v2063_v38  ;;  %vm2254_vm13 = vweird.f32 %v2063_v38  ;;  %vm2259_vm15 = vcmp.eq.f32.partialorder %v2258_v50, 8.507059e+37 }
 0x1dd   : > { %1861 = vmatmul.bf16.gmra.mxu1 %v3104_v0  ;;  %v2236_v6 = vsub.f32 1.0, %v2235_v53  ;;  %v1909_v41 = vadd.f32 %v1908_v62, %v1820_v14 }
 0x1de   : > { %v1644_v5 = vpop.f32.mrf.mxu3  ;;  %v2261_v10 = vor.u32 1.1754944e-38, %v2260_v42 }
 0x1df   : > { %v2237_v60 = vmul.f32 %v3614_v29, %v2236_v6  ;;  %v3346_v3 = vmul.f32 -1.442695, %v1909_v41  ;;  %v1645_v47 = vadd.f32 %v1644_v5, %v4193_v26  ;;  %v1911_v4 = vpop.f32.mrf.mxu2  ;;  %v3616_v11 = vpop.eup %3615 }
 0x1e0   : > { %v1735_v58 = vpop.f32.mrf.mxu0  ;;  %v3618_v28 = vpop.eup %3617  ;;  %v2064_v56 = vadd.f32 1.0, %v3616_v11 }
 0x1e1   : > { %v2238_v46 = vadd.f32 %v3614_v29, %v2237_v60  ;;  %3619 = vpow2.f32 %v3346_v3  ;;  %v1734_v55 = vadd.f32 %v1733_v34, %v1645_v47  ;;  %v2250_v59 = vmul.f32 %v3618_v28, %v2063_v38 }
 0x1e2   : > { %v1824_v25 = vpop.f32.mrf.mxu1  ;;  %3621 = vrcp.f32 %v2064_v56  ;;  %vm2255_vm12 = vweird.f32 %v3618_v28  ;;  %v2273_v27 = vand.u32 2147483647, %v2064_v56  ;;  %v2275_v53 = vand.u32 2147483648, %v2064_v56 }
 0x1e3   : > { %v2242_v39 = vsel %vm2241_vm10, %v3614_v29, %v2238_v46  ;;  %v1823_v57 = vadd.f32 %v1822_v1, %v1734_v55  ;;  %v2251_v26 = vsub.f32 1.0, %v2250_v59  ;;  %vm2256_vm14 = vmor %vm2254_vm13, %vm2255_vm12  ;;  %vm2269_vm1 = vweird.f32 %v2064_v56 }
 0x1e4   : > { %v2247_v40 = vsel %vm2244_vm11, %v2246_v49, %v2242_v39  ;;  %v2276_v11 = vor.u32 1.1754944e-38, %v2275_v53  ;;  %vm2274_vm3 = vcmp.eq.f32.partialorder %v2273_v27, 8.507059e+37 }
 0x1e5   : > { %2574 = vst [vmem:[%s4318_s13 + $0x50] sm:$0xff] %v2247_v40  ;;  %v1912_v18 = vadd.f32 %v1911_v4, %v1823_v57  ;;  %v2252_v19 = vmul.f32 %v3618_v28, %v2251_v26 }
 0x1e6   : > { %v1646_v22 = vpop.f32.mrf.mxu3 }
 0x1e7   : > { %v3620_v45 = vpop.eup %3619  ;;  %v3347_v7 = vmul.f32 -1.442695, %v1912_v18  ;;  %v1647_v15 = vadd.f32 %v1646_v22, %v4208_v54  ;;  %v1913_v61 = vpop.f32.mrf.mxu2  ;;  %v2253_v33 = vadd.f32 %v3618_v28, %v2252_v19 }
 0x1e8   : > { %v4450_v9 = vadd.f32 1.0, %v3620_v45  ;;  %v1738_v62 = vpop.f32.mrf.mxu0  ;;  %v3622_v0 = vpop.eup %3621 }
 0x1e9   : > { %3623 = vpow2.f32 %v3347_v7  ;;  %v1736_v34 = vadd.f32 %v1735_v58, %v1647_v15  ;;  %v2257_v63 = vsel %vm2256_vm14, %v3618_v28, %v2253_v33  ;;  %v2265_v23 = vmul.f32 %v3622_v0, %v2064_v56 }
 0x1ea   : > { %v1827_v52 = vpop.f32.mrf.mxu1  ;;  %3625 = vrcp.f32 %v4450_v9  ;;  %v2262_v54 = vsel %vm2259_vm15, %v2261_v10, %v2257_v63  ;;  %vm2270_vm0 = vweird.f32 %v3622_v0  ;;  %v2288_v39 = vand.u32 2147483647, %v4450_v9 }
 0x1eb   : > { %v1825_v24 = vadd.f32 %v1824_v25, %v1736_v34  ;;  %2575 = vst [vmem:[%s4318_s13 + $0x58] sm:$0xff] %v2262_v54  ;;  %v2266_v1 = vsub.f32 1.0, %v2265_v23  ;;  %vm2271_vm2 = vmor %vm2269_vm1, %vm2270_vm0  ;;  %vm2284_vm5 = vweird.f32 %v4450_v9 }
 0x1ec   : > { %vm2289_vm7 = vcmp.eq.f32.partialorder %v2288_v39, 8.507059e+37 }
 0x1ed   : > { %v1914_v29 = vadd.f32 %v1913_v61, %v1825_v24  ;;  %v2267_v6 = vmul.f32 %v3622_v0, %v2266_v1 }
 0x1ee   : > { %v1649_v14 = vpop.f32.mrf.mxu3 }
 0x1ef   : > { %v3624_v38 = vpop.eup %3623  ;;  %v3348_v41 = vmul.f32 -1.442695, %v1914_v29  ;;  %v1650_v37 = vadd.f32 %v1649_v14, %v4214_v2  ;;  %v1916_v12 = vpop.f32.mrf.mxu2  ;;  %v2268_v47 = vadd.f32 %v3622_v0, %v2267_v6  ;;  %v2290_v2 = vand.u32 2147483648, %v4450_v9 }
 0x1f0   : > { %v3626_v5 = vpop.eup %3625  ;;  %v2066_v60 = vadd.f32 1.0, %v3624_v38  ;;  %v1740_v3 = vpop.f32.mrf.mxu0 }
 0x1f1   : > { %v2280_v4 = vmul.f32 %v3626_v5, %v4450_v9  ;;  %3627 = vpow2.f32 %v3348_v41  ;;  %v2272_v46 = vsel %vm2271_vm2, %v3622_v0, %v2268_v47  ;;  %v1739_v25 = vadd.f32 %v1738_v62, %v1650_v37 }
 0x1f2   : > { %v1829_v58 = vpop.f32.mrf.mxu1  ;;  %3629 = vrcp.f32 %v2066_v60  ;;  %v2277_v28 = vsel %vm2274_vm3, %v2276_v11, %v2272_v46  ;;  %vm2285_vm4 = vweird.f32 %v3626_v5  ;;  %v2291_v22 = vor.u32 1.1754944e-38, %v2290_v2 }
 0x1f3   : > { %v2281_v55 = vsub.f32 1.0, %v2280_v4  ;;  %2576 = vst [vmem:[%s4318_s13 + $0x60] sm:$0xff] %v2277_v28  ;;  %v1828_v56 = vadd.f32 %v1827_v52, %v1739_v25  ;;  %vm2286_vm6 = vmor %vm2284_vm5, %vm2285_vm4  ;;  %v2305_v52 = vand.u32 2147483648, %v2066_v60  ;;  %vm2299_vm9 = vweird.f32 %v2066_v60 }
 0x1f5   : > { %v2282_v49 = vmul.f32 %v3626_v5, %v2281_v55  ;;  %v1917_v26 = vadd.f32 %v1916_v12, %v1828_v56  ;;  %v2306_v27 = vor.u32 1.1754944e-38, %v2305_v52 }
 0x1f6   : > { %v1651_v59 = vpop.f32.mrf.mxu3 }
 0x1f7   : > { %v3628_v57 = vpop.eup %3627  ;;  %v2283_v40 = vadd.f32 %v3626_v5, %v2282_v49  ;;  %v1652_v18 = vadd.f32 %v1651_v59, %v4228_v36  ;;  %v1918_v50 = vpop.f32.mrf.mxu2  ;;  %v3349_v61 = vmul.f32 -1.442695, %v1917_v26  ;;  %v2303_v36 = vand.u32 2147483647, %v2066_v60 }
 0x1f8   : > { %v3630_v42 = vpop.eup %3629  ;;  %v2067_v45 = vadd.f32 1.0, %v3628_v57  ;;  %v1743_v19 = vpop.f32.mrf.mxu0 }
 0x1f9   : > { %v2287_v7 = vsel %vm2286_vm6, %v3626_v5, %v2283_v40  ;;  %v2295_v15 = vmul.f32 %v3630_v42, %v2066_v60  ;;  %v1741_v9 = vadd.f32 %v1740_v3, %v1652_v18  ;;  %vm2300_vm8 = vweird.f32 %v3630_v42 }
 0x1fa   : > { %v1832_v62 = vpop.f32.mrf.mxu1  ;;  %v2292_v33 = vsel %vm2289_vm7, %v2291_v22, %v2287_v7  ;;  %3631 = vrcp.f32 %v2067_v45  ;;  %vm2301_vm10 = vmor %vm2299_vm9, %vm2300_vm8  ;;  %vm2304_vm11 = vcmp.eq.f32.partialorder %v2303_v36, 8.507059e+37  ;;  %v2320_v47 = vand.u32 2147483648, %v2067_v45 }
 0x1fb   : > { %2577 = vst [vmem:[%s4318_s13 + $0x68] sm:$0xff] %v2292_v33  ;;  %v2296_v34 = vsub.f32 1.0, %v2295_v15  ;;  %3633 = vpow2.f32 %v3349_v61  ;;  %v1830_v10 = vadd.f32 %v1829_v58, %v1741_v9  ;;  %v2318_v4 = vand.u32 2147483647, %v2067_v45 }
 0x1fc   : > { %vm2314_vm13 = vweird.f32 %v2067_v45  ;;  %v2321_v2 = vor.u32 1.1754944e-38, %v2320_v47 }
 0x1fd   : > { %v2297_v0 = vmul.f32 %v3630_v42, %v2296_v34  ;;  %v1919_v24 = vadd.f32 %v1918_v50, %v1830_v10  ;;  %vm2319_vm15 = vcmp.eq.f32.partialorder %v2318_v4, 8.507059e+37 }
 0x1fe   : > { %v1654_v63 = vpop.f32.mrf.mxu3 }
 0x1ff   : > { %v2298_v23 = vadd.f32 %v3630_v42, %v2297_v0  ;;  %v1655_v54 = vadd.f32 %v1654_v63, %v4234_v35  ;;  %v1921_v1 = vpop.f32.mrf.mxu2  ;;  %v3350_v41 = vmul.f32 -1.442695, %v1919_v24 }
 0x200   : > { %v3632_v29 = vpop.eup %3631  ;;  %v1745_v53 = vpop.f32.mrf.mxu0 }
 0x201   : > { %v3634_v14 = vpop.eup %3633  ;;  %v2302_v38 = vsel %vm2301_vm10, %v3630_v42, %v2298_v23  ;;  %v2310_v6 = vmul.f32 %v3632_v29, %v2067_v45  ;;  %v1744_v3 = vadd.f32 %v1743_v19, %v1655_v54  ;;  %3635 = vpow2.f32 %v3350_v41 }
 0x202   : > { %v1834_v37 = vpop.f32.mrf.mxu1  ;;  %v2307_v12 = vsel %vm2304_vm11, %v2306_v27, %v2302_v38  ;;  %v2068_v5 = vadd.f32 1.0, %v3634_v14  ;;  %vm2315_vm12 = vweird.f32 %v3632_v29 }
 0x203   : > { %2578 = vst [vmem:[%s4318_s13 + $0x70] sm:$0xff] %v2307_v12  ;;  %v2311_v60 = vsub.f32 1.0, %v2310_v6  ;;  %v1833_v58 = vadd.f32 %v1832_v62, %v1744_v3  ;;  %vm2316_vm14 = vmor %vm2314_vm13, %vm2315_vm12 }
 0x204   : > { %3637 = vrcp.f32 %v2068_v5  ;;  %v2333_v19 = vand.u32 2147483647, %v2068_v5  ;;  %v2335_v7 = vand.u32 2147483648, %v2068_v5  ;;  %vm2329_vm1 = vweird.f32 %v2068_v5 }
 0x205   : > { %v2312_v35 = vmul.f32 %v3632_v29, %v2311_v60  ;;  %v1922_v55 = vadd.f32 %v1921_v1, %v1833_v58 }
 0x206   : > { %v1656_v11 = vpop.f32.mrf.mxu3  ;;  %v2336_v23 = vor.u32 1.1754944e-38, %v2335_v7  ;;  %vm2334_vm3 = vcmp.eq.f32.partialorder %v2333_v19, 8.507059e+37 }
 0x207   : > { %v2313_v46 = vadd.f32 %v3632_v29, %v2312_v35  ;;  %v1657_v25 = vadd.f32 %v1656_v11, %v4248_v20  ;;  %v1923_v28 = vpop.f32.mrf.mxu2  ;;  %v3636_v39 = vpop.eup %3635  ;;  %v3351_v59 = vmul.f32 -1.442695, %v1922_v55 }
 0x208   : > { %v1748_v49 = vpop.f32.mrf.mxu0  ;;  %v2069_v50 = vadd.f32 1.0, %v3636_v39 }
 0x209   : > { %v2317_v56 = vsel %vm2316_vm14, %v3632_v29, %v2313_v46  ;;  %v1746_v57 = vadd.f32 %v1745_v53, %v1657_v25  ;;  %3639 = vpow2.f32 %v3351_v59 }
 0x20a   : > { %v1837_v40 = vpop.f32.mrf.mxu1  ;;  %v3638_v26 = vpop.eup %3637  ;;  %v2322_v18 = vsel %vm2319_vm15, %v2321_v2, %v2317_v56  ;;  %3641 = vrcp.f32 %v2069_v50  ;;  %v2348_v14 = vand.u32 2147483647, %v2069_v50  ;;  %v2350_v38 = vand.u32 2147483648, %v2069_v50 }
 0x20b   : > { %2579 = vst [vmem:[%s4318_s13 + $0x78] sm:$0xff] %v2322_v18  ;;  %v2325_v42 = vmul.f32 %v3638_v26, %v2068_v5  ;;  %v1835_v22 = vadd.f32 %v1834_v37, %v1746_v57  ;;  %vm2330_vm0 = vweird.f32 %v3638_v26  ;;  %vm2344_vm5 = vweird.f32 %v2069_v50 }
 0x20c   : > { %vm2331_vm2 = vmor %vm2329_vm1, %vm2330_vm0  ;;  %v2351_v46 = vor.u32 1.1754944e-38, %v2350_v38  ;;  %vm2349_vm7 = vcmp.eq.f32.partialorder %v2348_v14, 8.507059e+37 }
 0x20d   : > { %v2326_v45 = vsub.f32 1.0, %v2325_v42  ;;  %v1924_v20 = vadd.f32 %v1923_v28, %v1835_v22 }
 0x20e   : > { %v1659_v15 = vpop.f32.mrf.mxu3 }
 0x20f   : > { %v2327_v61 = vmul.f32 %v3638_v26, %v2326_v45  ;;  %v3352_v62 = vmul.f32 -1.442695, %v1924_v20  ;;  %v1660_v33 = vadd.f32 %v1659_v15, %v4254_v31  ;;  %v1926_v34 = vpop.f32.mrf.mxu2  ;;  %v3640_v52 = vpop.eup %3639 }
 0x210   : > { %v1750_v9 = vpop.f32.mrf.mxu0  ;;  %v3642_v63 = vpop.eup %3641  ;;  %v2070_v24 = vadd.f32 1.0, %v3640_v52 }
 0x211   : > { %v2328_v0 = vadd.f32 %v3638_v26, %v2327_v61  ;;  %3643 = vpow2.f32 %v3352_v62  ;;  %v1749_v36 = vadd.f32 %v1748_v49, %v1660_v33  ;;  %v2340_v1 = vmul.f32 %v3642_v63, %v2069_v50 }
 0x212   : > { %v1839_v10 = vpop.f32.mrf.mxu1  ;;  %3645 = vrcp.f32 %v2070_v24  ;;  %vm2345_vm4 = vweird.f32 %v3642_v63  ;;  %v2363_v39 = vand.u32 2147483647, %v2070_v24  ;;  %v2365_v56 = vand.u32 2147483648, %v2070_v24 }
 0x213   : > { %v2332_v54 = vsel %vm2331_vm2, %v3638_v26, %v2328_v0  ;;  %v1838_v29 = vadd.f32 %v1837_v40, %v1749_v36  ;;  %v2341_v31 = vsub.f32 1.0, %v2340_v1  ;;  %vm2346_vm6 = vmor %vm2344_vm5, %vm2345_vm4  ;;  %vm2359_vm9 = vweird.f32 %v2070_v24 }
 0x214   : > { %v2337_v27 = vsel %vm2334_vm3, %v2336_v23, %v2332_v54  ;;  %v2366_v15 = vor.u32 1.1754944e-38, %v2365_v56  ;;  %vm2364_vm11 = vcmp.eq.f32.partialorder %v2363_v39, 8.507059e+37 }
 0x215   : > { %2580 = vst [vmem:[%s4318_s13 + $0x80] sm:$0xff] %v2337_v27  ;;  %v1927_v53 = vadd.f32 %v1926_v34, %v1838_v29  ;;  %v2342_v37 = vmul.f32 %v3642_v63, %v2341_v31 }
 0x216   : > { %v1661_v6 = vpop.f32.mrf.mxu3 }
 0x217   : > { %v3644_v41 = vpop.eup %3643  ;;  %v3353_v12 = vmul.f32 -1.442695, %v1927_v53  ;;  %v1662_v5 = vadd.f32 %v1661_v6, %v4268_v16  ;;  %v1928_v3 = vpop.f32.mrf.mxu2  ;;  %v2343_v35 = vadd.f32 %v3642_v63, %v2342_v37 }
 0x218   : > { %v4469_v60 = vadd.f32 1.0, %v3644_v41  ;;  %v1753_v47 = vpop.f32.mrf.mxu0  ;;  %v3646_v11 = vpop.eup %3645 }
 0x219   : > { %3647 = vpow2.f32 %v3353_v12  ;;  %v1751_v4 = vadd.f32 %v1750_v9, %v1662_v5  ;;  %v2347_v55 = vsel %vm2346_vm6, %v3642_v63, %v2343_v35  ;;  %v2355_v25 = vmul.f32 %v3646_v11, %v2070_v24 }
 0x21a   : > { %v1842_v58 = vpop.f32.mrf.mxu1  ;;  %3649 = vrcp.f32 %v4469_v60  ;;  %v2352_v16 = vsel %vm2349_vm7, %v2351_v46, %v2347_v55  ;;  %vm2360_vm8 = vweird.f32 %v3646_v11  ;;  %v2378_v52 = vand.u32 2147483647, %v4469_v60 }
 0x21b   : > { %v1840_v28 = vadd.f32 %v1839_v10, %v1751_v4  ;;  %2581 = vst [vmem:[%s4318_s13 + $0x88] sm:$0xff] %v2352_v16  ;;  %v2356_v2 = vsub.f32 1.0, %v2355_v25  ;;  %vm2361_vm10 = vmor %vm2359_vm9, %vm2360_vm8  ;;  %vm2374_vm13 = vweird.f32 %v4469_v60 }
 0x21c   : > { %vm2379_vm15 = vcmp.eq.f32.partialorder %v2378_v52, 8.507059e+37 }
 0x21d   : > { %v1929_v49 = vadd.f32 %v1928_v3, %v1840_v28  ;;  %v2357_v40 = vmul.f32 %v3646_v11, %v2356_v2 }
 0x21e   : > { %v1664_v59 = vpop.f32.mrf.mxu3 }
 0x21f   : > { %v3648_v57 = vpop.eup %3647  ;;  %v3354_v26 = vmul.f32 -1.442695, %v1929_v49  ;;  %v1665_v18 = vadd.f32 %v1664_v59, %v4274_v21  ;;  %v1931_v50 = vpop.f32.mrf.mxu2  ;;  %v2358_v20 = vadd.f32 %v3646_v11, %v2357_v40  ;;  %v2380_v21 = vand.u32 2147483648, %v4469_v60 }
 0x220   : > { %v3650_v42 = vpop.eup %3649  ;;  %v2072_v22 = vadd.f32 1.0, %v3648_v57  ;;  %v1755_v45 = vpop.f32.mrf.mxu0 }
 0x221   : > { %v2370_v19 = vmul.f32 %v3650_v42, %v4469_v60  ;;  %3651 = vpow2.f32 %v3354_v26  ;;  %v2362_v61 = vsel %vm2361_vm10, %v3646_v11, %v2358_v20  ;;  %v1754_v33 = vadd.f32 %v1753_v47, %v1665_v18 }
 0x222   : > { %v1844_v7 = vpop.f32.mrf.mxu1  ;;  %3653 = vrcp.f32 %v2072_v22  ;;  %v2367_v34 = vsel %vm2364_vm11, %v2366_v15, %v2362_v61  ;;  %vm2375_vm12 = vweird.f32 %v3650_v42  ;;  %v2381_v29 = vor.u32 1.1754944e-38, %v2380_v21 }
 0x223   : > { %v2371_v62 = vsub.f32 1.0, %v2370_v19  ;;  %2582 = vst [vmem:[%s4318_s13 + $0x90] sm:$0xff] %v2367_v34  ;;  %v1843_v0 = vadd.f32 %v1842_v58, %v1754_v33  ;;  %vm2376_vm14 = vmor %vm2374_vm13, %vm2375_vm12  ;;  %v2395_v5 = vand.u32 2147483648, %v2072_v22  ;;  %vm2389_vm1 = vweird.f32 %v2072_v22 }
 0x225   : > { %v2372_v9 = vmul.f32 %v3650_v42, %v2371_v62  ;;  %v1932_v23 = vadd.f32 %v1931_v50, %v1843_v0  ;;  %v2396_v55 = vor.u32 1.1754944e-38, %v2395_v5 }
 0x226   : > { %v1666_v36 = vpop.f32.mrf.mxu3 }
 0x227   : > { %v3652_v10 = vpop.eup %3651  ;;  %v2373_v63 = vadd.f32 %v3650_v42, %v2372_v9  ;;  %v1667_v24 = vadd.f32 %v1666_v36, %v4288_v48  ;;  %v1933_v54 = vpop.f32.mrf.mxu2  ;;  %v3355_v38 = vmul.f32 -1.442695, %v1932_v23  ;;  %v2393_v48 = vand.u32 2147483647, %v2072_v22 }
 0x228   : > { %v3654_v1 = vpop.eup %3653  ;;  %v2073_v27 = vadd.f32 1.0, %v3652_v10  ;;  %v1758_v31 = vpop.f32.mrf.mxu0 }
 0x229   : > { %v2377_v53 = vsel %vm2376_vm14, %v3650_v42, %v2373_v63  ;;  %v2385_v14 = vmul.f32 %v3654_v1, %v2072_v22  ;;  %v1756_v12 = vadd.f32 %v1755_v45, %v1667_v24  ;;  %vm2390_vm0 = vweird.f32 %v3654_v1 }
 0x22a   : > { %v1847_v6 = vpop.f32.mrf.mxu1  ;;  %v2382_v41 = vsel %vm2379_vm15, %v2381_v29, %v2377_v53  ;;  %3655 = vrcp.f32 %v2073_v27  ;;  %vm2391_vm2 = vmor %vm2389_vm1, %vm2390_vm0  ;;  %vm2394_vm3 = vcmp.eq.f32.partialorder %v2393_v48, 8.507059e+37  ;;  %v2410_v26 = vand.u32 2147483648, %v2073_v27 }
 0x22b   : > { %2583 = vst [vmem:[%s4318_s13 + $0x98] sm:$0xff] %v2382_v41  ;;  %v2386_v37 = vsub.f32 1.0, %v2385_v14  ;;  %3657 = vpow2.f32 %v3355_v38  ;;  %v1845_v60 = vadd.f32 %v1844_v7, %v1756_v12  ;;  %v2408_v18 = vand.u32 2147483647, %v2073_v27 }
 0x22c   : > { %vm2404_vm5 = vweird.f32 %v2073_v27  ;;  %v2411_v7 = vor.u32 1.1754944e-38, %v2410_v26 }
 0x22d   : > { %v2387_v3 = vmul.f32 %v3654_v1, %v2386_v37  ;;  %v1934_v4 = vadd.f32 %v1933_v54, %v1845_v60  ;;  %vm2409_vm7 = vcmp.eq.f32.partialorder %v2408_v18, 8.507059e+37 }
 0x22e   : > { %v1669_v47 = vpop.f32.mrf.mxu3 }
 0x22f   : > { %v2388_v35 = vadd.f32 %v3654_v1, %v2387_v3  ;;  %v1670_v58 = vadd.f32 %v1669_v47, %v4212_v51  ;;  %v1936_v11 = vpop.f32.mrf.mxu2  ;;  %v3356_v49 = vmul.f32 -1.442695, %v1934_v4 }
 0x230   : > { %v3656_v46 = vpop.eup %3655  ;;  %v1760_v25 = vpop.f32.mrf.mxu0 }
 0x231   : > { %v3658_v28 = vpop.eup %3657  ;;  %v2392_v16 = vsel %vm2391_vm2, %v3654_v1, %v2388_v35  ;;  %v2400_v2 = vmul.f32 %v3656_v46, %v2073_v27  ;;  %v1759_v57 = vadd.f32 %v1758_v31, %v1670_v58  ;;  %3659 = vpow2.f32 %v3356_v49 }
 0x232   : > { %v1849_v39 = vpop.f32.mrf.mxu1  ;;  %v2397_v56 = vsel %vm2394_vm3, %v2396_v55, %v2392_v16  ;;  %v2074_v59 = vadd.f32 1.0, %v3658_v28  ;;  %vm2405_vm4 = vweird.f32 %v3656_v46 }
 0x233   : > { %2584 = vst [vmem:[%s4318_s13 + $0xa0] sm:$0xff] %v2397_v56  ;;  %v2401_v40 = vsub.f32 1.0, %v2400_v2  ;;  %v1848_v50 = vadd.f32 %v1847_v6, %v1759_v57  ;;  %vm2406_vm6 = vmor %vm2404_vm5, %vm2405_vm4 }
 0x234   : > { %3661 = vrcp.f32 %v2074_v59  ;;  %v2423_v23 = vand.u32 2147483647, %v2074_v59  ;;  %v2425_v24 = vand.u32 2147483648, %v2074_v59  ;;  %vm2419_vm9 = vweird.f32 %v2074_v59 }
 0x235   : > { %v2402_v51 = vmul.f32 %v3656_v46, %v2401_v40  ;;  %v1937_v45 = vadd.f32 %v1936_v11, %v1848_v50 }
 0x236   : > { %v1671_v42 = vpop.f32.mrf.mxu3  ;;  %v2426_v37 = vor.u32 1.1754944e-38, %v2425_v24  ;;  %vm2424_vm11 = vcmp.eq.f32.partialorder %v2423_v23, 8.507059e+37 }
 0x237   : > { %v2403_v22 = vadd.f32 %v3656_v46, %v2402_v51  ;;  %v1672_v20 = vadd.f32 %v1671_v42, %v4226_v32  ;;  %v1938_v19 = vpop.f32.mrf.mxu2  ;;  %v3660_v61 = vpop.eup %3659  ;;  %v3357_v33 = vmul.f32 -1.442695, %v1937_v45 }
 0x238   : > { %v1763_v15 = vpop.f32.mrf.mxu0  ;;  %v2075_v0 = vadd.f32 1.0, %v3660_v61 }
 0x239   : > { %v2407_v62 = vsel %vm2406_vm6, %v3656_v46, %v2403_v22  ;;  %v1761_v34 = vadd.f32 %v1760_v25, %v1672_v20  ;;  %3663 = vpow2.f32 %v3357_v33 }
 0x23a   : > { %v1852_v21 = vpop.f32.mrf.mxu1  ;;  %v3662_v9 = vpop.eup %3661  ;;  %v2412_v52 = vsel %vm2409_vm7, %v2411_v7, %v2407_v62  ;;  %3665 = vrcp.f32 %v2075_v0  ;;  %v2438_v4 = vand.u32 2147483647, %v2075_v0  ;;  %v2440_v58 = vand.u32 2147483648, %v2075_v0 }
 0x23b   : > { %2585 = vst [vmem:[%s4318_s13 + $0xa8] sm:$0xff] %v2412_v52  ;;  %v2415_v36 = vmul.f32 %v3662_v9, %v2074_v59  ;;  %v1850_v10 = vadd.f32 %v1849_v39, %v1761_v34  ;;  %vm2420_vm8 = vweird.f32 %v3662_v9  ;;  %vm2434_vm13 = vweird.f32 %v2075_v0 }
 0x23c   : > { %vm2421_vm10 = vmor %vm2419_vm9, %vm2420_vm8  ;;  %v2441_v59 = vor.u32 1.1754944e-38, %v2440_v58  ;;  %vm2439_vm15 = vcmp.eq.f32.partialorder %v2438_v4, 8.507059e+37 }
 0x23d   : > { %v2416_v63 = vsub.f32 1.0, %v2415_v36  ;;  %v1939_v32 = vadd.f32 %v1938_v19, %v1850_v10 }
 0x23e   : > { %v1674_v54 = vpop.f32.mrf.mxu3 }
 0x23f   : > { %v2417_v1 = vmul.f32 %v3662_v9, %v2416_v63  ;;  %v3358_v29 = vmul.f32 -1.442695, %v1939_v32  ;;  %v1675_v27 = vadd.f32 %v1674_v54, %v4232_v43  ;;  %v1941_v31 = vpop.f32.mrf.mxu2  ;;  %v3664_v14 = vpop.eup %3663 }
 0x240   : > { %v1765_v53 = vpop.f32.mrf.mxu0  ;;  %v3666_v41 = vpop.eup %3665  ;;  %v2076_v12 = vadd.f32 1.0, %v3664_v14 }
 0x241   : > { %v2418_v38 = vadd.f32 %v3662_v9, %v2417_v1  ;;  %3667 = vpow2.f32 %v3358_v29  ;;  %v1764_v6 = vadd.f32 %v1763_v15, %v1675_v27  ;;  %v2430_v48 = vmul.f32 %v3666_v41, %v2075_v0 }
 0x242   : > { %v1854_v5 = vpop.f32.mrf.mxu1  ;;  %3669 = vrcp.f32 %v2076_v12  ;;  %vm2435_vm12 = vweird.f32 %v3666_v41  ;;  %v2453_v22 = vand.u32 2147483647, %v2076_v12  ;;  %v2455_v45 = vand.u32 2147483648, %v2076_v12 }
 0x243   : > { %v2422_v3 = vsel %vm2421_vm10, %v3662_v9, %v2418_v38  ;;  %v1853_v60 = vadd.f32 %v1852_v21, %v1764_v6  ;;  %v2431_v43 = vsub.f32 1.0, %v2430_v48  ;;  %vm2436_vm14 = vmor %vm2434_vm13, %vm2435_vm12  ;;  %vm2449_vm1 = vweird.f32 %v2076_v12 }
 0x244   : > { %v2427_v47 = vsel %vm2424_vm11, %v2426_v37, %v2422_v3  ;;  %v2456_v52 = vor.u32 1.1754944e-38, %v2455_v45  ;;  %vm2454_vm3 = vcmp.eq.f32.partialorder %v2453_v22, 8.507059e+37 }
 0x245   : > { %2586 = vst [vmem:[%s4318_s13 + $0xb0] sm:$0xff] %v2427_v47  ;;  %v1942_v35 = vadd.f32 %v1941_v31, %v1853_v60  ;;  %v2432_v55 = vmul.f32 %v3666_v41, %v2431_v43 }
 0x246   : > { %v1676_v11 = vpop.f32.mrf.mxu3 }
 0x247   : > { %v3668_v46 = vpop.eup %3667  ;;  %v3359_v25 = vmul.f32 -1.442695, %v1942_v35  ;;  %v1677_v28 = vadd.f32 %v1676_v11, %v4246_v8  ;;  %v1943_v16 = vpop.f32.mrf.mxu2  ;;  %v2433_v49 = vadd.f32 %v3666_v41, %v2432_v55 }
 0x248   : > { %v4488_v2 = vadd.f32 1.0, %v3668_v46  ;;  %v3670_v56 = vpop.eup %3669  ;;  %v1768_v57 = vpop.f32.mrf.mxu0 }
 0x249   : > { %3671 = vpow2.f32 %v3359_v25  ;;  %v1766_v39 = vadd.f32 %v1765_v53, %v1677_v28  ;;  %v2437_v40 = vsel %vm2436_vm14, %v3666_v41, %v2433_v49  ;;  %v2445_v26 = vmul.f32 %v3670_v56, %v2076_v12 }
 0x24a   : > { %3673 = vrcp.f32 %v4488_v2  ;;  %v2442_v18 = vsel %vm2439_vm15, %v2441_v59, %v2437_v40  ;;  %v1857_v8 = vpop.f32.mrf.mxu1  ;;  %vm2450_vm0 = vweird.f32 %v3670_v56  ;;  %v2470_v32 = vand.u32 2147483648, %v4488_v2 }
 0x24b   : > { %v1855_v51 = vadd.f32 %v1854_v5, %v1766_v39  ;;  %2587 = vst [vmem:[%s4318_s13 + $0xb8] sm:$0xff] %v2442_v18  ;;  %v2446_v50 = vsub.f32 1.0, %v2445_v26  ;;  %vm2451_vm2 = vmor %vm2449_vm1, %vm2450_vm0  ;;  %v2468_v24 = vand.u32 2147483647, %v4488_v2  ;;  %vm2464_vm5 = vweird.f32 %v4488_v2 }
 0x24c   : > { %v2471_v6 = vor.u32 1.1754944e-38, %v2470_v32 }
 0x24d   : > { %v1944_v42 = vadd.f32 %v1943_v16, %v1855_v51  ;;  %v2447_v7 = vmul.f32 %v3670_v56, %v2446_v50  ;;  %vm2469_vm7 = vcmp.eq.f32.partialorder %v2468_v24, 8.507059e+37 }
 0x24e   : > { %v1679_v20 = vpop.f32.mrf.mxu3 }
 0x24f   : > { %v3672_v19 = vpop.eup %3671  ;;  %v3360_v15 = vmul.f32 -1.442695, %v1944_v42  ;;  %v1680_v61 = vadd.f32 %v1679_v20, %v4252_v30  ;;  %v1946_v62 = vpop.f32.mrf.mxu2  ;;  %v2448_v21 = vadd.f32 %v3670_v56, %v2447_v7 }
 0x250   : > { %v3674_v33 = vpop.eup %3673  ;;  %v2078_v34 = vadd.f32 1.0, %v3672_v19  ;;  %v1770_v30 = vpop.f32.mrf.mxu0 }
 0x251   : > { %v2460_v9 = vmul.f32 %v3674_v33, %v4488_v2  ;;  %3675 = vpow2.f32 %v3360_v15  ;;  %v2452_v0 = vsel %vm2451_vm2, %v3670_v56, %v2448_v21  ;;  %v1769_v10 = vadd.f32 %v1768_v57, %v1680_v61 }
 0x252   : > { %3677 = vrcp.f32 %v2078_v34  ;;  %v2457_v63 = vsel %vm2454_vm3, %v2456_v52, %v2452_v0  ;;  %vm2465_vm4 = vweird.f32 %v3674_v33  ;;  %v1859_v1 = vpop.f32.mrf.mxu1  ;;  %v2485_v43 = vand.u32 2147483648, %v2078_v34 }
 0x253   : > { %v2461_v36 = vsub.f32 1.0, %v2460_v9  ;;  %2588 = vst [vmem:[%s4318_s13 + $0xc0] sm:$0xff] %v2457_v63  ;;  %v1858_v54 = vadd.f32 %v1857_v8, %v1769_v10  ;;  %vm2466_vm6 = vmor %vm2464_vm5, %vm2465_vm4  ;;  %v2483_v4 = vand.u32 2147483647, %v2078_v34  ;;  %vm2479_vm9 = vweird.f32 %v2078_v34 }
 0x254   : > { %v2486_v16 = vor.u32 1.1754944e-38, %v2485_v43 }
 0x255   : > { %v2462_v23 = vmul.f32 %v3674_v33, %v2461_v36  ;;  %v1947_v53 = vadd.f32 %v1946_v62, %v1858_v54  ;;  %vm2484_vm11 = vcmp.eq.f32.partialorder %v2483_v4, 8.507059e+37 }
 0x256   : > { %v1681_v29 = vpop.f32.mrf.mxu3 }
 0x257   : > { %v3676_v27 = vpop.eup %3675  ;;  %v2463_v31 = vadd.f32 %v3674_v33, %v2462_v23  ;;  %v1682_v14 = vadd.f32 %v1681_v29, %v4266_v44  ;;  %v1948_v37 = vpop.f32.mrf.mxu2  ;;  %v3361_v3 = vmul.f32 -1.442695, %v1947_v53 }
 0x258   : > { %v3678_v38 = vpop.eup %3677  ;;  %v2079_v41 = vadd.f32 1.0, %v3676_v27  ;;  %v1773_v58 = vpop.f32.mrf.mxu0 }
 0x259   : > { %v2467_v12 = vsel %vm2466_vm6, %v3674_v33, %v2463_v31  ;;  %v2475_v5 = vmul.f32 %v3678_v38, %v2078_v34  ;;  %v1771_v47 = vadd.f32 %v1770_v30, %v1682_v14  ;;  %vm2480_vm8 = vweird.f32 %v3678_v38 }
 0x25a   : > { %v2472_v48 = vsel %vm2469_vm7, %v2471_v6, %v2467_v12  ;;  %3679 = vrcp.f32 %v2079_v41  ;;  %vm2481_vm10 = vmor %vm2479_vm9, %vm2480_vm8  ;;  %v1862_v2 = vpop.f32.mrf.mxu1  ;;  %v2500_v8 = vand.u32 2147483648, %v2079_v41  ;;  %vm2494_vm13 = vweird.f32 %v2079_v41 }
 0x25b   : > { %2589 = vst [vmem:[%s4318_s13 + $0xc8] sm:$0xff] %v2472_v48  ;;  %v2476_v60 = vsub.f32 1.0, %v2475_v5  ;;  %3681 = vpow2.f32 %v3361_v3  ;;  %v1860_v44 = vadd.f32 %v1859_v1, %v1771_v47 }
 0x25c   : > { %v2501_v7 = vor.u32 1.1754944e-38, %v2500_v8 }
 0x25d   : > { %v2477_v35 = vmul.f32 %v3678_v38, %v2476_v60  ;;  %v1949_v55 = vadd.f32 %v1948_v37, %v1860_v44 }
 0x25e   : > { %v1684_v11 = vpop.f32.mrf.mxu3 }
 0x25f   : > { %v2478_v46 = vadd.f32 %v3678_v38, %v2477_v35  ;;  %v1685_v25 = vadd.f32 %v1684_v11, %v4272_v17  ;;  %v3362_v59 = vmul.f32 -1.442695, %v1949_v55  ;;  %v1951_v51 = vpop.f32.mrf.mxu2  ;;  %v2498_v17 = vand.u32 2147483647, %v2079_v41 }
 0x260   : > { %v3680_v28 = vpop.eup %3679  ;;  %v1775_v15 = vpop.f32.mrf.mxu0 }
 0x261   : > { %v3682_v49 = vpop.eup %3681  ;;  %v2482_v39 = vsel %vm2481_vm10, %v3678_v38, %v2478_v46  ;;  %v2490_v56 = vmul.f32 %v3680_v28, %v2079_v41  ;;  %v1774_v26 = vadd.f32 %v1773_v58, %v1685_v25  ;;  %3683 = vpow2.f32 %v3362_v59 }
 0x262   : > { %v2487_v57 = vsel %vm2484_vm11, %v2486_v16, %v2482_v39  ;;  %v2080_v40 = vadd.f32 1.0, %v3682_v49  ;;  %vm2495_vm12 = vweird.f32 %v3680_v28  ;;  %vm2499_vm15 = vcmp.eq.f32.partialorder %v2498_v17, 8.507059e+37  ;;  %v1864_v0 = vpop.f32.mrf.mxu1 }
 0x263   : > { %2590 = vst [vmem:[%s4318_s13 + $0xd0] sm:$0xff] %v2487_v57  ;;  %v2491_v18 = vsub.f32 1.0, %v2490_v56  ;;  %v1863_v42 = vadd.f32 %v1862_v2, %v1774_v26  ;;  %vm2496_vm14 = vmor %vm2494_vm13, %vm2495_vm12 }
 0x264   : > { %3685 = vrcp.f32 %v2080_v40  ;;  %v2515_v30 = vand.u32 2147483648, %v2080_v40  ;;  %v2513_v24 = vand.u32 2147483647, %v2080_v40  ;;  %vm2509_vm1 = vweird.f32 %v2080_v40 }
 0x265   : > { %v2492_v50 = vmul.f32 %v3680_v28, %v2491_v18  ;;  %v1952_v20 = vadd.f32 %v1951_v51, %v1863_v42 }
 0x266   : > { %v1686_v22 = vpop.f32.mrf.mxu3  ;;  %v2516_v31 = vor.u32 1.1754944e-38, %v2515_v30  ;;  %vm2514_vm3 = vcmp.eq.f32.partialorder %v2513_v24, 8.507059e+37 }
 0x267   : > { %v2493_v45 = vadd.f32 %v3680_v28, %v2492_v50  ;;  %v1687_v19 = vadd.f32 %v1686_v22, %v4286_v13  ;;  %v3684_v61 = vpop.eup %3683  ;;  %v3363_v33 = vmul.f32 -1.442695, %v1952_v20  ;;  %v1953_v63 = vpop.f32.mrf.mxu2 }
 0x268   : > { %v2081_v52 = vadd.f32 1.0, %v3684_v61 }
 0x269   : > { %v2497_v62 = vsel %vm2496_vm14, %v3680_v28, %v2493_v45  ;;  %v1776_v34 = vadd.f32 %v1775_v15, %v1687_v19  ;;  %3687 = vpow2.f32 %v3363_v33 }
 0x26a   : > { %v3686_v21 = vpop.eup %3685  ;;  %v2502_v9 = vsel %vm2499_vm15, %v2501_v7, %v2497_v62  ;;  %3689 = vrcp.f32 %v2081_v52  ;;  %v2530_v37 = vand.u32 2147483648, %v2081_v52  ;;  %v2528_v3 = vand.u32 2147483647, %v2081_v52 }
 0x26b   : > { %2591 = vst [vmem:[%s4318_s13 + $0xd8] sm:$0xff] %v2502_v9  ;;  %v2505_v36 = vmul.f32 %v3686_v21, %v2080_v40  ;;  %v1865_v10 = vadd.f32 %v1864_v0, %v1776_v34  ;;  %vm2510_vm0 = vweird.f32 %v3686_v21  ;;  %vm2524_vm5 = vweird.f32 %v2081_v52 }
 0x26c   : > { %vm2511_vm2 = vmor %vm2509_vm1, %vm2510_vm0  ;;  %v2531_v43 = vor.u32 1.1754944e-38, %v2530_v37  ;;  %vm2529_vm7 = vcmp.eq.f32.partialorder %v2528_v3, 8.507059e+37 }
 0x26d   : > { %v2506_v32 = vsub.f32 1.0, %v2505_v36  ;;  %v1954_v13 = vadd.f32 %v1953_v63, %v1865_v10 }
 0x26f   : > { %v2507_v23 = vmul.f32 %v3686_v21, %v2506_v32  ;;  %v3364_v54 = vmul.f32 -1.442695, %v1954_v13  ;;  %v3688_v1 = vpop.eup %3687 }
 0x270   : > { %v3690_v27 = vpop.eup %3689  ;;  %v2082_v53 = vadd.f32 1.0, %v3688_v1 }
 0x271   : > { %v2508_v29 = vadd.f32 %v3686_v21, %v2507_v23  ;;  %3691 = vpow2.f32 %v3364_v54  ;;  %v2520_v38 = vmul.f32 %v3690_v27, %v2081_v52  ;;  %vm2525_vm4 = vweird.f32 %v3690_v27 }
 0x272   : > { %3693 = vrcp.f32 %v2082_v53  ;;  %vm2526_vm6 = vmor %vm2524_vm5, %vm2525_vm4  ;;  %v2545_v11 = vand.u32 2147483648, %v2082_v53  ;;  %v2543_v55 = vand.u32 2147483647, %v2082_v53  ;;  %vm2539_vm9 = vweird.f32 %v2082_v53 }
 0x273   : > { %v2512_v14 = vsel %vm2511_vm2, %v3686_v21, %v2508_v29  ;;  %v2521_v41 = vsub.f32 1.0, %v2520_v38 }
 0x274   : > { %v2517_v6 = vsel %vm2514_vm3, %v2516_v31, %v2512_v14  ;;  %v2546_v2 = vor.u32 1.1754944e-38, %v2545_v11  ;;  %vm2544_vm11 = vcmp.eq.f32.partialorder %v2543_v55, 8.507059e+37 }
 0x275   : > { %2592 = vst [vmem:[%s4318_s13 + $0xe0] sm:$0xff] %v2517_v6  ;;  %v2522_v5 = vmul.f32 %v3690_v27, %v2521_v41 }
 0x277   : > { %v3692_v12 = vpop.eup %3691  ;;  %v2523_v60 = vadd.f32 %v3690_v27, %v2522_v5 }
 0x278   : > { %v2083_v48 = vadd.f32 1.0, %v3692_v12  ;;  %v3694_v47 = vpop.eup %3693 }
 0x279   : > { %v2527_v35 = vsel %vm2526_vm6, %v3690_v27, %v2523_v60  ;;  %v2535_v4 = vmul.f32 %v3694_v47, %v2082_v53  ;;  %vm2540_vm8 = vweird.f32 %v3694_v47 }
 0x27a   : > { %3695 = vrcp.f32 %v2083_v48  ;;  %v2532_v44 = vsel %vm2529_vm7, %v2531_v43, %v2527_v35  ;;  %vm2541_vm10 = vmor %vm2539_vm9, %vm2540_vm8  ;;  %v2560_v59 = vand.u32 2147483648, %v2083_v48  ;;  %v2558_v40 = vand.u32 2147483647, %v2083_v48 }
 0x27b   : > { %2593 = vst [vmem:[%s4318_s13 + $0xe8] sm:$0xff] %v2532_v44  ;;  %v2536_v58 = vsub.f32 1.0, %v2535_v4  ;;  %vm2554_vm13 = vweird.f32 %v2083_v48 }
 0x27c   : > { %v2561_v51 = vor.u32 1.1754944e-38, %v2560_v59  ;;  %vm2559_vm15 = vcmp.eq.f32.partialorder %v2558_v40, 8.507059e+37 }
 0x27d   : > { %v2537_v46 = vmul.f32 %v3694_v47, %v2536_v58 }
 0x27f   : > { %v2538_v28 = vadd.f32 %v3694_v47, %v2537_v46 }
 0x280   : > { %v3696_v25 = vpop.eup %3695 }
 0x281   : > { %v2550_v16 = vmul.f32 %v3696_v25, %v2083_v48  ;;  %v2542_v49 = vsel %vm2541_vm10, %v3694_v47, %v2538_v28  ;;  %vm2555_vm12 = vweird.f32 %v3696_v25 }
 0x282   : > { %v2547_v56 = vsel %vm2544_vm11, %v2546_v2, %v2542_v49  ;;  %vm2556_vm14 = vmor %vm2554_vm13, %vm2555_vm12 }
 0x283   : > { %v2551_v39 = vsub.f32 1.0, %v2550_v16  ;;  %2594 = vst [vmem:[%s4318_s13 + $0xf0] sm:$0xff] %v2547_v56 }
 0x285   : > { %v2552_v57 = vmul.f32 %v3696_v25, %v2551_v39 }
 0x287   : > { %v2553_v26 = vadd.f32 %v3696_v25, %v2552_v57 }
 0x289   : > { %v2557_v18 = vsel %vm2556_vm14, %v3696_v25, %v2553_v26 }
 0x28a   : > { %v2562_v8 = vsel %vm2559_vm15, %v2561_v51, %v2557_v18 }
 0x28b   : > { %2595 = vst [vmem:[%s4318_s13 + $0xf8] sm:$0xff] %v2562_v8 }
 0x28c PF: > { %s13_s12 = sadd.s32 1, %s3703_s12  }
 0x28d   : > { %p10_p4 = scmp.ge.s32.totalorder %s13_s12, 4  }
 0x28f   :  { %12 = sbr.rel (!%p10_p4) target bundleno = 1 (0x1), region = 62 }

</bundles_post_ra>
